<compile_context>
chip_gen: v6e
topology: v6e:2x2x1
jax: 0.10.0
libtpu: 0.0.40
codegen_flags: <defaults>
</compile_context>

<pallas_src>
import functools
import math

import jax
import jax.numpy as jnp
import numpy as np
from jax.experimental import pallas as pl
from jax.experimental.pallas import tpu as pltpu


def _round_up(v, m):
    return ((v + m - 1) // m) * m


# ---------------------------------------------------------------------------
# Fused attention kernel.
# Per row-tile of x, against two VMEM-resident memories:
#   w : (K1, C)   full memory (mem_dim rows)
#   s : (K2p, C)  class-level memory, zero-row-padded to a lane multiple
# it computes   scores = x @ mem^T ; softmax ; hard_shrink_relu ; L1-normalize
#               out    = att @ mem
# and emits out_w ('output_part'), out_s ('output', optionally + residual) and
# the class attention weights att_s ('att', lane-dense).
# ---------------------------------------------------------------------------
def _softmax_shrink(scores, shrink_thres):
    m = jnp.max(scores, axis=1, keepdims=True)
    e = jnp.exp(scores - m)
    denom = jnp.sum(e, axis=1, keepdims=True)
    att = e * pl.reciprocal(denom, approx=True)                   # softmax
    if shrink_thres > 0:
        shifted = att - shrink_thres
        # hard_shrink_relu: relu(att - l) * att / (|att - l| + eps)   (kept exact)
        att = jax.nn.relu(shifted) * att / (jnp.abs(shifted) + 1e-12)
        # F.normalize(p=1, dim=1)
        l1 = jnp.maximum(jnp.sum(jnp.abs(att), axis=1, keepdims=True), 1e-12)
        att = att * pl.reciprocal(l1, approx=True)
    return att


def _fused_attention_kernel(x_ref, w_ref, s_ref,
                            out_w_ref, out_s_ref, att_s_ref,
                            *, shrink_thres, n_valid_sem, residual):
    x = x_ref[...]                      # (tile_n, C)  f32
    w = w_ref[...]                      # (K1, C)      full memory
    s = s_ref[...]                      # (K2p, C)     class memory (padded rows = 0)

    # ---- attention against the full memory (returned as 'output_part') ----
    scores_w = jax.lax.dot_general(x, w, (((1,), (1,)), ((), ())),
                                   preferred_element_type=jnp.float32)
    att_w = _softmax_shrink(scores_w, shrink_thres)
    out_w = jax.lax.dot_general(att_w, w, (((1,), (0,)), ((), ())),
                                preferred_element_type=jnp.float32)

    # ---- attention against the class-level memory ('output' / 'att') ----
    scores_s = jax.lax.dot_general(x, s, (((1,), (1,)), ((), ())),
                                   preferred_element_type=jnp.float32)
    if n_valid_sem < scores_s.shape[1]:
        col = jax.lax.broadcasted_iota(jnp.int32, scores_s.shape, 1)
        scores_s = jnp.where(col < n_valid_sem, scores_s, -1e30)  # mask padded rows
    att_s = _softmax_shrink(scores_s, shrink_thres)
    out_s = jax.lax.dot_general(att_s, s, (((1,), (0,)), ((), ())),
                                preferred_element_type=jnp.float32)

    if residual:
        out_s = out_s + out_w           # in-register residual add

    out_w_ref[...] = out_w.astype(out_w_ref.dtype)
    out_s_ref[...] = out_s.astype(out_s_ref.dtype)
    att_s_ref[...] = att_s.astype(att_s_ref.dtype)


# Conservative double-buffered working-set budget: fits v5e's 16 MiB default
# scoped-VMEM limit and v6e/v7x's 32 MiB (v7x has only 64 MiB physical per TC).
_VMEM_BUDGET_BYTES = 12 * 1024 * 1024


def _pick_tile_n(n, c, k1, k2p, requested):
    bpe = 4  # f32
    tile = max(8, min(int(requested), _round_up(n, 8)))
    tile = _round_up(tile, 8)
    resident = 2 * (k1 * c + k2p * c) * bpe          # both memories, double-buffered
    per_row = (c + c + c + k2p) * bpe                # x in + two outs + att out
    while tile > 8 and resident + 2 * tile * per_row > _VMEM_BUDGET_BYTES:
        tile = max(8, _round_up(tile // 2, 8))
    return tile


def fused_mem_attention(x, weight, sem_att, shrink_thres,
                        residual=False, tile_n=1024):
    """Returns (output_part, output_sem, sem_att_weight)."""
    N, C = x.shape
    K1, C1 = weight.shape
    K2, C2 = sem_att.shape
    assert C == C1 == C2

    # lane-dense att output: pad the class memory rows up to a multiple of 128
    K2p = max(_round_up(K2, 128), 128)
    sem_p = jnp.pad(sem_att, ((0, K2p - K2), (0, 0))) if K2p != K2 else sem_att

    tile = _pick_tile_n(N, C, K1, K2p, tile_n)
    Np = _round_up(N, tile)
    x_p = jnp.pad(x, ((0, Np - N), (0, 0))) if Np != N else x

    kernel = functools.partial(_fused_attention_kernel,
                               shrink_thres=float(shrink_thres),
                               n_valid_sem=int(K2),
                               residual=bool(residual))

    out_w, out_s, att_s = pl.pallas_call(
        kernel,
        out_shape=(jax.ShapeDtypeStruct((Np, C), x.dtype),
                   jax.ShapeDtypeStruct((Np, C), x.dtype),
                   jax.ShapeDtypeStruct((Np, K2p), x.dtype)),
        grid=(Np // tile,),
        in_specs=[pl.BlockSpec((tile, C), lambda i: (i, 0)),
                  pl.BlockSpec((K1, C), lambda i: (0, 0)),
                  pl.BlockSpec((K2p, C), lambda i: (0, 0))],
        out_specs=(pl.BlockSpec((tile, C), lambda i: (i, 0)),
                   pl.BlockSpec((tile, C), lambda i: (i, 0)),
                   pl.BlockSpec((tile, K2p), lambda i: (i, 0))),
        compiler_params=pltpu.CompilerParams(
            dimension_semantics=("parallel",)),
    )(x_p, weight, sem_p)

    return out_w[:N], out_s[:N], att_s[:N, :K2]


# ---------------------------------------------------------------------------
# Module wrapper with deterministic parameter init (mirrors __init__).
# ---------------------------------------------------------------------------
class MemoryUnitPallas:
    def __init__(self, ptt_num, num_cls, part_num, fea_dim,
                 shrink_thres=0.0025, key=None):
        self.num_cls = num_cls
        self.ptt_num = ptt_num
        self.part_num = part_num
        self.fea_dim = fea_dim
        self.mem_dim = ptt_num * num_cls * part_num
        self.shrink_thres = shrink_thres

        key = jax.random.PRNGKey(0) if key is None else key
        k_w, k_pw, k_pb, k_iw, k_ib = jax.random.split(key, 5)

        stdv = 1.0 / math.sqrt(fea_dim)
        self.weight = jax.random.uniform(
            k_w, (self.mem_dim, fea_dim), jnp.float32, -stdv, stdv)

        bp = 1.0 / math.sqrt(part_num)   # Conv1d(part_num, part_num, 1) init bound
        self.part_w = jax.random.uniform(k_pw, (part_num, part_num), jnp.float32, -bp, bp)
        self.part_b = jax.random.uniform(k_pb, (part_num,), jnp.float32, -bp, bp)

        bi = 1.0 / math.sqrt(ptt_num)    # Conv1d(ptt_num, ptt_num, 1) init bound
        self.ins_w = jax.random.uniform(k_iw, (ptt_num, ptt_num), jnp.float32, -bi, bi)
        self.ins_b = jax.random.uniform(k_ib, (ptt_num,), jnp.float32, -bi, bi)

    def _class_memory(self):
        """part -> prototype -> class summarisation of the memory.

        Parameter-only and tiny (<= mem_dim x fea_dim numbers); done in plain
        jnp per the perf review (pallas_call overhead exceeds its compute)."""
        L, T, P, C = self.num_cls, self.ptt_num, self.part_num, self.fea_dim
        # == weight.view(L*T, C, P).permute(0, 2, 1) in torch
        rp = self.weight.reshape(L * T, C, P).transpose(0, 2, 1)            # (L*T, P, C)
        conv = jnp.einsum('pq,gqc->gpc', self.part_w, rp) + self.part_b[None, :, None]
        part_ins_att = jnp.mean(jax.nn.sigmoid(conv) * rp, axis=1)          # (L*T, C)
        ri = part_ins_att.reshape(L, T, C)                                  # (L, T, C)
        conv2 = jnp.einsum('ts,lsc->ltc', self.ins_w, ri) + self.ins_b[None, :, None]
        sem_att = jnp.mean(jax.nn.sigmoid(conv2) * ri, axis=1)              # (L, C)
        return sem_att

    def __call__(self, x, residual=False):
        sem_att = self._class_memory()
        # Note: the torch forward also computes an intermediate attention
        # against part_ins_att whose results are never returned; it is
        # intentionally not executed here (dead work removed per review).
        out_part, out_sem, sem_att_weight = fused_mem_attention(
            x, self.weight, sem_att, self.shrink_thres, residual=residual)
        return {'output': out_sem, 'att': sem_att_weight,
                'sem_attn': sem_att, 'output_part': out_part}


# ---------------------------------------------------------------------------
# Pure-JAX reference (for correctness check only).
# ---------------------------------------------------------------------------
def _ref_attention(x, mem, thres):
    s = jnp.dot(x, mem.T)
    a = jax.nn.softmax(s, axis=1)
    if thres > 0:
        sh = a - thres
        a = jax.nn.relu(sh) * a / (jnp.abs(sh) + 1e-12)
        a = a / jnp.maximum(jnp.sum(jnp.abs(a), axis=1, keepdims=True), 1e-12)
    return jnp.dot(a, mem), a


def _ref_forward(m, x, residual=False):
    L, T, P, C = m.num_cls, m.ptt_num, m.part_num, m.fea_dim
    output, _ = _ref_attention(x, m.weight, m.shrink_thres)
    rp = m.weight.reshape(L * T, C, P).transpose(0, 2, 1)
    conv = jnp.einsum('pq,gqc->gpc', m.part_w, rp) + m.part_b[None, :, None]
    part_ins_att = jnp.mean(jax.nn.sigmoid(conv) * rp, axis=1)
    ri = part_ins_att.reshape(L, T, C)
    conv2 = jnp.einsum('ts,lsc->ltc', m.ins_w, ri) + m.ins_b[None, :, None]
    sem_att = jnp.mean(jax.nn.sigmoid(conv2) * ri, axis=1)
    output_sem, sem_att_weight = _ref_attention(x, sem_att, m.shrink_thres)
    if residual:
        output_sem = output_sem + output
    return {'output': output_sem, 'att': sem_att_weight,
            'sem_attn': sem_att, 'output_part': output}


if __name__ == "__main__":
    # Small shapes: batch=2, spatial 16x16, fea_dim=32 -> input (2*16*16, 32)
    ptt_num, num_cls, part_num, fea_dim = 2, 3, 4, 32
    N = 2 * 16 * 16

    key = jax.random.PRNGKey(0)
    k_param, k_x = jax.random.split(key)
    module = MemoryUnitPallas(ptt_num, num_cls, part_num, fea_dim,
                              shrink_thres=0.0025, key=k_param)
    x = jax.random.normal(k_x, (N, fea_dim), jnp.float32)

    for residual in (False, True):
        result = module(x, residual=residual)
        jax.block_until_ready(result)
        ref = _ref_forward(module, x, residual=residual)
        for k in ('output', 'att', 'sem_attn', 'output_part'):
            np.testing.assert_allclose(np.asarray(result[k]), np.asarray(ref[k]),
                                       rtol=1e-2, atol=1e-2)

    print("KERNEL_OK")
</pallas_src>

<mosaic_0001>
module attributes {stable_mosaic.version = 11 : i64} {
  func.func @_fused_attention_kernel(%arg0: i32, %arg1: memref<512x32xf32, #tpu.memory_space<vmem>>, %arg2: memref<24x32xf32, #tpu.memory_space<vmem>>, %arg3: memref<128x32xf32, #tpu.memory_space<vmem>>, %arg4: memref<512x32xf32, #tpu.memory_space<vmem>>, %arg5: memref<512x32xf32, #tpu.memory_space<vmem>>, %arg6: memref<512x128xf32, #tpu.memory_space<vmem>>) attributes {dimension_semantics = [#tpu.dimension_semantics<parallel>], iteration_bounds = array<i64: 1>, scalar_prefetch = 0 : i64, scratch_operands = 0 : i64, tpu.core_type = #tpu.core_type<tc>, window_params = [{transform_indices = @transform_0, window_bounds = array<i64: 512, 32>}, {pipeline_mode = #tpu.pipeline_mode<synchronous>, transform_indices = @transform_1, window_bounds = array<i64: 24, 32>}, {pipeline_mode = #tpu.pipeline_mode<synchronous>, transform_indices = @transform_2, window_bounds = array<i64: 128, 32>}, {transform_indices = @transform_3, window_bounds = array<i64: 512, 32>}, {transform_indices = @transform_4, window_bounds = array<i64: 512, 32>}, {transform_indices = @transform_5, window_bounds = array<i64: 512, 128>}]} {
    %c0 = arith.constant 0 : index
    %c0_0 = arith.constant 0 : index
    %0 = vector.load %arg1[%c0, %c0_0] : memref<512x32xf32, #tpu.memory_space<vmem>>, vector<512x32xf32>
    %c0_1 = arith.constant 0 : index
    %c0_2 = arith.constant 0 : index
    %1 = vector.load %arg2[%c0_1, %c0_2] : memref<24x32xf32, #tpu.memory_space<vmem>>, vector<24x32xf32>
    %c0_3 = arith.constant 0 : index
    %c0_4 = arith.constant 0 : index
    %2 = vector.load %arg3[%c0_3, %c0_4] : memref<128x32xf32, #tpu.memory_space<vmem>>, vector<128x32xf32>
    %cst = arith.constant dense<0.000000e+00> : vector<512x24xf32>
    %3 = tpu.matmul %0, %1, %cst {dimension_numbers = #tpu.dot_dimension_numbers<[1], [1], [0], [0], [0, 0, 1, 0], [], []>} : vector<512x32xf32>, vector<24x32xf32>, vector<512x24xf32> -> vector<512x24xf32>
    %cst_5 = arith.constant dense<0xFF800000> : vector<512xf32>
    %4 = vector.multi_reduction <maximumf>, %3, %cst_5 [1] : vector<512x24xf32> to vector<512xf32>
    %5 = vector.shape_cast %4 : vector<512xf32> to vector<512x1xf32>
    %6 = vector.broadcast %5 : vector<512x1xf32> to vector<512x24xf32>
    %7 = arith.subf %3, %6 : vector<512x24xf32>
    %8 = math.exp %7 : vector<512x24xf32>
    %cst_6 = arith.constant dense<0.000000e+00> : vector<512xf32>
    %9 = vector.multi_reduction <add>, %8, %cst_6 [1] : vector<512x24xf32> to vector<512xf32>
    %10 = vector.shape_cast %9 : vector<512xf32> to vector<512x1xf32>
    %11 = tpu.reciprocal %10 {approx = true} : vector<512x1xf32> -> vector<512x1xf32>
    %12 = vector.broadcast %11 : vector<512x1xf32> to vector<512x24xf32>
    %13 = arith.mulf %8, %12 : vector<512x24xf32>
    %cst_7 = arith.constant 2.500000e-03 : f32
    %14 = vector.broadcast %cst_7 : f32 to vector<512x24xf32>
    %15 = arith.subf %13, %14 : vector<512x24xf32>
    %cst_8 = arith.constant 0.000000e+00 : f32
    %16 = vector.broadcast %cst_8 : f32 to vector<512x24xf32>
    %17 = arith.maximumf %15, %16 : vector<512x24xf32>
    %18 = arith.mulf %17, %13 : vector<512x24xf32>
    %19 = math.absf %15 : vector<512x24xf32>
    %cst_9 = arith.constant 9.99999996E-13 : f32
    %20 = vector.broadcast %cst_9 : f32 to vector<512x24xf32>
    %21 = arith.addf %19, %20 : vector<512x24xf32>
    %22 = arith.divf %18, %21 : vector<512x24xf32>
    %23 = math.absf %22 : vector<512x24xf32>
    %cst_10 = arith.constant dense<0.000000e+00> : vector<512xf32>
    %24 = vector.multi_reduction <add>, %23, %cst_10 [1] : vector<512x24xf32> to vector<512xf32>
    %25 = vector.shape_cast %24 : vector<512xf32> to vector<512x1xf32>
    %cst_11 = arith.constant 9.99999996E-13 : f32
    %26 = vector.broadcast %cst_11 : f32 to vector<512x1xf32>
    %27 = arith.maximumf %25, %26 : vector<512x1xf32>
    %28 = tpu.reciprocal %27 {approx = true} : vector<512x1xf32> -> vector<512x1xf32>
    %29 = vector.broadcast %28 : vector<512x1xf32> to vector<512x24xf32>
    %30 = arith.mulf %22, %29 : vector<512x24xf32>
    %cst_12 = arith.constant dense<0.000000e+00> : vector<512x32xf32>
    %31 = tpu.matmul %30, %1, %cst_12 {dimension_numbers = #tpu.dot_dimension_numbers<[1], [0], [0], [1], [0, 0, 1, 1], [], []>} : vector<512x24xf32>, vector<24x32xf32>, vector<512x32xf32> -> vector<512x32xf32>
    %cst_13 = arith.constant dense<0.000000e+00> : vector<512x128xf32>
    %32 = tpu.matmul %0, %2, %cst_13 {dimension_numbers = #tpu.dot_dimension_numbers<[1], [1], [0], [0], [0, 0, 1, 0], [], []>} : vector<512x32xf32>, vector<128x32xf32>, vector<512x128xf32> -> vector<512x128xf32>
    %33 = tpu.iota {dimensions = array<i32: 1>} : vector<512x128xi32>
    %c3_i32 = arith.constant 3 : i32
    %34 = vector.broadcast %c3_i32 : i32 to vector<512x128xi32>
    %35 = arith.cmpi slt, %33, %34 : vector<512x128xi32>
    %cst_14 = arith.constant -1.000000e+30 : f32
    %36 = vector.broadcast %cst_14 : f32 to vector<512x128xf32>
    %37 = arith.select %35, %32, %36 : vector<512x128xi1>, vector<512x128xf32>
    %cst_15 = arith.constant dense<0xFF800000> : vector<512xf32>
    %38 = vector.multi_reduction <maximumf>, %37, %cst_15 [1] : vector<512x128xf32> to vector<512xf32>
    %39 = vector.shape_cast %38 : vector<512xf32> to vector<512x1xf32>
    %40 = vector.broadcast %39 : vector<512x1xf32> to vector<512x128xf32>
    %41 = arith.subf %37, %40 : vector<512x128xf32>
    %42 = math.exp %41 : vector<512x128xf32>
    %cst_16 = arith.constant dense<0.000000e+00> : vector<512xf32>
    %43 = vector.multi_reduction <add>, %42, %cst_16 [1] : vector<512x128xf32> to vector<512xf32>
    %44 = vector.shape_cast %43 : vector<512xf32> to vector<512x1xf32>
    %45 = tpu.reciprocal %44 {approx = true} : vector<512x1xf32> -> vector<512x1xf32>
    %46 = vector.broadcast %45 : vector<512x1xf32> to vector<512x128xf32>
    %47 = arith.mulf %42, %46 : vector<512x128xf32>
    %cst_17 = arith.constant 2.500000e-03 : f32
    %48 = vector.broadcast %cst_17 : f32 to vector<512x128xf32>
    %49 = arith.subf %47, %48 : vector<512x128xf32>
    %cst_18 = arith.constant 0.000000e+00 : f32
    %50 = vector.broadcast %cst_18 : f32 to vector<512x128xf32>
    %51 = arith.maximumf %49, %50 : vector<512x128xf32>
    %52 = arith.mulf %51, %47 : vector<512x128xf32>
    %53 = math.absf %49 : vector<512x128xf32>
    %cst_19 = arith.constant 9.99999996E-13 : f32
    %54 = vector.broadcast %cst_19 : f32 to vector<512x128xf32>
    %55 = arith.addf %53, %54 : vector<512x128xf32>
    %56 = arith.divf %52, %55 : vector<512x128xf32>
    %57 = math.absf %56 : vector<512x128xf32>
    %cst_20 = arith.constant dense<0.000000e+00> : vector<512xf32>
    %58 = vector.multi_reduction <add>, %57, %cst_20 [1] : vector<512x128xf32> to vector<512xf32>
    %59 = vector.shape_cast %58 : vector<512xf32> to vector<512x1xf32>
    %cst_21 = arith.constant 9.99999996E-13 : f32
    %60 = vector.broadcast %cst_21 : f32 to vector<512x1xf32>
    %61 = arith.maximumf %59, %60 : vector<512x1xf32>
    %62 = tpu.reciprocal %61 {approx = true} : vector<512x1xf32> -> vector<512x1xf32>
    %63 = vector.broadcast %62 : vector<512x1xf32> to vector<512x128xf32>
    %64 = arith.mulf %56, %63 : vector<512x128xf32>
    %cst_22 = arith.constant dense<0.000000e+00> : vector<512x32xf32>
    %65 = tpu.matmul %64, %2, %cst_22 {dimension_numbers = #tpu.dot_dimension_numbers<[1], [0], [0], [1], [0, 0, 1, 1], [], []>} : vector<512x128xf32>, vector<128x32xf32>, vector<512x32xf32> -> vector<512x32xf32>
    %c0_23 = arith.constant 0 : index
    %c0_24 = arith.constant 0 : index
    %66 = vector.load %arg4[%c0_23, %c0_24] : memref<512x32xf32, #tpu.memory_space<vmem>>, vector<512x32xf32>
    tpu.vector_store %arg4[%c0_23, %c0_24], %31 {strides = array<i32>} : memref<512x32xf32, #tpu.memory_space<vmem>>, vector<512x32xf32>,
    %c0_25 = arith.constant 0 : index
    %c0_26 = arith.constant 0 : index
    %67 = vector.load %arg5[%c0_25, %c0_26] : memref<512x32xf32, #tpu.memory_space<vmem>>, vector<512x32xf32>
    tpu.vector_store %arg5[%c0_25, %c0_26], %65 {strides = array<i32>} : memref<512x32xf32, #tpu.memory_space<vmem>>, vector<512x32xf32>,
    %c0_27 = arith.constant 0 : index
    %c0_28 = arith.constant 0 : index
    %68 = vector.load %arg6[%c0_27, %c0_28] : memref<512x128xf32, #tpu.memory_space<vmem>>, vector<512x128xf32>
    tpu.vector_store %arg6[%c0_27, %c0_28], %64 {strides = array<i32>} : memref<512x128xf32, #tpu.memory_space<vmem>>, vector<512x128xf32>,
    return
  }
  func.func @transform_0(%arg0: i32) -> (i32, i32) {
    %c0_i32 = arith.constant 0 : i32
    %c0_i32_0 = arith.constant 0 : i32
    return %arg0, %c0_i32 : i32, i32
  }
  func.func @transform_1(%arg0: i32) -> (i32, i32) {
    %c0_i32 = arith.constant 0 : i32
    %c0_i32_0 = arith.constant 0 : i32
    %c0_i32_1 = arith.constant 0 : i32
    return %c0_i32, %c0_i32_0 : i32, i32
  }
  func.func @transform_2(%arg0: i32) -> (i32, i32) {
    %c0_i32 = arith.constant 0 : i32
    %c0_i32_0 = arith.constant 0 : i32
    %c0_i32_1 = arith.constant 0 : i32
    return %c0_i32, %c0_i32_0 : i32, i32
  }
  func.func @transform_3(%arg0: i32) -> (i32, i32) {
    %c0_i32 = arith.constant 0 : i32
    %c0_i32_0 = arith.constant 0 : i32
    return %arg0, %c0_i32 : i32, i32
  }
  func.func @transform_4(%arg0: i32) -> (i32, i32) {
    %c0_i32 = arith.constant 0 : i32
    %c0_i32_0 = arith.constant 0 : i32
    return %arg0, %c0_i32 : i32, i32
  }
  func.func @transform_5(%arg0: i32) -> (i32, i32) {
    %c0_i32 = arith.constant 0 : i32
    %c0_i32_0 = arith.constant 0 : i32
    return %arg0, %c0_i32 : i32, i32
  }
}

</mosaic_0001>

<bundles_post_ra>
// kernel: tpu_custom_call.1
= control target key start
LH: loop header
LB: loop body
LE: loop exit
PB: predicated region body
PF: predicated region fallthrough
CT: control target
= control target key end

     0   :  { %vm101_vm0 = vcmask 261120   ;;  %s11895_s0 = inlined_call_operand.vmem [shape: f32[512,32], index: 0, kind: input, shape index: {}]   ;;  %s11896_s1 = inlined_call_operand.vmem [shape: f32[24,32], index: 1, kind: input, shape index: {}]   ;;  %s11897_s2 = inlined_call_operand.vmem [shape: f32[128,32], index: 2, kind: input, shape index: {}]   ;;  %s11898_s3 = inlined_call_operand.vmem [shape: f32[512,32], index: 3, kind: output, shape index: {0}]   ;;  %s11899_s4 = inlined_call_operand.vmem [shape: f32[512,32], index: 4, kind: output, shape index: {1}]   ;;  %s11900_s5 = inlined_call_operand.hbm [shape: f32[512,128], index: 5, kind: output, shape index: {2}]  }
   0x1   :  { %v84_v0 = vld [vmem:[%s11896_s1 + $0x10] sm:$0xff]  ;;  %v83_v1 = vld [vmem:[%s11896_s1 + $0x8] sm:$0xff]  ;;  %v18_v2 = vld [vmem:[%s11895_s0] sm:$0xff] }
   0x2   :  { %6008 = vmatprep.subr.msk.mxu0 %vm101_vm0, %v84_v0  ;;  %6110 = vmatprep.subr.mxu1 %v84_v0  ;;  %v82_v3 = vld [vmem:[%s11896_s1] sm:$0xff]  ;;  %v19_v4 = vld [vmem:[%s11895_s0 + $0x8] sm:$0xff]  ;;  %v20_v5 = vld [vmem:[%s11895_s0 + $0x10] sm:$0xff] }
   0x3   :  { %6009 = vmatpush3.xpose.msk.msra.mxu0 %vm101_vm0, %v84_v0  ;;  %6014 = vmatprep.mubr.msk.f32.mxu0 %vm101_vm0, %v18_v2  ;;  %v21_v6 = vld [vmem:[%s11895_s0 + $0x18] sm:$0xff]  ;;  %v22_v7 = vld [vmem:[%s11895_s0 + $0x20] sm:$0xff]  ;;  %v23_v8 = vld [vmem:[%s11895_s0 + $0x28] sm:$0xff] }
   0x4   :  { %6010 = vmatprep.subr.msk.mxu0 %vm101_vm0, %v83_v1  ;;  %6111 = vmatpush3.msra.mxu1 %v84_v0  ;;  %v24_v9 = vld [vmem:[%s11895_s0 + $0x30] sm:$0xff]  ;;  %v25_v10 = vld [vmem:[%s11895_s0 + $0x38] sm:$0xff] }
   0x5   :  { %6112 = vmatprep.subr.mxu1 %v83_v1 }
   0x6   :  { %6113 = vmatpush3.msra.mxu1 %v83_v1 }
   0x7   :  { %6011 = vmatpush3.xpose.msk.msra.mxu0 %vm101_vm0, %v83_v1  ;;  %6114 = vmatprep.subr.mxu1 %v82_v3 }
   0x8   :  { %6012 = vmatprep.subr.msk.mxu0 %vm101_vm0, %v82_v3  ;;  %6115 = vmatpush3.msra.mxu1 %v82_v3 }
   0xb   :  { %6013 = vmatpush3.xpose.msk.msra.mxu0 %vm101_vm0, %v82_v3 }
   0xe   :  { %6015 = vmatmul.mubr.msk.f32.vlgmr.msra.gmra.mxu0 %vm101_vm0, %v19_v4 }
   0xf   :  { %6017 = vmatprep.mubr.msk.f32.mxu0 %vm101_vm0, %v20_v5 }
  0x12   :  { %6018 = vmatmul.mubr.msk.f32.gmra.mxu0 %vm101_vm0, %v21_v6 }
  0x13   :  { %6020 = vmatprep.mubr.msk.f32.mxu0 %vm101_vm0, %v22_v7 }
  0x16   :  { %6021 = vmatmul.mubr.msk.f32.gmra.mxu0 %vm101_vm0, %v23_v8 }
  0x17   :  { %6023 = vmatprep.mubr.msk.f32.mxu0 %vm101_vm0, %v24_v9 }
  0x18   :  { %11 = vsyncpa [#allocation3], 0  ;;  %v26_v11 = vld [vmem:[%s11895_s0 + $0x40] sm:$0xff]  ;;  %v27_v12 = vld [vmem:[%s11895_s0 + $0x48] sm:$0xff]  ;;  %vm688_vm1 = vcmask 195584   ;;  %s7583_s9 = smov [#allocation2]  }
  0x19   :  { %v28_v13 = vld [vmem:[%s11895_s0 + $0x50] sm:$0xff]  ;;  %v29_v14 = vld [vmem:[%s11895_s0 + $0x58] sm:$0xff]  ;;  %v30_v15 = vld [vmem:[%s11895_s0 + $0x60] sm:$0xff]  ;;  %s5360_s10 = sshll.u32 %s7583_s9, 4  ;;  %s5361_s10 = int_to_ptr.vmem [resolvable:$true] %s5360_s10 }
  0x1a   :  { %6024 = vmatmul.mubr.msk.f32.gmra.mxu0 %vm101_vm0, %v25_v10  ;;  %v31_v16 = vld [vmem:[%s11895_s0 + $0x68] sm:$0xff]  ;;  %v32_v17 = vld [vmem:[%s11895_s0 + $0x70] sm:$0xff]  ;;  %v33_v18 = vld [vmem:[%s11895_s0 + $0x78] sm:$0xff]  ;;  %s7561_s13 = scalar_lea.vmem %s5361_s10, 8192  ;;  %p7566_p1 = scmp.lt.s32.totalorder %s5361_s10, %s5361_s10 }
  0x1b   :  { %6026 = vmatprep.mubr.msk.f32.mxu0 %vm101_vm0, %v26_v11  ;;  %v34_v19 = vld [vmem:[%s11895_s0 + $0x80] sm:$0xff]  ;;  %v35_v20 = vld [vmem:[%s11895_s0 + $0x88] sm:$0xff]  ;;  %v36_v21 = vld [vmem:[%s11895_s0 + $0x90] sm:$0xff]  ;;  %p7562_p0 = scmp.ne.s32.totalorder %s5361_s10, %s7561_s13  ;;  %p7567_p2 = scmp.lt.s32.totalorder %s7561_s13, %s7561_s13 }
  0x1c   :  { %v37_v22 = vld [vmem:[%s11895_s0 + $0x98] sm:$0xff]  ;;  %v38_v23 = vld [vmem:[%s11895_s0 + $0xa0] sm:$0xff]  ;;  %v39_v24 = vld [vmem:[%s11895_s0 + $0xa8] sm:$0xff] }
  0x1d   :  { %v40_v25 = vld [vmem:[%s11895_s0 + $0xb0] sm:$0xff]  ;;  %v41_v26 = vld [vmem:[%s11895_s0 + $0xb8] sm:$0xff]  ;;  %v42_v27 = vld [vmem:[%s11895_s0 + $0xc0] sm:$0xff]  ;;  %p7568_p3 = por %p7567_p2, %p7566_p1 }
  0x1e   :  { %6027 = vmatmul.mubr.msk.f32.gmra.mxu0 %vm101_vm0, %v27_v12  ;;  %v43_v28 = vld [vmem:[%s11895_s0 + $0xc8] sm:$0xff]  ;;  %v44_v29 = vld [vmem:[%s11895_s0 + $0xd0] sm:$0xff]  ;;  %v45_v30 = vld [vmem:[%s11895_s0 + $0xd8] sm:$0xff] }
  0x1f   :  { %6029 = vmatprep.mubr.msk.f32.mxu0 %vm101_vm0, %v28_v13  ;;  %v46_v31 = vld [vmem:[%s11895_s0 + $0xe0] sm:$0xff]  ;;  %v47_v32 = vld [vmem:[%s11895_s0 + $0xe8] sm:$0xff]  ;;  %v48_v33 = vld [vmem:[%s11895_s0 + $0xf0] sm:$0xff]  ;;  %p7569_p4 = pnand %p7568_p3, %p7562_p0 }
  0x20   :  { %v49_v34 = vld [vmem:[%s11895_s0 + $0xf8] sm:$0xff]  ;;  %v50_v35 = vld [vmem:[%s11895_s0 + $0x100] sm:$0xff]  ;;  %v51_v36 = vld [vmem:[%s11895_s0 + $0x108] sm:$0xff] }
  0x21   :  { %v52_v37 = vld [vmem:[%s11895_s0 + $0x110] sm:$0xff]  ;;  %v53_v38 = vld [vmem:[%s11895_s0 + $0x118] sm:$0xff]  ;;  %v54_v39 = vld [vmem:[%s11895_s0 + $0x120] sm:$0xff] }
  0x22   :  { %6030 = vmatmul.mubr.msk.f32.gmra.mxu0 %vm101_vm0, %v29_v14  ;;  %v55_v40 = vld [vmem:[%s11895_s0 + $0x128] sm:$0xff]  ;;  %v56_v41 = vld [vmem:[%s11895_s0 + $0x130] sm:$0xff]  ;;  %v57_v42 = vld [vmem:[%s11895_s0 + $0x138] sm:$0xff] }
  0x23   :  { %6032 = vmatprep.mubr.msk.f32.mxu0 %vm101_vm0, %v30_v15  ;;  %v58_v43 = vld [vmem:[%s11895_s0 + $0x140] sm:$0xff]  ;;  %v59_v44 = vld [vmem:[%s11895_s0 + $0x148] sm:$0xff]  ;;  %v60_v45 = vld [vmem:[%s11895_s0 + $0x150] sm:$0xff] }
  0x24   :  { %v61_v46 = vld [vmem:[%s11895_s0 + $0x158] sm:$0xff]  ;;  %v62_v47 = vld [vmem:[%s11895_s0 + $0x160] sm:$0xff]  ;;  %v63_v48 = vld [vmem:[%s11895_s0 + $0x168] sm:$0xff] }
  0x25   :  { %v64_v49 = vld [vmem:[%s11895_s0 + $0x170] sm:$0xff]  ;;  %v65_v50 = vld [vmem:[%s11895_s0 + $0x178] sm:$0xff]  ;;  %v66_v51 = vld [vmem:[%s11895_s0 + $0x180] sm:$0xff] }
  0x26   :  { %6033 = vmatmul.mubr.msk.f32.gmra.mxu0 %vm101_vm0, %v31_v16  ;;  %v67_v52 = vld [vmem:[%s11895_s0 + $0x188] sm:$0xff]  ;;  %v68_v53 = vld [vmem:[%s11895_s0 + $0x190] sm:$0xff]  ;;  %v69_v54 = vld [vmem:[%s11895_s0 + $0x198] sm:$0xff] }
  0x27   :  { %6035 = vmatprep.mubr.msk.f32.mxu0 %vm101_vm0, %v32_v17  ;;  %v70_v55 = vld [vmem:[%s11895_s0 + $0x1a0] sm:$0xff]  ;;  %v71_v56 = vld [vmem:[%s11895_s0 + $0x1a8] sm:$0xff]  ;;  %v72_v57 = vld [vmem:[%s11895_s0 + $0x1b0] sm:$0xff] }
  0x28   :  { %v73_v58 = vld [vmem:[%s11895_s0 + $0x1b8] sm:$0xff]  ;;  %v74_v59 = vld [vmem:[%s11895_s0 + $0x1c0] sm:$0xff]  ;;  %v75_v60 = vld [vmem:[%s11895_s0 + $0x1c8] sm:$0xff] }
  0x29   :  { %v76_v61 = vld [vmem:[%s11895_s0 + $0x1d0] sm:$0xff]  ;;  %v77_v62 = vld [vmem:[%s11895_s0 + $0x1d8] sm:$0xff]  ;;  %v78_v63 = vld [vmem:[%s11895_s0 + $0x1e0] sm:$0xff] }
  0x2a   :  { %6036 = vmatmul.mubr.msk.f32.gmra.mxu0 %vm101_vm0, %v33_v18  ;;  %v79_v0 = vld [vmem:[%s11895_s0 + $0x1e8] sm:$0xff]  ;;  %v80_v1 = vld [vmem:[%s11895_s0 + $0x1f0] sm:$0xff]  ;;  %v81_v2 = vld [vmem:[%s11895_s0 + $0x1f8] sm:$0xff] }
  0x2b   :  { %6038 = vmatprep.mubr.msk.f32.mxu0 %vm101_vm0, %v34_v19 }
  0x2e   :  { %6039 = vmatmul.mubr.msk.f32.gmra.mxu0 %vm101_vm0, %v35_v20 }
  0x2f   :  { %6041 = vmatprep.mubr.msk.f32.mxu0 %vm101_vm0, %v36_v21 }
  0x32   :  { %6042 = vmatmul.mubr.msk.f32.gmra.mxu0 %vm101_vm0, %v37_v22 }
  0x33   :  { %6044 = vmatprep.mubr.msk.f32.mxu0 %vm101_vm0, %v38_v23 }
  0x36   :  { %6045 = vmatmul.mubr.msk.f32.gmra.mxu0 %vm101_vm0, %v39_v24 }
  0x37   :  { %6047 = vmatprep.mubr.msk.f32.mxu0 %vm101_vm0, %v40_v25 }
  0x3a   :  { %6048 = vmatmul.mubr.msk.f32.gmra.mxu0 %vm101_vm0, %v41_v26 }
  0x3b   :  { %6050 = vmatprep.mubr.msk.f32.mxu0 %vm101_vm0, %v42_v27 }
  0x3e   :  { %6051 = vmatmul.mubr.msk.f32.gmra.mxu0 %vm101_vm0, %v43_v28 }
  0x3f   :  { %6053 = vmatprep.mubr.msk.f32.mxu0 %vm101_vm0, %v44_v29 }
  0x42   :  { %6054 = vmatmul.mubr.msk.f32.gmra.mxu0 %vm101_vm0, %v45_v30 }
  0x43   :  { %6056 = vmatprep.mubr.msk.f32.mxu0 %vm101_vm0, %v46_v31 }
  0x46   :  { %6057 = vmatmul.mubr.msk.f32.gmra.mxu0 %vm101_vm0, %v47_v32 }
  0x47   :  { %6059 = vmatprep.mubr.msk.f32.mxu0 %vm101_vm0, %v48_v33 }
  0x4a   :  { %6060 = vmatmul.mubr.msk.f32.gmra.mxu0 %vm101_vm0, %v49_v34 }
  0x4b   :  { %6062 = vmatprep.mubr.msk.f32.mxu0 %vm101_vm0, %v50_v35 }
  0x4e   :  { %6063 = vmatmul.mubr.msk.f32.gmra.mxu0 %vm101_vm0, %v51_v36 }
  0x4f   :  { %6065 = vmatprep.mubr.msk.f32.mxu0 %vm101_vm0, %v52_v37 }
  0x52   :  { %6066 = vmatmul.mubr.msk.f32.gmra.mxu0 %vm101_vm0, %v53_v38 }
  0x53   :  { %6068 = vmatprep.mubr.msk.f32.mxu0 %vm101_vm0, %v54_v39 }
  0x56   :  { %6069 = vmatmul.mubr.msk.f32.gmra.mxu0 %vm101_vm0, %v55_v40 }
  0x57   :  { %6071 = vmatprep.mubr.msk.f32.mxu0 %vm101_vm0, %v56_v41 }
  0x5a   :  { %6072 = vmatmul.mubr.msk.f32.gmra.mxu0 %vm101_vm0, %v57_v42 }
  0x5b   :  { %6074 = vmatprep.mubr.msk.f32.mxu0 %vm101_vm0, %v58_v43 }
  0x5e   :  { %6075 = vmatmul.mubr.msk.f32.gmra.mxu0 %vm101_vm0, %v59_v44 }
  0x5f   :  { %6077 = vmatprep.mubr.msk.f32.mxu0 %vm101_vm0, %v60_v45 }
  0x62   :  { %6078 = vmatmul.mubr.msk.f32.gmra.mxu0 %vm101_vm0, %v61_v46 }
  0x63   :  { %6080 = vmatprep.mubr.msk.f32.mxu0 %vm101_vm0, %v62_v47 }
  0x66   :  { %6081 = vmatmul.mubr.msk.f32.gmra.mxu0 %vm101_vm0, %v63_v48 }
  0x67   :  { %6083 = vmatprep.mubr.msk.f32.mxu0 %vm101_vm0, %v64_v49 }
  0x6a   :  { %6084 = vmatmul.mubr.msk.f32.gmra.mxu0 %vm101_vm0, %v65_v50 }
  0x6b   :  { %6086 = vmatprep.mubr.msk.f32.mxu0 %vm101_vm0, %v66_v51 }
  0x6e   :  { %6087 = vmatmul.mubr.msk.f32.gmra.mxu0 %vm101_vm0, %v67_v52 }
  0x6f   :  { %6089 = vmatprep.mubr.msk.f32.mxu0 %vm101_vm0, %v68_v53 }
  0x72   :  { %6090 = vmatmul.mubr.msk.f32.gmra.mxu0 %vm101_vm0, %v69_v54 }
  0x73   :  { %6092 = vmatprep.mubr.msk.f32.mxu0 %vm101_vm0, %v70_v55 }
  0x76   :  { %6093 = vmatmul.mubr.msk.f32.gmra.mxu0 %vm101_vm0, %v71_v56 }
  0x77   :  { %6095 = vmatprep.mubr.msk.f32.mxu0 %vm101_vm0, %v72_v57 }
  0x7a   :  { %6096 = vmatmul.mubr.msk.f32.gmra.mxu0 %vm101_vm0, %v73_v58 }
  0x7b   :  { %6098 = vmatprep.mubr.msk.f32.mxu0 %vm101_vm0, %v74_v59 }
  0x7e   :  { %6099 = vmatmul.mubr.msk.f32.gmra.mxu0 %vm101_vm0, %v75_v60 }
  0x7f   :  { %6101 = vmatprep.mubr.msk.f32.mxu0 %vm101_vm0, %v76_v61 }
  0x82   :  { %6102 = vmatmul.mubr.msk.f32.gmra.mxu0 %vm101_vm0, %v77_v62 }
  0x83   :  { %6104 = vmatprep.mubr.msk.f32.mxu0 %vm101_vm0, %v78_v63 }
  0x86   :  { %6105 = vmatmul.mubr.msk.f32.gmra.mxu0 %vm101_vm0, %v79_v0 }
  0x87   :  { %6107 = vmatprep.mubr.msk.f32.mxu0 %vm101_vm0, %v80_v1 }
  0x8a   :  { %6108 = vmatmul.mubr.msk.f32.gmra.mxu0 %vm101_vm0, %v81_v2 }
  0xce   :  { %v7887_v3 = vpop.f32.mrf.mxu0 }
  0xcf   :  { %v692_v4 = vsel %vm688_vm1, %v7887_v3, -inf }
  0xd0   :  { %693 = vmax.xlane.f32.xlu0 %v692_v4  ;;  %v7891_v5 = vpop.f32.mrf.mxu0 }
  0xd1   :  { %v689_v7 = vsel %vm688_vm1, %v7891_v5, -inf }
  0xd2   :  { %v7893_v6 = vpop.f32.mrf.mxu0 }
  0xd3   :  { %v698_v8 = vsel %vm688_vm1, %v7893_v6, -inf }
  0xd4   :  { %690 = vmax.xlane.f32.xlu0 %v689_v7  ;;  %699 = vmax.xlane.f32.xlu1 %v698_v8  ;;  %v7899_v9 = vpop.f32.mrf.mxu0 }
  0xd5   :  { %v695_v11 = vsel %vm688_vm1, %v7899_v9, -inf }
  0xd6   :  { %v7901_v10 = vpop.f32.mrf.mxu0 }
  0xd7   :  { %v704_v14 = vsel %vm688_vm1, %v7901_v10, -inf }
  0xd8   :  { %696 = vmax.xlane.f32.xlu1 %v695_v11  ;;  %v7905_v12 = vpop.f32.mrf.mxu0 }
  0xd9   :  { %v701_v13 = vsel %vm688_vm1, %v7905_v12, -inf }
  0xda   :  { %702 = vmax.xlane.f32.xlu0 %v701_v13  ;;  %v7911_v15 = vpop.f32.mrf.mxu0 }
  0xdb   :  { %v710_v18 = vsel %vm688_vm1, %v7911_v15, -inf }
  0xdc   :  { %705 = vmax.xlane.f32.xlu1 %v704_v14  ;;  %v7913_v16 = vpop.f32.mrf.mxu0 }
  0xdd   :  { %v707_v17 = vsel %vm688_vm1, %v7913_v16, -inf }
  0xde   :  { %708 = vmax.xlane.f32.xlu0 %v707_v17  ;;  %v7919_v19 = vpop.f32.mrf.mxu0 }
  0xdf   :  { %v716_v22 = vsel %vm688_vm1, %v7919_v19, -inf }
  0xe0   :  { %711 = vmax.xlane.f32.xlu1 %v710_v18  ;;  %v7921_v20 = vpop.f32.mrf.mxu0 }
  0xe1   :  { %v713_v21 = vsel %vm688_vm1, %v7921_v20, -inf }
  0xe2   :  { %714 = vmax.xlane.f32.xlu0 %v713_v21  ;;  %v7927_v23 = vpop.f32.mrf.mxu0 }
  0xe3   :  { %v722_v26 = vsel %vm688_vm1, %v7927_v23, -inf }
  0xe4   :  { %717 = vmax.xlane.f32.xlu1 %v716_v22  ;;  %v7929_v24 = vpop.f32.mrf.mxu0 }
  0xe5   :  { %v719_v25 = vsel %vm688_vm1, %v7929_v24, -inf }
  0xe6   :  { %720 = vmax.xlane.f32.xlu0 %v719_v25  ;;  %v7935_v27 = vpop.f32.mrf.mxu0 }
  0xe7   :  { %v728_v30 = vsel %vm688_vm1, %v7935_v27, -inf }
  0xe8   :  { %723 = vmax.xlane.f32.xlu1 %v722_v26  ;;  %v7937_v28 = vpop.f32.mrf.mxu0 }
  0xe9   :  { %v725_v29 = vsel %vm688_vm1, %v7937_v28, -inf }
  0xea   :  { %726 = vmax.xlane.f32.xlu0 %v725_v29  ;;  %v7943_v31 = vpop.f32.mrf.mxu0 }
  0xeb   :  { %v734_v34 = vsel %vm688_vm1, %v7943_v31, -inf }
  0xec   :  { %729 = vmax.xlane.f32.xlu1 %v728_v30  ;;  %v7945_v32 = vpop.f32.mrf.mxu0 }
  0xed   :  { %v731_v33 = vsel %vm688_vm1, %v7945_v32, -inf }
  0xee   :  { %732 = vmax.xlane.f32.xlu0 %v731_v33  ;;  %v7951_v35 = vpop.f32.mrf.mxu0 }
  0xef   :  { %v740_v38 = vsel %vm688_vm1, %v7951_v35, -inf }
  0xf0   :  { %735 = vmax.xlane.f32.xlu1 %v734_v34  ;;  %v7953_v36 = vpop.f32.mrf.mxu0 }
  0xf1   :  { %v737_v37 = vsel %vm688_vm1, %v7953_v36, -inf }
  0xf2   :  { %738 = vmax.xlane.f32.xlu0 %v737_v37  ;;  %v7959_v39 = vpop.f32.mrf.mxu0 }
  0xf3   :  { %v746_v42 = vsel %vm688_vm1, %v7959_v39, -inf }
  0xf4   :  { %741 = vmax.xlane.f32.xlu1 %v740_v38  ;;  %v7961_v40 = vpop.f32.mrf.mxu0 }
  0xf5   :  { %v743_v41 = vsel %vm688_vm1, %v7961_v40, -inf }
  0xf6   :  { %744 = vmax.xlane.f32.xlu0 %v743_v41  ;;  %v7967_v43 = vpop.f32.mrf.mxu0 }
  0xf7   :  { %v752_v46 = vsel %vm688_vm1, %v7967_v43, -inf }
  0xf8   :  { %747 = vmax.xlane.f32.xlu1 %v746_v42  ;;  %v7969_v44 = vpop.f32.mrf.mxu0 }
  0xf9   :  { %v749_v45 = vsel %vm688_vm1, %v7969_v44, -inf }
  0xfa   :  { %750 = vmax.xlane.f32.xlu0 %v749_v45  ;;  %v7975_v47 = vpop.f32.mrf.mxu0 }
  0xfb   :  { %v758_v50 = vsel %vm688_vm1, %v7975_v47, -inf }
  0xfc   :  { %753 = vmax.xlane.f32.xlu1 %v752_v46  ;;  %v7977_v48 = vpop.f32.mrf.mxu0 }
  0xfd   :  { %v755_v49 = vsel %vm688_vm1, %v7977_v48, -inf }
  0xfe   :  { %756 = vmax.xlane.f32.xlu0 %v755_v49  ;;  %v7983_v51 = vpop.f32.mrf.mxu0 }
  0xff   :  { %v764_v54 = vsel %vm688_vm1, %v7983_v51, -inf }
 0x100   :  { %759 = vmax.xlane.f32.xlu1 %v758_v50  ;;  %v7985_v52 = vpop.f32.mrf.mxu0 }
 0x101   :  { %v761_v53 = vsel %vm688_vm1, %v7985_v52, -inf }
 0x102   :  { %762 = vmax.xlane.f32.xlu0 %v761_v53  ;;  %v7991_v55 = vpop.f32.mrf.mxu0 }
 0x103   :  { %v770_v58 = vsel %vm688_vm1, %v7991_v55, -inf }
 0x104   :  { %765 = vmax.xlane.f32.xlu1 %v764_v54  ;;  %v7993_v56 = vpop.f32.mrf.mxu0 }
 0x105   :  { %v767_v57 = vsel %vm688_vm1, %v7993_v56, -inf }
 0x106   :  { %768 = vmax.xlane.f32.xlu0 %v767_v57  ;;  %v7999_v59 = vpop.f32.mrf.mxu0 }
 0x107   :  { %v776_v62 = vsel %vm688_vm1, %v7999_v59, -inf }
 0x108   :  { %771 = vmax.xlane.f32.xlu1 %v770_v58  ;;  %v8001_v60 = vpop.f32.mrf.mxu0 }
 0x109   :  { %v773_v61 = vsel %vm688_vm1, %v8001_v60, -inf }
 0x10a   :  { %774 = vmax.xlane.f32.xlu0 %v773_v61  ;;  %v8007_v63 = vpop.f32.mrf.mxu0 }
 0x10b   :  { %v782_v2 = vsel %vm688_vm1, %v8007_v63, -inf }
 0x10c   :  { %777 = vmax.xlane.f32.xlu1 %v776_v62  ;;  %v8009_v0 = vpop.f32.mrf.mxu0 }
 0x10d   :  { %v779_v1 = vsel %vm688_vm1, %v8009_v0, -inf }
 0x10e   :  { %780 = vmax.xlane.f32.xlu0 %v779_v1  ;;  %v8015_v4 = vpop.f32.mrf.mxu0 }
 0x10f   :  { %v788_v11 = vsel %vm688_vm1, %v8015_v4, -inf }
 0x110   :  { %783 = vmax.xlane.f32.xlu1 %v782_v2  ;;  %v8017_v7 = vpop.f32.mrf.mxu0 }
 0x111   :  { %v785_v8 = vsel %vm688_vm1, %v8017_v7, -inf }
 0x112   :  { %786 = vmax.xlane.f32.xlu0 %v785_v8  ;;  %v8023_v13 = vpop.f32.mrf.mxu0 }
 0x113   :  { %v794_v18 = vsel %vm688_vm1, %v8023_v13, -inf }
 0x114   :  { %789 = vmax.xlane.f32.xlu1 %v788_v11  ;;  %v8025_v14 = vpop.f32.mrf.mxu0 }
 0x115   :  { %v791_v17 = vsel %vm688_vm1, %v8025_v14, -inf }
 0x116   :  { %792 = vmax.xlane.f32.xlu0 %v791_v17  ;;  %v8031_v21 = vpop.f32.mrf.mxu0 }
 0x117   :  { %v800_v26 = vsel %vm688_vm1, %v8031_v21, -inf }
 0x118   :  { %795 = vmax.xlane.f32.xlu1 %v794_v18  ;;  %v8033_v22 = vpop.f32.mrf.mxu0 }
 0x119   :  { %v797_v25 = vsel %vm688_vm1, %v8033_v22, -inf }
 0x11a   :  { %798 = vmax.xlane.f32.xlu0 %v797_v25  ;;  %v8039_v29 = vpop.f32.mrf.mxu0 }
 0x11b   :  { %v806_v34 = vsel %vm688_vm1, %v8039_v29, -inf }
 0x11c   :  { %801 = vmax.xlane.f32.xlu1 %v800_v26  ;;  %v8041_v30 = vpop.f32.mrf.mxu0 }
 0x11d   :  { %v803_v33 = vsel %vm688_vm1, %v8041_v30, -inf }
 0x11e   :  { %804 = vmax.xlane.f32.xlu0 %v803_v33  ;;  %v8047_v37 = vpop.f32.mrf.mxu0 }
 0x11f   :  { %v812_v42 = vsel %vm688_vm1, %v8047_v37, -inf }
 0x120   :  { %807 = vmax.xlane.f32.xlu1 %v806_v34  ;;  %v8049_v38 = vpop.f32.mrf.mxu0 }
 0x121   :  { %v809_v41 = vsel %vm688_vm1, %v8049_v38, -inf }
 0x122   :  { %810 = vmax.xlane.f32.xlu0 %v809_v41  ;;  %v8055_v45 = vpop.f32.mrf.mxu0 }
 0x123   :  { %v818_v50 = vsel %vm688_vm1, %v8055_v45, -inf }
 0x124   :  { %813 = vmax.xlane.f32.xlu1 %v812_v42  ;;  %v8057_v46 = vpop.f32.mrf.mxu0 }
 0x125   :  { %v815_v49 = vsel %vm688_vm1, %v8057_v46, -inf }
 0x126   :  { %816 = vmax.xlane.f32.xlu0 %v815_v49  ;;  %v8063_v53 = vpop.f32.mrf.mxu0 }
 0x127   :  { %v824_v58 = vsel %vm688_vm1, %v8063_v53, -inf }
 0x128   :  { %819 = vmax.xlane.f32.xlu1 %v818_v50  ;;  %v8065_v54 = vpop.f32.mrf.mxu0 }
 0x129   :  { %v821_v57 = vsel %vm688_vm1, %v8065_v54, -inf }
 0x12a   :  { %822 = vmax.xlane.f32.xlu0 %v821_v57  ;;  %v8071_v61 = vpop.f32.mrf.mxu0 }
 0x12b   :  { %v830_v2 = vsel %vm688_vm1, %v8071_v61, -inf }
 0x12c   :  { %825 = vmax.xlane.f32.xlu1 %v824_v58  ;;  %v8073_v62 = vpop.f32.mrf.mxu0 }
 0x12d   :  { %v827_v1 = vsel %vm688_vm1, %v8073_v62, -inf }
 0x12e   :  { %828 = vmax.xlane.f32.xlu0 %v827_v1  ;;  %v8079_v8 = vpop.f32.mrf.mxu0 }
 0x12f   :  { %v836_v18 = vsel %vm688_vm1, %v8079_v8, -inf }
 0x130   :  { %831 = vmax.xlane.f32.xlu1 %v830_v2  ;;  %v8081_v11 = vpop.f32.mrf.mxu0 }
 0x131   :  { %v833_v17 = vsel %vm688_vm1, %v8081_v11, -inf }
 0x132   :  { %834 = vmax.xlane.f32.xlu0 %v833_v17  ;;  %v8087_v25 = vpop.f32.mrf.mxu0 }
 0x133   :  { %12027 = vst [vmem:[#allocation5_spill] sm:$0xff] %v8087_v25  ;;  %v842_v34 = vsel %vm688_vm1, %v8087_v25, -inf }
 0x134   :  { %837 = vmax.xlane.f32.xlu1 %v836_v18  ;;  %v8089_v26 = vpop.f32.mrf.mxu0 }
 0x135   :  { %12028 = vst [vmem:[#allocation6_spill] sm:$0xff] %v8089_v26  ;;  %v839_v33 = vsel %vm688_vm1, %v8089_v26, -inf }
 0x136   :  { %840 = vmax.xlane.f32.xlu0 %v839_v33  ;;  %v8095_v41 = vpop.f32.mrf.mxu0 }
 0x137   :  { %12029 = vst [vmem:[#allocation7_spill] sm:$0xff] %v8095_v41  ;;  %v848_v50 = vsel %vm688_vm1, %v8095_v41, -inf }
 0x138   :  { %843 = vmax.xlane.f32.xlu1 %v842_v34  ;;  %v8097_v42 = vpop.f32.mrf.mxu0 }
 0x139   :  { %12030 = vst [vmem:[#allocation8_spill] sm:$0xff] %v8097_v42  ;;  %v845_v49 = vsel %vm688_vm1, %v8097_v42, -inf }
 0x13a   :  { %846 = vmax.xlane.f32.xlu0 %v845_v49  ;;  %v8103_v57 = vpop.f32.mrf.mxu0 }
 0x13b   :  { %12031 = vst [vmem:[#allocation9_spill] sm:$0xff] %v8103_v57  ;;  %v854_v2 = vsel %vm688_vm1, %v8103_v57, -inf }
 0x13c   :  { %849 = vmax.xlane.f32.xlu1 %v848_v50  ;;  %v8105_v58 = vpop.f32.mrf.mxu0 }
 0x13d   :  { %12032 = vst [vmem:[#allocation10_spill] sm:$0xff] %v8105_v58  ;;  %v851_v1 = vsel %vm688_vm1, %v8105_v58, -inf }
 0x13e   :  { %852 = vmax.xlane.f32.xlu0 %v851_v1  ;;  %v8111_v17 = vpop.f32.mrf.mxu0 }
 0x13f   :  { %12033 = vst [vmem:[#allocation11_spill] sm:$0xff] %v8111_v17  ;;  %v860_v34 = vsel %vm688_vm1, %v8111_v17, -inf }
 0x140   :  { %855 = vmax.xlane.f32.xlu1 %v854_v2  ;;  %v8113_v18 = vpop.f32.mrf.mxu0 }
 0x141   :  { %12034 = vst [vmem:[#allocation12_spill] sm:$0xff] %v8113_v18  ;;  %v857_v33 = vsel %vm688_vm1, %v8113_v18, -inf }
 0x142   :  { %858 = vmax.xlane.f32.xlu0 %v857_v33  ;;  %v8119_v49 = vpop.f32.mrf.mxu0 }
 0x143   :  { %12035 = vst [vmem:[#allocation13_spill] sm:$0xff] %v8119_v49  ;;  %v866_v2 = vsel %vm688_vm1, %v8119_v49, -inf }
 0x144   :  { %861 = vmax.xlane.f32.xlu1 %v860_v34  ;;  %v8121_v50 = vpop.f32.mrf.mxu0 }
 0x145   :  { %12036 = vst [vmem:[#allocation14_spill] sm:$0xff] %v8121_v50  ;;  %v863_v1 = vsel %vm688_vm1, %v8121_v50, -inf }
 0x146   :  { %864 = vmax.xlane.f32.xlu0 %v863_v1  ;;  %v8127_v57 = vpop.f32.mrf.mxu0 }
 0x147   :  { %12037 = vst [vmem:[#allocation15_spill] sm:$0xff] %v8127_v57  ;;  %v872_v34 = vsel %vm688_vm1, %v8127_v57, -inf }
 0x148   :  { %867 = vmax.xlane.f32.xlu1 %v866_v2  ;;  %v8129_v18 = vpop.f32.mrf.mxu0 }
 0x149   :  { %12038 = vst [vmem:[#allocation16_spill] sm:$0xff] %v8129_v18  ;;  %v869_v33 = vsel %vm688_vm1, %v8129_v18, -inf }
 0x14a   :  { %870 = vmax.xlane.f32.xlu0 %v869_v33  ;;  %v8135_v17 = vpop.f32.mrf.mxu0 }
 0x14b   :  { %12039 = vst [vmem:[#allocation17_spill] sm:$0xff] %v8135_v17  ;;  %v878_v2 = vsel %vm688_vm1, %v8135_v17, -inf }
 0x14c   :  { %873 = vmax.xlane.f32.xlu1 %v872_v34  ;;  %v8137_v50 = vpop.f32.mrf.mxu0 }
 0x14d   :  { %12040 = vst [vmem:[#allocation18_spill] sm:$0xff] %v8137_v50  ;;  %v875_v1 = vsel %vm688_vm1, %v8137_v50, -inf }
 0x14e   :  { %876 = vmax.xlane.f32.xlu0 %v875_v1 }
 0x150   :  { %879 = vmax.xlane.f32.xlu1 %v878_v2 }
 0x159   :  { %v694_v49 = vpop.xlane.xlu0 %693 }
 0x15a   :  { %v882_v18 = vsub.f32 %v7887_v3, %v694_v49 }
 0x15c   :  { %v947_v58 = vmul.f32 1.442695, %v882_v18 }
 0x15d   :  { %v691_v41 = vpop.xlane.xlu0 %690  ;;  %v700_v57 = vpop.xlane.xlu1 %699 }
 0x15e   :  { %6471 = vpow2.f32 %v947_v58  ;;  %v881_v33 = vsub.f32 %v7891_v5, %v691_v41  ;;  %v884_v34 = vsub.f32 %v7893_v6, %v700_v57 }
 0x160   :  { %v945_v42 = vmul.f32 1.442695, %v881_v33  ;;  %v951_v25 = vmul.f32 1.442695, %v884_v34 }
 0x161   :  { %v697_v26 = vpop.xlane.xlu1 %696 }
 0x162   :  { %6473 = vpow2.f32 %v945_v42  ;;  %v883_v50 = vsub.f32 %v7899_v9, %v697_v26 }
 0x163   :  { %6475 = vpow2.f32 %v951_v25  ;;  %v703_v1 = vpop.xlane.xlu0 %702 }
 0x164   :  { %v949_v2 = vmul.f32 1.442695, %v883_v50  ;;  %v885_v17 = vsub.f32 %v7905_v12, %v703_v1 }
 0x165   :  { %v706_v3 = vpop.xlane.xlu1 %705 }
 0x166   :  { %6477 = vpow2.f32 %v949_v2  ;;  %v953_v18 = vmul.f32 1.442695, %v885_v17  ;;  %v886_v58 = vsub.f32 %v7901_v10, %v706_v3 }
 0x167   :  { %v709_v49 = vpop.xlane.xlu0 %708 }
 0x168   :  { %6479 = vpow2.f32 %v953_v18  ;;  %v955_v5 = vmul.f32 1.442695, %v886_v58  ;;  %v887_v6 = vsub.f32 %v7913_v16, %v709_v49 }
 0x169   :  { %v712_v41 = vpop.xlane.xlu1 %711 }
 0x16a   :  { %6481 = vpow2.f32 %v955_v5  ;;  %v957_v42 = vmul.f32 1.442695, %v887_v6  ;;  %v888_v9 = vsub.f32 %v7911_v15, %v712_v41 }
 0x16b   :  { %v8151_v25 = vpop.eup %6471  ;;  %v715_v26 = vpop.xlane.xlu0 %714 }
 0x16c   :  { %6483 = vpow2.f32 %v957_v42  ;;  %v959_v12 = vmul.f32 1.442695, %v888_v9  ;;  %v889_v57 = vsub.f32 %v7921_v20, %v715_v26  ;;  %v1076_v10 = vsel %vm688_vm1, %v8151_v25, 0.0 }
 0x16d   :  { %v718_v17 = vpop.xlane.xlu1 %717  ;;  %1077 = vadd.xlane.f32.xlu1 %v1076_v10 }
 0x16e   :  { %6485 = vpow2.f32 %v959_v12  ;;  %v961_v50 = vmul.f32 1.442695, %v889_v57  ;;  %v890_v16 = vsub.f32 %v7919_v19, %v718_v17 }
 0x16f   :  { %v8157_v33 = vpop.eup %6473  ;;  %v721_v34 = vpop.xlane.xlu0 %720 }
 0x170   :  { %v8159_v15 = vpop.eup %6475  ;;  %6487 = vpow2.f32 %v961_v50  ;;  %v963_v1 = vmul.f32 1.442695, %v890_v16  ;;  %v891_v2 = vsub.f32 %v7929_v24, %v721_v34  ;;  %v1073_v20 = vsel %vm688_vm1, %v8157_v33, 0.0 }
 0x171   :  { %v724_v3 = vpop.xlane.xlu1 %723  ;;  %v1082_v18 = vsel %vm688_vm1, %v8159_v15, 0.0  ;;  %1074 = vadd.xlane.f32.xlu0 %v1073_v20 }
 0x172   :  { %6489 = vpow2.f32 %v963_v1  ;;  %v965_v58 = vmul.f32 1.442695, %v891_v2  ;;  %v892_v19 = vsub.f32 %v7927_v23, %v724_v3  ;;  %1083 = vadd.xlane.f32.xlu1 %v1082_v18 }
 0x173   :  { %v8167_v49 = vpop.eup %6477  ;;  %v727_v5 = vpop.xlane.xlu0 %726 }
 0x174   :  { %6491 = vpow2.f32 %v965_v58  ;;  %v967_v6 = vmul.f32 1.442695, %v892_v19  ;;  %v893_v24 = vsub.f32 %v7937_v28, %v727_v5  ;;  %v1079_v41 = vsel %vm688_vm1, %v8167_v49, 0.0 }
 0x175   :  { %v8172_v42 = vpop.eup %6479  ;;  %v730_v9 = vpop.xlane.xlu1 %729  ;;  %1080 = vadd.xlane.f32.xlu0 %v1079_v41 }
 0x176   :  { %6493 = vpow2.f32 %v967_v6  ;;  %v969_v26 = vmul.f32 1.442695, %v893_v24  ;;  %v894_v12 = vsub.f32 %v7935_v27, %v730_v9  ;;  %v1085_v10 = vsel %vm688_vm1, %v8172_v42, 0.0 }
 0x177   :  { %v8175_v23 = vpop.eup %6481  ;;  %v733_v57 = vpop.xlane.xlu0 %732 }
 0x178   :  { %6495 = vpow2.f32 %v969_v26  ;;  %v971_v17 = vmul.f32 1.442695, %v894_v12  ;;  %v895_v28 = vsub.f32 %v7945_v32, %v733_v57  ;;  %v1088_v50 = vsel %vm688_vm1, %v8175_v23, 0.0 }
 0x179   :  { %v8182_v16 = vpop.eup %6483  ;;  %v736_v34 = vpop.xlane.xlu1 %735  ;;  %1089 = vadd.xlane.f32.xlu1 %v1088_v50  ;;  %1086 = vadd.xlane.f32.xlu0 %v1085_v10 }
 0x17a   :  { %6497 = vpow2.f32 %v971_v17  ;;  %v973_v27 = vmul.f32 1.442695, %v895_v28  ;;  %v896_v1 = vsub.f32 %v7943_v31, %v736_v34  ;;  %v1091_v3 = vsel %vm688_vm1, %v8182_v16, 0.0 }
 0x17b   :  { %v8185_v2 = vpop.eup %6485  ;;  %v739_v20 = vpop.xlane.xlu0 %738 }
 0x17c   :  { %6499 = vpow2.f32 %v973_v27  ;;  %v975_v32 = vmul.f32 1.442695, %v896_v1  ;;  %v897_v18 = vsub.f32 %v7953_v36, %v739_v20  ;;  %v1094_v58 = vsel %vm688_vm1, %v8185_v2, 0.0 }
 0x17d   :  { %v8192_v19 = vpop.eup %6487  ;;  %v742_v5 = vpop.xlane.xlu1 %741  ;;  %1095 = vadd.xlane.f32.xlu1 %v1094_v58  ;;  %1092 = vadd.xlane.f32.xlu0 %v1091_v3 }
 0x17e   :  { %6501 = vpow2.f32 %v975_v32  ;;  %v977_v31 = vmul.f32 1.442695, %v897_v18  ;;  %v898_v6 = vsub.f32 %v7951_v35, %v742_v5  ;;  %v1097_v9 = vsel %vm688_vm1, %v8192_v19, 0.0 }
 0x17f   :  { %v8195_v24 = vpop.eup %6489  ;;  %v745_v41 = vpop.xlane.xlu0 %744 }
 0x180   :  { %6503 = vpow2.f32 %v977_v31  ;;  %v979_v36 = vmul.f32 1.442695, %v898_v6  ;;  %v899_v26 = vsub.f32 %v7961_v40, %v745_v41  ;;  %v1100_v12 = vsel %vm688_vm1, %v8195_v24, 0.0 }
 0x181   :  { %v8202_v57 = vpop.eup %6491  ;;  %v748_v10 = vpop.xlane.xlu1 %747  ;;  %1101 = vadd.xlane.f32.xlu1 %v1100_v12  ;;  %1098 = vadd.xlane.f32.xlu0 %v1097_v9 }
 0x182   :  { %6505 = vpow2.f32 %v979_v36  ;;  %v981_v35 = vmul.f32 1.442695, %v899_v26  ;;  %v900_v17 = vsub.f32 %v7959_v39, %v748_v10  ;;  %v1103_v34 = vsel %vm688_vm1, %v8202_v57, 0.0 }
 0x183   :  { %v8205_v28 = vpop.eup %6493  ;;  %v751_v50 = vpop.xlane.xlu0 %750 }
 0x184   :  { %6507 = vpow2.f32 %v981_v35  ;;  %v983_v40 = vmul.f32 1.442695, %v900_v17  ;;  %v901_v27 = vsub.f32 %v7969_v44, %v751_v50  ;;  %v1106_v1 = vsel %vm688_vm1, %v8205_v28, 0.0 }
 0x185   :  { %v8212_v20 = vpop.eup %6495  ;;  %v754_v3 = vpop.xlane.xlu1 %753  ;;  %1107 = vadd.xlane.f32.xlu1 %v1106_v1  ;;  %1104 = vadd.xlane.f32.xlu0 %v1103_v34 }
 0x186   :  { %6509 = vpow2.f32 %v983_v40  ;;  %v985_v39 = vmul.f32 1.442695, %v901_v27  ;;  %v902_v32 = vsub.f32 %v7967_v43, %v754_v3  ;;  %v1109_v5 = vsel %vm688_vm1, %v8212_v20, 0.0 }
 0x187   :  { %v8215_v18 = vpop.eup %6497  ;;  %v757_v58 = vpop.xlane.xlu0 %756 }
 0x188   :  { %6511 = vpow2.f32 %v985_v39  ;;  %v987_v44 = vmul.f32 1.442695, %v902_v32  ;;  %v903_v31 = vsub.f32 %v7977_v48, %v757_v58  ;;  %v1112_v6 = vsel %vm688_vm1, %v8215_v18, 0.0 }
 0x189   :  { %v8222_v41 = vpop.eup %6499  ;;  %v760_v9 = vpop.xlane.xlu1 %759  ;;  %1113 = vadd.xlane.f32.xlu1 %v1112_v6  ;;  %1110 = vadd.xlane.f32.xlu0 %v1109_v5 }
 0x18a   :  { %6513 = vpow2.f32 %v987_v44  ;;  %v989_v43 = vmul.f32 1.442695, %v903_v31  ;;  %v904_v36 = vsub.f32 %v7975_v47, %v760_v9  ;;  %v1115_v10 = vsel %vm688_vm1, %v8222_v41, 0.0 }
 0x18b   :  { %v8225_v26 = vpop.eup %6501  ;;  %v763_v12 = vpop.xlane.xlu0 %762 }
 0x18c   :  { %6515 = vpow2.f32 %v989_v43  ;;  %v991_v48 = vmul.f32 1.442695, %v904_v36  ;;  %v905_v35 = vsub.f32 %v7985_v52, %v763_v12  ;;  %v1118_v17 = vsel %vm688_vm1, %v8225_v26, 0.0 }
 0x18d   :  { %v8232_v50 = vpop.eup %6503  ;;  %v766_v34 = vpop.xlane.xlu1 %765  ;;  %1119 = vadd.xlane.f32.xlu1 %v1118_v17  ;;  %1116 = vadd.xlane.f32.xlu0 %v1115_v10 }
 0x18e   :  { %6517 = vpow2.f32 %v991_v48  ;;  %v993_v47 = vmul.f32 1.442695, %v905_v35  ;;  %v906_v40 = vsub.f32 %v7983_v51, %v766_v34  ;;  %v1121_v3 = vsel %vm688_vm1, %v8232_v50, 0.0 }
 0x18f   :  { %v8235_v27 = vpop.eup %6505  ;;  %v769_v1 = vpop.xlane.xlu0 %768 }
 0x190   :  { %6519 = vpow2.f32 %v993_v47  ;;  %v995_v52 = vmul.f32 1.442695, %v906_v40  ;;  %v907_v39 = vsub.f32 %v7993_v56, %v769_v1  ;;  %v1124_v32 = vsel %vm688_vm1, %v8235_v27, 0.0 }
 0x191   :  { %v8242_v58 = vpop.eup %6507  ;;  %v772_v5 = vpop.xlane.xlu1 %771  ;;  %1125 = vadd.xlane.f32.xlu1 %v1124_v32  ;;  %1122 = vadd.xlane.f32.xlu0 %v1121_v3 }
 0x192   :  { %6521 = vpow2.f32 %v995_v52  ;;  %v997_v51 = vmul.f32 1.442695, %v907_v39  ;;  %v908_v44 = vsub.f32 %v7991_v55, %v772_v5  ;;  %v1127_v9 = vsel %vm688_vm1, %v8242_v58, 0.0 }
 0x193   :  { %v8245_v31 = vpop.eup %6509  ;;  %v775_v6 = vpop.xlane.xlu0 %774 }
 0x194   :  { %6523 = vpow2.f32 %v997_v51  ;;  %v999_v56 = vmul.f32 1.442695, %v908_v44  ;;  %v909_v43 = vsub.f32 %v8001_v60, %v775_v6  ;;  %v1130_v36 = vsel %vm688_vm1, %v8245_v31, 0.0 }
 0x195   :  { %v8252_v12 = vpop.eup %6511  ;;  %v778_v10 = vpop.xlane.xlu1 %777  ;;  %1131 = vadd.xlane.f32.xlu1 %v1130_v36  ;;  %1128 = vadd.xlane.f32.xlu0 %v1127_v9 }
 0x196   :  { %6525 = vpow2.f32 %v999_v56  ;;  %v1001_v55 = vmul.f32 1.442695, %v909_v43  ;;  %v910_v48 = vsub.f32 %v7999_v59, %v778_v10  ;;  %v1133_v34 = vsel %vm688_vm1, %v8252_v12, 0.0 }
 0x197   :  { %v8255_v35 = vpop.eup %6513  ;;  %v781_v17 = vpop.xlane.xlu0 %780 }
 0x198   :  { %6527 = vpow2.f32 %v1001_v55  ;;  %v1003_v60 = vmul.f32 1.442695, %v910_v48  ;;  %v911_v47 = vsub.f32 %v8009_v0, %v781_v17  ;;  %v1136_v40 = vsel %vm688_vm1, %v8255_v35, 0.0 }
 0x199   :  { %v8262_v1 = vpop.eup %6515  ;;  %v784_v3 = vpop.xlane.xlu1 %783  ;;  %1137 = vadd.xlane.f32.xlu1 %v1136_v40  ;;  %1134 = vadd.xlane.f32.xlu0 %v1133_v34 }
 0x19a   :  { %6529 = vpow2.f32 %v1003_v60  ;;  %v1005_v59 = vmul.f32 1.442695, %v911_v47  ;;  %v912_v52 = vsub.f32 %v8007_v63, %v784_v3  ;;  %v1139_v5 = vsel %vm688_vm1, %v8262_v1, 0.0 }
 0x19b   :  { %v8265_v39 = vpop.eup %6517  ;;  %v787_v32 = vpop.xlane.xlu0 %786 }
 0x19c   :  { %6531 = vpow2.f32 %v1005_v59  ;;  %v1007_v0 = vmul.f32 1.442695, %v912_v52  ;;  %v913_v51 = vsub.f32 %v8017_v7, %v787_v32  ;;  %v1142_v44 = vsel %vm688_vm1, %v8265_v39, 0.0 }
 0x19d   :  { %v8272_v6 = vpop.eup %6519  ;;  %v790_v9 = vpop.xlane.xlu1 %789  ;;  %1143 = vadd.xlane.f32.xlu1 %v1142_v44  ;;  %1140 = vadd.xlane.f32.xlu0 %v1139_v5 }
 0x19e   :  { %6533 = vpow2.f32 %v1007_v0  ;;  %v1009_v63 = vmul.f32 1.442695, %v913_v51  ;;  %v914_v56 = vsub.f32 %v8015_v4, %v790_v9  ;;  %v1145_v10 = vsel %vm688_vm1, %v8272_v6, 0.0 }
 0x19f   :  { %v8275_v43 = vpop.eup %6521  ;;  %v793_v36 = vpop.xlane.xlu0 %792 }
 0x1a0   :  { %6535 = vpow2.f32 %v1009_v63  ;;  %v1011_v7 = vmul.f32 1.442695, %v914_v56  ;;  %v915_v55 = vsub.f32 %v8025_v14, %v793_v36  ;;  %v1148_v48 = vsel %vm688_vm1, %v8275_v43, 0.0 }
 0x1a1   :  { %v8282_v17 = vpop.eup %6523  ;;  %v796_v34 = vpop.xlane.xlu1 %795  ;;  %1149 = vadd.xlane.f32.xlu1 %v1148_v48  ;;  %1146 = vadd.xlane.f32.xlu0 %v1145_v10 }
 0x1a2   :  { %6537 = vpow2.f32 %v1011_v7  ;;  %v1013_v4 = vmul.f32 1.442695, %v915_v55  ;;  %v916_v60 = vsub.f32 %v8023_v13, %v796_v34  ;;  %v1151_v3 = vsel %vm688_vm1, %v8282_v17, 0.0 }
 0x1a3   :  { %v8285_v47 = vpop.eup %6525  ;;  %v799_v40 = vpop.xlane.xlu0 %798 }
 0x1a4   :  { %6539 = vpow2.f32 %v1013_v4  ;;  %v1015_v14 = vmul.f32 1.442695, %v916_v60  ;;  %v917_v59 = vsub.f32 %v8033_v22, %v799_v40  ;;  %v1154_v52 = vsel %vm688_vm1, %v8285_v47, 0.0 }
 0x1a5   :  { %v8292_v32 = vpop.eup %6527  ;;  %v802_v5 = vpop.xlane.xlu1 %801  ;;  %1155 = vadd.xlane.f32.xlu1 %v1154_v52  ;;  %1152 = vadd.xlane.f32.xlu0 %v1151_v3 }
 0x1a6   :  { %6541 = vpow2.f32 %v1015_v14  ;;  %v1017_v13 = vmul.f32 1.442695, %v917_v59  ;;  %v918_v0 = vsub.f32 %v8031_v21, %v802_v5  ;;  %v1157_v9 = vsel %vm688_vm1, %v8292_v32, 0.0 }
 0x1a7   :  { %v8295_v51 = vpop.eup %6529  ;;  %v805_v44 = vpop.xlane.xlu0 %804 }
 0x1a8   :  { %6543 = vpow2.f32 %v1017_v13  ;;  %v1019_v22 = vmul.f32 1.442695, %v918_v0  ;;  %v919_v63 = vsub.f32 %v8041_v30, %v805_v44  ;;  %v1160_v56 = vsel %vm688_vm1, %v8295_v51, 0.0 }
 0x1a9   :  { %v8302_v36 = vpop.eup %6531  ;;  %v808_v10 = vpop.xlane.xlu1 %807  ;;  %1161 = vadd.xlane.f32.xlu1 %v1160_v56  ;;  %1158 = vadd.xlane.f32.xlu0 %v1157_v9 }
 0x1aa   :  { %6545 = vpow2.f32 %v1019_v22  ;;  %v1021_v21 = vmul.f32 1.442695, %v919_v63  ;;  %v920_v7 = vsub.f32 %v8039_v29, %v808_v10  ;;  %v1163_v34 = vsel %vm688_vm1, %v8302_v36, 0.0 }
 0x1ab   :  { %v8305_v55 = vpop.eup %6533  ;;  %v811_v48 = vpop.xlane.xlu0 %810 }
 0x1ac   :  { %6547 = vpow2.f32 %v1021_v21  ;;  %v1023_v30 = vmul.f32 1.442695, %v920_v7  ;;  %v921_v4 = vsub.f32 %v8049_v38, %v811_v48  ;;  %v1166_v60 = vsel %vm688_vm1, %v8305_v55, 0.0 }
 0x1ad   :  { %v8312_v40 = vpop.eup %6535  ;;  %v814_v3 = vpop.xlane.xlu1 %813  ;;  %1167 = vadd.xlane.f32.xlu1 %v1166_v60  ;;  %1164 = vadd.xlane.f32.xlu0 %v1163_v34 }
 0x1ae   :  { %6549 = vpow2.f32 %v1023_v30  ;;  %v1025_v29 = vmul.f32 1.442695, %v921_v4  ;;  %v922_v14 = vsub.f32 %v8047_v37, %v814_v3  ;;  %v1169_v5 = vsel %vm688_vm1, %v8312_v40, 0.0 }
 0x1af   :  { %v8315_v59 = vpop.eup %6537  ;;  %v817_v52 = vpop.xlane.xlu0 %816 }
 0x1b0   :  { %6551 = vpow2.f32 %v1025_v29  ;;  %v1027_v38 = vmul.f32 1.442695, %v922_v14  ;;  %v923_v13 = vsub.f32 %v8057_v46, %v817_v52  ;;  %v1172_v0 = vsel %vm688_vm1, %v8315_v59, 0.0 }
 0x1b1   :  { %v8322_v44 = vpop.eup %6539  ;;  %v820_v9 = vpop.xlane.xlu1 %819  ;;  %1173 = vadd.xlane.f32.xlu1 %v1172_v0  ;;  %1170 = vadd.xlane.f32.xlu0 %v1169_v5 }
 0x1b2   :  { %6553 = vpow2.f32 %v1027_v38  ;;  %v1029_v37 = vmul.f32 1.442695, %v923_v13  ;;  %v924_v22 = vsub.f32 %v8055_v45, %v820_v9  ;;  %v1175_v10 = vsel %vm688_vm1, %v8322_v44, 0.0 }
 0x1b3   :  { %v8325_v63 = vpop.eup %6541  ;;  %v823_v56 = vpop.xlane.xlu0 %822 }
 0x1b4   :  { %6555 = vpow2.f32 %v1029_v37  ;;  %v1031_v46 = vmul.f32 1.442695, %v924_v22  ;;  %v925_v21 = vsub.f32 %v8065_v54, %v823_v56  ;;  %v1178_v7 = vsel %vm688_vm1, %v8325_v63, 0.0 }
 0x1b5   :  { %v8332_v48 = vpop.eup %6543  ;;  %v826_v34 = vpop.xlane.xlu1 %825  ;;  %1179 = vadd.xlane.f32.xlu1 %v1178_v7  ;;  %1176 = vadd.xlane.f32.xlu0 %v1175_v10 }
 0x1b6   :  { %12041 = vst [vmem:[#allocation19_spill] sm:$0xff] %v8332_v48  ;;  %6557 = vpow2.f32 %v1031_v46  ;;  %v1033_v45 = vmul.f32 1.442695, %v925_v21  ;;  %v926_v30 = vsub.f32 %v8063_v53, %v826_v34  ;;  %v1181_v3 = vsel %vm688_vm1, %v8332_v48, 0.0 }
 0x1b7   :  { %v8335_v4 = vpop.eup %6545  ;;  %v829_v60 = vpop.xlane.xlu0 %828 }
 0x1b8   :  { %6559 = vpow2.f32 %v1033_v45  ;;  %v1035_v54 = vmul.f32 1.442695, %v926_v30  ;;  %v927_v29 = vsub.f32 %v8073_v62, %v829_v60  ;;  %v1184_v14 = vsel %vm688_vm1, %v8335_v4, 0.0  ;;  %v12044_v45 = vld [vmem:[#allocation6_spill] sm:$0xff] }
 0x1b9   :  { %v8342_v52 = vpop.eup %6547  ;;  %v832_v5 = vpop.xlane.xlu1 %831  ;;  %1185 = vadd.xlane.f32.xlu1 %v1184_v14  ;;  %1182 = vadd.xlane.f32.xlu0 %v1181_v3 }
 0x1ba   :  { %12042 = vst [vmem:[#allocation20_spill] sm:$0xff] %v8342_v52  ;;  %6561 = vpow2.f32 %v1035_v54  ;;  %v1037_v53 = vmul.f32 1.442695, %v927_v29  ;;  %v928_v38 = vsub.f32 %v8071_v61, %v832_v5  ;;  %v1187_v9 = vsel %vm688_vm1, %v8342_v52, 0.0  ;;  %v12046_v29 = vld [vmem:[#allocation5_spill] sm:$0xff] }
 0x1bb   :  { %v8345_v13 = vpop.eup %6549  ;;  %v835_v0 = vpop.xlane.xlu0 %834 }
 0x1bc   :  { %6563 = vpow2.f32 %v1037_v53  ;;  %v1039_v62 = vmul.f32 1.442695, %v928_v38  ;;  %v929_v37 = vsub.f32 %v8081_v11, %v835_v0  ;;  %v1190_v22 = vsel %vm688_vm1, %v8345_v13, 0.0 }
 0x1bd   :  { %v8352_v56 = vpop.eup %6551  ;;  %v838_v10 = vpop.xlane.xlu1 %837  ;;  %1191 = vadd.xlane.f32.xlu1 %v1190_v22  ;;  %1188 = vadd.xlane.f32.xlu0 %v1187_v9  ;;  %v12048_v9 = vld [vmem:[#allocation8_spill] sm:$0xff] }
 0x1be   :  { %12043 = vst [vmem:[#allocation21_spill] sm:$0xff] %v8352_v56  ;;  %6565 = vpow2.f32 %v1039_v62  ;;  %v1041_v61 = vmul.f32 1.442695, %v929_v37  ;;  %v930_v46 = vsub.f32 %v8079_v8, %v838_v10  ;;  %v1193_v34 = vsel %vm688_vm1, %v8352_v56, 0.0 }
 0x1bf   :  { %v8355_v21 = vpop.eup %6553  ;;  %v841_v7 = vpop.xlane.xlu0 %840 }
 0x1c0   :  { %6567 = vpow2.f32 %v1041_v61  ;;  %v1043_v11 = vmul.f32 1.442695, %v930_v46  ;;  %v931_v30 = vsub.f32 %v12044_v45, %v841_v7  ;;  %v1196_v60 = vsel %vm688_vm1, %v8355_v21, 0.0  ;;  %v12050_v46 = vld [vmem:[#allocation7_spill] sm:$0xff] }
 0x1c1   :  { %v8362_v3 = vpop.eup %6555  ;;  %v844_v54 = vpop.xlane.xlu1 %843  ;;  %1197 = vadd.xlane.f32.xlu1 %v1196_v60  ;;  %1194 = vadd.xlane.f32.xlu0 %v1193_v34  ;;  %v12052_v60 = vld [vmem:[#allocation10_spill] sm:$0xff] }
 0x1c2   :  { %12045 = vst [vmem:[#allocation6_spill] sm:$0xff] %v8362_v3  ;;  %6569 = vpow2.f32 %v1043_v11  ;;  %v1045_v8 = vmul.f32 1.442695, %v931_v30  ;;  %v932_v14 = vsub.f32 %v12046_v29, %v844_v54  ;;  %v1199_v38 = vsel %vm688_vm1, %v8362_v3, 0.0 }
 0x1c3   :  { %v8365_v5 = vpop.eup %6557  ;;  %v847_v53 = vpop.xlane.xlu0 %846 }
 0x1c4   :  { %12047 = vst [vmem:[#allocation5_spill] sm:$0xff] %v8365_v5  ;;  %6571 = vpow2.f32 %v1045_v8  ;;  %v1047_v0 = vmul.f32 1.442695, %v932_v14  ;;  %v933_v62 = vsub.f32 %v12048_v9, %v847_v53  ;;  %v1202_v37 = vsel %vm688_vm1, %v8365_v5, 0.0 }
 0x1c5   :  { %v8372_v22 = vpop.eup %6559  ;;  %v850_v10 = vpop.xlane.xlu1 %849  ;;  %1203 = vadd.xlane.f32.xlu1 %v1202_v37  ;;  %1200 = vadd.xlane.f32.xlu0 %v1199_v38  ;;  %v12054_v38 = vld [vmem:[#allocation9_spill] sm:$0xff] }
 0x1c6   :  { %12049 = vst [vmem:[#allocation8_spill] sm:$0xff] %v8372_v22  ;;  %6573 = vpow2.f32 %v1047_v0  ;;  %v1049_v61 = vmul.f32 1.442695, %v933_v62  ;;  %v934_v7 = vsub.f32 %v12050_v46, %v850_v10  ;;  %v1205_v45 = vsel %vm688_vm1, %v8372_v22, 0.0 }
 0x1c7   :  { %v8375_v34 = vpop.eup %6561  ;;  %v853_v11 = vpop.xlane.xlu0 %852 }
 0x1c8   :  { %12051 = vst [vmem:[#allocation7_spill] sm:$0xff] %v8375_v34  ;;  %6575 = vpow2.f32 %v1049_v61  ;;  %v1051_v30 = vmul.f32 1.442695, %v934_v7  ;;  %v935_v54 = vsub.f32 %v12052_v60, %v853_v11  ;;  %v1208_v8 = vsel %vm688_vm1, %v8375_v34, 0.0  ;;  %v12056_v61 = vld [vmem:[#allocation12_spill] sm:$0xff] }
 0x1c9   :  { %v8382_v29 = vpop.eup %6563  ;;  %v856_v14 = vpop.xlane.xlu1 %855  ;;  %1209 = vadd.xlane.f32.xlu1 %v1208_v8  ;;  %1206 = vadd.xlane.f32.xlu0 %v1205_v45 }
 0x1ca   :  { %12053 = vst [vmem:[#allocation10_spill] sm:$0xff] %v8382_v29  ;;  %6577 = vpow2.f32 %v1051_v30  ;;  %v1053_v53 = vmul.f32 1.442695, %v935_v54  ;;  %v936_v0 = vsub.f32 %v12054_v38, %v856_v14  ;;  %v1211_v37 = vsel %vm688_vm1, %v8382_v29, 0.0  ;;  %v12058_v30 = vld [vmem:[#allocation11_spill] sm:$0xff] }
 0x1cb   :  { %v8385_v9 = vpop.eup %6565  ;;  %v859_v62 = vpop.xlane.xlu0 %858 }
 0x1cc   :  { %12055 = vst [vmem:[#allocation9_spill] sm:$0xff] %v8385_v9  ;;  %6579 = vpow2.f32 %v1053_v53  ;;  %v1055_v10 = vmul.f32 1.442695, %v936_v0  ;;  %v937_v46 = vsub.f32 %v12056_v61, %v859_v62  ;;  %v1214_v7 = vsel %vm688_vm1, %v8385_v9, 0.0 }
 0x1cd   :  { %v8392_v11 = vpop.eup %6567  ;;  %v862_v45 = vpop.xlane.xlu1 %861  ;;  %1215 = vadd.xlane.f32.xlu1 %v1214_v7  ;;  %1212 = vadd.xlane.f32.xlu0 %v1211_v37  ;;  %v12061_v37 = vld [vmem:[#allocation13_spill] sm:$0xff] }
 0x1ce   :  { %12057 = vst [vmem:[#allocation12_spill] sm:$0xff] %v8392_v11  ;;  %6581 = vpow2.f32 %v1055_v10  ;;  %v938_v60 = vsub.f32 %v12058_v30, %v862_v45  ;;  %v1057_v8 = vmul.f32 1.442695, %v937_v46  ;;  %v1217_v0 = vsel %vm688_vm1, %v8392_v11, 0.0  ;;  %v12063_v45 = vld [vmem:[#allocation14_spill] sm:$0xff] }
 0x1cf   :  { %v8395_v54 = vpop.eup %6569  ;;  %v865_v38 = vpop.xlane.xlu0 %864 }
 0x1d0   :  { %12059 = vst [vmem:[#allocation11_spill] sm:$0xff] %v8395_v54  ;;  %v1059_v14 = vmul.f32 1.442695, %v938_v60  ;;  %v1220_v53 = vsel %vm688_vm1, %v8395_v54, 0.0  ;;  %v939_v46 = vsub.f32 %v12063_v45, %v865_v38 }
 0x1d1   :  { %v8401_v62 = vpop.eup %6571  ;;  %v868_v61 = vpop.xlane.xlu1 %867  ;;  %1221 = vadd.xlane.f32.xlu1 %v1220_v53  ;;  %1218 = vadd.xlane.f32.xlu0 %v1217_v0  ;;  %v12066_v0 = vld [vmem:[#allocation15_spill] sm:$0xff] }
 0x1d2   :  { %12060 = vst [vmem:[#allocation22_spill] sm:$0xff] %v8401_v62  ;;  %6583 = vpow2.f32 %v1059_v14  ;;  %v940_v10 = vsub.f32 %v12061_v37, %v868_v61  ;;  %v1223_v11 = vsel %vm688_vm1, %v8401_v62, 0.0  ;;  %v1061_v53 = vmul.f32 1.442695, %v939_v46 }
 0x1d3   :  { %v8404_v7 = vpop.eup %6573  ;;  %6585 = vpow2.f32 %v1057_v8 }
 0x1d4   :  { %12062 = vst [vmem:[#allocation13_spill] sm:$0xff] %v8404_v7  ;;  %v1063_v30 = vmul.f32 1.442695, %v940_v10  ;;  %v1226_v60 = vsel %vm688_vm1, %v8404_v7, 0.0  ;;  %v871_v10 = vpop.xlane.xlu0 %870 }
 0x1d5   :  { %v8411_v29 = vpop.eup %6575  ;;  %v874_v22 = vpop.xlane.xlu1 %873  ;;  %1227 = vadd.xlane.f32.xlu1 %v1226_v60  ;;  %1224 = vadd.xlane.f32.xlu0 %v1223_v11  ;;  %v12069_v11 = vld [vmem:[#allocation16_spill] sm:$0xff] }
 0x1d6   :  { %12064 = vst [vmem:[#allocation14_spill] sm:$0xff] %v8411_v29  ;;  %6587 = vpow2.f32 %v1063_v30  ;;  %v942_v61 = vsub.f32 %v12066_v0, %v874_v22  ;;  %v1229_v38 = vsel %vm688_vm1, %v8411_v29, 0.0  ;;  %v941_v60 = vsub.f32 %v12069_v11, %v871_v10  ;;  %v12073_v11 = vld [vmem:[#allocation18_spill] sm:$0xff] }
 0x1d7   :  { %v8413_v14 = vpop.eup %6577  ;;  %6589 = vpow2.f32 %v1061_v53 }
 0x1d8   :  { %12065 = vst [vmem:[#allocation23_spill] sm:$0xff] %v8413_v14  ;;  %v1232_v8 = vsel %vm688_vm1, %v8413_v14, 0.0  ;;  %v1067_v46 = vmul.f32 1.442695, %v942_v61  ;;  %v1065_v62 = vmul.f32 1.442695, %v941_v60  ;;  %v877_v61 = vpop.xlane.xlu0 %876 }
 0x1d9   :  { %v8420_v37 = vpop.eup %6579  ;;  %1233 = vadd.xlane.f32.xlu1 %v1232_v8  ;;  %1230 = vadd.xlane.f32.xlu0 %v1229_v38  ;;  %v880_v0 = vpop.xlane.xlu1 %879  ;;  %v12071_v8 = vld [vmem:[#allocation17_spill] sm:$0xff] }
 0x1da   :  { %12067 = vst [vmem:[#allocation15_spill] sm:$0xff] %v8420_v37  ;;  %v1235_v30 = vsel %vm688_vm1, %v8420_v37, 0.0  ;;  %6591 = vpow2.f32 %v1067_v46  ;;  %v944_v38 = vsub.f32 %v12071_v8, %v880_v0 }
 0x1db   :  { %v8422_v45 = vpop.eup %6581  ;;  %6593 = vpow2.f32 %v1065_v62 }
 0x1dc   :  { %12068 = vst [vmem:[#allocation24_spill] sm:$0xff] %v8422_v45  ;;  %v1238_v22 = vsel %vm688_vm1, %v8422_v45, 0.0  ;;  %v943_v45 = vsub.f32 %v12073_v11, %v877_v61  ;;  %v1071_v37 = vmul.f32 1.442695, %v944_v38 }
 0x1dd   :  { %1239 = vadd.xlane.f32.xlu1 %v1238_v22  ;;  %1236 = vadd.xlane.f32.xlu0 %v1235_v30 }
 0x1de   :  { %v1069_v46 = vmul.f32 1.442695, %v943_v45  ;;  %6595 = vpow2.f32 %v1071_v37 }
 0x1df   :  { %v8429_v29 = vpop.eup %6583 }
 0x1e0   :  { %12070 = vst [vmem:[#allocation16_spill] sm:$0xff] %v8429_v29  ;;  %v1244_v53 = vsel %vm688_vm1, %v8429_v29, 0.0  ;;  %v8434_v10 = vpop.eup %6585  ;;  %6597 = vpow2.f32 %v1069_v46 }
 0x1e1   :  { %12072 = vst [vmem:[#allocation17_spill] sm:$0xff] %v8434_v10  ;;  %1245 = vadd.xlane.f32.xlu1 %v1244_v53  ;;  %v1241_v22 = vsel %vm688_vm1, %v8434_v10, 0.0 }
 0x1e3   :  { %v8439_v30 = vpop.eup %6587 }
 0x1e4   :  { %12074 = vst [vmem:[#allocation18_spill] sm:$0xff] %v8439_v30  ;;  %v8441_v60 = vpop.eup %6589  ;;  %v1250_v0 = vsel %vm688_vm1, %v8439_v30, 0.0 }
 0x1e5   :  { %1242 = vadd.xlane.f32.xlu1 %v1241_v22  ;;  %12075 = vst [vmem:[#allocation25_spill] sm:$0xff] %v8441_v60  ;;  %v1247_v62 = vsel %vm688_vm1, %v8441_v60, 0.0 }
 0x1e7   :  { %v8447_v8 = vpop.eup %6591 }
 0x1e8   :  { %12076 = vst [vmem:[#allocation26_spill] sm:$0xff] %v8447_v8  ;;  %v1256_v38 = vsel %vm688_vm1, %v8447_v8, 0.0  ;;  %v8451_v53 = vpop.eup %6593 }
 0x1e9   :  { %1251 = vadd.xlane.f32.xlu1 %v1250_v0  ;;  %12077 = vst [vmem:[#allocation27_spill] sm:$0xff] %v8451_v53  ;;  %v1253_v37 = vsel %vm688_vm1, %v8451_v53, 0.0 }
 0x1eb   :  { %v8455_v45 = vpop.eup %6595 }
 0x1ec   :  { %12078 = vst [vmem:[#allocation28_spill] sm:$0xff] %v8455_v45  ;;  %v1262_v11 = vsel %vm688_vm1, %v8455_v45, 0.0 }
 0x1ed   :  { %1248 = vadd.xlane.f32.xlu1 %v1247_v62  ;;  %v8459_v22 = vpop.eup %6597 }
 0x1ee   :  { %12079 = vst [vmem:[#allocation29_spill] sm:$0xff] %v8459_v22  ;;  %v1259_v62 = vsel %vm688_vm1, %v8459_v22, 0.0 }
 0x1f1   :  { %1257 = vadd.xlane.f32.xlu1 %v1256_v38 }
 0x1f5   :  { %1254 = vadd.xlane.f32.xlu1 %v1253_v37 }
 0x1f6   :  { %v1078_v61 = vpop.xlane.xlu1 %1077 }
 0x1f7   :  { %6599 = vrcp.f32 %v1078_v61 }
 0x1f9   :  { %1263 = vadd.xlane.f32.xlu1 %v1262_v11 }
 0x1fa   :  { %v1075_v46 = vpop.xlane.xlu0 %1074 }
 0x1fb   :  { %v1084_v0 = vpop.xlane.xlu1 %1083  ;;  %6601 = vrcp.f32 %v1075_v46 }
 0x1fc   :  { %6603 = vrcp.f32 %v1084_v0 }
 0x1fd   :  { %1260 = vadd.xlane.f32.xlu1 %v1259_v62 }
 0x1fe   :  { %v1081_v38 = vpop.xlane.xlu0 %1080 }
 0x1ff   :  { %6605 = vrcp.f32 %v1081_v38 }
 0x202   :  { %v1090_v53 = vpop.xlane.xlu1 %1089  ;;  %v1087_v37 = vpop.xlane.xlu0 %1086 }
 0x203   :  { %6607 = vrcp.f32 %v1090_v53 }
 0x204   :  { %v6600_v61 = vpop.eup %6599  ;;  %6609 = vrcp.f32 %v1087_v37 }
 0x205   :  { %v1330_v45 = vmul.f32 %v6600_v61, %v8151_v25 }
 0x206   :  { %v1096_v60 = vpop.xlane.xlu1 %1095  ;;  %v1093_v8 = vpop.xlane.xlu0 %1092 }
 0x207   :  { %6611 = vrcp.f32 %v1096_v60  ;;  %v5443_v11 = vadd.f32 -0.0025, %v1330_v45 }
 0x208   :  { %v6602_v10 = vpop.eup %6601  ;;  %6613 = vrcp.f32 %v1093_v8 }
 0x209   :  { %v6604_v46 = vpop.eup %6603  ;;  %v1586_v0 = vand.u32 2147483647, %v5443_v11  ;;  %v8465_v22 = vmul.f32 %v6602_v10, %v8157_v33  ;;  %v1458_v3 = vmax.f32 %v5443_v11, 0.0 }
 0x20a   :  { %v1102_v62 = vpop.xlane.xlu1 %1101  ;;  %v1099_v38 = vpop.xlane.xlu0 %1098  ;;  %v8468_v30 = vmul.f32 %v6604_v46, %v8159_v15 }
 0x20b   :  { %6615 = vrcp.f32 %v1102_v62  ;;  %v1650_v53 = vadd.f32 1e-12, %v1586_v0  ;;  %v8471_v25 = vadd.f32 -0.0025, %v8465_v22 }
 0x20c   :  { %v6606_v37 = vpop.eup %6605  ;;  %6617 = vrcp.f32 %v1099_v38  ;;  %v8474_v60 = vadd.f32 -0.0025, %v8468_v30 }
 0x20d   :  { %6619 = vrcp.f32 %v1650_v53  ;;  %v1585_v8 = vand.u32 2147483647, %v8471_v25  ;;  %v8478_v33 = vmul.f32 %v6606_v37, %v8167_v49 }
 0x20e   :  { %v1108_v10 = vpop.xlane.xlu1 %1107  ;;  %v1105_v61 = vpop.xlane.xlu0 %1104  ;;  %v1588_v15 = vand.u32 2147483647, %v8474_v60 }
 0x20f   :  { %6621 = vrcp.f32 %v1108_v10  ;;  %v1649_v46 = vadd.f32 1e-12, %v1585_v8  ;;  %v8482_v0 = vadd.f32 -0.0025, %v8478_v33 }
 0x210   :  { %v6608_v62 = vpop.eup %6607  ;;  %v1652_v38 = vadd.f32 1e-12, %v1588_v15 }
 0x211   :  { %v6610_v29 = vpop.eup %6609  ;;  %6623 = vrcp.f32 %v1649_v46  ;;  %v1587_v53 = vand.u32 2147483647, %v8482_v0  ;;  %v1334_v14 = vmul.f32 %v6608_v62, %v8175_v23 }
 0x212   :  { %v1114_v7 = vpop.xlane.xlu1 %1113  ;;  %v1111_v49 = vpop.xlane.xlu0 %1110  ;;  %6625 = vrcp.f32 %v1652_v38  ;;  %v1333_v37 = vmul.f32 %v6610_v29, %v8172_v42  ;;  %v1522_v42 = vmul.f32 %v1458_v3, %v1330_v45 }
 0x213   :  { %6627 = vrcp.f32 %v1114_v7  ;;  %v1651_v10 = vadd.f32 1e-12, %v1587_v53  ;;  %v5447_v8 = vadd.f32 -0.0025, %v1334_v14 }
 0x214   :  { %v6612_v54 = vpop.eup %6611  ;;  %6629 = vrcp.f32 %v1105_v61  ;;  %v5446_v56 = vadd.f32 -0.0025, %v1333_v37  ;;  %v1457_v61 = vmax.f32 %v8471_v25, 0.0 }
 0x215   :  { %v6614_v9 = vpop.eup %6613  ;;  %6631 = vrcp.f32 %v1651_v10  ;;  %v1590_v15 = vand.u32 2147483647, %v5447_v8  ;;  %v8488_v46 = vmul.f32 %v6612_v54, %v8185_v2  ;;  %v1460_v10 = vmax.f32 %v8474_v60, 0.0 }
 0x216   :  { %v1120_v52 = vpop.xlane.xlu1 %1119  ;;  %v1117_v23 = vpop.xlane.xlu0 %1116  ;;  %v1589_v62 = vand.u32 2147483647, %v5446_v56  ;;  %v8491_v38 = vmul.f32 %v6614_v9, %v8182_v16 }
 0x217   :  { %6633 = vrcp.f32 %v1120_v52  ;;  %v1654_v29 = vadd.f32 1e-12, %v1590_v15  ;;  %v8494_v7 = vadd.f32 -0.0025, %v8488_v46  ;;  %v1462_v15 = vmax.f32 %v5447_v8, 0.0 }
 0x218   :  { %v6616_v11 = vpop.eup %6615  ;;  %6635 = vrcp.f32 %v1111_v49  ;;  %v1653_v53 = vadd.f32 1e-12, %v1589_v62  ;;  %v8498_v2 = vadd.f32 -0.0025, %v8491_v38  ;;  %v1459_v49 = vmax.f32 %v8482_v0, 0.0 }
 0x219   :  { %v6618_v54 = vpop.eup %6617  ;;  %6637 = vrcp.f32 %v1654_v29  ;;  %v8502_v16 = vmul.f32 %v6616_v11, %v8195_v24  ;;  %v1592_v52 = vand.u32 2147483647, %v8494_v7  ;;  %v1461_v29 = vmax.f32 %v5446_v56, 0.0 }
 0x21a   :  { %v6620_v3 = vpop.eup %6619  ;;  %v1126_v9 = vpop.xlane.xlu1 %1125  ;;  %6639 = vrcp.f32 %v1653_v53  ;;  %v1591_v25 = vand.u32 2147483647, %v8498_v2  ;;  %v1521_v11 = vmul.f32 %v1457_v61, %v8465_v22  ;;  %v8514_v48 = vmul.f32 %v6618_v54, %v8192_v19 }
 0x21b   :  { %v1123_v45 = vpop.xlane.xlu0 %1122  ;;  %6641 = vrcp.f32 %v1126_v9  ;;  %v8507_v62 = vmul.f32 %v6620_v3, %v1522_v42  ;;  %v8510_v60 = vadd.f32 -0.0025, %v8502_v16  ;;  %v1656_v34 = vadd.f32 1e-12, %v1592_v52 }
 0x21c   :  { %v6622_v24 = vpop.eup %6621  ;;  %6643 = vrcp.f32 %v1117_v23  ;;  %v1655_v42 = vadd.f32 1e-12, %v1591_v25  ;;  %v1524_v56 = vmul.f32 %v1460_v10, %v8468_v30  ;;  %v1523_v23 = vmul.f32 %v1459_v49, %v8478_v33 }
 0x21d   :  { %12080 = vst [vmem:[#allocation30_spill] sm:$0xff] %v8507_v62  ;;  %v1842_v0 = vand.u32 2147483647, %v8507_v62  ;;  %v1594_v8 = vand.u32 2147483647, %v8510_v60  ;;  %v8519_v53 = vmul.f32 %v6622_v24, %v8205_v28  ;;  %v1526_v22 = vmul.f32 %v1462_v15, %v1334_v14 }
 0x21e   :  { %v6624_v3 = vpop.eup %6623  ;;  %v1132_v9 = vpop.xlane.xlu1 %1131  ;;  %6645 = vrcp.f32 %v1656_v34  ;;  %v1525_v52 = vmul.f32 %v1461_v29, %v1333_v37  ;;  %v1464_v30 = vmax.f32 %v8494_v7, 0.0  ;;  %v5450_v33 = vadd.f32 -0.0025, %v8514_v48 }
 0x21f   :  { %v1129_v5 = vpop.xlane.xlu0 %1128  ;;  %v6626_v61 = vpop.eup %6625  ;;  %6647 = vrcp.f32 %v1132_v9  ;;  %v1908_v19 = vsel %vm688_vm1, %v1842_v0, 0.0  ;;  %v8524_v54 = vmul.f32 %v6624_v3, %v1521_v11  ;;  %v1658_v25 = vadd.f32 1e-12, %v1594_v8 }
 0x220   :  { %v6628_v62 = vpop.eup %6627  ;;  %1909 = vadd.xlane.f32.xlu0 %v1908_v19  ;;  %v8526_v28 = vmul.f32 %v6626_v61, %v1524_v56  ;;  %v5453_v24 = vadd.f32 -0.0025, %v8519_v53  ;;  %6649 = vrcp.f32 %v1655_v42  ;;  %v1463_v0 = vmax.f32 %v8498_v2, 0.0 }
 0x221   :  { %v6630_v10 = vpop.eup %6629  ;;  %v1841_v14 = vand.u32 2147483647, %v8524_v54  ;;  %v1342_v34 = vmul.f32 %v6628_v62, %v8215_v18  ;;  %6651 = vrcp.f32 %v1658_v25  ;;  %v1528_v62 = vmul.f32 %v1464_v30, %v8488_v46 }
 0x222   :  { %v6632_v49 = vpop.eup %6631  ;;  %v1138_v15 = vpop.xlane.xlu1 %1137  ;;  %v1844_v29 = vand.u32 2147483647, %v8526_v28  ;;  %v1596_v11 = vand.u32 2147483647, %v5453_v24  ;;  %v8540_v42 = vmul.f32 %v6630_v10, %v8202_v57  ;;  %v1466_v61 = vmax.f32 %v8510_v60, 0.0 }
 0x223   :  { %v1135_v37 = vpop.xlane.xlu0 %1134  ;;  %6653 = vrcp.f32 %v1138_v15  ;;  %v1905_v7 = vsel %vm688_vm1, %v1841_v14, 0.0  ;;  %v8536_v8 = vmul.f32 %v6632_v49, %v1523_v23  ;;  %v5455_v3 = vadd.f32 -0.0025, %v1342_v34 }
 0x224   :  { %v6634_v9 = vpop.eup %6633  ;;  %6655 = vrcp.f32 %v1123_v45  ;;  %1906 = vadd.xlane.f32.xlu0 %v1905_v7  ;;  %v1660_v18 = vadd.f32 1e-12, %v1596_v11  ;;  %v1465_v25 = vmax.f32 %v5450_v33, 0.0  ;;  %v1914_v45 = vsel %vm688_vm1, %v1844_v29, 0.0 }
 0x225   :  { %v6636_v56 = vpop.eup %6635  ;;  %v1598_v19 = vand.u32 2147483647, %v5455_v3  ;;  %v8544_v2 = vmul.f32 %v6634_v9, %v8225_v26  ;;  %v1468_v15 = vmax.f32 %v5453_v24, 0.0  ;;  %v1593_v11 = vand.u32 2147483647, %v5450_v33 }
 0x226   :  { %v6638_v23 = vpop.eup %6637  ;;  %v1144_v14 = vpop.xlane.xlu1 %1143  ;;  %6657 = vrcp.f32 %v1660_v18  ;;  %v1843_v57 = vand.u32 2147483647, %v8536_v8  ;;  %v1470_v60 = vmax.f32 %v5455_v3, 0.0  ;;  %v5452_v9 = vadd.f32 -0.0025, %v8540_v42 }
 0x227   :  { %v1141_v49 = vpop.xlane.xlu0 %1140  ;;  %v6640_v46 = vpop.eup %6639  ;;  %6659 = vrcp.f32 %v1144_v14  ;;  %v8548_v30 = vmul.f32 %v6638_v23, %v1526_v22  ;;  %v1662_v26 = vadd.f32 1e-12, %v1598_v19  ;;  %v8551_v7 = vadd.f32 -0.0025, %v8544_v2 }
 0x228   :  { %v6642_v10 = vpop.eup %6641  ;;  %6661 = vrcp.f32 %v1129_v5  ;;  %1915 = vadd.xlane.f32.xlu0 %v1914_v45  ;;  %v8554_v24 = vmul.f32 %v6640_v46, %v1525_v52  ;;  %v1657_v33 = vadd.f32 1e-12, %v1593_v11  ;;  %v1530_v3 = vmul.f32 %v1466_v61, %v8502_v16 }
 0x229   :  { %12081 = vst [vmem:[#allocation31_spill] sm:$0xff] %v8548_v30  ;;  %v6644_v29 = vpop.eup %6643  ;;  %6663 = vrcp.f32 %v1135_v37  ;;  %v8557_v18 = vmul.f32 %v6642_v10, %v8235_v27  ;;  %v1527_v5 = vmul.f32 %v1463_v0, %v8491_v38  ;;  %v1600_v19 = vand.u32 2147483647, %v8551_v7 }
 0x22a   :  { %v1150_v22 = vpop.xlane.xlu1 %1149  ;;  %6665 = vrcp.f32 %v1662_v26  ;;  %v1911_v45 = vsel %vm688_vm1, %v1843_v57, 0.0  ;;  %v1846_v37 = vand.u32 2147483647, %v8548_v30  ;;  %v1532_v52 = vmul.f32 %v1468_v15, %v8519_v53 }
 0x22b   :  { %v1147_v23 = vpop.xlane.xlu0 %1146  ;;  %v6646_v14 = vpop.eup %6645  ;;  %v5459_v11 = vadd.f32 -0.0025, %v8557_v18  ;;  %6667 = vrcp.f32 %v1141_v49  ;;  %v8566_v46 = vmul.f32 %v1470_v60, %v1342_v34  ;;  %v8569_v16 = vmul.f32 %v1465_v25, %v8514_v48 }
 0x22c   :  { %v6648_v27 = vpop.eup %6647  ;;  %1912 = vadd.xlane.f32.xlu0 %v1911_v45  ;;  %v1467_v38 = vmax.f32 %v5452_v9, 0.0  ;;  %v1845_v0 = vand.u32 2147483647, %v8554_v24  ;;  %v1664_v61 = vadd.f32 1e-12, %v1600_v19  ;;  %6669 = vrcp.f32 %v1657_v33 }
 0x22d   :  { %v1602_v57 = vand.u32 2147483647, %v5459_v11  ;;  %v6650_v10 = vpop.eup %6649  ;;  %6671 = vrcp.f32 %v1150_v22  ;;  %v1595_v15 = vand.u32 2147483647, %v5452_v9  ;;  %v8573_v30 = vmul.f32 %v6648_v27, %v8245_v31 }
 0x22e   :  { %v1156_v26 = vpop.xlane.xlu1 %1155  ;;  %v8576_v34 = vmul.f32 %v6636_v56, %v8212_v20  ;;  %v6652_v49 = vpop.eup %6651  ;;  %v1920_v48 = vsel %vm688_vm1, %v1846_v37, 0.0  ;;  %v8579_v25 = vmul.f32 %v6646_v14, %v1528_v62  ;;  %v1472_v60 = vmax.f32 %v8551_v7, 0.0 }
 0x22f   :  { %v1153_v53 = vpop.xlane.xlu0 %1152  ;;  %v1666_v33 = vadd.f32 1e-12, %v1602_v57  ;;  %6673 = vrcp.f32 %v1156_v26  ;;  %v8582_v22 = vmul.f32 %v6652_v49, %v1530_v3  ;;  %v1474_v9 = vmax.f32 %v5459_v11, 0.0 }
 0x230   :  { %v6654_v19 = vpop.eup %6653  ;;  %1921 = vadd.xlane.f32.xlu0 %v1920_v48  ;;  %v8585_v31 = vmul.f32 %v1467_v38, %v8540_v42  ;;  %6675 = vrcp.f32 %v1664_v61  ;;  %v1659_v20 = vadd.f32 1e-12, %v1595_v15  ;;  %v8588_v56 = vadd.f32 -0.0025, %v8573_v30 }
 0x231   :  { %v6656_v45 = vpop.eup %6655  ;;  %v8591_v62 = vadd.f32 -0.0025, %v8576_v34  ;;  %v1850_v37 = vand.u32 2147483647, %v8582_v22  ;;  %6677 = vrcp.f32 %v1666_v33  ;;  %v8595_v3 = vmul.f32 %v6654_v19, %v8255_v35 }
 0x232   :  { %v1162_v7 = vpop.xlane.xlu1 %1161  ;;  %v8598_v42 = vmul.f32 %v6644_v29, %v8222_v41  ;;  %v1917_v27 = vsel %vm688_vm1, %v1845_v0, 0.0  ;;  %v1848_v38 = vand.u32 2147483647, %v8579_v25  ;;  %v8602_v61 = vmul.f32 %v6650_v10, %v1527_v5 }
 0x233   :  { %v1159_v14 = vpop.xlane.xlu0 %1158  ;;  %v6658_v11 = vpop.eup %6657  ;;  %v1604_v57 = vand.u32 2147483647, %v8588_v56  ;;  %6679 = vrcp.f32 %v1147_v23  ;;  %v1932_v15 = vsel %vm688_vm1, %v1850_v37, 0.0  ;;  %v1536_v35 = vmul.f32 %v1472_v60, %v8544_v2 }
 0x234   :  { %v6660_v26 = vpop.eup %6659  ;;  %1918 = vadd.xlane.f32.xlu0 %v1917_v27  ;;  %v8606_v49 = vmul.f32 %v6658_v11, %v1532_v52  ;;  %1933 = vadd.xlane.f32.xlu1 %v1932_v15  ;;  %v8610_v29 = vmul.f32 %v1474_v9, %v8557_v18  ;;  %6681 = vrcp.f32 %v1659_v20  ;;  %v1597_v5 = vand.u32 2147483647, %v8591_v62 }
 0x235   :  { %v6662_v41 = vpop.eup %6661  ;;  %v1668_v0 = vadd.f32 1e-12, %v1604_v57  ;;  %6683 = vrcp.f32 %v1153_v53  ;;  %v8617_v52 = vadd.f32 -0.0025, %v8595_v3  ;;  %v8620_v2 = vadd.f32 -0.0025, %v8598_v42 }
 0x236   :  { %v8613_v10 = vpop.eup %6663  ;;  %v1168_v23 = vpop.xlane.xlu1 %1167  ;;  %v1852_v33 = vand.u32 2147483647, %v8606_v49  ;;  %v1926_v18 = vsel %vm688_vm1, %v1848_v38, 0.0  ;;  %v1847_v19 = vand.u32 2147483647, %v8602_v61  ;;  %v8625_v20 = vmul.f32 %v6660_v26, %v8265_v39 }
 0x237   :  { %v1165_v48 = vpop.xlane.xlu0 %1164  ;;  %v6666_v60 = vpop.eup %6665  ;;  %v1661_v9 = vadd.f32 1e-12, %v1597_v5  ;;  %6685 = vrcp.f32 %v1162_v7  ;;  %v1476_v11 = vmax.f32 %v8588_v56, 0.0  ;;  %v1606_v38 = vand.u32 2147483647, %v8617_v52 }
 0x238   :  { %v1938_v53 = vsel %vm688_vm1, %v1852_v33, 0.0  ;;  %1927 = vadd.xlane.f32.xlu0 %v1926_v18  ;;  %v8629_v37 = vmul.f32 %v6666_v60, %v8566_v46  ;;  %v8632_v27 = vpop.eup %6667  ;;  %6687 = vrcp.f32 %v1668_v0  ;;  %v1599_v57 = vand.u32 2147483647, %v8620_v2 }
 0x239   :  { %1939 = vadd.xlane.f32.xlu1 %v1938_v53  ;;  %v8637_v39 = vmul.f32 %v6656_v45, %v8232_v50  ;;  %v6670_v7 = vpop.eup %6669  ;;  %v1469_v46 = vmax.f32 %v8591_v62, 0.0  ;;  %6689 = vrcp.f32 %v1661_v9  ;;  %v8642_v56 = vadd.f32 -0.0025, %v8625_v20 }
 0x23a   :  { %12082 = vst [vmem:[#allocation32_spill] sm:$0xff] %v8629_v37  ;;  %v1174_v26 = vpop.xlane.xlu1 %1173  ;;  %v1854_v5 = vand.u32 2147483647, %v8629_v37  ;;  %v6672_v33 = vpop.eup %6671  ;;  %6691 = vrcp.f32 %v1159_v14  ;;  %v1923_v0 = vsel %vm688_vm1, %v1847_v19, 0.0  ;;  %v8646_v60 = vmul.f32 %v6670_v7, %v8569_v16 }
 0x23b   :  { %v1171_v15 = vpop.xlane.xlu0 %1170  ;;  %v1670_v50 = vadd.f32 1e-12, %v1606_v38  ;;  %6693 = vrcp.f32 %v1168_v23  ;;  %v1540_v18 = vmul.f32 %v1476_v11, %v8573_v30  ;;  %v1663_v53 = vadd.f32 1e-12, %v1599_v57 }
 0x23c   :  { %v1944_v45 = vsel %vm688_vm1, %v1854_v5, 0.0  ;;  %1924 = vadd.xlane.f32.xlu0 %v1923_v0  ;;  %v6674_v62 = vpop.eup %6673  ;;  %v1849_v9 = vand.u32 2147483647, %v8646_v60  ;;  %v1608_v14 = vand.u32 2147483647, %v8642_v56  ;;  %v1533_v23 = vmul.f32 %v1469_v46, %v8576_v34 }
 0x23d   :  { %1945 = vadd.xlane.f32.xlu1 %v1944_v45  ;;  %6695 = vrcp.f32 %v1670_v50  ;;  %v8653_v19 = vadd.f32 -0.0025, %v8637_v39  ;;  %v6676_v16 = vpop.eup %6675  ;;  %v8657_v5 = vmul.f32 %v6672_v33, %v8275_v43  ;;  %v8660_v30 = vmul.f32 %v6662_v41, %v8242_v58 }
 0x23e   :  { %v1180_v7 = vpop.xlane.xlu1 %1179  ;;  %6697 = vrcp.f32 %v1663_v53  ;;  %v6678_v11 = vpop.eup %6677  ;;  %v8662_v57 = vmul.f32 %v6676_v16, %v1536_v35  ;;  %v1929_v0 = vsel %vm688_vm1, %v1849_v9, 0.0  ;;  %v1478_v50 = vmax.f32 %v8617_v52, 0.0 }
 0x23f   :  { %v1177_v38 = vpop.xlane.xlu0 %1176  ;;  %v1672_v45 = vadd.f32 1e-12, %v1608_v14  ;;  %6699 = vrcp.f32 %v1165_v48  ;;  %v8667_v37 = vmul.f32 %v6678_v11, %v8610_v29  ;;  %v1471_v34 = vmax.f32 %v8620_v2, 0.0 }
 0x240   :  { %1930 = vadd.xlane.f32.xlu0 %v1929_v0  ;;  %v1601_v43 = vand.u32 2147483647, %v8653_v19  ;;  %v8671_v46 = vpop.eup %6679  ;;  %v1856_v58 = vand.u32 2147483647, %v8662_v57  ;;  %v8675_v35 = vadd.f32 -0.0025, %v8657_v5  ;;  %v8682_v53 = vmul.f32 %v6674_v62, %v8285_v47 }
 0x241   :  { %12083 = vst [vmem:[#allocation33_spill] sm:$0xff] %v8667_v37  ;;  %6701 = vrcp.f32 %v1672_v45  ;;  %v8678_v41 = vadd.f32 -0.0025, %v8660_v30  ;;  %v6682_v48 = vpop.eup %6681  ;;  %v1858_v33 = vand.u32 2147483647, %v8667_v37  ;;  %v1542_v11 = vmul.f32 %v1478_v50, %v8595_v3 }
 0x242   :  { %6703 = vrcp.f32 %v1174_v26  ;;  %v1186_v52 = vpop.xlane.xlu1 %1185  ;;  %v1665_v2 = vadd.f32 1e-12, %v1601_v43  ;;  %v8684_v9 = vpop.eup %6683  ;;  %v1950_v14 = vsel %vm688_vm1, %v1856_v58, 0.0  ;;  %v8688_v16 = vmul.f32 %v6682_v48, %v8585_v31 }
 0x243   :  { %v1183_v29 = vpop.xlane.xlu0 %1182  ;;  %6705 = vrcp.f32 %v1171_v15  ;;  %1951 = vadd.xlane.f32.xlu1 %v1950_v14  ;;  %v1535_v26 = vmul.f32 %v1471_v34, %v8598_v42  ;;  %v1480_v0 = vmax.f32 %v8642_v56, 0.0  ;;  %v1610_v45 = vand.u32 2147483647, %v8675_v35 }
 0x244   :  { %6707 = vrcp.f32 %v1180_v7  ;;  %v6686_v47 = vpop.eup %6685  ;;  %v1956_v62 = vsel %vm688_vm1, %v1858_v33, 0.0  ;;  %v1851_v15 = vand.u32 2147483647, %v8688_v16  ;;  %v1603_v43 = vand.u32 2147483647, %v8678_v41 }
 0x245   :  { %6709 = vrcp.f32 %v1665_v2  ;;  %v6688_v31 = vpop.eup %6687  ;;  %v1473_v3 = vmax.f32 %v8653_v19, 0.0  ;;  %v1674_v7 = vadd.f32 1e-12, %v1610_v45  ;;  %v8699_v42 = vadd.f32 -0.0025, %v8682_v53 }
 0x246   :  { %v1192_v58 = vpop.xlane.xlu1 %1191  ;;  %v8703_v56 = vmul.f32 %v8613_v10, %v8252_v12  ;;  %v6690_v50 = vpop.eup %6689  ;;  %6711 = vrcp.f32 %v1177_v38  ;;  %v1935_v34 = vsel %vm688_vm1, %v1851_v15, 0.0  ;;  %v8706_v33 = vmul.f32 %v6688_v31, %v1540_v18 }
 0x247   :  { %v1189_v48 = vpop.xlane.xlu0 %1188  ;;  %v1667_v2 = vadd.f32 1e-12, %v1603_v43  ;;  %v8708_v14 = vpop.eup %6691  ;;  %6713 = vrcp.f32 %v1186_v52  ;;  %1957 = vadd.xlane.f32.xlu1 %v1956_v62  ;;  %1936 = vadd.xlane.f32.xlu0 %v1935_v34  ;;  %v8710_v19 = vmul.f32 %v6690_v50, %v1533_v23  ;;  %v1544_v45 = vmul.f32 %v1480_v0, %v8625_v20 }
 0x248   :  { %12084 = vst [vmem:[#allocation34_spill] sm:$0xff] %v8706_v33  ;;  %v1612_v37 = vand.u32 2147483647, %v8699_v42  ;;  %v6694_v12 = vpop.eup %6693  ;;  %v1860_v10 = vand.u32 2147483647, %v8706_v33  ;;  %6715 = vrcp.f32 %v1674_v7  ;;  %v8719_v18 = vmul.f32 %v6686_v47, %v8295_v51 }
 0x249   :  { %v8716_v38 = vadd.f32 -0.0025, %v8703_v56  ;;  %v1853_v52 = vand.u32 2147483647, %v8710_v19  ;;  %v1537_v43 = vmul.f32 %v1473_v3, %v8637_v39  ;;  %6717 = vrcp.f32 %v1667_v2 }
 0x24a   :  { %v6696_v15 = vpop.eup %6695  ;;  %v1198_v62 = vpop.xlane.xlu1 %1197  ;;  %v1676_v20 = vadd.f32 1e-12, %v1612_v37  ;;  %6719 = vrcp.f32 %v1183_v29  ;;  %v1962_v31 = vsel %vm688_vm1, %v1860_v10, 0.0  ;;  %v1482_v50 = vmax.f32 %v8675_v35, 0.0 }
 0x24b   :  { %v1195_v23 = vpop.xlane.xlu0 %1194  ;;  %v6698_v0 = vpop.eup %6697  ;;  %v8724_v7 = vmul.f32 %v6696_v15, %v1542_v11  ;;  %6721 = vrcp.f32 %v1192_v58  ;;  %1963 = vadd.xlane.f32.xlu1 %v1962_v31  ;;  %v1941_v51 = vsel %vm688_vm1, %v1853_v52, 0.0  ;;  %v1605_v34 = vand.u32 2147483647, %v8716_v38 }
 0x24c   :  { %v8728_v47 = vmul.f32 %v6698_v0, %v1535_v26  ;;  %v8731_v33 = vpop.eup %6699  ;;  %1942 = vadd.xlane.f32.xlu0 %v1941_v51  ;;  %v1475_v39 = vmax.f32 %v8678_v41, 0.0  ;;  %6723 = vrcp.f32 %v1676_v20  ;;  %v8736_v29 = vadd.f32 -0.0025, %v8719_v18 }
 0x24d   :  { %v1862_v37 = vand.u32 2147483647, %v8724_v7  ;;  %v1669_v26 = vadd.f32 1e-12, %v1605_v34  ;;  %v8741_v2 = vmul.f32 %v8632_v27, %v8262_v1  ;;  %v8744_v10 = vmul.f32 %v6694_v12, %v8305_v55 }
 0x24e   :  { %v6702_v35 = vpop.eup %6701  ;;  %v1855_v11 = vand.u32 2147483647, %v8728_v47  ;;  %v1204_v58 = vpop.xlane.xlu1 %1203  ;;  %6725 = vrcp.f32 %v1189_v48  ;;  %v1546_v20 = vmul.f32 %v1482_v50, %v8657_v5  ;;  %v1484_v51 = vmax.f32 %v8699_v42, 0.0 }
 0x24f   :  { %v1201_v3 = vpop.xlane.xlu0 %1200  ;;  %v6704_v15 = vpop.eup %6703  ;;  %v1968_v41 = vsel %vm688_vm1, %v1862_v37, 0.0  ;;  %v8747_v52 = vmul.f32 %v6702_v35, %v1544_v45  ;;  %v1614_v1 = vand.u32 2147483647, %v8736_v29  ;;  %v8756_v55 = vadd.f32 -0.0025, %v8741_v2 }
 0x250   :  { %v8750_v0 = vpop.eup %6705  ;;  %1969 = vadd.xlane.f32.xlu1 %v1968_v41  ;;  %v1947_v31 = vsel %vm688_vm1, %v1855_v11, 0.0  ;;  %v1539_v45 = vmul.f32 %v1475_v39, %v8660_v30  ;;  %6727 = vrcp.f32 %v1669_v26  ;;  %v8761_v5 = vadd.f32 -0.0025, %v8744_v10 }
 0x251   :  { %v6708_v27 = vpop.eup %6707  ;;  %1948 = vadd.xlane.f32.xlu0 %v1947_v31  ;;  %v1864_v48 = vand.u32 2147483647, %v8747_v52  ;;  %6729 = vrcp.f32 %v1198_v62  ;;  %v1678_v42 = vadd.f32 1e-12, %v1614_v1  ;;  %v1607_v37 = vand.u32 2147483647, %v8756_v55 }
 0x252   :  { %v6710_v12 = vpop.eup %6709  ;;  %v1210_v50 = vpop.xlane.xlu1 %1209  ;;  %v8766_v35 = vmul.f32 %v8671_v46, %v8272_v6  ;;  %6731 = vrcp.f32 %v1195_v23  ;;  %v1477_v30 = vmax.f32 %v8716_v38, 0.0  ;;  %v1548_v62 = vmul.f32 %v1484_v51, %v8682_v53  ;;  %v100_v38 = vld [vmem:[%s11897_s2 + $0x78] sm:$0xff] }
 0x253   :  { %v1207_v34 = vpop.xlane.xlu0 %1206  ;;  %v1974_v11 = vsel %vm688_vm1, %v1864_v48, 0.0  ;;  %v8769_v41 = vmul.f32 %v6710_v12, %v1537_v43  ;;  %v8772_v39 = vpop.eup %6711  ;;  %6733 = vrcp.f32 %v1204_v58  ;;  %v1671_v26 = vadd.f32 1e-12, %v1607_v37  ;;  %6212 = vmatprep.subr.msk.mxu1 %vm101_vm0, %v100_v38  ;;  %6340 = vmatprep.subr.mxu0 %v100_v38 }
 0x254   :  { %1975 = vadd.xlane.f32.xlu1 %v1974_v11  ;;  %v1616_v31 = vand.u32 2147483647, %v8761_v5  ;;  %v6714_v1 = vpop.eup %6713  ;;  %v1486_v46 = vmax.f32 %v8736_v29, 0.0  ;;  %6735 = vrcp.f32 %v1678_v42  ;;  %v8779_v23 = vadd.f32 -0.0025, %v8766_v35  ;;  %6341 = vmatpush3.msra.mxu0 %v100_v38 }
 0x255   :  { %v1857_v6 = vand.u32 2147483647, %v8769_v41  ;;  %v6716_v43 = vpop.eup %6715  ;;  %6737 = vrcp.f32 %v1671_v26  ;;  %v8785_v51 = vmul.f32 %v6704_v15, %v8315_v59  ;;  %v8789_v12 = vmul.f32 %v8684_v9, %v8282_v17 }
 0x256   :  { %v1216_v58 = vpop.xlane.xlu1 %1215  ;;  %v1680_v53 = vadd.f32 1e-12, %v1616_v31  ;;  %v6718_v29 = vpop.eup %6717  ;;  %6739 = vrcp.f32 %v1201_v3  ;;  %v8793_v37 = vmul.f32 %v6716_v43, %v1546_v20  ;;  %v1541_v11 = vmul.f32 %v1477_v30, %v8703_v56 }
 0x257   :  { %v1213_v48 = vpop.xlane.xlu0 %1212  ;;  %v1953_v42 = vsel %vm688_vm1, %v1857_v6, 0.0  ;;  %v8796_v26 = vpop.eup %6719  ;;  %v8798_v59 = vmul.f32 %v6718_v29, %v1539_v45  ;;  %v1479_v17 = vmax.f32 %v8756_v55, 0.0  ;;  %v1609_v9 = vand.u32 2147483647, %v8779_v23 }
 0x258   :  { %12085 = vst [vmem:[#allocation35_spill] sm:$0xff] %v8793_v37  ;;  %1954 = vadd.xlane.f32.xlu0 %v1953_v42  ;;  %v8803_v15 = vadd.f32 -0.0025, %v8785_v51  ;;  %v8805_v3 = vpop.eup %6721  ;;  %v1866_v20 = vand.u32 2147483647, %v8793_v37  ;;  %v1550_v31 = vmul.f32 %v1486_v46, %v8719_v18  ;;  %6741 = vrcp.f32 %v1680_v53 }
 0x259   :  { %v8810_v56 = vadd.f32 -0.0025, %v8789_v12  ;;  %v6724_v30 = vpop.eup %6723  ;;  %6743 = vrcp.f32 %v1210_v50  ;;  %v1859_v45 = vand.u32 2147483647, %v8798_v59  ;;  %v1673_v6 = vadd.f32 1e-12, %v1609_v9 }
 0x25a   :  { %v1222_v55 = vpop.xlane.xlu1 %1221  ;;  %v8814_v38 = vmul.f32 %v6708_v27, %v8325_v63  ;;  %6745 = vrcp.f32 %v1207_v34  ;;  %v1980_v43 = vsel %vm688_vm1, %v1866_v20, 0.0  ;;  %v8817_v29 = vmul.f32 %v6724_v30, %v1548_v62 }
 0x25b   :  { %v1618_v18 = vand.u32 2147483647, %v8803_v15  ;;  %v8820_v46 = vpop.eup %6725  ;;  %1981 = vadd.xlane.f32.xlu1 %v1980_v43  ;;  %v1959_v53 = vsel %vm688_vm1, %v1859_v45, 0.0  ;;  %6747 = vrcp.f32 %v1216_v58  ;;  %v1219_v50 = vpop.xlane.xlu0 %1218  ;;  %v1543_v42 = vmul.f32 %v1479_v17, %v8741_v2 }
 0x25c   :  { %12086 = vst [vmem:[#allocation36_spill] sm:$0xff] %v8817_v29  ;;  %v1488_v9 = vmax.f32 %v8761_v5, 0.0  ;;  %1960 = vadd.xlane.f32.xlu0 %v1959_v53  ;;  %v1868_v63 = vand.u32 2147483647, %v8817_v29  ;;  %6749 = vrcp.f32 %v1673_v6  ;;  %v1611_v34 = vand.u32 2147483647, %v8810_v56 }
 0x25d   :  { %v1682_v27 = vadd.f32 1e-12, %v1618_v18  ;;  %v6728_v62 = vpop.eup %6727  ;;  %v1481_v30 = vmax.f32 %v8779_v23, 0.0  ;;  %v8829_v43 = vadd.f32 -0.0025, %v8814_v38  ;;  %v8833_v58 = vmul.f32 %v8708_v14, %v8292_v32  ;;  %v99_v5 = vld [vmem:[%s11897_s2 + $0x70] sm:$0xff] }
 0x25e   :  { %v1228_v20 = vpop.xlane.xlu1 %1227  ;;  %v8836_v2 = vmul.f32 %v6714_v1, %v8335_v4  ;;  %v8841_v17 = vpop.eup %6729  ;;  %6751 = vrcp.f32 %v1213_v48  ;;  %v1986_v45 = vsel %vm688_vm1, %v1868_v63, 0.0  ;;  %v8844_v23 = vmul.f32 %v6728_v62, %v1541_v11  ;;  %6342 = vmatprep.subr.mxu0 %v99_v5 }
 0x25f   :  { %v1675_v6 = vadd.f32 1e-12, %v1611_v34  ;;  %v8846_v18 = vpop.eup %6731  ;;  %1987 = vadd.xlane.f32.xlu1 %v1986_v45  ;;  %v1490_v32 = vmax.f32 %v8803_v15, 0.0  ;;  %v1483_v4 = vmax.f32 %v8810_v56, 0.0  ;;  %v1620_v14 = vand.u32 2147483647, %v8829_v43  ;;  %6343 = vmatpush3.msra.mxu0 %v99_v5  ;;  %v1225_v15 = vpop.xlane.xlu0 %1224 }
 0x260   :  { %v8852_v1 = vadd.f32 -0.0025, %v8833_v58  ;;  %v8854_v48 = vpop.eup %6733  ;;  %v1861_v11 = vand.u32 2147483647, %v8844_v23  ;;  %v1552_v53 = vmul.f32 %v1488_v9, %v8744_v10  ;;  %6753 = vrcp.f32 %v1682_v27 }
 0x261   :  { %v8859_v63 = vadd.f32 -0.0025, %v8836_v2  ;;  %v6736_v34 = vpop.eup %6735  ;;  %v1545_v56 = vmul.f32 %v1481_v30, %v8766_v35  ;;  %6755 = vrcp.f32 %v1675_v6  ;;  %v1684_v45 = vadd.f32 1e-12, %v1620_v14 }
 0x262   :  { %v1234_v62 = vpop.xlane.xlu1 %1233  ;;  %v8864_v5 = vmul.f32 %v8731_v33, %v8302_v36  ;;  %v6738_v29 = vpop.eup %6737  ;;  %v1965_v37 = vsel %vm688_vm1, %v1861_v11, 0.0  ;;  %6757 = vrcp.f32 %v1222_v55  ;;  %v8867_v10 = vmul.f32 %v6736_v34, %v1550_v31 }
 0x263   :  { %v1613_v9 = vand.u32 2147483647, %v8852_v1  ;;  %v8870_v27 = vpop.eup %6739  ;;  %1966 = vadd.xlane.f32.xlu0 %v1965_v37  ;;  %6759 = vrcp.f32 %v1219_v50  ;;  %v8872_v35 = vmul.f32 %v6738_v29, %v1543_v42  ;;  %v1554_v30 = vmul.f32 %v1490_v32, %v8785_v51  ;;  %v1231_v34 = vpop.xlane.xlu0 %1230 }
 0x264   :  { %12087 = vst [vmem:[#allocation37_spill] sm:$0xff] %v8867_v10  ;;  %v8876_v6 = vmul.f32 %v1483_v4, %v8789_v12  ;;  %v1870_v36 = vand.u32 2147483647, %v8867_v10  ;;  %6761 = vrcp.f32 %v1684_v45  ;;  %v1622_v31 = vand.u32 2147483647, %v8859_v63 }
 0x265   :  { %v1677_v33 = vadd.f32 1e-12, %v1613_v9  ;;  %v6742_v55 = vpop.eup %6741  ;;  %v1863_v14 = vand.u32 2147483647, %v8872_v35  ;;  %v1492_v37 = vmax.f32 %v8829_v43, 0.0  ;;  %v8887_v51 = vmul.f32 %v8805_v3, %v8345_v13 }
 0x266   :  { %v1240_v11 = vpop.xlane.xlu1 %1239  ;;  %v8883_v29 = vadd.f32 -0.0025, %v8864_v5  ;;  %v8889_v12 = vpop.eup %6743  ;;  %v1992_v50 = vsel %vm688_vm1, %v1870_v36, 0.0  ;;  %6763 = vrcp.f32 %v1228_v20  ;;  %v8892_v42 = vmul.f32 %v6742_v55, %v1552_v53 }
 0x267   :  { %v1686_v32 = vadd.f32 1e-12, %v1622_v31  ;;  %v8894_v4 = vpop.eup %6745  ;;  %1993 = vadd.xlane.f32.xlu1 %v1992_v50  ;;  %v1971_v43 = vsel %vm688_vm1, %v1863_v14, 0.0  ;;  %6765 = vrcp.f32 %v1225_v15  ;;  %v1485_v45 = vmax.f32 %v8852_v1, 0.0  ;;  %v8912_v15 = vld [vmem:[%s11897_s2 + $0x68] sm:$0xff] }
 0x268   :  { %12088 = vst [vmem:[#allocation38_spill] sm:$0xff] %v8892_v42  ;;  %v1615_v13 = vand.u32 2147483647, %v8883_v29  ;;  %v8899_v3 = vpop.eup %6747  ;;  %1972 = vadd.xlane.f32.xlu0 %v1971_v43  ;;  %v1872_v9 = vand.u32 2147483647, %v8892_v42  ;;  %6767 = vrcp.f32 %v1677_v33  ;;  %v8907_v53 = vmul.f32 %v8750_v0, %v8312_v40  ;;  %6344 = vmatprep.subr.mxu0 %v8912_v15 }
 0x269   :  { %v8903_v20 = vadd.f32 -0.0025, %v8887_v51  ;;  %v6750_v1 = vpop.eup %6749  ;;  %v1556_v36 = vmul.f32 %v1492_v37, %v8814_v38  ;;  %6769 = vrcp.f32 %v1686_v32  ;;  %v8917_v33 = vmul.f32 %v8841_v17, %v8355_v21  ;;  %6345 = vmatpush3.msra.mxu0 %v8912_v15  ;;  %v1237_v32 = vpop.xlane.xlu0 %1236 }
 0x26a   :  { %v1246_v31 = vpop.xlane.xlu1 %1245  ;;  %v1679_v55 = vadd.f32 1e-12, %v1615_v13  ;;  %v1998_v40 = vsel %vm688_vm1, %v1872_v9, 0.0  ;;  %v8921_v0 = vmul.f32 %v6750_v1, %v1545_v56  ;;  %6771 = vrcp.f32 %v1234_v62  ;;  %v12089_v1 = vld [vmem:[#allocation5_spill] sm:$0xff] }
 0x26b   :  { %v1494_v14 = vmax.f32 %v8859_v63, 0.0  ;;  %v8925_v50 = vpop.eup %6751  ;;  %1999 = vadd.xlane.f32.xlu1 %v1998_v40  ;;  %v1624_v38 = vand.u32 2147483647, %v8903_v20  ;;  %v8929_v21 = vadd.f32 -0.0025, %v8907_v53  ;;  %v1549_v62 = vmul.f32 %v1485_v45, %v8833_v58 }
 0x26c   :  { %6773 = vrcp.f32 %v1679_v55  ;;  %v8932_v17 = vadd.f32 -0.0025, %v8917_v33  ;;  %v1865_v56 = vand.u32 2147483647, %v8921_v0  ;;  %v8938_v63 = vmul.f32 %v8772_v39, %v8322_v44 }
 0x26d   :  { %6775 = vrcp.f32 %v1231_v34  ;;  %v6754_v37 = vpop.eup %6753  ;;  %v1688_v13 = vadd.f32 1e-12, %v1624_v38  ;;  %v1617_v9 = vand.u32 2147483647, %v8929_v21  ;;  %v8943_v55 = vmul.f32 %v8854_v48, %v12089_v1 }
 0x26e   :  { %6777 = vrcp.f32 %v1240_v11  ;;  %v1243_v43 = vpop.xlane.xlu1 %1242  ;;  %v6756_v40 = vpop.eup %6755  ;;  %v1977_v34 = vsel %vm688_vm1, %v1865_v56, 0.0  ;;  %v8946_v42 = vmul.f32 %v6754_v37, %v1554_v30  ;;  %v1487_v58 = vmax.f32 %v8883_v29, 0.0 }
 0x26f   :  { %v1626_v44 = vand.u32 2147483647, %v8932_v17  ;;  %v8950_v39 = vpop.eup %6757  ;;  %1978 = vadd.xlane.f32.xlu0 %v1977_v34  ;;  %v8953_v11 = vmul.f32 %v6756_v40, %v8876_v6  ;;  %v1558_v45 = vmul.f32 %v1494_v14, %v8836_v2  ;;  %6779 = vrcp.f32 %v1688_v13  ;;  %v12092_v40 = vld [vmem:[#allocation19_spill] sm:$0xff] }
 0x270   :  { %12090 = vst [vmem:[#allocation5_spill] sm:$0xff] %v8946_v42  ;;  %v1681_v48 = vadd.f32 1e-12, %v1617_v9  ;;  %v8956_v38 = vpop.eup %6759  ;;  %v1874_v56 = vand.u32 2147483647, %v8946_v42  ;;  %6781 = vrcp.f32 %v1237_v32  ;;  %v8968_v2 = vmul.f32 %v8796_v26, %v12092_v40 }
 0x271   :  { %12091 = vst [vmem:[#allocation39_spill] sm:$0xff] %v8953_v11  ;;  %v1690_v30 = vadd.f32 1e-12, %v1626_v44  ;;  %v8960_v29 = vadd.f32 -0.0025, %v8938_v63  ;;  %v6762_v37 = vpop.eup %6761  ;;  %v1551_v32 = vmul.f32 %v1487_v58, %v8864_v5  ;;  %v1496_v9 = vmax.f32 %v8903_v20, 0.0 }
 0x272   :  { %v1867_v1 = vand.u32 2147483647, %v8953_v11  ;;  %6783 = vrcp.f32 %v1681_v48  ;;  %v8964_v6 = vadd.f32 -0.0025, %v8943_v55  ;;  %v2004_v14 = vsel %vm688_vm1, %v1874_v56, 0.0  ;;  %v1252_v42 = vpop.xlane.xlu1 %1251 }
 0x273   :  { %v8971_v13 = vmul.f32 %v6762_v37, %v1556_v36  ;;  %v8975_v34 = vpop.eup %6763  ;;  %2005 = vadd.xlane.f32.xlu1 %v2004_v14  ;;  %v1489_v48 = vmax.f32 %v8929_v21, 0.0  ;;  %6785 = vrcp.f32 %v1690_v30  ;;  %v1619_v26 = vand.u32 2147483647, %v8960_v29  ;;  %v12094_v21 = vld [vmem:[#allocation7_spill] sm:$0xff] }
 0x274   :  { %v1983_v44 = vsel %vm688_vm1, %v1867_v1, 0.0  ;;  %v8980_v40 = vpop.eup %6765  ;;  %6787 = vrcp.f32 %v1246_v31  ;;  %v1628_v5 = vand.u32 2147483647, %v8964_v6  ;;  %v8985_v20 = vadd.f32 -0.0025, %v8968_v2  ;;  %v12095_v1 = vld [vmem:[#allocation20_spill] sm:$0xff] }
 0x275   :  { %12093 = vst [vmem:[#allocation19_spill] sm:$0xff] %v8971_v13  ;;  %1984 = vadd.xlane.f32.xlu0 %v1983_v44  ;;  %v1876_v36 = vand.u32 2147483647, %v8971_v13  ;;  %v6768_v58 = vpop.eup %6767  ;;  %v1498_v56 = vmax.f32 %v8932_v17, 0.0  ;;  %v1683_v37 = vadd.f32 1e-12, %v1619_v26  ;;  %v8990_v30 = vmul.f32 %v8889_v12, %v12094_v21 }
 0x276   :  { %v8994_v14 = vmul.f32 %v8820_v46, %v12095_v1  ;;  %v8999_v31 = vld [vmem:[%s11897_s2 + $0x60] sm:$0xff]  ;;  %v6770_v44 = vpop.eup %6769  ;;  %v9002_v10 = vmul.f32 %v6768_v58, %v1549_v62  ;;  %6789 = vrcp.f32 %v1243_v43  ;;  %v1692_v17 = vadd.f32 1e-12, %v1628_v5  ;;  %v1249_v5 = vpop.xlane.xlu1 %1248 }
 0x277   :  { %v2010_v13 = vsel %vm688_vm1, %v1876_v36, 0.0  ;;  %6346 = vmatprep.subr.mxu0 %v8999_v31  ;;  %v9005_v12 = vpop.eup %6771  ;;  %v9007_v26 = vmul.f32 %v6770_v44, %v1558_v45  ;;  %v1560_v46 = vmul.f32 %v1496_v9, %v8887_v51  ;;  %6791 = vrcp.f32 %v1683_v37 }
 0x278   :  { %12096 = vst [vmem:[#allocation7_spill] sm:$0xff] %v9002_v10  ;;  %2011 = vadd.xlane.f32.xlu1 %v2010_v13  ;;  %v1621_v21 = vand.u32 2147483647, %v8985_v20  ;;  %6347 = vmatpush3.msra.mxu0 %v8999_v31  ;;  %v1869_v62 = vand.u32 2147483647, %v9002_v10  ;;  %6793 = vrcp.f32 %v1692_v17  ;;  %v1553_v9 = vmul.f32 %v1489_v48, %v8907_v53 }
 0x279   :  { %12097 = vst [vmem:[#allocation20_spill] sm:$0xff] %v9007_v26  ;;  %v6774_v1 = vpop.eup %6773  ;;  %v9014_v43 = vadd.f32 -0.0025, %v8990_v30  ;;  %v9017_v36 = vadd.f32 -0.0025, %v8994_v14  ;;  %6795 = vrcp.f32 %v1252_v42  ;;  %v1562_v17 = vmul.f32 %v1498_v56, %v8917_v33  ;;  %v12099_v42 = vld [vmem:[#allocation9_spill] sm:$0xff] }
 0x27a   :  { %v9019_v13 = vpop.eup %6775  ;;  %v1878_v45 = vand.u32 2147483647, %v9007_v26  ;;  %v9022_v51 = vmul.f32 %v6774_v1, %v1551_v32  ;;  %v1685_v58 = vadd.f32 1e-12, %v1621_v21  ;;  %v1989_v44 = vsel %vm688_vm1, %v1869_v62, 0.0 }
 0x27b   :  { %v9025_v37 = vpop.eup %6777  ;;  %v1630_v10 = vand.u32 2147483647, %v9014_v43  ;;  %1990 = vadd.xlane.f32.xlu0 %v1989_v44  ;;  %v1491_v32 = vmax.f32 %v8960_v29, 0.0  ;;  %v1500_v48 = vmax.f32 %v8964_v6, 0.0  ;;  %v1623_v1 = vand.u32 2147483647, %v9017_v36 }
 0x27c   :  { %12098 = vst [vmem:[#allocation40_spill] sm:$0xff] %v9022_v51  ;;  %v2016_v11 = vsel %vm688_vm1, %v1878_v45, 0.0  ;;  %v1871_v26 = vand.u32 2147483647, %v9022_v51  ;;  %6797 = vrcp.f32 %v1685_v58  ;;  %v6780_v53 = vpop.eup %6779  ;;  %v9037_v33 = vmul.f32 %v8899_v3, %v12099_v42  ;;  %v12101_v58 = vld [vmem:[#allocation21_spill] sm:$0xff]  ;;  %v12102_v3 = vld [vmem:[#allocation11_spill] sm:$0xff] }
 0x27d   :  { %2017 = vadd.xlane.f32.xlu1 %v2016_v11  ;;  %v1694_v21 = vadd.f32 1e-12, %v1630_v10  ;;  %v9039_v56 = vpop.eup %6781  ;;  %v9042_v45 = vmul.f32 %v6780_v53, %v1560_v46  ;;  %v1493_v29 = vmax.f32 %v8985_v20, 0.0  ;;  %v9047_v11 = vmul.f32 %v8846_v18, %v12101_v58  ;;  %v1258_v53 = vpop.xlane.xlu1 %1257 }
 0x27e   :  { %v1995_v62 = vsel %vm688_vm1, %v1871_v26, 0.0  ;;  %v1687_v10 = vadd.f32 1e-12, %v1623_v1  ;;  %v9050_v44 = vadd.f32 -0.0025, %v9037_v33  ;;  %v9054_v42 = vmul.f32 %v8950_v39, %v12102_v3 }
 0x27f   :  { %12100 = vst [vmem:[#allocation9_spill] sm:$0xff] %v9042_v45  ;;  %v6784_v6 = vpop.eup %6783  ;;  %6799 = vrcp.f32 %v1694_v21  ;;  %1996 = vadd.xlane.f32.xlu0 %v1995_v62  ;;  %v1880_v26 = vand.u32 2147483647, %v9042_v45  ;;  %v1555_v20 = vmul.f32 %v1491_v32, %v8938_v63  ;;  %v9061_v18 = vadd.f32 -0.0025, %v9047_v11 }
 0x280   :  { %v9057_v46 = vmul.f32 %v6784_v6, %v1553_v9  ;;  %v6786_v21 = vpop.eup %6785  ;;  %v1564_v1 = vmul.f32 %v1500_v48, %v8943_v55  ;;  %6801 = vrcp.f32 %v1687_v10  ;;  %v1632_v58 = vand.u32 2147483647, %v9050_v44  ;;  %v9071_v9 = vld [vmem:[%s11897_s2 + $0x58] sm:$0xff] }
 0x281   :  { %v9066_v39 = vadd.f32 -0.0025, %v9054_v42  ;;  %v9073_v62 = vpop.eup %6787  ;;  %v2022_v63 = vsel %vm688_vm1, %v1880_v26, 0.0  ;;  %v9077_v6 = vmul.f32 %v6786_v21, %v1562_v17  ;;  %v1502_v55 = vmax.f32 %v9014_v43, 0.0  ;;  %6348 = vmatprep.subr.mxu0 %v9071_v9 }
 0x282   :  { %12103 = vst [vmem:[#allocation21_spill] sm:$0xff] %v9057_v46  ;;  %v1873_v32 = vand.u32 2147483647, %v9057_v46  ;;  %2023 = vadd.xlane.f32.xlu1 %v2022_v63  ;;  %6803 = vrcp.f32 %v1249_v5  ;;  %v1557_v48 = vmul.f32 %v1493_v29, %v8968_v2  ;;  %v1696_v10 = vadd.f32 1e-12, %v1632_v58  ;;  %6349 = vmatpush3.msra.mxu0 %v9071_v9  ;;  %v12105_v29 = vld [vmem:[#allocation6_spill] sm:$0xff] }
 0x283   :  { %12104 = vst [vmem:[#allocation11_spill] sm:$0xff] %v9077_v6  ;;  %v1625_v3 = vand.u32 2147483647, %v9061_v18  ;;  %v9084_v45 = vpop.eup %6789  ;;  %v1882_v17 = vand.u32 2147483647, %v9077_v6  ;;  %6805 = vrcp.f32 %v1258_v53  ;;  %v1495_v43 = vmax.f32 %v9017_v36, 0.0  ;;  %v1255_v53 = vpop.xlane.xlu1 %1254 }
 0x284   :  { %v2001_v26 = vsel %vm688_vm1, %v1873_v32, 0.0  ;;  %v6792_v21 = vpop.eup %6791  ;;  %6807 = vrcp.f32 %v1696_v10  ;;  %v1634_v2 = vand.u32 2147483647, %v9066_v39  ;;  %v9092_v58 = vmul.f32 %v8870_v27, %v12105_v29  ;;  %v12106_v6 = vld [vmem:[#allocation13_spill] sm:$0xff] }
 0x285   :  { %2002 = vadd.xlane.f32.xlu0 %v2001_v26  ;;  %v1689_v5 = vadd.f32 1e-12, %v1625_v3  ;;  %v6794_v63 = vpop.eup %6793  ;;  %v2028_v46 = vsel %vm688_vm1, %v1882_v17, 0.0  ;;  %v9095_v51 = vmul.f32 %v6792_v21, %v1555_v20  ;;  %v1566_v32 = vmul.f32 %v1502_v55, %v8990_v30  ;;  %v12108_v55 = vld [vmem:[#allocation8_spill] sm:$0xff] }
 0x286   :  { %v9100_v36 = vmul.f32 %v8975_v34, %v12106_v6  ;;  %2029 = vadd.xlane.f32.xlu1 %v2028_v46  ;;  %v9102_v10 = vmul.f32 %v6794_v63, %v1564_v1  ;;  %v1698_v3 = vadd.f32 1e-12, %v1634_v2  ;;  %v9105_v27 = vadd.f32 -0.0025, %v9092_v58  ;;  %v9107_v26 = vpop.eup %6795 }
 0x287   :  { %6809 = vrcp.f32 %v1689_v5  ;;  %v1875_v20 = vand.u32 2147483647, %v9095_v51  ;;  %v1504_v17 = vmax.f32 %v9050_v44, 0.0  ;;  %v9116_v34 = vmul.f32 %v8894_v4, %v12108_v55 }
 0x288   :  { %12107 = vst [vmem:[#allocation6_spill] sm:$0xff] %v9102_v10  ;;  %v9112_v30 = vadd.f32 -0.0025, %v9100_v36  ;;  %v1884_v1 = vand.u32 2147483647, %v9102_v10  ;;  %v1559_v6 = vmul.f32 %v1495_v43, %v8994_v14  ;;  %6811 = vrcp.f32 %v1698_v3 }
 0x289   :  { %v6798_v46 = vpop.eup %6797  ;;  %v1627_v21 = vand.u32 2147483647, %v9105_v27  ;;  %v2007_v5 = vsel %vm688_vm1, %v1875_v20, 0.0  ;;  %6813 = vrcp.f32 %v1255_v53  ;;  %v1497_v4 = vmax.f32 %v9061_v18, 0.0  ;;  %v12110_v53 = vld [vmem:[#allocation23_spill] sm:$0xff] }
 0x28a   :  { %v9122_v2 = vmul.f32 %v6798_v46, %v1557_v48  ;;  %v1636_v44 = vand.u32 2147483647, %v9112_v30  ;;  %2008 = vadd.xlane.f32.xlu0 %v2007_v5  ;;  %v2034_v29 = vsel %vm688_vm1, %v1884_v1, 0.0  ;;  %v9128_v55 = vadd.f32 -0.0025, %v9116_v34  ;;  %v1264_v48 = vpop.xlane.xlu1 %1263  ;;  %v9139_v18 = vld [vmem:[%s11897_s2 + $0x50] sm:$0xff] }
 0x28b   :  { %v1691_v63 = vadd.f32 1e-12, %v1627_v21  ;;  %2035 = vadd.xlane.f32.xlu1 %v2034_v29  ;;  %v1568_v3 = vmul.f32 %v1504_v17, %v9037_v33  ;;  %v9134_v46 = vmul.f32 %v9005_v12, %v12110_v53  ;;  %v1506_v21 = vmax.f32 %v9066_v39, 0.0  ;;  %6350 = vmatprep.subr.mxu0 %v9139_v18 }
 0x28c   :  { %12109 = vst [vmem:[#allocation13_spill] sm:$0xff] %v9122_v2  ;;  %v6800_v14 = vpop.eup %6799  ;;  %v1877_v43 = vand.u32 2147483647, %v9122_v2  ;;  %v1700_v20 = vadd.f32 1e-12, %v1636_v44  ;;  %v12112_v44 = vld [vmem:[#allocation10_spill] sm:$0xff]  ;;  %6351 = vmatpush3.msra.mxu0 %v9139_v18 }
 0x28d   :  { %v9141_v1 = vmul.f32 %v6800_v14, %v1566_v32  ;;  %6815 = vrcp.f32 %v1691_v63  ;;  %v1629_v5 = vand.u32 2147483647, %v9128_v55  ;;  %v6802_v33 = vpop.eup %6801  ;;  %v9148_v12 = vadd.f32 -0.0025, %v9134_v46 }
 0x28e   :  { %v2013_v17 = vsel %vm688_vm1, %v1877_v43, 0.0  ;;  %6817 = vrcp.f32 %v1700_v20  ;;  %v9152_v29 = vmul.f32 %v8925_v50, %v12112_v44  ;;  %v9156_v32 = vmul.f32 %v6802_v33, %v1559_v6  ;;  %v12114_v50 = vld [vmem:[#allocation24_spill] sm:$0xff]  ;;  %v1261_v10 = vpop.xlane.xlu1 %1260 }
 0x28f   :  { %12111 = vst [vmem:[#allocation8_spill] sm:$0xff] %v9141_v1  ;;  %2014 = vadd.xlane.f32.xlu0 %v2013_v17  ;;  %v1886_v39 = vand.u32 2147483647, %v9141_v1  ;;  %6819 = vrcp.f32 %v1264_v48  ;;  %v1693_v63 = vadd.f32 1e-12, %v1629_v5  ;;  %v9158_v14 = vpop.eup %6803  ;;  %v1561_v43 = vmul.f32 %v1497_v4, %v9047_v11  ;;  %v12115_v5 = vld [vmem:[#allocation12_spill] sm:$0xff] }
 0x290   :  { %12113 = vst [vmem:[#allocation23_spill] sm:$0xff] %v9156_v32  ;;  %v1638_v20 = vand.u32 2147483647, %v9148_v12  ;;  %v9163_v53 = vadd.f32 -0.0025, %v9152_v29  ;;  %v9167_v44 = vmul.f32 %v9025_v37, %v12114_v50  ;;  %v9169_v17 = vpop.eup %6805  ;;  %v9175_v33 = vmul.f32 %v8956_v38, %v12115_v5 }
 0x291   :  { %v2040_v6 = vsel %vm688_vm1, %v1886_v39, 0.0  ;;  %v1879_v48 = vand.u32 2147483647, %v9156_v32  ;;  %6821 = vrcp.f32 %v1693_v63  ;;  %v6808_v11 = vpop.eup %6807  ;;  %v1570_v4 = vmul.f32 %v1506_v21, %v9054_v42  ;;  %v12117_v21 = vld [vmem:[#allocation16_spill] sm:$0xff] }
 0x292   :  { %2041 = vadd.xlane.f32.xlu1 %v2040_v6  ;;  %v1499_v1 = vmax.f32 %v9105_v27, 0.0  ;;  %v1702_v37 = vadd.f32 1e-12, %v1638_v20  ;;  %v1631_v50 = vand.u32 2147483647, %v9163_v53  ;;  %v9181_v39 = vmul.f32 %v6808_v11, %v1568_v3 }
 0x293   :  { %v2019_v2 = vsel %vm688_vm1, %v1879_v48, 0.0  ;;  %v9184_v63 = vadd.f32 -0.0025, %v9167_v44  ;;  %v9187_v38 = vadd.f32 -0.0025, %v9175_v33  ;;  %v1508_v42 = vmax.f32 %v9112_v30, 0.0 }
 0x294   :  { %12116 = vst [vmem:[#allocation10_spill] sm:$0xff] %v9181_v39  ;;  %v6810_v5 = vpop.eup %6809  ;;  %2020 = vadd.xlane.f32.xlu0 %v2019_v2  ;;  %6823 = vrcp.f32 %v1702_v37  ;;  %v1695_v27 = vadd.f32 1e-12, %v1631_v50  ;;  %v9192_v20 = vmul.f32 %v9073_v62, %v12117_v21  ;;  %v1888_v6 = vand.u32 2147483647, %v9181_v39 }
 0x295   :  { %v9195_v3 = vmul.f32 %v6810_v5, %v1561_v43  ;;  %6825 = vrcp.f32 %v1261_v10  ;;  %v1640_v48 = vand.u32 2147483647, %v9184_v63  ;;  %v6812_v11 = vpop.eup %6811  ;;  %v1501_v32 = vmax.f32 %v9128_v55, 0.0  ;;  %v9213_v55 = vld [vmem:[%s11897_s2 + $0x48] sm:$0xff] }
 0x296   :  { %6827 = vrcp.f32 %v1695_v27  ;;  %v1633_v2 = vand.u32 2147483647, %v9187_v38  ;;  %v9201_v30 = vadd.f32 -0.0025, %v9192_v20  ;;  %v9203_v37 = vpop.eup %6813  ;;  %v2046_v62 = vsel %vm688_vm1, %v1888_v6, 0.0  ;;  %6352 = vmatprep.subr.mxu0 %v9213_v55 }
 0x297   :  { %12118 = vst [vmem:[#allocation24_spill] sm:$0xff] %v9195_v3  ;;  %v1881_v50 = vand.u32 2147483647, %v9195_v3  ;;  %v9207_v43 = vmul.f32 %v6812_v11, %v1570_v4  ;;  %v1563_v10 = vmul.f32 %v1499_v1, %v9092_v58  ;;  %2047 = vadd.xlane.f32.xlu1 %v2046_v62  ;;  %v1572_v5 = vmul.f32 %v1508_v42, %v9100_v36  ;;  %v12120_v1 = vld [vmem:[#allocation22_spill] sm:$0xff] }
 0x298   :  { %v1510_v27 = vmax.f32 %v9148_v12, 0.0  ;;  %v1704_v21 = vadd.f32 1e-12, %v1640_v48  ;;  %v1697_v39 = vadd.f32 1e-12, %v1633_v2  ;;  %v9223_v11 = vmul.f32 %v8980_v40, %v12120_v1  ;;  %6353 = vmatpush3.msra.mxu0 %v9213_v55  ;;  %v12121_v12 = vld [vmem:[#allocation14_spill] sm:$0xff] }
 0x299   :  { %12119 = vst [vmem:[#allocation12_spill] sm:$0xff] %v9207_v43  ;;  %v2025_v6 = vsel %vm688_vm1, %v1881_v50, 0.0  ;;  %v1890_v4 = vand.u32 2147483647, %v9207_v43  ;;  %v1642_v58 = vand.u32 2147483647, %v9201_v30  ;;  %v1565_v36 = vmul.f32 %v1501_v32, %v9116_v34 }
 0x29a   :  { %v6816_v62 = vpop.eup %6815  ;;  %2026 = vadd.xlane.f32.xlu0 %v2025_v6  ;;  %6829 = vrcp.f32 %v1704_v21  ;;  %v9229_v42 = vmul.f32 %v9019_v13, %v12121_v12  ;;  %v12122_v48 = vld [vmem:[#allocation18_spill] sm:$0xff]  ;;  %v1574_v32 = vmul.f32 %v1510_v27, %v9134_v46  ;;  %v9244_v13 = vadd.f32 -0.0025, %v9223_v11  ;;  %v12124_v46 = vld [vmem:[#allocation15_spill] sm:$0xff] }
 0x29b   :  { %v9233_v2 = vmul.f32 %v9107_v26, %v12122_v48  ;;  %v6818_v50 = vpop.eup %6817  ;;  %v2052_v43 = vsel %vm688_vm1, %v1890_v4, 0.0  ;;  %v9236_v40 = vmul.f32 %v6816_v62, %v1563_v10  ;;  %6831 = vrcp.f32 %v1697_v39  ;;  %v12125_v4 = vld [vmem:[#allocation17_spill] sm:$0xff] }
 0x29c   :  { %v1706_v1 = vadd.f32 1e-12, %v1642_v58  ;;  %v9238_v3 = vpop.eup %6819  ;;  %2053 = vadd.xlane.f32.xlu1 %v2052_v43  ;;  %v9240_v34 = vmul.f32 %v6818_v50, %v1572_v5  ;;  %v9247_v26 = vadd.f32 -0.0025, %v9229_v42  ;;  %v1503_v10 = vmax.f32 %v9163_v53, 0.0 }
 0x29d   :  { %v1883_v21 = vand.u32 2147483647, %v9236_v40  ;;  %v9252_v39 = vadd.f32 -0.0025, %v9233_v2  ;;  %v1635_v5 = vand.u32 2147483647, %v9244_v13  ;;  %v9258_v27 = vmul.f32 %v9039_v56, %v12124_v46 }
 0x29e   :  { %12123 = vst [vmem:[#allocation16_spill] sm:$0xff] %v9240_v34  ;;  %6833 = vrcp.f32 %v1706_v1  ;;  %v6822_v6 = vpop.eup %6821  ;;  %v1892_v43 = vand.u32 2147483647, %v9240_v34  ;;  %v9262_v58 = vmul.f32 %v9084_v45, %v12125_v4  ;;  %v1512_v12 = vmax.f32 %v9184_v63, 0.0  ;;  %v9275_v45 = vld [vmem:[%s11897_s2 + $0x40] sm:$0xff] }
 0x29f   :  { %v2031_v62 = vsel %vm688_vm1, %v1883_v21, 0.0  ;;  %v9265_v53 = vmul.f32 %v6822_v6, %v1565_v36  ;;  %v1637_v48 = vand.u32 2147483647, %v9247_v26  ;;  %v1505_v1 = vmax.f32 %v9187_v38, 0.0  ;;  %6354 = vmatprep.subr.mxu0 %v9275_v45 }
 0x2a0   :  { %2032 = vadd.xlane.f32.xlu0 %v2031_v62  ;;  %v2058_v50 = vsel %vm688_vm1, %v1892_v43, 0.0  ;;  %v1514_v56 = vmax.f32 %v9201_v30, 0.0  ;;  %v1699_v46 = vadd.f32 1e-12, %v1635_v5  ;;  %v1567_v63 = vmul.f32 %v1503_v10, %v9152_v29  ;;  %6355 = vmatpush3.msra.mxu0 %v9275_v45 }
 0x2a1   :  { %12126 = vst [vmem:[#allocation22_spill] sm:$0xff] %v9265_v53  ;;  %v6824_v21 = vpop.eup %6823  ;;  %2059 = vadd.xlane.f32.xlu1 %v2058_v50  ;;  %v1885_v36 = vand.u32 2147483647, %v9265_v53  ;;  %v1701_v6 = vadd.f32 1e-12, %v1637_v48  ;;  %v12128_v48 = vld [vmem:[#allocation26_spill] sm:$0xff]  ;;  %v1569_v53 = vmul.f32 %v1505_v1, %v9175_v33 }
 0x2a2   :  { %v1644_v4 = vand.u32 2147483647, %v9252_v39  ;;  %v9281_v38 = vpop.eup %6825  ;;  %v9283_v30 = vmul.f32 %v6824_v21, %v1574_v32  ;;  %6835 = vrcp.f32 %v1699_v46  ;;  %v9286_v43 = vadd.f32 -0.0025, %v9258_v27 }
 0x2a3   :  { %v9289_v5 = vadd.f32 -0.0025, %v9262_v58  ;;  %v6828_v62 = vpop.eup %6827  ;;  %v2037_v29 = vsel %vm688_vm1, %v1885_v36, 0.0  ;;  %6837 = vrcp.f32 %v1701_v6  ;;  %v9295_v50 = vmul.f32 %v9169_v17, %v12128_v48 }
 0x2a4   :  { %12127 = vst [vmem:[#allocation14_spill] sm:$0xff] %v9283_v30  ;;  %v1708_v10 = vadd.f32 1e-12, %v1644_v4  ;;  %2038 = vadd.xlane.f32.xlu0 %v2037_v29  ;;  %v1894_v32 = vand.u32 2147483647, %v9283_v30  ;;  %v9298_v46 = vmul.f32 %v6828_v62, %v1567_v63  ;;  %v1576_v21 = vmul.f32 %v1512_v12, %v9167_v44 }
 0x2a5   :  { %v1639_v34 = vand.u32 2147483647, %v9286_v43  ;;  %v1641_v36 = vand.u32 2147483647, %v9289_v5  ;;  %v9305_v6 = vadd.f32 -0.0025, %v9295_v50  ;;  %v1578_v29 = vmul.f32 %v1514_v56, %v9192_v20 }
 0x2a6   :  { %12129 = vst [vmem:[#allocation18_spill] sm:$0xff] %v9298_v46  ;;  %6839 = vrcp.f32 %v1708_v10  ;;  %v2064_v17 = vsel %vm688_vm1, %v1894_v32, 0.0  ;;  %v1887_v4 = vand.u32 2147483647, %v9298_v46  ;;  %v1507_v44 = vmax.f32 %v9244_v13, 0.0  ;;  %v12130_v32 = vld [vmem:[#allocation25_spill] sm:$0xff] }
 0x2a7   :  { %v1703_v63 = vadd.f32 1e-12, %v1639_v34  ;;  %v6830_v62 = vpop.eup %6829  ;;  %2065 = vadd.xlane.f32.xlu1 %v2064_v17  ;;  %v1509_v12 = vmax.f32 %v9247_v26, 0.0  ;;  %v1705_v33 = vadd.f32 1e-12, %v1641_v36  ;;  %v9318_v46 = vmul.f32 %v9158_v14, %v12130_v32 }
 0x2a8   :  { %v1646_v1 = vand.u32 2147483647, %v9305_v6  ;;  %v6832_v10 = vpop.eup %6831  ;;  %v2043_v48 = vsel %vm688_vm1, %v1887_v4, 0.0  ;;  %v9314_v30 = vmul.f32 %v6830_v62, %v1576_v21  ;;  %v1516_v34 = vmax.f32 %v9252_v39, 0.0  ;;  %v12131_v21 = vld [vmem:[#allocation27_spill] sm:$0xff]  ;;  %v12133_v39 = vld [vmem:[#allocation28_spill] sm:$0xff] }
 0x2a9   :  { %6841 = vrcp.f32 %v1703_v63  ;;  %2044 = vadd.xlane.f32.xlu0 %v2043_v48  ;;  %v9320_v20 = vmul.f32 %v6832_v10, %v1569_v53  ;;  %v1910_v26 = vpop.xlane.xlu0 %1909  ;;  %v9325_v17 = vadd.f32 -0.0025, %v9318_v46  ;;  %v9329_v4 = vmul.f32 %v9203_v37, %v12131_v21 }
 0x2aa   :  { %6843 = vrcp.f32 %v1705_v33  ;;  %v1710_v13 = vadd.f32 1e-12, %v1646_v1  ;;  %v1896_v36 = vand.u32 2147483647, %v9314_v30  ;;  %v2098_v14 = vmax.f32 %v1910_v26, 1e-12 }
 0x2ab   :  { %v6834_v56 = vpop.eup %6833  ;;  %v1889_v63 = vand.u32 2147483647, %v9320_v20  ;;  %v9336_v62 = vmul.f32 %v9238_v3, %v12133_v39  ;;  %v1643_v1 = vand.u32 2147483647, %v9325_v17  ;;  %v9341_v10 = vadd.f32 -0.0025, %v9329_v4 }
 0x2ac   :  { %v9332_v53 = vmul.f32 %v6834_v56, %v1578_v29  ;;  %6845 = vrcp.f32 %v1710_v13  ;;  %v2070_v33 = vsel %vm688_vm1, %v1896_v36, 0.0  ;;  %v1571_v29 = vmul.f32 %v1507_v44, %v9223_v11  ;;  %v9352_v3 = vld [vmem:[%s11897_s2 + $0x38] sm:$0xff] }
 0x2ad   :  { %2071 = vadd.xlane.f32.xlu1 %v2070_v33  ;;  %v2049_v37 = vsel %vm688_vm1, %v1889_v63, 0.0  ;;  %v9347_v32 = vadd.f32 -0.0025, %v9336_v62  ;;  %v1907_v13 = vpop.xlane.xlu0 %1906  ;;  %v1573_v26 = vmul.f32 %v1509_v12, %v9229_v42  ;;  %v1580_v56 = vmul.f32 %v1516_v34, %v9233_v2  ;;  %6356 = vmatprep.subr.mxu0 %v9352_v3 }
 0x2ae   :  { %12132 = vst [vmem:[#allocation15_spill] sm:$0xff] %v9332_v53  ;;  %v1898_v48 = vand.u32 2147483647, %v9332_v53  ;;  %2050 = vadd.xlane.f32.xlu0 %v2049_v37  ;;  %v1707_v36 = vadd.f32 1e-12, %v1643_v1  ;;  %6847 = vrcp.f32 %v2098_v14  ;;  %6357 = vmatpush3.msra.mxu0 %v9352_v3  ;;  %v1511_v42 = vmax.f32 %v9286_v43, 0.0 }
 0x2af   :  { %v1645_v21 = vand.u32 2147483647, %v9341_v10  ;;  %v6836_v11 = vpop.eup %6835  ;;  %v1648_v63 = vand.u32 2147483647, %v9347_v32  ;;  %v2097_v39 = vmax.f32 %v1907_v13, 1e-12 }
 0x2b0   :  { %v2076_v44 = vsel %vm688_vm1, %v1898_v48, 0.0  ;;  %v6838_v33 = vpop.eup %6837  ;;  %v9361_v37 = vmul.f32 %v6836_v11, %v1571_v29  ;;  %6849 = vrcp.f32 %v1707_v36  ;;  %v1513_v34 = vmax.f32 %v9289_v5, 0.0  ;;  %v12134_v29 = vld [vmem:[#allocation29_spill] sm:$0xff] }
 0x2b1   :  { %v1709_v2 = vadd.f32 1e-12, %v1645_v21  ;;  %2077 = vadd.xlane.f32.xlu1 %v2076_v44  ;;  %v9364_v12 = vmul.f32 %v6838_v33, %v1573_v26  ;;  %v1712_v1 = vadd.f32 1e-12, %v1648_v63  ;;  %6851 = vrcp.f32 %v2097_v39  ;;  %v1916_v14 = vpop.xlane.xlu0 %1915 }
 0x2b2   :  { %v1891_v13 = vand.u32 2147483647, %v9361_v37  ;;  %v1518_v53 = vmax.f32 %v9305_v6, 0.0  ;;  %v9371_v11 = vmul.f32 %v9281_v38, %v12134_v29  ;;  %v2100_v26 = vmax.f32 %v1916_v14, 1e-12 }
 0x2b3   :  { %v6840_v48 = vpop.eup %6839  ;;  %6853 = vrcp.f32 %v1709_v2  ;;  %v1893_v5 = vand.u32 2147483647, %v9364_v12  ;;  %v1575_v21 = vmul.f32 %v1511_v42, %v9258_v27  ;;  %v1577_v38 = vmul.f32 %v1513_v34, %v9262_v58 }
 0x2b4   :  { %v9373_v43 = vmul.f32 %v6840_v48, %v1580_v56  ;;  %6855 = vrcp.f32 %v1712_v1  ;;  %v2055_v36 = vsel %vm688_vm1, %v1891_v13, 0.0  ;;  %v9379_v44 = vadd.f32 -0.0025, %v9371_v11  ;;  %v9386_v56 = vld [vmem:[%s11897_s2 + $0x30] sm:$0xff] }
 0x2b5   :  { %2056 = vadd.xlane.f32.xlu0 %v2055_v36  ;;  %v1913_v39 = vpop.xlane.xlu0 %1912  ;;  %v1582_v27 = vmul.f32 %v1518_v53, %v9295_v50  ;;  %6358 = vmatprep.subr.mxu0 %v9386_v56  ;;  %v1515_v58 = vmax.f32 %v9325_v17, 0.0  ;;  %6857 = vrcp.f32 %v2100_v26  ;;  %v2061_v13 = vsel %vm688_vm1, %v1893_v5, 0.0 }
 0x2b6   :  { %v6842_v63 = vpop.eup %6841  ;;  %v1900_v6 = vand.u32 2147483647, %v9373_v43  ;;  %v1647_v42 = vand.u32 2147483647, %v9379_v44  ;;  %v2099_v1 = vmax.f32 %v1913_v39, 1e-12  ;;  %6359 = vmatpush3.msra.mxu0 %v9386_v56 }
 0x2b7   :  { %v6844_v33 = vpop.eup %6843  ;;  %v9388_v2 = vmul.f32 %v6842_v63, %v1575_v21  ;;  %v1517_v21 = vmax.f32 %v9341_v10, 0.0  ;;  %v1520_v63 = vmax.f32 %v9347_v32, 0.0  ;;  %v1579_v39 = vmul.f32 %v1515_v58, %v9318_v46 }
 0x2b8   :  { %v2082_v14 = vsel %vm688_vm1, %v1900_v6, 0.0  ;;  %v9394_v48 = vmul.f32 %v6844_v33, %v1577_v38  ;;  %v1711_v53 = vadd.f32 1e-12, %v1647_v42  ;;  %6859 = vrcp.f32 %v2099_v1 }
 0x2b9   :  { %v6846_v34 = vpop.eup %6845  ;;  %2083 = vadd.xlane.f32.xlu1 %v2082_v14  ;;  %v1895_v50 = vand.u32 2147483647, %v9388_v2  ;;  %2062 = vadd.xlane.f32.xlu0 %v2061_v13  ;;  %v1922_v36 = vpop.xlane.xlu0 %1921  ;;  %v1581_v32 = vmul.f32 %v1517_v21, %v9329_v4 }
 0x2ba   :  { %v9400_v29 = vmul.f32 %v6846_v34, %v1582_v27  ;;  %6861 = vrcp.f32 %v1711_v53  ;;  %v1897_v17 = vand.u32 2147483647, %v9394_v48  ;;  %v2102_v6 = vmax.f32 %v1922_v36, 1e-12 }
 0x2bb   :  { %v6848_v5 = vpop.eup %6847  ;;  %v2067_v38 = vsel %vm688_vm1, %v1895_v50, 0.0  ;;  %v1584_v50 = vmul.f32 %v1520_v63, %v9336_v62  ;;  %v9425_v62 = vld [vmem:[%s11897_s2 + $0x28] sm:$0xff]  ;;  %v1519_v63 = vmax.f32 %v9379_v44, 0.0 }
 0x2bc   :  { %v1902_v26 = vand.u32 2147483647, %v9400_v29  ;;  %v2073_v53 = vsel %vm688_vm1, %v1897_v17, 0.0  ;;  %6863 = vrcp.f32 %v2102_v6  ;;  %6360 = vmatprep.subr.mxu0 %v9425_v62 }
 0x2bd   :  { %v6850_v33 = vpop.eup %6849  ;;  %2068 = vadd.xlane.f32.xlu0 %v2067_v38  ;;  %v1919_v42 = vpop.xlane.xlu0 %1918  ;;  %v12135_v38 = vld [vmem:[#allocation30_spill] sm:$0xff]  ;;  %6361 = vmatpush3.msra.mxu0 %v9425_v62 }
 0x2be   :  { %v2088_v27 = vsel %vm688_vm1, %v1902_v26, 0.0  ;;  %v6852_v1 = vpop.eup %6851  ;;  %v9409_v10 = vmul.f32 %v6850_v33, %v1579_v39  ;;  %v1934_v14 = vpop.xlane.xlu1 %1933  ;;  %v2101_v34 = vmax.f32 %v1919_v42, 1e-12  ;;  %v2226_v39 = vmul.f32 %v6848_v5, %v12135_v38  ;;  %v7495_v33 = vld [vmem:[%s11897_s2 + $0x78] sm:$0xff]  ;;  %v7496_v42 = vld [vmem:[%s11897_s2 + $0x70] sm:$0xff] }
 0x2bf   :  { %2089 = vadd.xlane.f32.xlu1 %v2088_v27  ;;  %v2225_v46 = vmul.f32 %v6852_v1, %v8524_v54 }
 0x2c0   :  { %v6854_v13 = vpop.eup %6853  ;;  %v1899_v36 = vand.u32 2147483647, %v9409_v10  ;;  %6865 = vrcp.f32 %v2101_v34 }
 0x2c1   :  { %v6856_v58 = vpop.eup %6855  ;;  %v9416_v26 = vmul.f32 %v6854_v13, %v1581_v32  ;;  %2074 = vadd.xlane.f32.xlu0 %v2073_v53  ;;  %6116 = vmatprep.mubr.msk.f32.mxu1 %vm688_vm1, %v2225_v46  ;;  %v1928_v21 = vpop.xlane.xlu0 %1927  ;;  %v1583_v53 = vmul.f32 %v1519_v63, %v9371_v11  ;;  %v9459_v11 = vld [vmem:[%s11897_s2 + $0x20] sm:$0xff] }
 0x2c2   :  { %v9419_v4 = vmul.f32 %v6856_v58, %v1584_v50  ;;  %v9429_v17 = vpop.xlane.xlu1 %1939  ;;  %6117 = vmatmul.mubr.msk.f32.vlgmr.msra.gmra.mxu1 %vm688_vm1, %v2226_v39  ;;  %v2104_v5 = vmax.f32 %v1928_v21, 1e-12  ;;  %v6858_v27 = vpop.eup %6857  ;;  %v2079_v44 = vsel %vm688_vm1, %v1899_v36, 0.0  ;;  %v2106_v36 = vmax.f32 %v1934_v14, 1e-12  ;;  %6362 = vmatprep.subr.mxu0 %v9459_v11 }
 0x2c3   :  { %v1901_v54 = vand.u32 2147483647, %v9416_v26  ;;  %6213 = vmatpush3.xpose.msk.msra.mxu1 %vm101_vm0, %v7495_v33  ;;  %v2228_v39 = vmul.f32 %v6858_v27, %v8526_v28  ;;  %6363 = vmatpush3.msra.mxu0 %v9459_v11  ;;  %v12136_v27 = vld [vmem:[#allocation31_spill] sm:$0xff] }
 0x2c4   :  { %v1904_v6 = vand.u32 2147483647, %v9419_v4  ;;  %6214 = vmatprep.subr.msk.mxu1 %vm101_vm0, %v7496_v42  ;;  %6867 = vrcp.f32 %v2104_v5 }
 0x2c5   :  { %v6860_v1 = vpop.eup %6859  ;;  %2080 = vadd.xlane.f32.xlu0 %v2079_v44  ;;  %v1925_v34 = vpop.xlane.xlu0 %1924  ;;  %v2085_v13 = vsel %vm688_vm1, %v1901_v54, 0.0 }
 0x2c6   :  { %v2094_v32 = vsel %vm688_vm1, %v1904_v6, 0.0  ;;  %v2103_v50 = vmax.f32 %v1925_v34, 1e-12  ;;  %v2227_v46 = vmul.f32 %v6860_v1, %v8536_v8  ;;  %v1946_v38 = vpop.xlane.xlu1 %1945 }
 0x2c7   :  { %2095 = vadd.xlane.f32.xlu1 %v2094_v32  ;;  %v6862_v58 = vpop.eup %6861  ;;  %6215 = vmatpush3.xpose.msk.msra.mxu1 %vm101_vm0, %v7496_v42 }
 0x2c8   :  { %v9450_v21 = vmul.f32 %v6862_v58, %v1583_v53  ;;  %6869 = vrcp.f32 %v2103_v50  ;;  %6119 = vmatprep.mubr.msk.f32.mxu1 %vm688_vm1, %v2227_v46  ;;  %6216 = vmatprep.subr.msk.mxu1 %vm101_vm0, %v8912_v15 }
 0x2c9   :  { %2086 = vadd.xlane.f32.xlu0 %v2085_v13  ;;  %6120 = vmatmul.mubr.msk.f32.gmra.mxu1 %vm688_vm1, %v2228_v39  ;;  %v1931_v8 = vpop.xlane.xlu0 %1930  ;;  %6871 = vrcp.f32 %v2106_v36  ;;  %v6864_v54 = vpop.eup %6863 }
 0x2ca   :  { %v1903_v28 = vand.u32 2147483647, %v9450_v21  ;;  %v2105_v14 = vmax.f32 %v1931_v8, 1e-12  ;;  %v2230_v44 = vmul.f32 %v6864_v54, %v12136_v27  ;;  %v9521_v54 = vld [vmem:[%s11897_s2 + $0x8] sm:$0xff] }
 0x2cb   :  { %6217 = vmatpush3.xpose.msk.msra.mxu1 %vm101_vm0, %v8912_v15  ;;  %v2108_v15 = vmax.f32 %v9429_v17, 1e-12  ;;  %v2110_v17 = vmax.f32 %v1946_v38, 1e-12 }
 0x2cc   :  { %v2091_v63 = vsel %vm688_vm1, %v1903_v28, 0.0  ;;  %6873 = vrcp.f32 %v2105_v14  ;;  %6218 = vmatprep.subr.msk.mxu1 %vm101_vm0, %v8999_v31  ;;  %v1952_v5 = vpop.xlane.xlu1 %1951 }
 0x2cd   :  { %v6866_v6 = vpop.eup %6865  ;;  %2092 = vadd.xlane.f32.xlu0 %v2091_v63  ;;  %6875 = vrcp.f32 %v2108_v15  ;;  %v2112_v36 = vmax.f32 %v1952_v5, 1e-12 }
 0x2ce   :  { %v2229_v33 = vmul.f32 %v6866_v6, %v8554_v24  ;;  %v9481_v24 = vld [vmem:[%s11897_s2 + $0x18] sm:$0xff] }
 0x2cf   :  { %6219 = vmatpush3.xpose.msk.msra.mxu1 %vm101_vm0, %v8999_v31  ;;  %6364 = vmatprep.subr.mxu0 %v9481_v24 }
 0x2d0   :  { %6122 = vmatprep.mubr.msk.f32.mxu1 %vm688_vm1, %v2229_v33  ;;  %6220 = vmatprep.subr.msk.mxu1 %vm101_vm0, %v9071_v9  ;;  %v1958_v42 = vpop.xlane.xlu1 %1957  ;;  %v1937_v1 = vpop.xlane.xlu0 %1936 }
 0x2d1   :  { %6123 = vmatmul.mubr.msk.f32.gmra.mxu1 %vm688_vm1, %v2230_v44  ;;  %v2107_v32 = vmax.f32 %v1937_v1, 1e-12  ;;  %6365 = vmatpush3.msra.mxu0 %v9481_v24  ;;  %v6868_v31 = vpop.eup %6867 }
 0x2d2   :  { %v2232_v58 = vmul.f32 %v6868_v31, %v8579_v25  ;;  %v9502_v25 = vld [vmem:[%s11897_s2 + $0x10] sm:$0xff] }
 0x2d3   :  { %6221 = vmatpush3.xpose.msk.msra.mxu1 %vm101_vm0, %v9071_v9  ;;  %6877 = vrcp.f32 %v2107_v32  ;;  %6366 = vmatprep.subr.mxu0 %v9502_v25 }
 0x2d4   :  { %6222 = vmatprep.subr.msk.mxu1 %vm101_vm0, %v9139_v18  ;;  %v1964_v13 = vpop.xlane.xlu1 %1963  ;;  %6879 = vrcp.f32 %v2110_v17  ;;  %6367 = vmatpush3.msra.mxu0 %v9502_v25 }
 0x2d5   :  { %v6870_v34 = vpop.eup %6869  ;;  %v1943_v53 = vpop.xlane.xlu0 %1942  ;;  %6368 = vmatprep.subr.mxu0 %v9521_v54 }
 0x2d6   :  { %v2231_v50 = vmul.f32 %v6870_v34, %v8602_v61  ;;  %v2109_v46 = vmax.f32 %v1943_v53, 1e-12  ;;  %v6872_v9 = vpop.eup %6871  ;;  %6369 = vmatpush3.msra.mxu0 %v9521_v54 }
 0x2d7   :  { %6223 = vmatpush3.xpose.msk.msra.mxu1 %vm101_vm0, %v9139_v18  ;;  %v2234_v28 = vmul.f32 %v6872_v9, %v8582_v22 }
 0x2d8   :  { %6125 = vmatprep.mubr.msk.f32.mxu1 %vm688_vm1, %v2231_v50  ;;  %6224 = vmatprep.subr.msk.mxu1 %vm101_vm0, %v9213_v55  ;;  %6881 = vrcp.f32 %v2109_v46 }
 0x2d9   :  { %v6874_v38 = vpop.eup %6873  ;;  %v9496_v39 = vpop.xlane.xlu1 %1969  ;;  %6126 = vmatmul.mubr.msk.f32.gmra.mxu1 %vm688_vm1, %v2232_v58  ;;  %6883 = vrcp.f32 %v2112_v36 }
 0x2da   :  { %v1949_v61 = vpop.xlane.xlu0 %1948  ;;  %v2233_v18 = vmul.f32 %v6874_v38, %v8646_v60  ;;  %v2114_v60 = vmax.f32 %v1958_v42, 1e-12  ;;  %v6876_v22 = vpop.eup %6875  ;;  %v12138_v38 = vld [vmem:[#allocation33_spill] sm:$0xff] }
 0x2db   :  { %v2111_v8 = vmax.f32 %v1949_v61, 1e-12  ;;  %6225 = vmatpush3.xpose.msk.msra.mxu1 %vm101_vm0, %v9213_v55  ;;  %v2236_v33 = vmul.f32 %v6876_v22, %v8606_v49  ;;  %v12137_v49 = vld [vmem:[#allocation32_spill] sm:$0xff] }
 0x2dc   :  { %6128 = vmatprep.mubr.msk.f32.mxu1 %vm688_vm1, %v2233_v18  ;;  %6226 = vmatprep.subr.msk.mxu1 %vm101_vm0, %v9275_v45 }
 0x2dd   :  { %6885 = vrcp.f32 %v2111_v8  ;;  %6129 = vmatmul.mubr.msk.f32.gmra.mxu1 %vm688_vm1, %v2234_v28  ;;  %v1976_v14 = vpop.xlane.xlu1 %1975  ;;  %v12139_v28 = vld [vmem:[#allocation34_spill] sm:$0xff] }
 0x2de   :  { %6887 = vrcp.f32 %v2114_v60 }
 0x2df   :  { %6227 = vmatpush3.xpose.msk.msra.mxu1 %vm101_vm0, %v9275_v45  ;;  %v2116_v45 = vmax.f32 %v1964_v13, 1e-12 }
 0x2e0   :  { %6228 = vmatprep.subr.msk.mxu1 %vm101_vm0, %v9352_v3  ;;  %v6878_v63 = vpop.eup %6877 }
 0x2e1   :  { %v1955_v55 = vpop.xlane.xlu0 %1954  ;;  %v2235_v5 = vmul.f32 %v6878_v63, %v8688_v16  ;;  %v6880_v27 = vpop.eup %6879  ;;  %v9536_v16 = vld [vmem:[%s11897_s2] sm:$0xff] }
 0x2e2   :  { %v2113_v6 = vmax.f32 %v1955_v55, 1e-12  ;;  %6370 = vmatprep.subr.mxu0 %v9536_v16  ;;  %v2238_v32 = vmul.f32 %v6880_v27, %v12137_v49 }
 0x2e3   :  { %6229 = vmatpush3.xpose.msk.msra.mxu1 %vm101_vm0, %v9352_v3  ;;  %6131 = vmatprep.mubr.msk.f32.mxu1 %vm688_vm1, %v2235_v5 }
 0x2e4   :  { %6889 = vrcp.f32 %v2113_v6  ;;  %6230 = vmatprep.subr.msk.mxu1 %vm101_vm0, %v9386_v56  ;;  %v1982_v44 = vpop.xlane.xlu1 %1981  ;;  %6132 = vmatmul.mubr.msk.f32.gmra.mxu1 %vm688_vm1, %v2236_v33 }
 0x2e5   :  { %v6882_v15 = vpop.eup %6881  ;;  %v1961_v42 = vpop.xlane.xlu0 %1960  ;;  %6891 = vrcp.f32 %v2116_v45  ;;  %6371 = vmatpush3.msra.mxu0 %v9536_v16  ;;  %v2122_v18 = vmax.f32 %v1982_v44, 1e-12 }
 0x2e6   :  { %v2115_v3 = vmax.f32 %v1961_v42, 1e-12  ;;  %v2237_v1 = vmul.f32 %v6882_v15, %v8710_v19  ;;  %v6884_v31 = vpop.eup %6883  ;;  %v2118_v19 = vmax.f32 %v9496_v39, 1e-12 }
 0x2e7   :  { %6231 = vmatpush3.xpose.msk.msra.mxu1 %vm101_vm0, %v9386_v56  ;;  %v2240_v13 = vmul.f32 %v6884_v31, %v8662_v57 }
 0x2e8   :  { %6232 = vmatprep.subr.msk.mxu1 %vm101_vm0, %v9425_v62  ;;  %6893 = vrcp.f32 %v2115_v3  ;;  %6134 = vmatprep.mubr.msk.f32.mxu1 %vm688_vm1, %v2237_v1  ;;  %v1988_v56 = vpop.xlane.xlu1 %1987 }
 0x2e9   :  { %6135 = vmatmul.mubr.msk.f32.gmra.mxu1 %vm688_vm1, %v2238_v32  ;;  %6895 = vrcp.f32 %v2118_v19 }
 0x2ea   :  { %v6886_v17 = vpop.eup %6885 }
 0x2eb   :  { %v2239_v34 = vmul.f32 %v6886_v17, %v8728_v47  ;;  %6233 = vmatpush3.xpose.msk.msra.mxu1 %vm101_vm0, %v9425_v62  ;;  %v6888_v46 = vpop.eup %6887  ;;  %v2120_v47 = vmax.f32 %v1976_v14, 1e-12 }
 0x2ec   :  { %6234 = vmatprep.subr.msk.mxu1 %vm101_vm0, %v9459_v11  ;;  %v1967_v53 = vpop.xlane.xlu0 %1966  ;;  %v2242_v39 = vmul.f32 %v6888_v46, %v12138_v38  ;;  %v12141_v46 = vld [vmem:[#allocation39_spill] sm:$0xff] }
 0x2ed   :  { %6137 = vmatprep.mubr.msk.f32.mxu1 %vm688_vm1, %v2239_v34  ;;  %v2117_v50 = vmax.f32 %v1967_v53, 1e-12 }
 0x2ee   :  { %6138 = vmatmul.mubr.msk.f32.gmra.mxu1 %vm688_vm1, %v2240_v13 }
 0x2ef   :  { %6235 = vmatpush3.xpose.msk.msra.mxu1 %vm101_vm0, %v9459_v11  ;;  %6897 = vrcp.f32 %v2117_v50 }
 0x2f0   :  { %6236 = vmatprep.subr.msk.mxu1 %vm101_vm0, %v9481_v24  ;;  %v1994_v62 = vpop.xlane.xlu1 %1993  ;;  %6899 = vrcp.f32 %v2120_v47 }
 0x2f1   :  { %v6890_v57 = vpop.eup %6889  ;;  %v1973_v58 = vpop.xlane.xlu0 %1972  ;;  %v2126_v27 = vmax.f32 %v1994_v62, 1e-12 }
 0x2f2   :  { %v2241_v9 = vmul.f32 %v6890_v57, %v8769_v41  ;;  %v2119_v36 = vmax.f32 %v1973_v58, 1e-12  ;;  %v6892_v11 = vpop.eup %6891  ;;  %v12142_v57 = vld [vmem:[#allocation36_spill] sm:$0xff] }
 0x2f3   :  { %6237 = vmatpush3.xpose.msk.msra.mxu1 %vm101_vm0, %v9481_v24  ;;  %v2244_v24 = vmul.f32 %v6892_v11, %v12139_v28 }
 0x2f4   :  { %6140 = vmatprep.mubr.msk.f32.mxu1 %vm688_vm1, %v2241_v9  ;;  %6238 = vmatprep.subr.msk.mxu1 %vm101_vm0, %v9502_v25  ;;  %6901 = vrcp.f32 %v2119_v36  ;;  %v2000_v8 = vpop.xlane.xlu1 %1999 }
 0x2f5   :  { %6141 = vmatmul.mubr.msk.f32.gmra.mxu1 %vm688_vm1, %v2242_v39  ;;  %v6894_v61 = vpop.eup %6893  ;;  %6903 = vrcp.f32 %v2122_v18 }
 0x2f6   :  { %v2243_v41 = vmul.f32 %v6894_v61, %v8798_v59  ;;  %v6896_v22 = vpop.eup %6895  ;;  %v2124_v59 = vmax.f32 %v1988_v56, 1e-12  ;;  %v12143_v61 = vld [vmem:[#allocation7_spill] sm:$0xff] }
 0x2f7   :  { %6239 = vmatpush3.xpose.msk.msra.mxu1 %vm101_vm0, %v9502_v25  ;;  %v2246_v45 = vmul.f32 %v6896_v22, %v8724_v7  ;;  %v12145_v22 = vld [vmem:[#allocation40_spill] sm:$0xff] }
 0x2f8   :  { %6240 = vmatprep.subr.msk.mxu1 %vm101_vm0, %v9521_v54  ;;  %v1979_v60 = vpop.xlane.xlu0 %1978  ;;  %6143 = vmatprep.mubr.msk.f32.mxu1 %vm688_vm1, %v2243_v41 }
 0x2f9   :  { %v2121_v14 = vmax.f32 %v1979_v60, 1e-12  ;;  %6144 = vmatmul.mubr.msk.f32.gmra.mxu1 %vm688_vm1, %v2244_v24 }
 0x2fb   :  { %6241 = vmatpush3.xpose.msk.msra.mxu1 %vm101_vm0, %v9521_v54  ;;  %6905 = vrcp.f32 %v2121_v14 }
 0x2fc   :  { %6242 = vmatprep.subr.msk.mxu1 %vm101_vm0, %v9536_v16  ;;  %v6898_v25 = vpop.eup %6897  ;;  %v2006_v55 = vpop.xlane.xlu1 %2005  ;;  %6907 = vrcp.f32 %v2124_v59 }
 0x2fd   :  { %v2245_v6 = vmul.f32 %v6898_v25, %v8844_v23  ;;  %v6900_v54 = vpop.eup %6899 }
 0x2fe   :  { %v1985_v63 = vpop.xlane.xlu0 %1984  ;;  %v2248_v23 = vmul.f32 %v6900_v54, %v8747_v52  ;;  %v2130_v52 = vmax.f32 %v2006_v55, 1e-12 }
 0x2ff   :  { %v2123_v5 = vmax.f32 %v1985_v63, 1e-12  ;;  %6243 = vmatpush3.xpose.msk.msra.mxu1 %vm101_vm0, %v9536_v16  ;;  %6146 = vmatprep.mubr.msk.f32.mxu1 %vm688_vm1, %v2245_v6  ;;  %v2128_v16 = vmax.f32 %v2000_v8, 1e-12  ;;  %v12144_v8 = vld [vmem:[#allocation37_spill] sm:$0xff]  ;;  %v12146_v63 = vld [vmem:[#allocation38_spill] sm:$0xff] }
 0x300   :  { %6147 = vmatmul.mubr.msk.f32.gmra.mxu1 %vm688_vm1, %v2246_v45 }
 0x301   :  { %6909 = vrcp.f32 %v2123_v5  ;;  %v6902_v33 = vpop.eup %6901  ;;  %v2012_v44 = vpop.xlane.xlu1 %2011 }
 0x302   :  { %v2247_v15 = vmul.f32 %v6902_v33, %v8872_v35  ;;  %6911 = vrcp.f32 %v2126_v27  ;;  %v6904_v3 = vpop.eup %6903  ;;  %v12140_v35 = vld [vmem:[#allocation35_spill] sm:$0xff]  ;;  %v12147_v27 = vld [vmem:[#allocation21_spill] sm:$0xff] }
 0x303   :  { %v2250_v19 = vmul.f32 %v6904_v3, %v12140_v35 }
 0x304   :  { %v1991_v42 = vpop.xlane.xlu0 %1990  ;;  %6149 = vmatprep.mubr.msk.f32.mxu1 %vm688_vm1, %v2247_v15  ;;  %v12148_v15 = vld [vmem:[#allocation5_spill] sm:$0xff] }
 0x305   :  { %v2125_v7 = vmax.f32 %v1991_v42, 1e-12  ;;  %6150 = vmatmul.mubr.msk.f32.gmra.mxu1 %vm688_vm1, %v2248_v23 }
 0x306   :  { %v2018_v49 = vpop.xlane.xlu1 %2017 }
 0x307   :  { %6913 = vrcp.f32 %v2125_v7  ;;  %v2134_v11 = vmax.f32 %v2018_v49, 1e-12 }
 0x308   :  { %v6906_v1 = vpop.eup %6905  ;;  %v1997_v32 = vpop.xlane.xlu0 %1996  ;;  %6915 = vrcp.f32 %v2128_v16 }
 0x309   :  { %v2127_v31 = vmax.f32 %v1997_v32, 1e-12  ;;  %v2249_v17 = vmul.f32 %v6906_v1, %v8921_v0  ;;  %v6908_v56 = vpop.eup %6907  ;;  %v2132_v0 = vmax.f32 %v2012_v44, 1e-12 }
 0x30a   :  { %v2252_v62 = vmul.f32 %v6908_v56, %v12142_v57 }
 0x30b   :  { %6917 = vrcp.f32 %v2127_v31  ;;  %6152 = vmatprep.mubr.msk.f32.mxu1 %vm688_vm1, %v2249_v17  ;;  %v2024_v53 = vpop.xlane.xlu1 %2023  ;;  %v12149_v31 = vld [vmem:[#allocation19_spill] sm:$0xff] }
 0x30c   :  { %6153 = vmatmul.mubr.msk.f32.gmra.mxu1 %vm688_vm1, %v2250_v19  ;;  %6919 = vrcp.f32 %v2130_v52  ;;  %v2136_v25 = vmax.f32 %v2024_v53, 1e-12 }
 0x30e   :  { %v6910_v34 = vpop.eup %6909  ;;  %v2003_v13 = vpop.xlane.xlu0 %2002 }
 0x30f   :  { %v2129_v50 = vmax.f32 %v2003_v13, 1e-12  ;;  %v2251_v47 = vmul.f32 %v6910_v34, %v12141_v46  ;;  %v6912_v58 = vpop.eup %6911  ;;  %v2030_v38 = vpop.xlane.xlu1 %2029  ;;  %v12150_v13 = vld [vmem:[#allocation13_spill] sm:$0xff]  ;;  %v12151_v46 = vld [vmem:[#allocation20_spill] sm:$0xff] }
 0x310   :  { %v2254_v41 = vmul.f32 %v6912_v58, %v12144_v8  ;;  %v2138_v42 = vmax.f32 %v2030_v38, 1e-12 }
 0x311   :  { %6921 = vrcp.f32 %v2129_v50  ;;  %6155 = vmatprep.mubr.msk.f32.mxu1 %vm688_vm1, %v2251_v47 }
 0x312   :  { %6156 = vmatmul.mubr.msk.f32.gmra.mxu1 %vm688_vm1, %v2252_v62  ;;  %6923 = vrcp.f32 %v2132_v0 }
 0x313   :  { %v2009_v9 = vpop.xlane.xlu0 %2008 }
 0x314   :  { %v6914_v36 = vpop.eup %6913  ;;  %v2131_v39 = vmax.f32 %v2009_v9, 1e-12  ;;  %v2036_v55 = vpop.xlane.xlu1 %2035 }
 0x315   :  { %v2253_v18 = vmul.f32 %v6914_v36, %v12143_v61  ;;  %v6916_v28 = vpop.eup %6915  ;;  %v2140_v19 = vmax.f32 %v2036_v55, 1e-12  ;;  %v12152_v36 = vld [vmem:[#allocation23_spill] sm:$0xff] }
 0x316   :  { %6925 = vrcp.f32 %v2131_v39  ;;  %v2256_v6 = vmul.f32 %v6916_v28, %v12146_v63  ;;  %v12153_v39 = vld [vmem:[#allocation9_spill] sm:$0xff] }
 0x317   :  { %6158 = vmatprep.mubr.msk.f32.mxu1 %vm688_vm1, %v2253_v18  ;;  %6927 = vrcp.f32 %v2134_v11 }
 0x318   :  { %v2015_v24 = vpop.xlane.xlu0 %2014  ;;  %v6918_v60 = vpop.eup %6917  ;;  %6159 = vmatmul.mubr.msk.f32.gmra.mxu1 %vm688_vm1, %v2254_v41 }
 0x319   :  { %v2133_v14 = vmax.f32 %v2015_v24, 1e-12  ;;  %v2255_v59 = vmul.f32 %v6918_v60, %v12145_v22  ;;  %v6920_v5 = vpop.eup %6919  ;;  %v12154_v60 = vld [vmem:[#allocation24_spill] sm:$0xff] }
 0x31a   :  { %v2258_v23 = vmul.f32 %v6920_v5, %v12148_v15 }
 0x31b   :  { %6929 = vrcp.f32 %v2133_v14  ;;  %6161 = vmatprep.mubr.msk.f32.mxu1 %vm688_vm1, %v2255_v59  ;;  %v2042_v7 = vpop.xlane.xlu1 %2041  ;;  %v12155_v59 = vld [vmem:[#allocation11_spill] sm:$0xff] }
 0x31c   :  { %6162 = vmatmul.mubr.msk.f32.gmra.mxu1 %vm688_vm1, %v2256_v6  ;;  %6931 = vrcp.f32 %v2136_v25  ;;  %v2142_v57 = vmax.f32 %v2042_v7, 1e-12  ;;  %v12157_v7 = vld [vmem:[#allocation22_spill] sm:$0xff] }
 0x31d   :  { %v2021_v45 = vpop.xlane.xlu0 %2020 }
 0x31e   :  { %v6922_v54 = vpop.eup %6921  ;;  %v2135_v33 = vmax.f32 %v2021_v45, 1e-12 }
 0x31f   :  { %v2257_v44 = vmul.f32 %v6922_v54, %v12147_v27  ;;  %v6924_v16 = vpop.eup %6923 }
 0x320   :  { %6933 = vrcp.f32 %v2135_v33  ;;  %v2260_v17 = vmul.f32 %v6924_v16, %v12149_v31  ;;  %v2048_v52 = vpop.xlane.xlu1 %2047  ;;  %v12156_v33 = vld [vmem:[#allocation6_spill] sm:$0xff] }
 0x321   :  { %6164 = vmatprep.mubr.msk.f32.mxu1 %vm688_vm1, %v2257_v44  ;;  %6935 = vrcp.f32 %v2138_v42  ;;  %v2144_v61 = vmax.f32 %v2048_v52, 1e-12  ;;  %v12159_v52 = vld [vmem:[#allocation18_spill] sm:$0xff] }
 0x322   :  { %6165 = vmatmul.mubr.msk.f32.gmra.mxu1 %vm688_vm1, %v2258_v23 }
 0x323   :  { %v2027_v3 = vpop.xlane.xlu0 %2026  ;;  %v6926_v1 = vpop.eup %6925 }
 0x324   :  { %v2137_v49 = vmax.f32 %v2027_v3, 1e-12  ;;  %v2259_v32 = vmul.f32 %v6926_v1, %v9095_v51  ;;  %v6928_v35 = vpop.eup %6927 }
 0x325   :  { %v2262_v47 = vmul.f32 %v6928_v35, %v12151_v46  ;;  %v2054_v0 = vpop.xlane.xlu1 %2053 }
 0x326   :  { %6937 = vrcp.f32 %v2137_v49  ;;  %6167 = vmatprep.mubr.msk.f32.mxu1 %vm688_vm1, %v2259_v32  ;;  %v2146_v22 = vmax.f32 %v2054_v0, 1e-12  ;;  %v12158_v49 = vld [vmem:[#allocation8_spill] sm:$0xff] }
 0x327   :  { %6168 = vmatmul.mubr.msk.f32.gmra.mxu1 %vm688_vm1, %v2260_v17  ;;  %6939 = vrcp.f32 %v2140_v19 }
 0x328   :  { %v6930_v56 = vpop.eup %6929 }
 0x329   :  { %v2033_v34 = vpop.xlane.xlu0 %2032  ;;  %v2261_v53 = vmul.f32 %v6930_v56, %v12150_v13  ;;  %v6932_v51 = vpop.eup %6931  ;;  %v12160_v13 = vld [vmem:[#allocation10_spill] sm:$0xff] }
 0x32a   :  { %v2139_v50 = vmax.f32 %v2033_v34, 1e-12  ;;  %v2264_v11 = vmul.f32 %v6932_v51, %v12153_v39  ;;  %v2060_v28 = vpop.xlane.xlu1 %2059 }
 0x32b   :  { %6170 = vmatprep.mubr.msk.f32.mxu1 %vm688_vm1, %v2261_v53  ;;  %v2148_v15 = vmax.f32 %v2060_v28, 1e-12 }
 0x32c   :  { %6941 = vrcp.f32 %v2139_v50  ;;  %6171 = vmatmul.mubr.msk.f32.gmra.mxu1 %vm688_vm1, %v2262_v47 }
 0x32d   :  { %v6934_v62 = vpop.eup %6933  ;;  %v2039_v58 = vpop.xlane.xlu0 %2038  ;;  %6943 = vrcp.f32 %v2142_v57 }
 0x32e   :  { %v2141_v9 = vmax.f32 %v2039_v58, 1e-12  ;;  %v2263_v38 = vmul.f32 %v6934_v62, %v12152_v36  ;;  %v6936_v18 = vpop.eup %6935 }
 0x32f   :  { %v2266_v25 = vmul.f32 %v6936_v18, %v12155_v59 }
 0x330   :  { %6945 = vrcp.f32 %v2141_v9  ;;  %6173 = vmatprep.mubr.msk.f32.mxu1 %vm688_vm1, %v2263_v38  ;;  %v2066_v45 = vpop.xlane.xlu1 %2065  ;;  %v12161_v9 = vld [vmem:[#allocation12_spill] sm:$0xff] }
 0x331   :  { %6174 = vmatmul.mubr.msk.f32.gmra.mxu1 %vm688_vm1, %v2264_v11  ;;  %6947 = vrcp.f32 %v2144_v61  ;;  %v2150_v31 = vmax.f32 %v2066_v45, 1e-12  ;;  %v12163_v45 = vld [vmem:[#allocation14_spill] sm:$0xff] }
 0x332   :  { %v2045_v8 = vpop.xlane.xlu0 %2044 }
 0x333   :  { %v6938_v41 = vpop.eup %6937  ;;  %v2143_v24 = vmax.f32 %v2045_v8, 1e-12 }
 0x334   :  { %v2265_v14 = vmul.f32 %v6938_v41, %v12154_v60  ;;  %v6940_v63 = vpop.eup %6939  ;;  %v12162_v60 = vld [vmem:[#allocation16_spill] sm:$0xff] }
 0x335   :  { %6949 = vrcp.f32 %v2143_v24  ;;  %v2268_v27 = vmul.f32 %v6940_v63, %v12156_v33 }
 0x336   :  { %6176 = vmatprep.mubr.msk.f32.mxu1 %vm688_vm1, %v2265_v14  ;;  %6951 = vrcp.f32 %v2146_v22  ;;  %v2072_v3 = vpop.xlane.xlu1 %2071 }
 0x337   :  { %v2051_v55 = vpop.xlane.xlu0 %2050  ;;  %6177 = vmatmul.mubr.msk.f32.gmra.mxu1 %vm688_vm1, %v2266_v25  ;;  %v2152_v34 = vmax.f32 %v2072_v3, 1e-12 }
 0x338   :  { %v2145_v6 = vmax.f32 %v2051_v55, 1e-12 }
 0x339   :  { %v6942_v5 = vpop.eup %6941 }
 0x33a   :  { %6953 = vrcp.f32 %v2145_v6  ;;  %v2267_v54 = vmul.f32 %v6942_v5, %v9236_v40  ;;  %v6944_v44 = vpop.eup %6943  ;;  %v2078_v50 = vpop.xlane.xlu1 %2077 }
 0x33b   :  { %v2270_v32 = vmul.f32 %v6944_v44, %v12158_v49  ;;  %6955 = vrcp.f32 %v2148_v15  ;;  %v2154_v62 = vmax.f32 %v2078_v50, 1e-12  ;;  %v7507_v50 = vld [vmem:[%s11895_s0 + $0x50] sm:$0xff] }
 0x33c   :  { %6179 = vmatprep.mubr.msk.f32.mxu1 %vm688_vm1, %v2267_v54 }
 0x33d   :  { %v6946_v23 = vpop.eup %6945  ;;  %6180 = vmatmul.mubr.msk.f32.gmra.mxu1 %vm688_vm1, %v2268_v27 }
 0x33e   :  { %v2057_v42 = vpop.xlane.xlu0 %2056  ;;  %v2269_v16 = vmul.f32 %v6946_v23, %v12157_v7  ;;  %v6948_v40 = vpop.eup %6947 }
 0x33f   :  { %v2147_v1 = vmax.f32 %v2057_v42, 1e-12  ;;  %v2272_v53 = vmul.f32 %v6948_v40, %v12160_v13  ;;  %v7505_v13 = vld [vmem:[%s11895_s0 + $0x40] sm:$0xff] }
 0x340   :  { %6182 = vmatprep.mubr.msk.f32.mxu1 %vm688_vm1, %v2269_v16  ;;  %v12164_v16 = vld [vmem:[#allocation15_spill] sm:$0xff] }
 0x341   :  { %6957 = vrcp.f32 %v2147_v1  ;;  %6183 = vmatmul.mubr.msk.f32.gmra.mxu1 %vm688_vm1, %v2270_v32 }
 0x342   :  { %v6950_v17 = vpop.eup %6949  ;;  %v2063_v35 = vpop.xlane.xlu0 %2062  ;;  %6959 = vrcp.f32 %v2150_v31 }
 0x343   :  { %v2149_v19 = vmax.f32 %v2063_v35, 1e-12  ;;  %v2271_v56 = vmul.f32 %v6950_v17, %v12159_v52  ;;  %v6952_v46 = vpop.eup %6951  ;;  %v2084_v58 = vpop.xlane.xlu1 %2083  ;;  %v7502_v52 = vld [vmem:[%s11895_s0 + $0x28] sm:$0xff] }
 0x344   :  { %v2274_v36 = vmul.f32 %v6952_v46, %v12161_v9  ;;  %v2156_v11 = vmax.f32 %v2084_v58, 1e-12  ;;  %v7508_v46 = vld [vmem:[%s11895_s0 + $0x58] sm:$0xff] }
 0x345   :  { %6961 = vrcp.f32 %v2149_v19  ;;  %6185 = vmatprep.mubr.msk.f32.mxu1 %vm688_vm1, %v2271_v56  ;;  %v7501_v19 = vld [vmem:[%s11895_s0 + $0x20] sm:$0xff]  ;;  %v7503_v56 = vld [vmem:[%s11895_s0 + $0x30] sm:$0xff]  ;;  %v7512_v9 = vld [vmem:[%s11895_s0 + $0x78] sm:$0xff] }
 0x346   :  { %v2069_v47 = vpop.xlane.xlu0 %2068  ;;  %6186 = vmatmul.mubr.msk.f32.gmra.mxu1 %vm688_vm1, %v2272_v53  ;;  %6963 = vrcp.f32 %v2152_v34  ;;  %v7504_v34 = vld [vmem:[%s11895_s0 + $0x38] sm:$0xff]  ;;  %v7506_v53 = vld [vmem:[%s11895_s0 + $0x48] sm:$0xff] }
 0x347   :  { %v6954_v57 = vpop.eup %6953  ;;  %v2151_v51 = vmax.f32 %v2069_v47, 1e-12 }
 0x348   :  { %v2273_v0 = vmul.f32 %v6954_v57, %v9320_v20  ;;  %v6956_v61 = vpop.eup %6955  ;;  %v2090_v18 = vpop.xlane.xlu1 %2089  ;;  %v7509_v57 = vld [vmem:[%s11895_s0 + $0x60] sm:$0xff] }
 0x349   :  { %6965 = vrcp.f32 %v2151_v51  ;;  %v2158_v24 = vmax.f32 %v2090_v18, 1e-12  ;;  %v2276_v14 = vmul.f32 %v6956_v61, %v12162_v60  ;;  %v7516_v18 = vld [vmem:[%s11895_s0 + $0x98] sm:$0xff] }
 0x34a   :  { %v2075_v38 = vpop.xlane.xlu0 %2074  ;;  %6188 = vmatprep.mubr.msk.f32.mxu1 %vm688_vm1, %v2273_v0  ;;  %6967 = vrcp.f32 %v2154_v62  ;;  %v7510_v62 = vld [vmem:[%s11895_s0 + $0x68] sm:$0xff]  ;;  %v7511_v0 = vld [vmem:[%s11895_s0 + $0x70] sm:$0xff]  ;;  %v7520_v60 = vld [vmem:[%s11895_s0 + $0xb8] sm:$0xff] }
 0x34b   :  { %v2153_v39 = vmax.f32 %v2075_v38, 1e-12  ;;  %6189 = vmatmul.mubr.msk.f32.gmra.mxu1 %vm688_vm1, %v2274_v36  ;;  %v7513_v36 = vld [vmem:[%s11895_s0 + $0x80] sm:$0xff] }
 0x34d   :  { %6969 = vrcp.f32 %v2153_v39  ;;  %v7514_v39 = vld [vmem:[%s11895_s0 + $0x88] sm:$0xff] }
 0x34e   :  { %v6958_v8 = vpop.eup %6957  ;;  %v2081_v41 = vpop.xlane.xlu0 %2080  ;;  %6971 = vrcp.f32 %v2156_v11  ;;  %v7515_v11 = vld [vmem:[%s11895_s0 + $0x90] sm:$0xff] }
 0x34f   :  { %v2155_v28 = vmax.f32 %v2081_v41, 1e-12  ;;  %v2275_v20 = vmul.f32 %v6958_v8, %v9361_v37  ;;  %v6960_v22 = vpop.eup %6959  ;;  %v7517_v8 = vld [vmem:[%s11895_s0 + $0xa0] sm:$0xff] }
 0x350   :  { %v2096_v59 = vpop.xlane.xlu1 %2095  ;;  %v2278_v37 = vmul.f32 %v6960_v22, %v12163_v45  ;;  %v7526_v45 = vld [vmem:[%s11895_s0 + $0xe8] sm:$0xff] }
 0x351   :  { %6973 = vrcp.f32 %v2155_v28  ;;  %6191 = vmatprep.mubr.msk.f32.mxu1 %vm688_vm1, %v2275_v20  ;;  %v2160_v5 = vmax.f32 %v2096_v59, 1e-12  ;;  %v7518_v28 = vld [vmem:[%s11895_s0 + $0xa8] sm:$0xff]  ;;  %v7519_v20 = vld [vmem:[%s11895_s0 + $0xb0] sm:$0xff] }
 0x352   :  { %v6962_v25 = vpop.eup %6961  ;;  %6192 = vmatmul.mubr.msk.f32.gmra.mxu1 %vm688_vm1, %v2276_v14  ;;  %v2087_v55 = vpop.xlane.xlu0 %2086  ;;  %6975 = vrcp.f32 %v2158_v24  ;;  %v7521_v14 = vld [vmem:[%s11895_s0 + $0xc0] sm:$0xff] }
 0x353   :  { %v2157_v63 = vmax.f32 %v2087_v55, 1e-12  ;;  %v2277_v6 = vmul.f32 %v6962_v25, %v9364_v12  ;;  %v6964_v54 = vpop.eup %6963  ;;  %v7522_v25 = vld [vmem:[%s11895_s0 + $0xc8] sm:$0xff]  ;;  %v7523_v55 = vld [vmem:[%s11895_s0 + $0xd0] sm:$0xff] }
 0x354   :  { %v2280_v23 = vmul.f32 %v6964_v54, %v9314_v30  ;;  %v7527_v54 = vld [vmem:[%s11895_s0 + $0xf0] sm:$0xff] }
 0x355   :  { %6977 = vrcp.f32 %v2157_v63  ;;  %6194 = vmatprep.mubr.msk.f32.mxu1 %vm688_vm1, %v2277_v6  ;;  %v7524_v6 = vld [vmem:[%s11895_s0 + $0xd8] sm:$0xff] }
 0x356   :  { %v6966_v33 = vpop.eup %6965  ;;  %6195 = vmatmul.mubr.msk.f32.gmra.mxu1 %vm688_vm1, %v2278_v37  ;;  %v2093_v27 = vpop.xlane.xlu0 %2092  ;;  %6979 = vrcp.f32 %v2160_v5  ;;  %v7525_v5 = vld [vmem:[%s11895_s0 + $0xe0] sm:$0xff] }
 0x357   :  { %v2279_v44 = vmul.f32 %v6966_v33, %v9388_v2  ;;  %v2159_v15 = vmax.f32 %v2093_v27, 1e-12  ;;  %v6968_v42 = vpop.eup %6967  ;;  %v7528_v27 = vld [vmem:[%s11895_s0 + $0xf8] sm:$0xff] }
 0x358   :  { %v2282_v3 = vmul.f32 %v6968_v42, %v12164_v16  ;;  %v7530_v42 = vld [vmem:[%s11895_s0 + $0x108] sm:$0xff] }
 0x359   :  { %6197 = vmatprep.mubr.msk.f32.mxu1 %vm688_vm1, %v2279_v44  ;;  %6981 = vrcp.f32 %v2159_v15  ;;  %v7529_v15 = vld [vmem:[%s11895_s0 + $0x100] sm:$0xff] }
 0x35a   :  { %v6970_v12 = vpop.eup %6969  ;;  %6198 = vmatmul.mubr.msk.f32.gmra.mxu1 %vm688_vm1, %v2280_v23 }
 0x35b   :  { %v2281_v7 = vmul.f32 %v6970_v12, %v9394_v48  ;;  %v6972_v1 = vpop.eup %6971 }
 0x35c   :  { %v2284_v30 = vmul.f32 %v6972_v1, %v9373_v43  ;;  %v7533_v1 = vld [vmem:[%s11895_s0 + $0x120] sm:$0xff] }
 0x35d   :  { %6200 = vmatprep.mubr.msk.f32.mxu1 %vm688_vm1, %v2281_v7  ;;  %v7531_v7 = vld [vmem:[%s11895_s0 + $0x110] sm:$0xff] }
 0x35e   :  { %v6974_v49 = vpop.eup %6973  ;;  %6201 = vmatmul.mubr.msk.f32.gmra.mxu1 %vm688_vm1, %v2282_v3  ;;  %v7532_v3 = vld [vmem:[%s11895_s0 + $0x118] sm:$0xff] }
 0x35f   :  { %v2283_v2 = vmul.f32 %v6974_v49, %v9409_v10  ;;  %v6976_v32 = vpop.eup %6975 }
 0x360   :  { %v2286_v40 = vmul.f32 %v6976_v32, %v9400_v29  ;;  %v7498_v29 = vld [vmem:[%s11895_s0 + $0x8] sm:$0xff] }
 0x361   :  { %6203 = vmatprep.mubr.msk.f32.mxu1 %vm688_vm1, %v2283_v2  ;;  %v7534_v2 = vld [vmem:[%s11895_s0 + $0x128] sm:$0xff] }
 0x362   :  { %v6978_v31 = vpop.eup %6977  ;;  %6204 = vmatmul.mubr.msk.f32.gmra.mxu1 %vm688_vm1, %v2284_v30  ;;  %v7535_v30 = vld [vmem:[%s11895_s0 + $0x130] sm:$0xff] }
 0x363   :  { %v2285_v48 = vmul.f32 %v6978_v31, %v9416_v26  ;;  %v6980_v17 = vpop.eup %6979  ;;  %v7497_v26 = vld [vmem:[%s11895_s0] sm:$0xff]  ;;  %v7536_v31 = vld [vmem:[%s11895_s0 + $0x138] sm:$0xff] }
 0x364   :  { %v2288_v43 = vmul.f32 %v6980_v17, %v9419_v4  ;;  %v7499_v4 = vld [vmem:[%s11895_s0 + $0x10] sm:$0xff] }
 0x365   :  { %6206 = vmatprep.mubr.msk.f32.mxu1 %vm688_vm1, %v2285_v48 }
 0x366   :  { %v6982_v35 = vpop.eup %6981  ;;  %6207 = vmatmul.mubr.msk.f32.gmra.mxu1 %vm688_vm1, %v2286_v40  ;;  %v7537_v40 = vld [vmem:[%s11895_s0 + $0x140] sm:$0xff] }
 0x367   :  { %v2287_v10 = vmul.f32 %v6982_v35, %v9450_v21  ;;  %v7500_v21 = vld [vmem:[%s11895_s0 + $0x18] sm:$0xff]  ;;  %v7538_v35 = vld [vmem:[%s11895_s0 + $0x148] sm:$0xff] }
 0x369   :  { %6209 = vmatprep.mubr.msk.f32.mxu1 %vm688_vm1, %v2287_v10  ;;  %v7539_v10 = vld [vmem:[%s11895_s0 + $0x150] sm:$0xff] }
 0x36a   :  { %6210 = vmatmul.mubr.msk.f32.gmra.mxu1 %vm688_vm1, %v2288_v43 }
 0x36b   :  { %6244 = vmatprep.mubr.msk.f32.mxu1 %vm101_vm0, %v7497_v26  ;;  %v7540_v26 = vld [vmem:[%s11895_s0 + $0x158] sm:$0xff] }
 0x36e   :  { %6245 = vmatmul.mubr.msk.f32.vlgmr.msra.gmra.mxu1 %vm101_vm0, %v7498_v29  ;;  %v7541_v29 = vld [vmem:[%s11895_s0 + $0x160] sm:$0xff] }
 0x36f   :  { %6247 = vmatprep.mubr.msk.f32.mxu1 %vm101_vm0, %v7499_v4 }
 0x372   :  { %6248 = vmatmul.mubr.msk.f32.gmra.mxu1 %vm101_vm0, %v7500_v21  ;;  %v7542_v21 = vld [vmem:[%s11895_s0 + $0x168] sm:$0xff] }
 0x373   :  { %6250 = vmatprep.mubr.msk.f32.mxu1 %vm101_vm0, %v7501_v19 }
 0x376   :  { %6251 = vmatmul.mubr.msk.f32.gmra.mxu1 %vm101_vm0, %v7502_v52  ;;  %v7543_v52 = vld [vmem:[%s11895_s0 + $0x170] sm:$0xff] }
 0x377   :  { %6253 = vmatprep.mubr.msk.f32.mxu1 %vm101_vm0, %v7503_v56 }
 0x37a   :  { %6254 = vmatmul.mubr.msk.f32.gmra.mxu1 %vm101_vm0, %v7504_v34  ;;  %v7544_v34 = vld [vmem:[%s11895_s0 + $0x178] sm:$0xff] }
 0x37b   :  { %6256 = vmatprep.mubr.msk.f32.mxu1 %vm101_vm0, %v7505_v13  ;;  %v7545_v13 = vld [vmem:[%s11895_s0 + $0x180] sm:$0xff] }
 0x37e   :  { %6257 = vmatmul.mubr.msk.f32.gmra.mxu1 %vm101_vm0, %v7506_v53 }
 0x37f   :  { %6259 = vmatprep.mubr.msk.f32.mxu1 %vm101_vm0, %v7507_v50  ;;  %v7546_v50 = vld [vmem:[%s11895_s0 + $0x188] sm:$0xff] }
 0x382   :  { %6260 = vmatmul.mubr.msk.f32.gmra.mxu1 %vm101_vm0, %v7508_v46  ;;  %v6118_v47 = vpop.f32.mrf.mxu1 }
 0x383   :  { %6262 = vmatprep.mubr.msk.f32.mxu1 %vm101_vm0, %v7509_v57  ;;  %5160 = vst.msk [vmem:[%s11898_s3 + $0x8] sm:$0xff] %vm101_vm0, %v6118_v47  ;;  %v7547_v47 = vld [vmem:[%s11895_s0 + $0x190] sm:$0xff] }
 0x384   :  { %v2547_v51 = vpop.f32.mrf.mxu1 }
 0x385   :  { %5159 = vst.msk [vmem:[%s11898_s3] sm:$0xff] %vm101_vm0, %v2547_v51  ;;  %v7548_v51 = vld [vmem:[%s11895_s0 + $0x198] sm:$0xff] }
 0x386   :  { %6263 = vmatmul.mubr.msk.f32.gmra.mxu1 %vm101_vm0, %v7510_v62  ;;  %v7549_v62 = vld [vmem:[%s11895_s0 + $0x1a0] sm:$0xff] }
 0x387   :  { %6265 = vmatprep.mubr.msk.f32.mxu1 %vm101_vm0, %v7511_v0 }
 0x389   :  { %v6121_v58 = vpop.f32.mrf.mxu1 }
 0x38a   :  { %6266 = vmatmul.mubr.msk.f32.gmra.mxu1 %vm101_vm0, %v7512_v9  ;;  %5162 = vst.msk [vmem:[%s11898_s3 + $0x18] sm:$0xff] %vm101_vm0, %v6121_v58  ;;  %v7550_v58 = vld [vmem:[%s11895_s0 + $0x1a8] sm:$0xff]  ;;  %v7551_v9 = vld [vmem:[%s11895_s0 + $0x1b0] sm:$0xff] }
 0x38b   :  { %6268 = vmatprep.mubr.msk.f32.mxu1 %vm101_vm0, %v7513_v36  ;;  %v2557_v38 = vpop.f32.mrf.mxu1 }
 0x38c   :  { %5161 = vst.msk [vmem:[%s11898_s3 + $0x10] sm:$0xff] %vm101_vm0, %v2557_v38  ;;  %v7552_v38 = vld [vmem:[%s11895_s0 + $0x1b8] sm:$0xff] }
 0x38e   :  { %6269 = vmatmul.mubr.msk.f32.gmra.mxu1 %vm101_vm0, %v7514_v39 }
 0x38f   :  { %6271 = vmatprep.mubr.msk.f32.mxu1 %vm101_vm0, %v7515_v11  ;;  %v7553_v11 = vld [vmem:[%s11895_s0 + $0x1c0] sm:$0xff] }
 0x391   :  { %v6124_v61 = vpop.f32.mrf.mxu1 }
 0x392   :  { %6272 = vmatmul.mubr.msk.f32.gmra.mxu1 %vm101_vm0, %v7516_v18  ;;  %5164 = vst.msk [vmem:[%s11898_s3 + $0x28] sm:$0xff] %vm101_vm0, %v6124_v61  ;;  %v7554_v18 = vld [vmem:[%s11895_s0 + $0x1c8] sm:$0xff] }
 0x393   :  { %6274 = vmatprep.mubr.msk.f32.mxu1 %vm101_vm0, %v7517_v8  ;;  %v2567_v41 = vpop.f32.mrf.mxu1 }
 0x394   :  { %5163 = vst.msk [vmem:[%s11898_s3 + $0x20] sm:$0xff] %vm101_vm0, %v2567_v41  ;;  %v7555_v41 = vld [vmem:[%s11895_s0 + $0x1d0] sm:$0xff] }
 0x396   :  { %6275 = vmatmul.mubr.msk.f32.gmra.mxu1 %vm101_vm0, %v7518_v28 }
 0x397   :  { %6277 = vmatprep.mubr.msk.f32.mxu1 %vm101_vm0, %v7519_v20  ;;  %v7556_v20 = vld [vmem:[%s11895_s0 + $0x1d8] sm:$0xff] }
 0x399   :  { %v6127_v24 = vpop.f32.mrf.mxu1 }
 0x39a   :  { %6278 = vmatmul.mubr.msk.f32.gmra.mxu1 %vm101_vm0, %v7520_v60  ;;  %5166 = vst.msk [vmem:[%s11898_s3 + $0x38] sm:$0xff] %vm101_vm0, %v6127_v24  ;;  %v7557_v24 = vld [vmem:[%s11895_s0 + $0x1e0] sm:$0xff] }
 0x39b   :  { %6280 = vmatprep.mubr.msk.f32.mxu1 %vm101_vm0, %v7521_v14  ;;  %v2577_v22 = vpop.f32.mrf.mxu1  ;;  %v7558_v14 = vld [vmem:[%s11895_s0 + $0x1e8] sm:$0xff] }
 0x39c   :  { %5165 = vst.msk [vmem:[%s11898_s3 + $0x30] sm:$0xff] %vm101_vm0, %v2577_v22  ;;  %v7559_v22 = vld [vmem:[%s11895_s0 + $0x1f0] sm:$0xff] }
 0x39d   :  { %v6130_v59 = vpop.f32.mrf.mxu1 }
 0x39e   :  { %6281 = vmatmul.mubr.msk.f32.gmra.mxu1 %vm101_vm0, %v7522_v25  ;;  %5168 = vst.msk [vmem:[%s11898_s3 + $0x48] sm:$0xff] %vm101_vm0, %v6130_v59 }
 0x39f   :  { %6283 = vmatprep.mubr.msk.f32.mxu1 %vm101_vm0, %v7523_v55  ;;  %v2587_v63 = vpop.f32.mrf.mxu1  ;;  %v7560_v55 = vld [vmem:[%s11895_s0 + $0x1f8] sm:$0xff] }
 0x3a0   :  { %5167 = vst.msk [vmem:[%s11898_s3 + $0x40] sm:$0xff] %vm101_vm0, %v2587_v63 }
 0x3a2   :  { %6284 = vmatmul.mubr.msk.f32.gmra.mxu1 %vm101_vm0, %v7524_v6 }
 0x3a3   :  { %6286 = vmatprep.mubr.msk.f32.mxu1 %vm101_vm0, %v7525_v5 }
 0x3a4   :  { %v6133_v37 = vpop.f32.mrf.mxu1 }
 0x3a5   :  { %5170 = vst.msk [vmem:[%s11898_s3 + $0x58] sm:$0xff] %vm101_vm0, %v6133_v37 }
 0x3a6   :  { %6287 = vmatmul.mubr.msk.f32.gmra.mxu1 %vm101_vm0, %v7526_v45  ;;  %v2597_v33 = vpop.f32.mrf.mxu1 }
 0x3a7   :  { %6289 = vmatprep.mubr.msk.f32.mxu1 %vm101_vm0, %v7527_v54  ;;  %5169 = vst.msk [vmem:[%s11898_s3 + $0x50] sm:$0xff] %vm101_vm0, %v2597_v33 }
 0x3a9   :  { %v6136_v44 = vpop.f32.mrf.mxu1 }
 0x3aa   :  { %6290 = vmatmul.mubr.msk.f32.gmra.mxu1 %vm101_vm0, %v7528_v27  ;;  %5172 = vst.msk [vmem:[%s11898_s3 + $0x68] sm:$0xff] %vm101_vm0, %v6136_v44 }
 0x3ab   :  { %6292 = vmatprep.mubr.msk.f32.mxu1 %vm101_vm0, %v7529_v15  ;;  %v2607_v23 = vpop.f32.mrf.mxu1 }
 0x3ac   :  { %5171 = vst.msk [vmem:[%s11898_s3 + $0x60] sm:$0xff] %vm101_vm0, %v2607_v23 }
 0x3ae   :  { %6293 = vmatmul.mubr.msk.f32.gmra.mxu1 %vm101_vm0, %v7530_v42  ;;  %v6139_v12 = vpop.f32.mrf.mxu1 }
 0x3af   :  { %6295 = vmatprep.mubr.msk.f32.mxu1 %vm101_vm0, %v7531_v7  ;;  %5174 = vst.msk [vmem:[%s11898_s3 + $0x78] sm:$0xff] %vm101_vm0, %v6139_v12 }
 0x3b0   :  { %v2617_v16 = vpop.f32.mrf.mxu1 }
 0x3b1   :  { %5173 = vst.msk [vmem:[%s11898_s3 + $0x70] sm:$0xff] %vm101_vm0, %v2617_v16 }
 0x3b2   :  { %6296 = vmatmul.mubr.msk.f32.gmra.mxu1 %vm101_vm0, %v7532_v3 }
 0x3b3   :  { %6298 = vmatprep.mubr.msk.f32.mxu1 %vm101_vm0, %v7533_v1 }
 0x3b5   :  { %v6142_v49 = vpop.f32.mrf.mxu1 }
 0x3b6   :  { %6299 = vmatmul.mubr.msk.f32.gmra.mxu1 %vm101_vm0, %v7534_v2  ;;  %5176 = vst.msk [vmem:[%s11898_s3 + $0x88] sm:$0xff] %vm101_vm0, %v6142_v49 }
 0x3b7   :  { %6301 = vmatprep.mubr.msk.f32.mxu1 %vm101_vm0, %v7535_v30  ;;  %v2627_v32 = vpop.f32.mrf.mxu1 }
 0x3b8   :  { %5175 = vst.msk [vmem:[%s11898_s3 + $0x80] sm:$0xff] %vm101_vm0, %v2627_v32 }
 0x3b9   :  { %v6145_v48 = vpop.f32.mrf.mxu1 }
 0x3ba   :  { %6302 = vmatmul.mubr.msk.f32.gmra.mxu1 %vm101_vm0, %v7536_v31  ;;  %5178 = vst.msk [vmem:[%s11898_s3 + $0x98] sm:$0xff] %vm101_vm0, %v6145_v48 }
 0x3bb   :  { %6304 = vmatprep.mubr.msk.f32.mxu1 %vm101_vm0, %v7537_v40  ;;  %v2637_v17 = vpop.f32.mrf.mxu1 }
 0x3bc   :  { %5177 = vst.msk [vmem:[%s11898_s3 + $0x90] sm:$0xff] %vm101_vm0, %v2637_v17  ;;  %v3299_v17 = vlaneseq }
 0x3be   :  { %6305 = vmatmul.mubr.msk.f32.gmra.mxu1 %vm101_vm0, %v7538_v35 }
 0x3bf   :  { %6307 = vmatprep.mubr.msk.f32.mxu1 %vm101_vm0, %v7539_v10 }
 0x3c0   :  { %v6148_v43 = vpop.f32.mrf.mxu1 }
 0x3c1   :  { %5180 = vst.msk [vmem:[%s11898_s3 + $0xa8] sm:$0xff] %vm101_vm0, %v6148_v43  ;;  %v10171_v43 = vand.u32 127, %v3299_v17 }
 0x3c2   :  { %6308 = vmatmul.mubr.msk.f32.gmra.mxu1 %vm101_vm0, %v7540_v26  ;;  %v2647_v4 = vpop.f32.mrf.mxu1 }
 0x3c3   :  { %6310 = vmatprep.mubr.msk.f32.mxu1 %vm101_vm0, %v7541_v29  ;;  %5179 = vst.msk [vmem:[%s11898_s3 + $0xa0] sm:$0xff] %vm101_vm0, %v2647_v4  ;;  %vm3301_vm2 = vcmp.lt.s32.totalorder %v10171_v43, 3 }
 0x3c5   :  { %v6151_v19 = vpop.f32.mrf.mxu1 }
 0x3c6   :  { %6311 = vmatmul.mubr.msk.f32.gmra.mxu1 %vm101_vm0, %v7542_v21  ;;  %5182 = vst.msk [vmem:[%s11898_s3 + $0xb8] sm:$0xff] %vm101_vm0, %v6151_v19 }
 0x3c7   :  { %6313 = vmatprep.mubr.msk.f32.mxu1 %vm101_vm0, %v7543_v52  ;;  %v2657_v56 = vpop.f32.mrf.mxu1 }
 0x3c8   :  { %5181 = vst.msk [vmem:[%s11898_s3 + $0xb0] sm:$0xff] %vm101_vm0, %v2657_v56 }
 0x3ca   :  { %6314 = vmatmul.mubr.msk.f32.gmra.mxu1 %vm101_vm0, %v7544_v34 }
 0x3cb   :  { %6316 = vmatprep.mubr.msk.f32.mxu1 %vm101_vm0, %v7545_v13 }
 0x3cc   :  { %v6154_v53 = vpop.f32.mrf.mxu1 }
 0x3cd   :  { %5184 = vst.msk [vmem:[%s11898_s3 + $0xc8] sm:$0xff] %vm101_vm0, %v6154_v53 }
 0x3ce   :  { %6317 = vmatmul.mubr.msk.f32.gmra.mxu1 %vm101_vm0, %v7546_v50  ;;  %v2667_v46 = vpop.f32.mrf.mxu1 }
 0x3cf   :  { %6319 = vmatprep.mubr.msk.f32.mxu1 %vm101_vm0, %v7547_v47  ;;  %5183 = vst.msk [vmem:[%s11898_s3 + $0xc0] sm:$0xff] %vm101_vm0, %v2667_v46 }
 0x3d2   :  { %v6157_v57 = vpop.f32.mrf.mxu1  ;;  %6320 = vmatmul.mubr.msk.f32.gmra.mxu1 %vm101_vm0, %v7548_v51 }
 0x3d3   :  { %5186 = vst.msk [vmem:[%s11898_s3 + $0xd8] sm:$0xff] %vm101_vm0, %v6157_v57  ;;  %6322 = vmatprep.mubr.msk.f32.mxu1 %vm101_vm0, %v7549_v62 }
 0x3d4   :  { %v2677_v0 = vpop.f32.mrf.mxu1 }
 0x3d5   :  { %5185 = vst.msk [vmem:[%s11898_s3 + $0xd0] sm:$0xff] %vm101_vm0, %v2677_v0 }
 0x3d6   :  { %6323 = vmatmul.mubr.msk.f32.gmra.mxu1 %vm101_vm0, %v7550_v58 }
 0x3d7   :  { %6325 = vmatprep.mubr.msk.f32.mxu1 %vm101_vm0, %v7551_v9 }
 0x3d8   :  { %v6160_v36 = vpop.f32.mrf.mxu1 }
 0x3d9   :  { %5188 = vst.msk [vmem:[%s11898_s3 + $0xe8] sm:$0xff] %vm101_vm0, %v6160_v36 }
 0x3da   :  { %6326 = vmatmul.mubr.msk.f32.gmra.mxu1 %vm101_vm0, %v7552_v38  ;;  %v2687_v39 = vpop.f32.mrf.mxu1 }
 0x3db   :  { %6328 = vmatprep.mubr.msk.f32.mxu1 %vm101_vm0, %v7553_v11  ;;  %5187 = vst.msk [vmem:[%s11898_s3 + $0xe0] sm:$0xff] %vm101_vm0, %v2687_v39 }
 0x3dc   :  { %v6163_v61 = vpop.f32.mrf.mxu1 }
 0x3dd   :  { %5190 = vst.msk [vmem:[%s11898_s3 + $0xf8] sm:$0xff] %vm101_vm0, %v6163_v61 }
 0x3de   :  { %6329 = vmatmul.mubr.msk.f32.gmra.mxu1 %vm101_vm0, %v7554_v18  ;;  %v2697_v8 = vpop.f32.mrf.mxu1 }
 0x3df   :  { %6331 = vmatprep.mubr.msk.f32.mxu1 %vm101_vm0, %v7555_v41  ;;  %5189 = vst.msk [vmem:[%s11898_s3 + $0xf0] sm:$0xff] %vm101_vm0, %v2697_v8 }
 0x3e2   :  { %v6166_v28 = vpop.f32.mrf.mxu1  ;;  %6332 = vmatmul.mubr.msk.f32.gmra.mxu1 %vm101_vm0, %v7556_v20 }
 0x3e3   :  { %5192 = vst.msk [vmem:[%s11898_s3 + $0x108] sm:$0xff] %vm101_vm0, %v6166_v28  ;;  %6334 = vmatprep.mubr.msk.f32.mxu1 %vm101_vm0, %v7557_v24 }
 0x3e4   :  { %v2707_v60 = vpop.f32.mrf.mxu1 }
 0x3e5   :  { %5191 = vst.msk [vmem:[%s11898_s3 + $0x100] sm:$0xff] %vm101_vm0, %v2707_v60 }
 0x3e6   :  { %6335 = vmatmul.mubr.msk.f32.gmra.mxu1 %vm101_vm0, %v7558_v14 }
 0x3e7   :  { %6337 = vmatprep.mubr.msk.f32.mxu1 %vm101_vm0, %v7559_v22  ;;  %v6169_v59 = vpop.f32.mrf.mxu1 }
 0x3e8   :  { %5194 = vst.msk [vmem:[%s11898_s3 + $0x118] sm:$0xff] %vm101_vm0, %v6169_v59 }
 0x3e9   :  { %v2717_v25 = vpop.f32.mrf.mxu1 }
 0x3ea   :  { %6338 = vmatmul.mubr.msk.f32.gmra.mxu1 %vm101_vm0, %v7560_v55  ;;  %5193 = vst.msk [vmem:[%s11898_s3 + $0x110] sm:$0xff] %vm101_vm0, %v2717_v25 }
 0x3ec   :  { %v6172_v63 = vpop.f32.mrf.mxu1 }
 0x3ed   :  { %5196 = vst.msk [vmem:[%s11898_s3 + $0x128] sm:$0xff] %vm101_vm0, %v6172_v63 }
 0x3ee   :  { %v2727_v6 = vpop.f32.mrf.mxu1 }
 0x3ef   :  { %5195 = vst.msk [vmem:[%s11898_s3 + $0x120] sm:$0xff] %vm101_vm0, %v2727_v6 }
 0x3f1   :  { %v6175_v5 = vpop.f32.mrf.mxu1 }
 0x3f2   :  { %5198 = vst.msk [vmem:[%s11898_s3 + $0x138] sm:$0xff] %vm101_vm0, %v6175_v5 }
 0x3f3   :  { %v2737_v45 = vpop.f32.mrf.mxu1 }
 0x3f4   :  { %5197 = vst.msk [vmem:[%s11898_s3 + $0x130] sm:$0xff] %vm101_vm0, %v2737_v45 }
 0x3f7   :  { %v6178_v37 = vpop.f32.mrf.mxu1 }
 0x3f8   :  { %5200 = vst.msk [vmem:[%s11898_s3 + $0x148] sm:$0xff] %vm101_vm0, %v6178_v37 }
 0x3f9   :  { %v2747_v54 = vpop.f32.mrf.mxu1 }
 0x3fa   :  { %5199 = vst.msk [vmem:[%s11898_s3 + $0x140] sm:$0xff] %vm101_vm0, %v2747_v54 }
 0x3fd   :  { %v6181_v33 = vpop.f32.mrf.mxu1 }
 0x3fe   :  { %5202 = vst.msk [vmem:[%s11898_s3 + $0x158] sm:$0xff] %vm101_vm0, %v6181_v33 }
 0x3ff   :  { %v2757_v27 = vpop.f32.mrf.mxu1 }
 0x400   :  { %5201 = vst.msk [vmem:[%s11898_s3 + $0x150] sm:$0xff] %vm101_vm0, %v2757_v27 }
 0x401   :  { %v6184_v44 = vpop.f32.mrf.mxu1 }
 0x402   :  { %5204 = vst.msk [vmem:[%s11898_s3 + $0x168] sm:$0xff] %vm101_vm0, %v6184_v44 }
 0x403   :  { %v2767_v15 = vpop.f32.mrf.mxu1 }
 0x404   :  { %5203 = vst.msk [vmem:[%s11898_s3 + $0x160] sm:$0xff] %vm101_vm0, %v2767_v15 }
 0x406   :  { %v6187_v23 = vpop.f32.mrf.mxu1 }
 0x407   :  { %5206 = vst.msk [vmem:[%s11898_s3 + $0x178] sm:$0xff] %vm101_vm0, %v6187_v23 }
 0x408   :  { %v2777_v42 = vpop.f32.mrf.mxu1 }
 0x409   :  { %5205 = vst.msk [vmem:[%s11898_s3 + $0x170] sm:$0xff] %vm101_vm0, %v2777_v42 }
 0x40b   :  { %v6190_v12 = vpop.f32.mrf.mxu1 }
 0x40c   :  { %5208 = vst.msk [vmem:[%s11898_s3 + $0x188] sm:$0xff] %vm101_vm0, %v6190_v12 }
 0x40d   :  { %v2787_v7 = vpop.f32.mrf.mxu1 }
 0x40e   :  { %5207 = vst.msk [vmem:[%s11898_s3 + $0x180] sm:$0xff] %vm101_vm0, %v2787_v7 }
 0x412   :  { %v6193_v16 = vpop.f32.mrf.mxu1 }
 0x413   :  { %5210 = vst.msk [vmem:[%s11898_s3 + $0x198] sm:$0xff] %vm101_vm0, %v6193_v16 }
 0x414   :  { %v2797_v3 = vpop.f32.mrf.mxu1 }
 0x415   :  { %5209 = vst.msk [vmem:[%s11898_s3 + $0x190] sm:$0xff] %vm101_vm0, %v2797_v3 }
 0x416   :  { %v6196_v1 = vpop.f32.mrf.mxu1 }
 0x417   :  { %5212 = vst.msk [vmem:[%s11898_s3 + $0x1a8] sm:$0xff] %vm101_vm0, %v6196_v1 }
 0x418   :  { %v2807_v49 = vpop.f32.mrf.mxu1 }
 0x419   :  { %5211 = vst.msk [vmem:[%s11898_s3 + $0x1a0] sm:$0xff] %vm101_vm0, %v2807_v49 }
 0x41a   :  { %v6199_v2 = vpop.f32.mrf.mxu1 }
 0x41b   :  { %5214 = vst.msk [vmem:[%s11898_s3 + $0x1b8] sm:$0xff] %vm101_vm0, %v6199_v2 }
 0x41c   :  { %v2817_v30 = vpop.f32.mrf.mxu1 }
 0x41d   :  { %5213 = vst.msk [vmem:[%s11898_s3 + $0x1b0] sm:$0xff] %vm101_vm0, %v2817_v30 }
 0x41e   :  { %v6202_v32 = vpop.f32.mrf.mxu1 }
 0x41f   :  { %5216 = vst.msk [vmem:[%s11898_s3 + $0x1c8] sm:$0xff] %vm101_vm0, %v6202_v32 }
 0x420   :  { %v2827_v31 = vpop.f32.mrf.mxu1 }
 0x421   :  { %5215 = vst.msk [vmem:[%s11898_s3 + $0x1c0] sm:$0xff] %vm101_vm0, %v2827_v31 }
 0x422   :  { %v6205_v48 = vpop.f32.mrf.mxu1 }
 0x423   :  { %5218 = vst.msk [vmem:[%s11898_s3 + $0x1d8] sm:$0xff] %vm101_vm0, %v6205_v48 }
 0x424   :  { %v2837_v40 = vpop.f32.mrf.mxu1 }
 0x425   :  { %5217 = vst.msk [vmem:[%s11898_s3 + $0x1d0] sm:$0xff] %vm101_vm0, %v2837_v40 }
 0x426   :  { %v6208_v35 = vpop.f32.mrf.mxu1 }
 0x427   :  { %5220 = vst.msk [vmem:[%s11898_s3 + $0x1e8] sm:$0xff] %vm101_vm0, %v6208_v35 }
 0x428   :  { %v2847_v10 = vpop.f32.mrf.mxu1 }
 0x429   :  { %5219 = vst.msk [vmem:[%s11898_s3 + $0x1e0] sm:$0xff] %vm101_vm0, %v2847_v10 }
 0x42a   :  { %v6211_v26 = vpop.f32.mrf.mxu1 }
 0x42b   :  { %5222 = vst.msk [vmem:[%s11898_s3 + $0x1f8] sm:$0xff] %vm101_vm0, %v6211_v26 }
 0x42c   :  { %v2857_v29 = vpop.f32.mrf.mxu1 }
 0x42d   :  { %5221 = vst.msk [vmem:[%s11898_s3 + $0x1f0] sm:$0xff] %vm101_vm0, %v2857_v29 }
 0x42e   :  { %v6246_v4 = vpop.f32.mrf.mxu1 }
 0x42f   :  { %v10188_v21 = vsel %vm3301_vm2, %v6246_v4, -1e+30 }
 0x430   :  { %3368 = vmax.xlane.f32.xlu1 %v10188_v21  ;;  %v2980_v19 = vpop.f32.mrf.mxu1 }
 0x431   :  { %v10193_v52 = vsel %vm3301_vm2, %v2980_v19, -1e+30 }
 0x432   :  { %3366 = vmax.xlane.f32.xlu0 %v10193_v52  ;;  %v6249_v56 = vpop.f32.mrf.mxu1 }
 0x433   :  { %v10198_v34 = vsel %vm3301_vm2, %v6249_v56, -1e+30 }
 0x434   :  { %3372 = vmax.xlane.f32.xlu1 %v10198_v34  ;;  %v2990_v13 = vpop.f32.mrf.mxu1 }
 0x435   :  { %v10203_v53 = vsel %vm3301_vm2, %v2990_v13, -1e+30 }
 0x436   :  { %3370 = vmax.xlane.f32.xlu0 %v10203_v53  ;;  %v6252_v50 = vpop.f32.mrf.mxu1 }
 0x437   :  { %v10208_v46 = vsel %vm3301_vm2, %v6252_v50, -1e+30 }
 0x438   :  { %3376 = vmax.xlane.f32.xlu1 %v10208_v46  ;;  %v3000_v47 = vpop.f32.mrf.mxu1 }
 0x439   :  { %v10213_v57 = vsel %vm3301_vm2, %v3000_v47, -1e+30 }
 0x43a   :  { %3374 = vmax.xlane.f32.xlu0 %v10213_v57  ;;  %v6255_v51 = vpop.f32.mrf.mxu1 }
 0x43b   :  { %v10218_v62 = vsel %vm3301_vm2, %v6255_v51, -1e+30 }
 0x43c   :  { %3380 = vmax.xlane.f32.xlu1 %v10218_v62  ;;  %v3010_v0 = vpop.f32.mrf.mxu1 }
 0x43d   :  { %v10223_v58 = vsel %vm3301_vm2, %v3010_v0, -1e+30 }
 0x43e   :  { %3378 = vmax.xlane.f32.xlu0 %v10223_v58  ;;  %v6258_v9 = vpop.f32.mrf.mxu1 }
 0x43f   :  { %v10228_v36 = vsel %vm3301_vm2, %v6258_v9, -1e+30 }
 0x440   :  { %3384 = vmax.xlane.f32.xlu1 %v10228_v36  ;;  %v3020_v38 = vpop.f32.mrf.mxu1 }
 0x441   :  { %v10233_v39 = vsel %vm3301_vm2, %v3020_v38, -1e+30 }
 0x442   :  { %3382 = vmax.xlane.f32.xlu0 %v10233_v39  ;;  %v6261_v11 = vpop.f32.mrf.mxu1 }
 0x443   :  { %v10238_v61 = vsel %vm3301_vm2, %v6261_v11, -1e+30 }
 0x444   :  { %3388 = vmax.xlane.f32.xlu1 %v10238_v61  ;;  %v3030_v18 = vpop.f32.mrf.mxu1 }
 0x445   :  { %v10243_v8 = vsel %vm3301_vm2, %v3030_v18, -1e+30 }
 0x446   :  { %3386 = vmax.xlane.f32.xlu0 %v10243_v8  ;;  %v6264_v41 = vpop.f32.mrf.mxu1 }
 0x447   :  { %v10248_v28 = vsel %vm3301_vm2, %v6264_v41, -1e+30 }
 0x448   :  { %3392 = vmax.xlane.f32.xlu1 %v10248_v28  ;;  %v3040_v20 = vpop.f32.mrf.mxu1 }
 0x449   :  { %v10253_v24 = vsel %vm3301_vm2, %v3040_v20, -1e+30 }
 0x44a   :  { %3390 = vmax.xlane.f32.xlu0 %v10253_v24  ;;  %v6267_v60 = vpop.f32.mrf.mxu1 }
 0x44b   :  { %v10258_v14 = vsel %vm3301_vm2, %v6267_v60, -1e+30 }
 0x44c   :  { %3396 = vmax.xlane.f32.xlu1 %v10258_v14  ;;  %v3050_v22 = vpop.f32.mrf.mxu1 }
 0x44d   :  { %v10263_v59 = vsel %vm3301_vm2, %v3050_v22, -1e+30 }
 0x44e   :  { %3394 = vmax.xlane.f32.xlu0 %v10263_v59  ;;  %v6270_v25 = vpop.f32.mrf.mxu1 }
 0x44f   :  { %v10268_v55 = vsel %vm3301_vm2, %v6270_v25, -1e+30 }
 0x450   :  { %3400 = vmax.xlane.f32.xlu1 %v10268_v55  ;;  %v3060_v63 = vpop.f32.mrf.mxu1 }
 0x451   :  { %v10273_v6 = vsel %vm3301_vm2, %v3060_v63, -1e+30 }
 0x452   :  { %3398 = vmax.xlane.f32.xlu0 %v10273_v6  ;;  %v6273_v5 = vpop.f32.mrf.mxu1 }
 0x453   :  { %v10278_v45 = vsel %vm3301_vm2, %v6273_v5, -1e+30 }
 0x454   :  { %3404 = vmax.xlane.f32.xlu1 %v10278_v45  ;;  %v3070_v37 = vpop.f32.mrf.mxu1 }
 0x455   :  { %v10283_v54 = vsel %vm3301_vm2, %v3070_v37, -1e+30 }
 0x456   :  { %3402 = vmax.xlane.f32.xlu0 %v10283_v54  ;;  %v6276_v33 = vpop.f32.mrf.mxu1 }
 0x457   :  { %v10288_v27 = vsel %vm3301_vm2, %v6276_v33, -1e+30 }
 0x458   :  { %3408 = vmax.xlane.f32.xlu1 %v10288_v27  ;;  %v3080_v44 = vpop.f32.mrf.mxu1 }
 0x459   :  { %v10293_v15 = vsel %vm3301_vm2, %v3080_v44, -1e+30 }
 0x45a   :  { %3406 = vmax.xlane.f32.xlu0 %v10293_v15  ;;  %v6279_v23 = vpop.f32.mrf.mxu1 }
 0x45b   :  { %v10298_v42 = vsel %vm3301_vm2, %v6279_v23, -1e+30 }
 0x45c   :  { %3412 = vmax.xlane.f32.xlu1 %v10298_v42  ;;  %v3090_v12 = vpop.f32.mrf.mxu1 }
 0x45d   :  { %v10303_v7 = vsel %vm3301_vm2, %v3090_v12, -1e+30 }
 0x45e   :  { %3410 = vmax.xlane.f32.xlu0 %v10303_v7  ;;  %v6282_v16 = vpop.f32.mrf.mxu1 }
 0x45f   :  { %v10308_v3 = vsel %vm3301_vm2, %v6282_v16, -1e+30 }
 0x460   :  { %3416 = vmax.xlane.f32.xlu1 %v10308_v3  ;;  %v3100_v1 = vpop.f32.mrf.mxu1 }
 0x461   :  { %v10313_v49 = vsel %vm3301_vm2, %v3100_v1, -1e+30 }
 0x462   :  { %3414 = vmax.xlane.f32.xlu0 %v10313_v49  ;;  %v6285_v2 = vpop.f32.mrf.mxu1 }
 0x463   :  { %v10318_v30 = vsel %vm3301_vm2, %v6285_v2, -1e+30 }
 0x464   :  { %3420 = vmax.xlane.f32.xlu1 %v10318_v30  ;;  %v3110_v32 = vpop.f32.mrf.mxu1 }
 0x465   :  { %v10323_v31 = vsel %vm3301_vm2, %v3110_v32, -1e+30 }
 0x466   :  { %3418 = vmax.xlane.f32.xlu0 %v10323_v31  ;;  %v6288_v48 = vpop.f32.mrf.mxu1 }
 0x467   :  { %v10328_v40 = vsel %vm3301_vm2, %v6288_v48, -1e+30 }
 0x468   :  { %3424 = vmax.xlane.f32.xlu1 %v10328_v40  ;;  %v3120_v17 = vpop.f32.mrf.mxu1 }
 0x469   :  { %v10333_v35 = vsel %vm3301_vm2, %v3120_v17, -1e+30 }
 0x46a   :  { %3422 = vmax.xlane.f32.xlu0 %v10333_v35  ;;  %v6291_v10 = vpop.f32.mrf.mxu1 }
 0x46b   :  { %v10338_v26 = vsel %vm3301_vm2, %v6291_v10, -1e+30 }
 0x46c   :  { %3428 = vmax.xlane.f32.xlu1 %v10338_v26  ;;  %v3130_v29 = vpop.f32.mrf.mxu1 }
 0x46d   :  { %v10343_v4 = vsel %vm3301_vm2, %v3130_v29, -1e+30 }
 0x46e   :  { %3426 = vmax.xlane.f32.xlu0 %v10343_v4  ;;  %v6294_v19 = vpop.f32.mrf.mxu1 }
 0x46f   :  { %v10348_v56 = vsel %vm3301_vm2, %v6294_v19, -1e+30 }
 0x470   :  { %3432 = vmax.xlane.f32.xlu1 %v10348_v56  ;;  %v3140_v13 = vpop.f32.mrf.mxu1 }
 0x471   :  { %v10353_v50 = vsel %vm3301_vm2, %v3140_v13, -1e+30 }
 0x472   :  { %3430 = vmax.xlane.f32.xlu0 %v10353_v50  ;;  %v6297_v47 = vpop.f32.mrf.mxu1 }
 0x473   :  { %v10358_v51 = vsel %vm3301_vm2, %v6297_v47, -1e+30 }
 0x474   :  { %3436 = vmax.xlane.f32.xlu1 %v10358_v51  ;;  %v3150_v0 = vpop.f32.mrf.mxu1 }
 0x475   :  { %v10363_v9 = vsel %vm3301_vm2, %v3150_v0, -1e+30 }
 0x476   :  { %3434 = vmax.xlane.f32.xlu0 %v10363_v9  ;;  %v6300_v38 = vpop.f32.mrf.mxu1 }
 0x477   :  { %v10368_v11 = vsel %vm3301_vm2, %v6300_v38, -1e+30 }
 0x478   :  { %3440 = vmax.xlane.f32.xlu1 %v10368_v11  ;;  %v3160_v18 = vpop.f32.mrf.mxu1 }
 0x479   :  { %v10373_v41 = vsel %vm3301_vm2, %v3160_v18, -1e+30 }
 0x47a   :  { %3438 = vmax.xlane.f32.xlu0 %v10373_v41  ;;  %v6303_v20 = vpop.f32.mrf.mxu1 }
 0x47b   :  { %v10378_v60 = vsel %vm3301_vm2, %v6303_v20, -1e+30 }
 0x47c   :  { %3444 = vmax.xlane.f32.xlu1 %v10378_v60  ;;  %v3170_v22 = vpop.f32.mrf.mxu1 }
 0x47d   :  { %v10383_v25 = vsel %vm3301_vm2, %v3170_v22, -1e+30 }
 0x47e   :  { %3442 = vmax.xlane.f32.xlu0 %v10383_v25  ;;  %v6306_v63 = vpop.f32.mrf.mxu1 }
 0x47f   :  { %v10388_v5 = vsel %vm3301_vm2, %v6306_v63, -1e+30 }
 0x480   :  { %3448 = vmax.xlane.f32.xlu1 %v10388_v5  ;;  %v3180_v37 = vpop.f32.mrf.mxu1 }
 0x481   :  { %v10393_v33 = vsel %vm3301_vm2, %v3180_v37, -1e+30 }
 0x482   :  { %3446 = vmax.xlane.f32.xlu0 %v10393_v33  ;;  %v6309_v44 = vpop.f32.mrf.mxu1 }
 0x483   :  { %v10398_v23 = vsel %vm3301_vm2, %v6309_v44, -1e+30 }
 0x484   :  { %3452 = vmax.xlane.f32.xlu1 %v10398_v23  ;;  %v3190_v12 = vpop.f32.mrf.mxu1 }
 0x485   :  { %v10403_v16 = vsel %vm3301_vm2, %v3190_v12, -1e+30 }
 0x486   :  { %3450 = vmax.xlane.f32.xlu0 %v10403_v16  ;;  %v6312_v1 = vpop.f32.mrf.mxu1 }
 0x487   :  { %v10408_v2 = vsel %vm3301_vm2, %v6312_v1, -1e+30 }
 0x488   :  { %v3200_v32 = vpop.f32.mrf.mxu1 }
 0x489   :  { %v10413_v48 = vsel %vm3301_vm2, %v3200_v32, -1e+30 }
 0x48a   :  { %3456 = vmax.xlane.f32.xlu0 %v10408_v2  ;;  %v6315_v17 = vpop.f32.mrf.mxu1 }
 0x48b   :  { %v10418_v10 = vsel %vm3301_vm2, %v6315_v17, -1e+30 }
 0x48c   :  { %v3210_v29 = vpop.f32.mrf.mxu1 }
 0x48d   :  { %v10423_v19 = vsel %vm3301_vm2, %v3210_v29, -1e+30 }
 0x48e   :  { %3454 = vmax.xlane.f32.xlu0 %v10413_v48  ;;  %v6318_v13 = vpop.f32.mrf.mxu1 }
 0x48f   :  { %v10428_v47 = vsel %vm3301_vm2, %v6318_v13, -1e+30 }
 0x490   :  { %12165 = vst [vmem:[#allocation17_spill] sm:$0xff] %v10428_v47  ;;  %v3220_v0 = vpop.f32.mrf.mxu1 }
 0x491   :  { %v10433_v38 = vsel %vm3301_vm2, %v3220_v0, -1e+30 }
 0x492   :  { %3460 = vmax.xlane.f32.xlu0 %v10418_v10  ;;  %v6321_v18 = vpop.f32.mrf.mxu1 }
 0x493   :  { %v10438_v20 = vsel %vm3301_vm2, %v6321_v18, -1e+30 }
 0x494   :  { %12166 = vst [vmem:[#allocation26_spill] sm:$0xff] %v10438_v20  ;;  %v3230_v22 = vpop.f32.mrf.mxu1 }
 0x495   :  { %v10443_v63 = vsel %vm3301_vm2, %v3230_v22, -1e+30 }
 0x496   :  { %3458 = vmax.xlane.f32.xlu0 %v10423_v19  ;;  %v6324_v37 = vpop.f32.mrf.mxu1 }
 0x497   :  { %v10448_v44 = vsel %vm3301_vm2, %v6324_v37, -1e+30 }
 0x498   :  { %12167 = vst [vmem:[#allocation25_spill] sm:$0xff] %v10448_v44  ;;  %v3240_v12 = vpop.f32.mrf.mxu1 }
 0x499   :  { %v10453_v1 = vsel %vm3301_vm2, %v3240_v12, -1e+30 }
 0x49a   :  { %3464 = vmax.xlane.f32.xlu0 %v10428_v47  ;;  %v6327_v32 = vpop.f32.mrf.mxu1 }
 0x49b   :  { %v10458_v17 = vsel %vm3301_vm2, %v6327_v32, -1e+30 }
 0x49c   :  { %12168 = vst [vmem:[#allocation27_spill] sm:$0xff] %v10458_v17  ;;  %v3250_v29 = vpop.f32.mrf.mxu1 }
 0x49d   :  { %v10463_v13 = vsel %vm3301_vm2, %v3250_v29, -1e+30 }
 0x49e   :  { %3462 = vmax.xlane.f32.xlu0 %v10433_v38  ;;  %12169 = vst [vmem:[#allocation28_spill] sm:$0xff] %v10463_v13  ;;  %v6330_v0 = vpop.f32.mrf.mxu1 }
 0x49f   :  { %v10468_v18 = vsel %vm3301_vm2, %v6330_v0, -1e+30 }
 0x4a0   :  { %12170 = vst [vmem:[#allocation29_spill] sm:$0xff] %v10468_v18  ;;  %v3260_v37 = vpop.f32.mrf.mxu1 }
 0x4a1   :  { %v10475_v29 = vsel %vm3301_vm2, %v3260_v37, -1e+30 }
 0x4a2   :  { %3468 = vmax.xlane.f32.xlu0 %v10438_v20  ;;  %v6333_v47 = vpop.f32.mrf.mxu1 }
 0x4a4   :  { %v3270_v37 = vpop.f32.mrf.mxu1 }
 0x4a6   :  { %3466 = vmax.xlane.f32.xlu0 %v10443_v63 }
 0x4aa   :  { %3472 = vmax.xlane.f32.xlu0 %v10448_v44 }
 0x4ae   :  { %3470 = vmax.xlane.f32.xlu0 %v10453_v1 }
 0x4b2   :  { %3476 = vmax.xlane.f32.xlu0 %v10458_v17 }
 0x4b6   :  { %3474 = vmax.xlane.f32.xlu0 %v10463_v13 }
 0x4b9   :  { %v3369_v22 = vpop.xlane.xlu1 %3368 }
 0x4ba   :  { %v3495_v12 = vsub.f32 %v10188_v21, %v3369_v22  ;;  %3480 = vmax.xlane.f32.xlu0 %v10468_v18  ;;  %v10481_v21 = vsel %vm3301_vm2, %v6333_v47, -1e+30  ;;  %v6336_v18 = vpop.f32.mrf.mxu1 }
 0x4bb   :  { %v3367_v32 = vpop.xlane.xlu0 %3366  ;;  %12171 = vst [vmem:[#allocation30_spill] sm:$0xff] %v10481_v21 }
 0x4bc   :  { %v3560_v44 = vmul.f32 1.442695, %v3495_v12  ;;  %v3494_v17 = vsub.f32 %v10193_v52, %v3367_v32 }
 0x4bd   :  { %v3373_v20 = vpop.xlane.xlu1 %3372 }
 0x4be   :  { %6983 = vpow2.f32 %v3560_v44  ;;  %v3558_v13 = vmul.f32 1.442695, %v3494_v17  ;;  %v3497_v0 = vsub.f32 %v10198_v34, %v3373_v20  ;;  %3478 = vmax.xlane.f32.xlu0 %v10475_v29  ;;  %v10487_v34 = vsel %vm3301_vm2, %v3270_v37, -1e+30  ;;  %v3280_v37 = vpop.f32.mrf.mxu1 }
 0x4bf   :  { %v3371_v22 = vpop.xlane.xlu0 %3370 }
 0x4c0   :  { %6985 = vpow2.f32 %v3558_v13  ;;  %v3564_v52 = vmul.f32 1.442695, %v3497_v0  ;;  %v3496_v32 = vsub.f32 %v10203_v53, %v3371_v22  ;;  %v10493_v13 = vsel %vm3301_vm2, %v6336_v18, -1e+30 }
 0x4c1   :  { %v3377_v12 = vpop.xlane.xlu1 %3376  ;;  %12172 = vst [vmem:[#allocation31_spill] sm:$0xff] %v10493_v13 }
 0x4c2   :  { %3484 = vmax.xlane.f32.xlu0 %v10481_v21  ;;  %6987 = vpow2.f32 %v3564_v52  ;;  %v3562_v17 = vmul.f32 1.442695, %v3496_v32  ;;  %v3499_v47 = vsub.f32 %v10208_v46, %v3377_v12  ;;  %v10502_v46 = vsel %vm3301_vm2, %v3280_v37, -1e+30 }
 0x4c3   :  { %v3375_v44 = vpop.xlane.xlu0 %3374  ;;  %12174 = vst [vmem:[#allocation33_spill] sm:$0xff] %v10502_v46 }
 0x4c4   :  { %6989 = vpow2.f32 %v3562_v17  ;;  %v3568_v22 = vmul.f32 1.442695, %v3499_v47  ;;  %v3498_v21 = vsub.f32 %v10213_v57, %v3375_v44  ;;  %v6339_v17 = vpop.f32.mrf.mxu1 }
 0x4c5   :  { %v3381_v20 = vpop.xlane.xlu1 %3380  ;;  %v10510_v47 = vsel %vm3301_vm2, %v6339_v17, -1e+30 }
 0x4c6   :  { %3482 = vmax.xlane.f32.xlu0 %v10487_v34  ;;  %6991 = vpow2.f32 %v3568_v22  ;;  %v3566_v18 = vmul.f32 1.442695, %v3498_v21  ;;  %v3501_v12 = vsub.f32 %v10218_v62, %v3381_v20  ;;  %v3290_v21 = vpop.f32.mrf.mxu1 }
 0x4c7   :  { %v3379_v53 = vpop.xlane.xlu0 %3378 }
 0x4c8   :  { %6993 = vpow2.f32 %v3566_v18  ;;  %v3572_v37 = vmul.f32 1.442695, %v3501_v12  ;;  %v3500_v22 = vsub.f32 %v10223_v58, %v3379_v53 }
 0x4c9   :  { %v3385_v0 = vpop.xlane.xlu1 %3384 }
 0x4ca   :  { %3488 = vmax.xlane.f32.xlu0 %v10493_v13  ;;  %6995 = vpow2.f32 %v3572_v37  ;;  %v3503_v18 = vsub.f32 %v10228_v36, %v3385_v0 }
 0x4cb   :  { %v10497_v52 = vpop.eup %6983  ;;  %v3383_v32 = vpop.xlane.xlu0 %3382 }
 0x4cc   :  { %12173 = vst [vmem:[#allocation32_spill] sm:$0xff] %v10497_v52  ;;  %3688 = vadd.xlane.f32.xlu1 %v10497_v52  ;;  %v10520_v52 = vsel %vm3301_vm2, %v3290_v21, -1e+30  ;;  %v3576_v12 = vmul.f32 1.442695, %v3503_v18 }
 0x4cd   :  { %v10506_v57 = vpop.eup %6985  ;;  %v3389_v44 = vpop.xlane.xlu1 %3388 }
 0x4ce   :  { %3486 = vmax.xlane.f32.xlu0 %v10502_v46  ;;  %12175 = vst [vmem:[#allocation34_spill] sm:$0xff] %v10506_v57  ;;  %v3570_v46 = vmul.f32 1.442695, %v3500_v22  ;;  %v3505_v0 = vsub.f32 %v10238_v61, %v3389_v44 }
 0x4cf   :  { %v3387_v13 = vpop.xlane.xlu0 %3386  ;;  %v10515_v62 = vpop.eup %6987 }
 0x4d0   :  { %3686 = vadd.xlane.f32.xlu1 %v10506_v57  ;;  %12176 = vst [vmem:[#allocation35_spill] sm:$0xff] %v10515_v62  ;;  %6997 = vpow2.f32 %v3570_v46 }
 0x4d1   :  { %v3393_v17 = vpop.xlane.xlu1 %3392  ;;  %v10524_v58 = vpop.eup %6989  ;;  %6999 = vpow2.f32 %v3576_v12 }
 0x4d2   :  { %3492 = vmax.xlane.f32.xlu0 %v10510_v47  ;;  %12177 = vst [vmem:[#allocation39_spill] sm:$0xff] %v10524_v58  ;;  %v3507_v44 = vsub.f32 %v10248_v28, %v3393_v17 }
 0x4d3   :  { %v3391_v20 = vpop.xlane.xlu0 %3390  ;;  %v10530_v43 = vpop.eup %6991 }
 0x4d4   :  { %3692 = vadd.xlane.f32.xlu1 %v10515_v62  ;;  %v3502_v62 = vsub.f32 %v10233_v39, %v3383_v32  ;;  %12178 = vst [vmem:[#allocation36_spill] sm:$0xff] %v10530_v43  ;;  %v3580_v39 = vmul.f32 1.442695, %v3505_v0  ;;  %v3504_v32 = vsub.f32 %v10243_v8, %v3387_v13  ;;  %v3584_v13 = vmul.f32 1.442695, %v3507_v44 }
 0x4d5   :  { %v3397_v21 = vpop.xlane.xlu1 %3396  ;;  %v10536_v37 = vpop.eup %6993 }
 0x4d6   :  { %3490 = vmax.xlane.f32.xlu0 %v10520_v52  ;;  %v3574_v36 = vmul.f32 1.442695, %v3502_v62  ;;  %12179 = vst [vmem:[#allocation7_spill] sm:$0xff] %v10536_v37  ;;  %v3578_v61 = vmul.f32 1.442695, %v3504_v32 }
 0x4d7   :  { %v10526_v53 = vpop.xlane.xlu0 %3394  ;;  %v10542_v18 = vpop.eup %6995 }
 0x4d8   :  { %3690 = vadd.xlane.f32.xlu1 %v10524_v58  ;;  %7001 = vpow2.f32 %v3574_v36 }
 0x4d9   :  { %v3401_v46 = vpop.xlane.xlu1 %3400  ;;  %7003 = vpow2.f32 %v3580_v39 }
 0x4db   :  { %v10532_v57 = vpop.xlane.xlu0 %3398 }
 0x4dc   :  { %3696 = vadd.xlane.f32.xlu1 %v10530_v43 }
 0x4dd   :  { %v10547_v12 = vpop.eup %6997 }
 0x4de   :  { %v10554_v0 = vpop.eup %6999 }
 0x4df   :  { %v10538_v22 = vpop.xlane.xlu0 %3402 }
 0x4e0   :  { %3694 = vadd.xlane.f32.xlu1 %v10536_v37  ;;  %v10549_v37 = vpop.xlane.xlu1 %3404 }
 0x4e3   :  { %v3407_v58 = vpop.xlane.xlu0 %3406 }
 0x4e4   :  { %v3514_v43 = vsub.f32 %v10293_v15, %v3407_v58  ;;  %3700 = vadd.xlane.f32.xlu1 %v10542_v18  ;;  %v3506_v15 = vsub.f32 %v10253_v24, %v3391_v20  ;;  %v10558_v17 = vpop.xlane.xlu1 %3408 }
 0x4e6   :  { %v3598_v62 = vmul.f32 1.442695, %v3514_v43  ;;  %v3582_v43 = vmul.f32 1.442695, %v3506_v15  ;;  %v3511_v15 = vsub.f32 %v10268_v55, %v3401_v46  ;;  %v3510_v55 = vsub.f32 %v10273_v6, %v10532_v57 }
 0x4e7   :  { %v3411_v36 = vpop.xlane.xlu0 %3410 }
 0x4e8   :  { %7005 = vpow2.f32 %v3598_v62  ;;  %v3516_v8 = vsub.f32 %v10303_v7, %v3411_v36  ;;  %3698 = vadd.xlane.f32.xlu1 %v10547_v12  ;;  %v3509_v7 = vsub.f32 %v10258_v14, %v3397_v21 }
 0x4e9   :  { %7007 = vpow2.f32 %v3578_v61  ;;  %v10561_v61 = vpop.eup %7001 }
 0x4ea   :  { %v3602_v58 = vmul.f32 1.442695, %v3516_v8  ;;  %v3588_v20 = vmul.f32 1.442695, %v3509_v7  ;;  %v10567_v36 = vpop.eup %7003  ;;  %v10569_v8 = vpop.xlane.xlu1 %3412 }
 0x4eb   :  { %v3415_v39 = vpop.xlane.xlu0 %3414 }
 0x4ec   :  { %7009 = vpow2.f32 %v3602_v58  ;;  %v3518_v28 = vsub.f32 %v10313_v49, %v3415_v39  ;;  %3704 = vadd.xlane.f32.xlu1 %v10554_v0  ;;  %v3508_v49 = vsub.f32 %v10263_v59, %v10526_v53 }
 0x4ed   :  { %7011 = vpow2.f32 %v3584_v13 }
 0x4ee   :  { %v3606_v32 = vmul.f32 1.442695, %v3518_v28  ;;  %v10583_v28 = vpop.xlane.xlu1 %3416 }
 0x4ef   :  { %v3419_v44 = vpop.xlane.xlu0 %3418 }
 0x4f0   :  { %7013 = vpow2.f32 %v3606_v32  ;;  %v3520_v24 = vsub.f32 %v10323_v31, %v3419_v44  ;;  %3702 = vadd.xlane.f32.xlu1 %v10561_v61  ;;  %v3586_v31 = vmul.f32 1.442695, %v3508_v49 }
 0x4f1   :  { %7015 = vpow2.f32 %v3582_v43  ;;  %v3592_v43 = vmul.f32 1.442695, %v3511_v15 }
 0x4f2   :  { %v3610_v62 = vmul.f32 1.442695, %v3520_v24  ;;  %v3590_v24 = vmul.f32 1.442695, %v3510_v55  ;;  %v10599_v57 = vpop.xlane.xlu1 %3420 }
 0x4f3   :  { %v3423_v14 = vpop.xlane.xlu0 %3422 }
 0x4f4   :  { %7017 = vpow2.f32 %v3610_v62  ;;  %v3522_v21 = vsub.f32 %v10333_v35, %v3423_v14  ;;  %3708 = vadd.xlane.f32.xlu1 %v10567_v36 }
 0x4f5   :  { %v10573_v13 = vpop.eup %7005  ;;  %7019 = vpow2.f32 %v3588_v20  ;;  %v3513_v20 = vsub.f32 %v10278_v45, %v10549_v37  ;;  %v3512_v45 = vsub.f32 %v10283_v54, %v10538_v22 }
 0x4f6   :  { %v3614_v58 = vmul.f32 1.442695, %v3522_v21  ;;  %3726 = vadd.xlane.f32.xlu0 %v10573_v13  ;;  %v10577_v59 = vpop.eup %7007 }
 0x4f7   :  { %v3427_v53 = vpop.xlane.xlu0 %3426  ;;  %v3596_v21 = vmul.f32 1.442695, %v3513_v20 }
 0x4f8   :  { %7021 = vpow2.f32 %v3614_v58  ;;  %v3524_v39 = vsub.f32 %v10343_v4, %v3427_v53  ;;  %3706 = vadd.xlane.f32.xlu1 %v10577_v59  ;;  %v3425_v53 = vpop.xlane.xlu1 %3424 }
 0x4f9   :  { %v10581_v35 = vpop.eup %7009  ;;  %7023 = vpow2.f32 %v3586_v31 }
 0x4fa   :  { %v3618_v46 = vmul.f32 1.442695, %v3524_v39  ;;  %3730 = vadd.xlane.f32.xlu0 %v10581_v35  ;;  %v10588_v7 = vpop.eup %7011  ;;  %v3594_v39 = vmul.f32 1.442695, %v3512_v45 }
 0x4fb   :  { %v3431_v32 = vpop.xlane.xlu0 %3430 }
 0x4fc   :  { %7025 = vpow2.f32 %v3618_v46  ;;  %v3526_v4 = vsub.f32 %v10353_v50, %v3431_v32  ;;  %3712 = vadd.xlane.f32.xlu1 %v10588_v7 }
 0x4fd   :  { %v10592_v44 = vpop.eup %7013  ;;  %7027 = vpow2.f32 %v3592_v43  ;;  %v3515_v43 = vsub.f32 %v10288_v27, %v10558_v17  ;;  %v3429_v17 = vpop.xlane.xlu1 %3428 }
 0x4fe   :  { %v3622_v49 = vmul.f32 1.442695, %v3526_v4  ;;  %3734 = vadd.xlane.f32.xlu0 %v10592_v44  ;;  %v10597_v6 = vpop.eup %7015  ;;  %v3517_v4 = vsub.f32 %v10298_v42, %v10569_v8 }
 0x4ff   :  { %v3435_v62 = vpop.xlane.xlu0 %3434  ;;  %v3600_v32 = vmul.f32 1.442695, %v3515_v43 }
 0x500   :  { %7029 = vpow2.f32 %v3622_v49  ;;  %v3528_v50 = vsub.f32 %v10363_v9, %v3435_v62  ;;  %3710 = vadd.xlane.f32.xlu1 %v10597_v6  ;;  %v3604_v62 = vmul.f32 1.442695, %v3517_v4 }
 0x501   :  { %v10603_v14 = vpop.eup %7017  ;;  %7031 = vpow2.f32 %v3590_v24 }
 0x502   :  { %v3626_v37 = vmul.f32 1.442695, %v3528_v50  ;;  %3738 = vadd.xlane.f32.xlu0 %v10603_v14  ;;  %v10608_v31 = vpop.eup %7019  ;;  %v3519_v50 = vsub.f32 %v10308_v3, %v10583_v28 }
 0x503   :  { %v3439_v15 = vpop.xlane.xlu0 %3438 }
 0x504   :  { %7033 = vpow2.f32 %v3626_v37  ;;  %v3530_v58 = vsub.f32 %v10373_v41, %v3439_v15  ;;  %3716 = vadd.xlane.f32.xlu1 %v10608_v31  ;;  %v3433_v37 = vpop.xlane.xlu1 %3432  ;;  %v3608_v15 = vmul.f32 1.442695, %v3519_v50 }
 0x505   :  { %v10612_v9 = vpop.eup %7021  ;;  %7035 = vpow2.f32 %v3596_v21  ;;  %v3527_v50 = vsub.f32 %v10348_v56, %v3433_v37 }
 0x506   :  { %v3630_v54 = vmul.f32 1.442695, %v3530_v58  ;;  %3742 = vadd.xlane.f32.xlu0 %v10612_v9  ;;  %v10617_v22 = vpop.eup %7023  ;;  %v3521_v58 = vsub.f32 %v10318_v30, %v10599_v57 }
 0x507   :  { %v3443_v55 = vpop.xlane.xlu0 %3442 }
 0x508   :  { %7037 = vpow2.f32 %v3630_v54  ;;  %v3532_v46 = vsub.f32 %v10383_v25, %v3443_v55  ;;  %3714 = vadd.xlane.f32.xlu1 %v10617_v22  ;;  %v3612_v43 = vmul.f32 1.442695, %v3521_v58  ;;  %v3523_v54 = vsub.f32 %v10328_v40, %v3425_v53  ;;  %v3437_v30 = vpop.xlane.xlu1 %3436 }
 0x509   :  { %v10621_v41 = vpop.eup %7025  ;;  %7039 = vpow2.f32 %v3594_v39 }
 0x50a   :  { %v3634_v24 = vmul.f32 1.442695, %v3532_v46  ;;  %3746 = vadd.xlane.f32.xlu0 %v10621_v41  ;;  %v10626_v27 = vpop.eup %7027  ;;  %v3616_v4 = vmul.f32 1.442695, %v3523_v54 }
 0x50b   :  { %v3447_v20 = vpop.xlane.xlu0 %3446 }
 0x50c   :  { %7041 = vpow2.f32 %v3634_v24  ;;  %v3534_v49 = vsub.f32 %v10393_v33, %v3447_v20  ;;  %3720 = vadd.xlane.f32.xlu1 %v10626_v27  ;;  %v3525_v24 = vsub.f32 %v10338_v26, %v3429_v17 }
 0x50d   :  { %v10630_v25 = vpop.eup %7029  ;;  %7043 = vpow2.f32 %v3600_v32 }
 0x50e   :  { %v3638_v42 = vmul.f32 1.442695, %v3534_v49  ;;  %3750 = vadd.xlane.f32.xlu0 %v10630_v25  ;;  %v10635_v8 = vpop.eup %7031 }
 0x50f   :  { %v3451_v21 = vpop.xlane.xlu0 %3450 }
 0x510   :  { %7045 = vpow2.f32 %v3638_v42  ;;  %v3536_v45 = vsub.f32 %v10403_v16, %v3451_v21  ;;  %3718 = vadd.xlane.f32.xlu1 %v10635_v8 }
 0x511   :  { %v10639_v33 = vpop.eup %7033  ;;  %7047 = vpow2.f32 %v3604_v62  ;;  %v3620_v62 = vmul.f32 1.442695, %v3525_v24 }
 0x512   :  { %v3642_v3 = vmul.f32 1.442695, %v3536_v45  ;;  %3754 = vadd.xlane.f32.xlu0 %v10639_v33  ;;  %v10644_v28 = vpop.eup %7035  ;;  %v3624_v45 = vmul.f32 1.442695, %v3527_v50 }
 0x513   :  { %v10646_v39 = vpop.xlane.xlu0 %3456 }
 0x514   :  { %7049 = vpow2.f32 %v3642_v3  ;;  %3724 = vadd.xlane.f32.xlu1 %v10644_v28 }
 0x515   :  { %v10649_v16 = vpop.eup %7037  ;;  %7051 = vpow2.f32 %v3608_v15  ;;  %v3529_v15 = vsub.f32 %v10358_v51, %v3437_v30 }
 0x516   :  { %3758 = vadd.xlane.f32.xlu0 %v10649_v16  ;;  %v10653_v55 = vpop.eup %7039  ;;  %7053 = vpow2.f32 %v3612_v43 }
 0x517   :  { %v3455_v57 = vpop.xlane.xlu0 %3454 }
 0x518   :  { %v3538_v46 = vsub.f32 %v10413_v48, %v3455_v57  ;;  %3722 = vadd.xlane.f32.xlu1 %v10653_v55  ;;  %v3441_v48 = vpop.xlane.xlu1 %3440 }
 0x519   :  { %v10657_v32 = vpop.eup %7041  ;;  %v3531_v43 = vsub.f32 %v10368_v11, %v3441_v48 }
 0x51a   :  { %v3646_v20 = vmul.f32 1.442695, %v3538_v46  ;;  %3762 = vadd.xlane.f32.xlu0 %v10657_v32  ;;  %v10661_v40 = vpop.eup %7043 }
 0x51b   :  { %v10663_v53 = vpop.xlane.xlu0 %3460 }
 0x51c   :  { %7055 = vpow2.f32 %v3646_v20  ;;  %3728 = vadd.xlane.f32.xlu1 %v10661_v40  ;;  %v3445_v56 = vpop.xlane.xlu1 %3444 }
 0x51d   :  { %v10666_v49 = vpop.eup %7045  ;;  %7057 = vpow2.f32 %v3616_v4  ;;  %v3632_v4 = vmul.f32 1.442695, %v3531_v43  ;;  %v3533_v24 = vsub.f32 %v10378_v60, %v3445_v56 }
 0x51e   :  { %3766 = vadd.xlane.f32.xlu0 %v10666_v49  ;;  %v10670_v26 = vpop.eup %7047  ;;  %7059 = vpow2.f32 %v3620_v62 }
 0x51f   :  { %v3459_v17 = vpop.xlane.xlu0 %3458 }
 0x520   :  { %v3540_v42 = vsub.f32 %v10423_v19, %v3459_v17  ;;  %3732 = vadd.xlane.f32.xlu1 %v10670_v26  ;;  %v3628_v19 = vmul.f32 1.442695, %v3529_v15  ;;  %v3449_v46 = vpop.xlane.xlu1 %3448 }
 0x521   :  { %v10674_v21 = vpop.eup %7049  ;;  %v3535_v48 = vsub.f32 %v10388_v5, %v3449_v46 }
 0x522   :  { %v3650_v58 = vmul.f32 1.442695, %v3540_v42  ;;  %3770 = vadd.xlane.f32.xlu0 %v10674_v21  ;;  %v10678_v3 = vpop.eup %7051 }
 0x523   :  { %v10680_v37 = vpop.xlane.xlu0 %3464  ;;  %v10684_v54 = vpop.eup %7053  ;;  %v3640_v15 = vmul.f32 1.442695, %v3535_v48 }
 0x524   :  { %7061 = vpow2.f32 %v3650_v58  ;;  %3736 = vadd.xlane.f32.xlu1 %v10678_v3  ;;  %v3453_v17 = vpop.xlane.xlu1 %3452 }
 0x525   :  { %7063 = vpow2.f32 %v3624_v45  ;;  %v3537_v58 = vsub.f32 %v10398_v23, %v3453_v17 }
 0x526   :  { %7065 = vpow2.f32 %v3628_v19 }
 0x527   :  { %v3463_v57 = vpop.xlane.xlu0 %3462  ;;  %v3644_v43 = vmul.f32 1.442695, %v3537_v58  ;;  %v12184_v58 = vld [vmem:[#allocation26_spill] sm:$0xff] }
 0x528   :  { %v3542_v51 = vsub.f32 %v10433_v38, %v3463_v57  ;;  %3740 = vadd.xlane.f32.xlu1 %v10684_v54  ;;  %v3636_v38 = vmul.f32 1.442695, %v3533_v24  ;;  %v3541_v24 = vsub.f32 %v10418_v10, %v10663_v53 }
 0x529   :  { %v10688_v30 = vpop.eup %7055 }
 0x52a   :  { %v3654_v20 = vmul.f32 1.442695, %v3542_v51  ;;  %3774 = vadd.xlane.f32.xlu0 %v10688_v30  ;;  %v10692_v62 = vpop.eup %7057 }
 0x52b   :  { %v3469_v11 = vpop.xlane.xlu0 %3468  ;;  %v10696_v50 = vpop.eup %7059 }
 0x52c   :  { %7067 = vpow2.f32 %v3654_v20  ;;  %3744 = vadd.xlane.f32.xlu1 %v10692_v62 }
 0x52d   :  { %7069 = vpow2.f32 %v3632_v4 }
 0x52e   :  { %7071 = vpow2.f32 %v3636_v38 }
 0x52f   :  { %v3467_v42 = vpop.xlane.xlu0 %3466 }
 0x530   :  { %v3544_v45 = vsub.f32 %v10443_v63, %v3467_v42  ;;  %3748 = vadd.xlane.f32.xlu1 %v10696_v50  ;;  %v3539_v63 = vsub.f32 %v10408_v2, %v10646_v39  ;;  %v12181_v39 = vld [vmem:[#allocation17_spill] sm:$0xff] }
 0x531   :  { %v10700_v60 = vpop.eup %7061  ;;  %v3543_v48 = vsub.f32 %v12181_v39, %v10680_v37 }
 0x532   :  { %v3658_v56 = vmul.f32 1.442695, %v3544_v45  ;;  %3778 = vadd.xlane.f32.xlu0 %v10700_v60  ;;  %v10704_v19 = vpop.eup %7063  ;;  %v3648_v4 = vmul.f32 1.442695, %v3539_v63  ;;  %v12182_v45 = vld [vmem:[#allocation28_spill] sm:$0xff] }
 0x533   :  { %v3473_v5 = vpop.xlane.xlu0 %3472  ;;  %v10709_v57 = vpop.eup %7065  ;;  %v3656_v53 = vmul.f32 1.442695, %v3543_v48  ;;  %v12187_v48 = vld [vmem:[#allocation27_spill] sm:$0xff] }
 0x534   :  { %7073 = vpow2.f32 %v3658_v56  ;;  %3752 = vadd.xlane.f32.xlu1 %v10704_v19  ;;  %v3545_v56 = vsub.f32 %v12184_v58, %v3469_v11 }
 0x535   :  { %7075 = vpow2.f32 %v3640_v15 }
 0x536   :  { %7077 = vpow2.f32 %v3644_v43  ;;  %v3660_v37 = vmul.f32 1.442695, %v3545_v56 }
 0x537   :  { %v3471_v51 = vpop.xlane.xlu0 %3470 }
 0x538   :  { %v3546_v46 = vsub.f32 %v10453_v1, %v3471_v51  ;;  %3756 = vadd.xlane.f32.xlu1 %v10709_v57  ;;  %v3652_v1 = vmul.f32 1.442695, %v3541_v24 }
 0x539   :  { %v10713_v23 = vpop.eup %7067 }
 0x53a   :  { %12180 = vst [vmem:[#allocation37_spill] sm:$0xff] %v10713_v23  ;;  %v3662_v20 = vmul.f32 1.442695, %v3546_v46  ;;  %3782 = vadd.xlane.f32.xlu0 %v10713_v23  ;;  %v10718_v38 = vpop.eup %7069  ;;  %v12185_v46 = vld [vmem:[#allocation25_spill] sm:$0xff] }
 0x53b   :  { %v3477_v2 = vpop.xlane.xlu0 %3476  ;;  %v10723_v17 = vpop.eup %7071 }
 0x53c   :  { %7079 = vpow2.f32 %v3662_v20  ;;  %3760 = vadd.xlane.f32.xlu1 %v10718_v38 }
 0x53d   :  { %7081 = vpow2.f32 %v3648_v4  ;;  %v3547_v4 = vsub.f32 %v12185_v46, %v3473_v5  ;;  %v12189_v5 = vld [vmem:[#allocation29_spill] sm:$0xff] }
 0x53e   :  { %7083 = vpow2.f32 %v3652_v1 }
 0x53f   :  { %v3475_v42 = vpop.xlane.xlu0 %3474  ;;  %v3664_v39 = vmul.f32 1.442695, %v3547_v4  ;;  %v12192_v4 = vld [vmem:[#allocation30_spill] sm:$0xff] }
 0x540   :  { %v3548_v15 = vsub.f32 %v12182_v45, %v3475_v42  ;;  %3764 = vadd.xlane.f32.xlu1 %v10723_v17  ;;  %v3549_v42 = vsub.f32 %v12187_v48, %v3477_v2 }
 0x541   :  { %v10727_v10 = vpop.eup %7073 }
 0x542   :  { %12183 = vst [vmem:[#allocation40_spill] sm:$0xff] %v10727_v10  ;;  %v3666_v43 = vmul.f32 1.442695, %v3548_v15  ;;  %3786 = vadd.xlane.f32.xlu0 %v10727_v10  ;;  %v10731_v63 = vpop.eup %7075 }
 0x543   :  { %v3481_v51 = vpop.xlane.xlu0 %3480  ;;  %v10735_v24 = vpop.eup %7077 }
 0x544   :  { %7085 = vpow2.f32 %v3666_v43  ;;  %3768 = vadd.xlane.f32.xlu1 %v10731_v63  ;;  %v3551_v58 = vsub.f32 %v12189_v5, %v3481_v51 }
 0x545   :  { %7087 = vpow2.f32 %v3656_v53 }
 0x546   :  { %7089 = vpow2.f32 %v3660_v37  ;;  %v3672_v46 = vmul.f32 1.442695, %v3551_v58 }
 0x547   :  { %v3479_v20 = vpop.xlane.xlu0 %3478 }
 0x548   :  { %v3550_v1 = vsub.f32 %v10475_v29, %v3479_v20  ;;  %3772 = vadd.xlane.f32.xlu1 %v10735_v24  ;;  %v3668_v29 = vmul.f32 1.442695, %v3549_v42 }
 0x549   :  { %v10739_v11 = vpop.eup %7079 }
 0x54a   :  { %12186 = vst [vmem:[#allocation38_spill] sm:$0xff] %v10739_v11  ;;  %v3670_v45 = vmul.f32 1.442695, %v3550_v1  ;;  %3790 = vadd.xlane.f32.xlu0 %v10739_v11  ;;  %v10743_v15 = vpop.eup %7081 }
 0x54b   :  { %12188 = vst [vmem:[#allocation21_spill] sm:$0xff] %v10743_v15  ;;  %v3485_v53 = vpop.xlane.xlu0 %3484  ;;  %v10747_v56 = vpop.eup %7083 }
 0x54c   :  { %7091 = vpow2.f32 %v3670_v45  ;;  %3776 = vadd.xlane.f32.xlu1 %v10743_v15  ;;  %12190 = vst [vmem:[#allocation5_spill] sm:$0xff] %v10747_v56  ;;  %v3553_v20 = vsub.f32 %v12192_v4, %v3485_v53  ;;  %v12196_v53 = vld [vmem:[#allocation33_spill] sm:$0xff] }
 0x54d   :  { %7093 = vpow2.f32 %v3664_v39 }
 0x54e   :  { %7095 = vpow2.f32 %v3668_v29  ;;  %v3676_v39 = vmul.f32 1.442695, %v3553_v20 }
 0x54f   :  { %v3483_v43 = vpop.xlane.xlu0 %3482 }
 0x550   :  { %v3552_v37 = vsub.f32 %v10487_v34, %v3483_v43  ;;  %3780 = vadd.xlane.f32.xlu1 %v10747_v56  ;;  %v12194_v34 = vld [vmem:[#allocation31_spill] sm:$0xff] }
 0x551   :  { %v10751_v2 = vpop.eup %7085 }
 0x552   :  { %12191 = vst [vmem:[#allocation19_spill] sm:$0xff] %v10751_v2  ;;  %v3674_v1 = vmul.f32 1.442695, %v3552_v37  ;;  %3794 = vadd.xlane.f32.xlu0 %v10751_v2  ;;  %v10755_v48 = vpop.eup %7087 }
 0x553   :  { %12193 = vst [vmem:[#allocation13_spill] sm:$0xff] %v10755_v48  ;;  %v3489_v51 = vpop.xlane.xlu0 %3488  ;;  %v10759_v5 = vpop.eup %7089 }
 0x554   :  { %7097 = vpow2.f32 %v3674_v1  ;;  %3784 = vadd.xlane.f32.xlu1 %v10755_v48  ;;  %v3555_v42 = vsub.f32 %v12194_v34, %v3489_v51  ;;  %12195 = vst [vmem:[#allocation20_spill] sm:$0xff] %v10759_v5 }
 0x555   :  { %7099 = vpow2.f32 %v3672_v46  ;;  %v3689_v45 = vpop.xlane.xlu1 %3688 }
 0x556   :  { %7101 = vrcp.f32 %v3689_v45  ;;  %v3680_v37 = vmul.f32 1.442695, %v3555_v42 }
 0x557   :  { %v3487_v58 = vpop.xlane.xlu0 %3486  ;;  %7103 = vpow2.f32 %v3676_v39 }
 0x558   :  { %v3554_v29 = vsub.f32 %v12196_v53, %v3487_v58  ;;  %3788 = vadd.xlane.f32.xlu1 %v10759_v5 }
 0x559   :  { %v10763_v43 = vpop.eup %7091  ;;  %v3687_v4 = vpop.xlane.xlu1 %3686 }
 0x55a   :  { %12197 = vst [vmem:[#allocation23_spill] sm:$0xff] %v10763_v43  ;;  %v3678_v1 = vmul.f32 1.442695, %v3554_v29  ;;  %7105 = vrcp.f32 %v3687_v4  ;;  %3798 = vadd.xlane.f32.xlu0 %v10763_v43  ;;  %v10766_v46 = vpop.eup %7093  ;;  %v12204_v43 = vld [vmem:[#allocation34_spill] sm:$0xff] }
 0x55b   :  { %12198 = vst [vmem:[#allocation9_spill] sm:$0xff] %v10766_v46  ;;  %v3493_v20 = vpop.xlane.xlu0 %3492  ;;  %v10770_v58 = vpop.eup %7095 }
 0x55c   :  { %7107 = vpow2.f32 %v3678_v1  ;;  %v3557_v51 = vsub.f32 %v10510_v47, %v3493_v20  ;;  %3792 = vadd.xlane.f32.xlu1 %v10766_v46  ;;  %12199 = vst [vmem:[#allocation24_spill] sm:$0xff] %v10770_v58  ;;  %v12202_v1 = vld [vmem:[#allocation32_spill] sm:$0xff] }
 0x55d   :  { %7109 = vpow2.f32 %v3680_v37  ;;  %v3693_v34 = vpop.xlane.xlu1 %3692 }
 0x55e   :  { %v3684_v45 = vmul.f32 1.442695, %v3557_v51  ;;  %7111 = vrcp.f32 %v3693_v34 }
 0x55f   :  { %v3491_v39 = vpop.xlane.xlu0 %3490 }
 0x560   :  { %v3556_v42 = vsub.f32 %v10520_v52, %v3491_v39  ;;  %3796 = vadd.xlane.f32.xlu1 %v10770_v58  ;;  %7113 = vpow2.f32 %v3684_v45 }
 0x561   :  { %v10774_v53 = vpop.eup %7097  ;;  %v3691_v29 = vpop.xlane.xlu1 %3690 }
 0x562   :  { %12200 = vst [vmem:[#allocation11_spill] sm:$0xff] %v10774_v53  ;;  %v10776_v4 = vpop.eup %7099  ;;  %v3682_v47 = vmul.f32 1.442695, %v3556_v42  ;;  %7115 = vrcp.f32 %v3691_v29  ;;  %3802 = vadd.xlane.f32.xlu0 %v10774_v53 }
 0x563   :  { %12201 = vst [vmem:[#allocation6_spill] sm:$0xff] %v10776_v4  ;;  %v7102_v37 = vpop.eup %7101 }
 0x564   :  { %7117 = vpow2.f32 %v3682_v47  ;;  %3800 = vadd.xlane.f32.xlu1 %v10776_v4  ;;  %v3879_v20 = vmul.f32 %v7102_v37, %v12202_v1  ;;  %v10781_v52 = vpop.eup %7103  ;;  %v12207_v4 = vld [vmem:[#allocation35_spill] sm:$0xff] }
 0x565   :  { %v3697_v51 = vpop.xlane.xlu1 %3696  ;;  %12203 = vst [vmem:[#allocation22_spill] sm:$0xff] %v10781_v52 }
 0x566   :  { %7119 = vrcp.f32 %v3697_v51  ;;  %v5651_v34 = vadd.f32 -0.0025, %v3879_v20 }
 0x567   :  { %v7106_v39 = vpop.eup %7105 }
 0x568   :  { %3804 = vadd.xlane.f32.xlu1 %v10781_v52  ;;  %v4135_v45 = vand.u32 2147483647, %v5651_v34  ;;  %v3878_v42 = vmul.f32 %v7106_v39, %v12204_v43  ;;  %v4007_v48 = vmax.f32 %v5651_v34, 0.0 }
 0x569   :  { %v10785_v29 = vpop.eup %7107  ;;  %v3695_v53 = vpop.xlane.xlu1 %3694 }
 0x56a   :  { %12205 = vst [vmem:[#allocation8_spill] sm:$0xff] %v10785_v29  ;;  %v10787_v2 = vpop.eup %7109  ;;  %7121 = vrcp.f32 %v3695_v53  ;;  %3806 = vadd.xlane.f32.xlu0 %v10785_v29  ;;  %v4199_v47 = vadd.f32 1e-12, %v4135_v45  ;;  %v5650_v37 = vadd.f32 -0.0025, %v3878_v42  ;;  %v12209_v45 = vld [vmem:[#allocation39_spill] sm:$0xff] }
 0x56b   :  { %12206 = vst [vmem:[#allocation18_spill] sm:$0xff] %v10787_v2  ;;  %v7112_v1 = vpop.eup %7111 }
 0x56c   :  { %3808 = vadd.xlane.f32.xlu1 %v10787_v2  ;;  %7123 = vrcp.f32 %v4199_v47  ;;  %v4134_v51 = vand.u32 2147483647, %v5650_v37  ;;  %v3881_v52 = vmul.f32 %v7112_v1, %v12207_v4  ;;  %v4006_v23 = vmax.f32 %v5650_v37, 0.0 }
 0x56d   :  { %v3701_v58 = vpop.xlane.xlu1 %3700  ;;  %v10792_v46 = vpop.eup %7113 }
 0x56e   :  { %12208 = vst [vmem:[#allocation10_spill] sm:$0xff] %v10792_v46  ;;  %7125 = vrcp.f32 %v3701_v58  ;;  %v4198_v43 = vadd.f32 1e-12, %v4134_v51  ;;  %v5653_v39 = vadd.f32 -0.0025, %v3881_v52  ;;  %v12211_v51 = vld [vmem:[#allocation36_spill] sm:$0xff] }
 0x56f   :  { %v7116_v11 = vpop.eup %7115 }
 0x570   :  { %3812 = vadd.xlane.f32.xlu1 %v10792_v46  ;;  %7127 = vrcp.f32 %v4198_v43  ;;  %v4137_v53 = vand.u32 2147483647, %v5653_v39  ;;  %v3880_v29 = vmul.f32 %v7116_v11, %v12209_v45 }
 0x571   :  { %v10796_v5 = vpop.eup %7117  ;;  %v3699_v2 = vpop.xlane.xlu1 %3698 }
 0x572   :  { %12210 = vst [vmem:[#allocation12_spill] sm:$0xff] %v10796_v5  ;;  %7129 = vrcp.f32 %v3699_v2  ;;  %3810 = vadd.xlane.f32.xlu0 %v10796_v5  ;;  %v4201_v4 = vadd.f32 1e-12, %v4137_v53  ;;  %v5652_v47 = vadd.f32 -0.0025, %v3880_v29  ;;  %v4071_v2 = vmul.f32 %v4007_v48, %v3879_v20  ;;  %v12212_v5 = vld [vmem:[#allocation7_spill] sm:$0xff] }
 0x573   :  { %v7120_v1 = vpop.eup %7119  ;;  %v4009_v48 = vmax.f32 %v5653_v39, 0.0 }
 0x574   :  { %7131 = vrcp.f32 %v4201_v4  ;;  %v4136_v58 = vand.u32 2147483647, %v5652_v47  ;;  %v10800_v10 = vmul.f32 %v7120_v1, %v12211_v51 }
 0x575   :  { %v3705_v46 = vpop.xlane.xlu1 %3704 }
 0x576   :  { %7133 = vrcp.f32 %v3705_v46  ;;  %v4200_v43 = vadd.f32 1e-12, %v4136_v58  ;;  %v10803_v11 = vadd.f32 -0.0025, %v10800_v10  ;;  %v4070_v58 = vmul.f32 %v4006_v23, %v3878_v42 }
 0x577   :  { %v7122_v45 = vpop.eup %7121 }
 0x578   :  { %7135 = vrcp.f32 %v4200_v43  ;;  %v4139_v53 = vand.u32 2147483647, %v10803_v11  ;;  %v10807_v56 = vmul.f32 %v7122_v45, %v12212_v5 }
 0x579   :  { %v7124_v34 = vpop.eup %7123  ;;  %v3703_v4 = vpop.xlane.xlu1 %3702 }
 0x57a   :  { %7137 = vrcp.f32 %v3703_v4  ;;  %v10809_v1 = vmul.f32 %v7124_v34, %v4071_v2  ;;  %v4203_v51 = vadd.f32 1e-12, %v4139_v53  ;;  %v10812_v15 = vadd.f32 -0.0025, %v10807_v56 }
 0x57b   :  { %v7126_v46 = vpop.eup %7125  ;;  %v4008_v34 = vmax.f32 %v5652_v47, 0.0 }
 0x57c   :  { %12213 = vst [vmem:[#allocation16_spill] sm:$0xff] %v10809_v1  ;;  %v4391_v37 = vand.u32 2147483647, %v10809_v1  ;;  %7139 = vrcp.f32 %v4203_v51  ;;  %v10816_v20 = vmul.f32 %v7126_v46, %v10542_v18  ;;  %v4138_v45 = vand.u32 2147483647, %v10812_v15 }
 0x57d   :  { %v7128_v5 = vpop.eup %7127  ;;  %v3709_v43 = vpop.xlane.xlu1 %3708  ;;  %v4073_v18 = vmul.f32 %v4009_v48, %v3881_v52  ;;  %v4011_v48 = vmax.f32 %v10803_v11, 0.0 }
 0x57e   :  { %7141 = vrcp.f32 %v3709_v43  ;;  %4456 = vadd.xlane.f32.xlu1 %v4391_v37  ;;  %v10819_v2 = vmul.f32 %v7128_v5, %v4070_v58  ;;  %v10822_v23 = vadd.f32 -0.0025, %v10816_v20  ;;  %v4202_v4 = vadd.f32 1e-12, %v4138_v45 }
 0x57f   :  { %v7130_v42 = vpop.eup %7129  ;;  %v3727_v53 = vpop.xlane.xlu0 %3726  ;;  %v4072_v45 = vmul.f32 %v4008_v34, %v3880_v29 }
 0x580   :  { %7143 = vrcp.f32 %v3727_v53  ;;  %v4390_v39 = vand.u32 2147483647, %v10819_v2  ;;  %v4141_v51 = vand.u32 2147483647, %v10822_v23  ;;  %v10827_v37 = vmul.f32 %v7130_v42, %v10547_v12 }
 0x581   :  { %v7132_v46 = vpop.eup %7131  ;;  %v3707_v1 = vpop.xlane.xlu1 %3706  ;;  %7145 = vrcp.f32 %v4202_v4 }
 0x582   :  { %7147 = vrcp.f32 %v3707_v1  ;;  %4454 = vadd.xlane.f32.xlu0 %v4390_v39  ;;  %v10829_v58 = vmul.f32 %v7132_v46, %v4073_v18  ;;  %v4205_v5 = vadd.f32 1e-12, %v4141_v51  ;;  %v10832_v53 = vadd.f32 -0.0025, %v10827_v37 }
 0x583   :  { %v7134_v43 = vpop.eup %7133  ;;  %v3731_v47 = vpop.xlane.xlu0 %3730 }
 0x584   :  { %7149 = vrcp.f32 %v3731_v47  ;;  %v4393_v52 = vand.u32 2147483647, %v10829_v58  ;;  %v10837_v4 = vmul.f32 %v7134_v43, %v10554_v0  ;;  %v4140_v42 = vand.u32 2147483647, %v10832_v53 }
 0x585   :  { %v7136_v12 = vpop.eup %7135  ;;  %v3713_v1 = vpop.xlane.xlu1 %3712  ;;  %7151 = vrcp.f32 %v4205_v5  ;;  %v4075_v0 = vmul.f32 %v4011_v48, %v10800_v10  ;;  %v4010_v47 = vmax.f32 %v10812_v15, 0.0 }
 0x586   :  { %7153 = vrcp.f32 %v3713_v1  ;;  %4460 = vadd.xlane.f32.xlu1 %v4393_v52  ;;  %v10840_v39 = vmul.f32 %v7136_v12, %v4072_v45  ;;  %v10843_v29 = vadd.f32 -0.0025, %v10837_v4  ;;  %v4204_v51 = vadd.f32 1e-12, %v4140_v42 }
 0x587   :  { %v7138_v34 = vpop.eup %7137  ;;  %v3735_v18 = vpop.xlane.xlu0 %3734 }
 0x588   :  { %12214 = vst [vmem:[#allocation14_spill] sm:$0xff] %v10840_v39  ;;  %7155 = vrcp.f32 %v3735_v18  ;;  %v4392_v11 = vand.u32 2147483647, %v10840_v39  ;;  %v4143_v46 = vand.u32 2147483647, %v10843_v29  ;;  %v10850_v45 = vmul.f32 %v7138_v34, %v10561_v61 }
 0x589   :  { %v7140_v5 = vpop.eup %7139  ;;  %v3711_v43 = vpop.xlane.xlu1 %3710  ;;  %7157 = vrcp.f32 %v4204_v51  ;;  %v4074_v61 = vmul.f32 %v4010_v47, %v10807_v56  ;;  %v4013_v34 = vmax.f32 %v10822_v23, 0.0  ;;  %v4012_v56 = vmax.f32 %v10832_v53, 0.0 }
 0x58a   :  { %7159 = vrcp.f32 %v3711_v43  ;;  %4458 = vadd.xlane.f32.xlu0 %v4392_v11  ;;  %v10852_v52 = vmul.f32 %v7140_v5, %v4075_v0  ;;  %v4207_v12 = vadd.f32 1e-12, %v4143_v46  ;;  %v10855_v18 = vadd.f32 -0.0025, %v10850_v45 }
 0x58b   :  { %v7142_v1 = vpop.eup %7141  ;;  %v3739_v42 = vpop.xlane.xlu0 %3738 }
 0x58c   :  { %12215 = vst [vmem:[#allocation15_spill] sm:$0xff] %v10852_v52  ;;  %v4395_v10 = vand.u32 2147483647, %v10852_v52  ;;  %v10859_v48 = vmul.f32 %v7142_v1, %v10567_v36  ;;  %7161 = vrcp.f32 %v4207_v12  ;;  %v4142_v11 = vand.u32 2147483647, %v10855_v18 }
 0x58d   :  { %v7144_v15 = vpop.eup %7143  ;;  %v3717_v51 = vpop.xlane.xlu1 %3716 }
 0x58e   :  { %v7146_v0 = vpop.eup %7145  ;;  %7163 = vrcp.f32 %v3717_v51  ;;  %4464 = vadd.xlane.f32.xlu1 %v4395_v10  ;;  %v10865_v46 = vadd.f32 -0.0025, %v10859_v48  ;;  %v10868_v5 = vmul.f32 %v7144_v15, %v10573_v13  ;;  %v4206_v52 = vadd.f32 1e-12, %v4142_v11 }
 0x58f   :  { %v7148_v36 = vpop.eup %7147  ;;  %v3743_v43 = vpop.xlane.xlu0 %3742  ;;  %v10870_v1 = vmul.f32 %v7146_v0, %v4074_v61  ;;  %7165 = vrcp.f32 %v3739_v42  ;;  %v4077_v13 = vmul.f32 %v4013_v34, %v10816_v20  ;;  %v4015_v34 = vmax.f32 %v10843_v29, 0.0 }
 0x590   :  { %v4145_v23 = vand.u32 2147483647, %v10865_v46  ;;  %v10875_v47 = vmul.f32 %v7148_v36, %v10577_v59  ;;  %7167 = vrcp.f32 %v4206_v52  ;;  %v10880_v15 = vadd.f32 -0.0025, %v10868_v5 }
 0x591   :  { %12216 = vst [vmem:[#allocation17_spill] sm:$0xff] %v10870_v1  ;;  %v7150_v12 = vpop.eup %7149  ;;  %v3715_v10 = vpop.xlane.xlu1 %3714  ;;  %v4394_v51 = vand.u32 2147483647, %v10870_v1  ;;  %v4076_v52 = vmul.f32 %v4012_v56, %v10827_v37 }
 0x592   :  { %v7152_v61 = vpop.eup %7151  ;;  %7169 = vrcp.f32 %v3715_v10  ;;  %v4209_v42 = vadd.f32 1e-12, %v4145_v23  ;;  %v10883_v53 = vadd.f32 -0.0025, %v10875_v47  ;;  %v4154_v36 = vand.u32 2147483647, %v10880_v15 }
 0x593   :  { %v7154_v11 = vpop.eup %7153  ;;  %7171 = vrcp.f32 %v3743_v43  ;;  %4462 = vadd.xlane.f32.xlu0 %v4394_v51  ;;  %v3747_v59 = vpop.xlane.xlu0 %3746  ;;  %v10885_v0 = vmul.f32 %v7152_v61, %v4077_v13  ;;  %v10889_v20 = vmul.f32 %v7150_v12, %v10581_v35  ;;  %v4014_v13 = vmax.f32 %v10855_v18, 0.0 }
 0x594   :  { %v4144_v23 = vand.u32 2147483647, %v10883_v53  ;;  %v10895_v10 = vmul.f32 %v7154_v11, %v10588_v7  ;;  %7173 = vrcp.f32 %v4209_v42  ;;  %v4218_v61 = vadd.f32 1e-12, %v4154_v36 }
 0x595   :  { %12217 = vst [vmem:[#allocation28_spill] sm:$0xff] %v10885_v0  ;;  %v7156_v1 = vpop.eup %7155  ;;  %v3721_v43 = vpop.xlane.xlu1 %3720  ;;  %v4397_v51 = vand.u32 2147483647, %v10885_v0  ;;  %v10905_v7 = vadd.f32 -0.0025, %v10889_v20  ;;  %v4017_v18 = vmax.f32 %v10865_v46, 0.0 }
 0x596   :  { %v7158_v39 = vpop.eup %7157  ;;  %7175 = vrcp.f32 %v3721_v43  ;;  %v4208_v35 = vadd.f32 1e-12, %v4144_v23  ;;  %v10900_v37 = vadd.f32 -0.0025, %v10895_v10  ;;  %v10908_v11 = vmul.f32 %v7156_v1, %v10592_v44 }
 0x597   :  { %v7160_v29 = vpop.eup %7159  ;;  %4468 = vadd.xlane.f32.xlu1 %v4397_v51  ;;  %v3751_v56 = vpop.xlane.xlu0 %3750  ;;  %v10902_v12 = vmul.f32 %v7158_v39, %v4076_v52  ;;  %7177 = vrcp.f32 %v4218_v61  ;;  %v4079_v39 = vmul.f32 %v4015_v34, %v10837_v4  ;;  %v4078_v52 = vmul.f32 %v4014_v13, %v10850_v45 }
 0x598   :  { %v4147_v42 = vand.u32 2147483647, %v10900_v37  ;;  %v10913_v36 = vmul.f32 %v7160_v29, %v10597_v6  ;;  %7179 = vrcp.f32 %v4208_v35  ;;  %v4026_v46 = vmax.f32 %v10880_v15, 0.0 }
 0x599   :  { %12218 = vst [vmem:[#allocation26_spill] sm:$0xff] %v10902_v12  ;;  %v3719_v23 = vpop.xlane.xlu1 %3718  ;;  %v4396_v43 = vand.u32 2147483647, %v10902_v12  ;;  %v7162_v51 = vpop.eup %7161  ;;  %v4156_v61 = vand.u32 2147483647, %v10905_v7  ;;  %v4081_v34 = vmul.f32 %v4017_v18, %v10859_v48  ;;  %v4019_v18 = vmax.f32 %v10900_v37, 0.0 }
 0x59a   :  { %7181 = vrcp.f32 %v3719_v23  ;;  %v4211_v44 = vadd.f32 1e-12, %v4147_v42  ;;  %v10919_v1 = vadd.f32 -0.0025, %v10913_v36  ;;  %v10922_v6 = vmul.f32 %v7162_v51, %v4079_v39 }
 0x59b   :  { %v7164_v0 = vpop.eup %7163  ;;  %7183 = vrcp.f32 %v3747_v59  ;;  %4466 = vadd.xlane.f32.xlu0 %v4396_v43  ;;  %v10926_v4 = vadd.f32 -0.0025, %v10908_v11  ;;  %v3755_v45 = vpop.xlane.xlu0 %3754  ;;  %v4016_v42 = vmax.f32 %v10883_v53, 0.0  ;;  %v10940_v48 = vmul.f32 %v4026_v46, %v10868_v5 }
 0x59c   :  { %12219 = vst [vmem:[#allocation25_spill] sm:$0xff] %v10922_v6  ;;  %7185 = vrcp.f32 %v3751_v56  ;;  %v4146_v13 = vand.u32 2147483647, %v10919_v1  ;;  %v10931_v35 = vmul.f32 %v7164_v0, %v10608_v31  ;;  %v7166_v15 = vpop.eup %7165  ;;  %v4399_v59 = vand.u32 2147483647, %v10922_v6 }
 0x59d   :  { %v3725_v29 = vpop.xlane.xlu1 %3724  ;;  %7187 = vrcp.f32 %v4211_v44  ;;  %v4158_v23 = vand.u32 2147483647, %v10926_v4  ;;  %v7168_v43 = vpop.eup %7167  ;;  %v4028_v53 = vmax.f32 %v10905_v7, 0.0  ;;  %v4220_v51 = vadd.f32 1e-12, %v4156_v61 }
 0x59e   :  { %7189 = vrcp.f32 %v3725_v29  ;;  %v4210_v56 = vadd.f32 1e-12, %v4146_v13  ;;  %v10937_v39 = vadd.f32 -0.0025, %v10931_v35  ;;  %4472 = vadd.xlane.f32.xlu1 %v4399_v59  ;;  %v10942_v0 = vmul.f32 %v7168_v43, %v4078_v52 }
 0x59f   :  { %v7170_v31 = vpop.eup %7169  ;;  %7191 = vrcp.f32 %v3755_v45  ;;  %v4222_v6 = vadd.f32 1e-12, %v4158_v23  ;;  %v4018_v46 = vmax.f32 %v10919_v1, 0.0  ;;  %v10953_v52 = vmul.f32 %v7166_v15, %v10603_v14  ;;  %v3759_v7 = vpop.xlane.xlu0 %3758 }
 0x5a0   :  { %v7172_v44 = vpop.eup %7171  ;;  %v4149_v29 = vand.u32 2147483647, %v10937_v39  ;;  %v10948_v13 = vmul.f32 %v7170_v31, %v10617_v22  ;;  %v4398_v5 = vand.u32 2147483647, %v10942_v0  ;;  %7193 = vrcp.f32 %v4210_v56 }
 0x5a1   :  { %v3723_v12 = vpop.xlane.xlu1 %3722  ;;  %v7174_v37 = vpop.eup %7173  ;;  %v4030_v59 = vmax.f32 %v10926_v4, 0.0  ;;  %v10960_v43 = vadd.f32 -0.0025, %v10953_v52  ;;  %v10963_v1 = vmul.f32 %v7172_v44, %v10612_v9  ;;  %v4080_v14 = vmul.f32 %v4016_v42, %v10875_v47 }
 0x5a2   :  { %7195 = vrcp.f32 %v3723_v12  ;;  %v4213_v61 = vadd.f32 1e-12, %v4149_v29  ;;  %v5664_v45 = vadd.f32 -0.0025, %v10948_v13  ;;  %4470 = vadd.xlane.f32.xlu0 %v4398_v5  ;;  %v10957_v23 = vmul.f32 %v7174_v37, %v4081_v34 }
 0x5a3   :  { %v7176_v22 = vpop.eup %7175  ;;  %7197 = vrcp.f32 %v4220_v51  ;;  %v4083_v34 = vmul.f32 %v4019_v18, %v10895_v10  ;;  %v10972_v51 = vmul.f32 %v4028_v53, %v10889_v20  ;;  %v4082_v9 = vmul.f32 %v4018_v46, %v10913_v36  ;;  %v3763_v53 = vpop.xlane.xlu0 %3762 }
 0x5a4   :  { %v4148_v15 = vand.u32 2147483647, %v5664_v45  ;;  %v10967_v12 = vmul.f32 %v7176_v22, %v10626_v27  ;;  %7199 = vrcp.f32 %v4222_v6  ;;  %v7178_v56 = vpop.eup %7177  ;;  %v4401_v31 = vand.u32 2147483647, %v10957_v23 }
 0x5a5   :  { %v3729_v4 = vpop.xlane.xlu1 %3728  ;;  %7201 = vrcp.f32 %v4213_v61  ;;  %v7180_v29 = vpop.eup %7179  ;;  %v10979_v44 = vmul.f32 %v4030_v59, %v10908_v11  ;;  %v4160_v10 = vand.u32 2147483647, %v10960_v43  ;;  %v10983_v18 = vadd.f32 -0.0025, %v10963_v1 }
 0x5a6   :  { %7203 = vrcp.f32 %v3729_v4  ;;  %v4212_v47 = vadd.f32 1e-12, %v4148_v15  ;;  %v5667_v42 = vadd.f32 -0.0025, %v10967_v12  ;;  %4476 = vadd.xlane.f32.xlu1 %v4401_v31  ;;  %v10976_v6 = vmul.f32 %v7180_v29, %v4080_v14 }
 0x5a7   :  { %v7182_v27 = vpop.eup %7181  ;;  %7205 = vrcp.f32 %v3759_v7  ;;  %v4021_v36 = vmax.f32 %v10937_v39, 0.0  ;;  %v4020_v59 = vmax.f32 %v5664_v45, 0.0  ;;  %v4224_v22 = vadd.f32 1e-12, %v4160_v10 }
 0x5a8   :  { %v7184_v20 = vpop.eup %7183  ;;  %v4151_v5 = vand.u32 2147483647, %v5667_v42  ;;  %v10987_v46 = vmul.f32 %v7182_v27, %v10635_v8  ;;  %v4400_v11 = vand.u32 2147483647, %v10976_v6  ;;  %7207 = vrcp.f32 %v4212_v47 }
 0x5a9   :  { %v10989_v37 = vpop.eup %7185  ;;  %v3733_v61 = vpop.xlane.xlu1 %3732  ;;  %v10996_v39 = vmul.f32 %v7178_v56, %v10940_v48  ;;  %v4032_v31 = vmax.f32 %v10960_v43, 0.0  ;;  %v4162_v45 = vand.u32 2147483647, %v10983_v18  ;;  %v4085_v29 = vmul.f32 %v4021_v36, %v10931_v35 }
 0x5aa   :  { %v7188_v14 = vpop.eup %7187  ;;  %7209 = vrcp.f32 %v3733_v61  ;;  %v4215_v15 = vadd.f32 1e-12, %v4151_v5  ;;  %v10993_v7 = vadd.f32 -0.0025, %v10987_v46  ;;  %4474 = vadd.xlane.f32.xlu0 %v4400_v11  ;;  %v3767_v5 = vpop.xlane.xlu0 %3766 }
 0x5ab   :  { %v7190_v4 = vpop.eup %7189  ;;  %7211 = vrcp.f32 %v3763_v53  ;;  %v10998_v8 = vmul.f32 %v7188_v14, %v4083_v34  ;;  %v4084_v34 = vmul.f32 %v4020_v59, %v10948_v13  ;;  %v4023_v53 = vmax.f32 %v5667_v42, 0.0 }
 0x5ac   :  { %v4150_v47 = vand.u32 2147483647, %v10993_v7  ;;  %v11005_v27 = vmul.f32 %v7190_v4, %v10644_v28  ;;  %7213 = vrcp.f32 %v4224_v22  ;;  %v11007_v10 = vpop.eup %7191  ;;  %v11016_v22 = vmul.f32 %v4032_v31, %v10953_v52 }
 0x5ad   :  { %v3737_v48 = vpop.xlane.xlu1 %3736  ;;  %v4403_v56 = vand.u32 2147483647, %v10998_v8  ;;  %7215 = vrcp.f32 %v4215_v15  ;;  %v7194_v43 = vpop.eup %7193  ;;  %v4226_v14 = vadd.f32 1e-12, %v4162_v45  ;;  %v11019_v13 = vmul.f32 %v7184_v20, %v10621_v41 }
 0x5ae   :  { %7217 = vrcp.f32 %v3737_v48  ;;  %v4214_v61 = vadd.f32 1e-12, %v4150_v47  ;;  %v5669_v35 = vadd.f32 -0.0025, %v11005_v27  ;;  %v11013_v11 = vmul.f32 %v7194_v43, %v4082_v9 }
 0x5af   :  { %v7196_v28 = vpop.eup %7195  ;;  %4480 = vadd.xlane.f32.xlu1 %v4403_v56  ;;  %v4034_v4 = vmax.f32 %v10983_v18, 0.0  ;;  %v4087_v52 = vmul.f32 %v4023_v53, %v10967_v12  ;;  %v11028_v31 = vadd.f32 -0.0025, %v11019_v13  ;;  %v4022_v20 = vmax.f32 %v10993_v7, 0.0  ;;  %v3771_v53 = vpop.xlane.xlu0 %3770 }
 0x5b0   :  { %v7198_v42 = vpop.eup %7197  ;;  %7219 = vrcp.f32 %v4214_v61  ;;  %v4153_v59 = vand.u32 2147483647, %v5669_v35  ;;  %v11022_v15 = vmul.f32 %v7196_v28, %v10653_v55  ;;  %v4402_v9 = vand.u32 2147483647, %v11013_v11 }
 0x5b1   :  { %v7200_v47 = vpop.eup %7199  ;;  %7221 = vrcp.f32 %v3767_v5  ;;  %v3741_v48 = vpop.xlane.xlu1 %3740  ;;  %v11037_v43 = vmul.f32 %v7198_v42, %v10972_v51  ;;  %v4164_v12 = vand.u32 2147483647, %v11028_v31  ;;  %v11043_v7 = vmul.f32 %v4034_v4, %v10963_v1 }
 0x5b2   :  { %v7202_v41 = vpop.eup %7201  ;;  %7223 = vrcp.f32 %v3741_v48  ;;  %v4217_v45 = vadd.f32 1e-12, %v4153_v59  ;;  %v11032_v55 = vadd.f32 -0.0025, %v11022_v15  ;;  %4478 = vadd.xlane.f32.xlu0 %v4402_v9  ;;  %v11047_v28 = vmul.f32 %v10989_v37, %v10630_v25 }
 0x5b3   :  { %v7204_v56 = vpop.eup %7203  ;;  %v11034_v18 = vmul.f32 %v7202_v41, %v4085_v29  ;;  %7225 = vrcp.f32 %v4226_v14  ;;  %v4025_v14 = vmax.f32 %v5669_v35, 0.0  ;;  %v4228_v42 = vadd.f32 1e-12, %v4164_v12 }
 0x5b4   :  { %v4152_v5 = vand.u32 2147483647, %v11032_v55  ;;  %v3899_v61 = vmul.f32 %v7204_v56, %v10661_v40  ;;  %v11049_v29 = vpop.eup %7205  ;;  %7227 = vrcp.f32 %v4217_v45  ;;  %v11053_v40 = vmul.f32 %v7200_v47, %v10979_v44  ;;  %v3775_v47 = vpop.xlane.xlu0 %3774 }
 0x5b5   :  { %v3745_v59 = vpop.xlane.xlu1 %3744  ;;  %v4405_v51 = vand.u32 2147483647, %v11034_v18  ;;  %v7208_v48 = vpop.eup %7207  ;;  %v4086_v37 = vmul.f32 %v4022_v20, %v10987_v46  ;;  %v5682_v12 = vadd.f32 -0.0025, %v11047_v28  ;;  %v11069_v46 = vmul.f32 %v11007_v10, %v10639_v33 }
 0x5b6   :  { %7229 = vrcp.f32 %v3745_v59  ;;  %v4216_v9 = vadd.f32 1e-12, %v4152_v5  ;;  %v5671_v41 = vadd.f32 -0.0025, %v3899_v61  ;;  %v11055_v25 = vmul.f32 %v7208_v48, %v4084_v34 }
 0x5b7   :  { %v7210_v1 = vpop.eup %7209  ;;  %7231 = vrcp.f32 %v3771_v53  ;;  %4484 = vadd.xlane.f32.xlu1 %v4405_v51  ;;  %v4089_v34 = vmul.f32 %v4025_v14, %v11005_v27  ;;  %v4036_v14 = vmax.f32 %v11028_v31, 0.0 }
 0x5b8   :  { %v11059_v56 = vpop.eup %7211  ;;  %7233 = vrcp.f32 %v4216_v9  ;;  %v4155_v35 = vand.u32 2147483647, %v5671_v41  ;;  %v11062_v45 = vmul.f32 %v7210_v1, %v10670_v26  ;;  %v4404_v53 = vand.u32 2147483647, %v11055_v25 }
 0x5b9   :  { %v7214_v44 = vpop.eup %7213  ;;  %v3749_v5 = vpop.xlane.xlu1 %3748  ;;  %7235 = vrcp.f32 %v4228_v42  ;;  %v4024_v1 = vmax.f32 %v11032_v55, 0.0  ;;  %v4027_v27 = vmax.f32 %v5671_v41, 0.0  ;;  %v4166_v42 = vand.u32 2147483647, %v5682_v12 }
 0x5ba   :  { %v7216_v20 = vpop.eup %7215  ;;  %7237 = vrcp.f32 %v3749_v5  ;;  %v4219_v59 = vadd.f32 1e-12, %v4155_v35  ;;  %v11072_v26 = vadd.f32 -0.0025, %v11062_v45  ;;  %4482 = vadd.xlane.f32.xlu0 %v4404_v53  ;;  %v5684_v55 = vadd.f32 -0.0025, %v11069_v46 }
 0x5bb   :  { %v7218_v48 = vpop.eup %7217  ;;  %v11075_v9 = vmul.f32 %v7216_v20, %v4087_v52  ;;  %7239 = vrcp.f32 %v3775_v47  ;;  %v11085_v52 = vmul.f32 %v7214_v44, %v11016_v22  ;;  %v3779_v31 = vpop.xlane.xlu0 %3778  ;;  %v11093_v4 = vmul.f32 %v4027_v27, %v3899_v61 }
 0x5bc   :  { %v4157_v33 = vand.u32 2147483647, %v11072_v26  ;;  %v11081_v10 = vmul.f32 %v7218_v48, %v10678_v3  ;;  %7241 = vrcp.f32 %v4219_v59  ;;  %v4038_v3 = vmax.f32 %v5682_v12, 0.0 }
 0x5bd   :  { %v7220_v35 = vpop.eup %7219  ;;  %v3753_v5 = vpop.xlane.xlu1 %3752  ;;  %v4407_v51 = vand.u32 2147483647, %v11075_v9  ;;  %v4088_v48 = vmul.f32 %v4024_v1, %v11022_v15  ;;  %v4100_v22 = vmul.f32 %v4036_v14, %v11019_v13  ;;  %v4168_v15 = vand.u32 2147483647, %v5684_v55 }
 0x5be   :  { %v11088_v41 = vpop.eup %7221  ;;  %7243 = vrcp.f32 %v3753_v5  ;;  %v11090_v47 = vmul.f32 %v7220_v35, %v4086_v37  ;;  %v4221_v53 = vadd.f32 1e-12, %v4157_v33  ;;  %v5675_v59 = vadd.f32 -0.0025, %v11081_v10 }
 0x5bf   :  { %v7224_v20 = vpop.eup %7223  ;;  %4488 = vadd.xlane.f32.xlu1 %v4407_v51  ;;  %v4230_v37 = vadd.f32 1e-12, %v4166_v42  ;;  %v11104_v13 = vmul.f32 %v4038_v3, %v11047_v28  ;;  %v11108_v27 = vmul.f32 %v11049_v29, %v10649_v16  ;;  %v4029_v42 = vmax.f32 %v11072_v26, 0.0 }
 0x5c0   :  { %v7226_v44 = vpop.eup %7225  ;;  %v4406_v36 = vand.u32 2147483647, %v11090_v47  ;;  %7245 = vrcp.f32 %v4221_v53  ;;  %v11099_v5 = vmul.f32 %v7224_v20, %v10684_v54  ;;  %v4159_v33 = vand.u32 2147483647, %v5675_v59 }
 0x5c1   :  { %7247 = vrcp.f32 %v3779_v31  ;;  %v3757_v12 = vpop.xlane.xlu1 %3756  ;;  %v7228_v61 = vpop.eup %7227  ;;  %v11114_v31 = vmul.f32 %v7226_v44, %v11043_v7  ;;  %v4040_v28 = vmax.f32 %v5684_v55, 0.0  ;;  %v5686_v44 = vadd.f32 -0.0025, %v11108_v27 }
 0x5c2   :  { %7249 = vrcp.f32 %v3757_v12  ;;  %4486 = vadd.xlane.f32.xlu0 %v4406_v36  ;;  %v5677_v1 = vadd.f32 -0.0025, %v11099_v5  ;;  %v11110_v14 = vmul.f32 %v7228_v61, %v4089_v34  ;;  %v4223_v35 = vadd.f32 1e-12, %v4159_v33 }
 0x5c3   :  { %v7230_v54 = vpop.eup %7229  ;;  %7251 = vrcp.f32 %v4230_v37  ;;  %v4031_v34 = vmax.f32 %v5675_v59, 0.0  ;;  %v4232_v12 = vadd.f32 1e-12, %v4168_v15  ;;  %v11132_v59 = vmul.f32 %v11059_v56, %v10657_v32 }
 0x5c4   :  { %v11116_v53 = vpop.eup %7231  ;;  %v4161_v36 = vand.u32 2147483647, %v5677_v1  ;;  %v11119_v20 = vmul.f32 %v7230_v54, %v10692_v62  ;;  %v4409_v29 = vand.u32 2147483647, %v11110_v14  ;;  %7253 = vrcp.f32 %v4223_v35 }
 0x5c5   :  { %v7234_v3 = vpop.eup %7233  ;;  %v3761_v16 = vpop.xlane.xlu1 %3760  ;;  %v4093_v62 = vmul.f32 %v4029_v42, %v11062_v45  ;;  %v11139_v54 = vmul.f32 %v4040_v28, %v11069_v46  ;;  %v4095_v56 = vmul.f32 %v4031_v34, %v11081_v10  ;;  %v4042_v46 = vmax.f32 %v5686_v44, 0.0 }
 0x5c6   :  { %v7236_v26 = vpop.eup %7235  ;;  %7255 = vrcp.f32 %v3761_v16  ;;  %v11122_v33 = vmul.f32 %v7234_v3, %v4088_v48  ;;  %v4225_v7 = vadd.f32 1e-12, %v4161_v36  ;;  %4492 = vadd.xlane.f32.xlu1 %v4409_v29  ;;  %v11127_v55 = vadd.f32 -0.0025, %v11119_v20  ;;  %v3783_v45 = vpop.xlane.xlu0 %3782 }
 0x5c7   :  { %v7238_v61 = vpop.eup %7237  ;;  %v4033_v36 = vmax.f32 %v5677_v1, 0.0  ;;  %v11144_v16 = vmul.f32 %v7236_v26, %v4100_v22  ;;  %v4170_v1 = vand.u32 2147483647, %v5686_v44  ;;  %v11160_v10 = vmul.f32 %v11088_v41, %v10666_v49 }
 0x5c8   :  { %v4408_v15 = vand.u32 2147483647, %v11122_v33  ;;  %7257 = vrcp.f32 %v4225_v7  ;;  %v11136_v48 = vmul.f32 %v7238_v61, %v10696_v50  ;;  %v11141_v35 = vpop.eup %7239  ;;  %v4163_v3 = vand.u32 2147483647, %v11127_v55 }
 0x5c9   :  { %v3765_v42 = vpop.xlane.xlu1 %3764  ;;  %12220 = vst [vmem:[#allocation27_spill] sm:$0xff] %v11144_v16  ;;  %7259 = vrcp.f32 %v4232_v12  ;;  %v7242_v32 = vpop.eup %7241  ;;  %v5688_v61 = vadd.f32 -0.0025, %v11132_v59  ;;  %v4035_v49 = vmax.f32 %v11127_v55, 0.0 }
 0x5ca   :  { %7261 = vrcp.f32 %v3765_v42  ;;  %4490 = vadd.xlane.f32.xlu0 %v4408_v15  ;;  %v11148_v50 = vadd.f32 -0.0025, %v11136_v48  ;;  %v11151_v29 = vmul.f32 %v7242_v32, %v11093_v4  ;;  %v4227_v7 = vadd.f32 1e-12, %v4163_v3 }
 0x5cb   :  { %v7244_v28 = vpop.eup %7243  ;;  %7263 = vrcp.f32 %v3783_v45  ;;  %v4097_v4 = vmul.f32 %v4033_v36, %v11099_v5  ;;  %v3787_v45 = vpop.xlane.xlu0 %3786  ;;  %v11176_v5 = vmul.f32 %v4042_v46, %v11108_v27  ;;  %v4234_v36 = vadd.f32 1e-12, %v4170_v1 }
 0x5cc   :  { %v4165_v22 = vand.u32 2147483647, %v11148_v50  ;;  %v11156_v12 = vmul.f32 %v7244_v28, %v10704_v19  ;;  %v4411_v15 = vand.u32 2147483647, %v11151_v29  ;;  %7265 = vrcp.f32 %v4227_v7 }
 0x5cd   :  { %v7246_v34 = vpop.eup %7245  ;;  %v3769_v26 = vpop.xlane.xlu1 %3768  ;;  %v12221_v19 = vand.u32 2147483647, %v10996_v39  ;;  %v4172_v7 = vand.u32 2147483647, %v5688_v61  ;;  %v12222_v46 = vand.u32 2147483647, %v11037_v43 }
 0x5ce   :  { %v11165_v42 = vpop.eup %7247  ;;  %7267 = vrcp.f32 %v3769_v26  ;;  %v11169_v3 = vmul.f32 %v7246_v34, %v4093_v62  ;;  %v4229_v41 = vadd.f32 1e-12, %v4165_v22  ;;  %4496 = vadd.xlane.f32.xlu1 %v4411_v15  ;;  %v11173_v28 = vadd.f32 -0.0025, %v11156_v12 }
 0x5cf   :  { %4494 = vadd.xlane.f32.xlu0 %v12221_v19  ;;  %v7250_v32 = vpop.eup %7249  ;;  %v11183_v62 = vadd.f32 -0.0025, %v11160_v10  ;;  %v4044_v15 = vmax.f32 %v5688_v61, 0.0  ;;  %v4236_v44 = vadd.f32 1e-12, %v4172_v7  ;;  %v4037_v1 = vmax.f32 %v11148_v50, 0.0 }
 0x5d0   :  { %v4413_v26 = vand.u32 2147483647, %v11169_v3  ;;  %7269 = vrcp.f32 %v4229_v41  ;;  %v11180_v19 = vmul.f32 %v7250_v32, %v10709_v57  ;;  %v7252_v55 = vpop.eup %7251  ;;  %v4167_v34 = vand.u32 2147483647, %v11173_v28 }
 0x5d1   :  { %7271 = vrcp.f32 %v3787_v45  ;;  %v3773_v22 = vpop.xlane.xlu1 %3772  ;;  %v7254_v27 = vpop.eup %7253  ;;  %v11194_v41 = vmul.f32 %v11116_v53, %v10674_v21  ;;  %v4174_v7 = vand.u32 2147483647, %v11183_v62  ;;  %v11206_v53 = vmul.f32 %v7252_v55, %v11104_v13 }
 0x5d2   :  { %7273 = vrcp.f32 %v3773_v22  ;;  %v11190_v57 = vadd.f32 -0.0025, %v11180_v19  ;;  %4500 = vadd.xlane.f32.xlu1 %v4413_v26  ;;  %v11196_v32 = vmul.f32 %v7254_v27, %v4095_v56  ;;  %v4231_v61 = vadd.f32 1e-12, %v4167_v34 }
 0x5d3   :  { %4498 = vadd.xlane.f32.xlu0 %v12222_v46  ;;  %v7256_v45 = vpop.eup %7255  ;;  %7275 = vrcp.f32 %v4234_v36  ;;  %v4099_v22 = vmul.f32 %v4035_v49, %v11119_v20  ;;  %v11209_v56 = vmul.f32 %v4044_v15, %v11132_v59  ;;  %v3791_v26 = vpop.xlane.xlu0 %3790  ;;  %v12223_v20 = vand.u32 2147483647, %v11053_v40 }
 0x5d4   :  { %v4169_v46 = vand.u32 2147483647, %v11190_v57  ;;  %v11202_v50 = vmul.f32 %v7256_v45, %v10718_v38  ;;  %7277 = vrcp.f32 %v4236_v44  ;;  %v4415_v21 = vand.u32 2147483647, %v11196_v32 }
 0x5d5   :  { %v7258_v37 = vpop.eup %7257  ;;  %v3777_v51 = vpop.xlane.xlu1 %3776  ;;  %7279 = vrcp.f32 %v4231_v61  ;;  %v4039_v44 = vmax.f32 %v11173_v28, 0.0  ;;  %v4101_v27 = vmul.f32 %v4037_v1, %v11136_v48  ;;  %v4238_v55 = vadd.f32 1e-12, %v4174_v7 }
 0x5d6   :  { %v7260_v36 = vpop.eup %7259  ;;  %7281 = vrcp.f32 %v3777_v51  ;;  %v11213_v38 = vmul.f32 %v7258_v37, %v4097_v4  ;;  %v4233_v49 = vadd.f32 1e-12, %v4169_v46  ;;  %4504 = vadd.xlane.f32.xlu1 %v4415_v21  ;;  %v5687_v13 = vadd.f32 -0.0025, %v11202_v50 }
 0x5d7   :  { %4502 = vadd.xlane.f32.xlu0 %v12223_v20  ;;  %v7262_v34 = vpop.eup %7261  ;;  %v11220_v59 = vmul.f32 %v11141_v35, %v10688_v30  ;;  %v11227_v4 = vadd.f32 -0.0025, %v11194_v41  ;;  %v4046_v45 = vmax.f32 %v11183_v62, 0.0  ;;  %v12224_v35 = vand.u32 2147483647, %v11085_v52 }
 0x5d8   :  { %v4417_v51 = vand.u32 2147483647, %v11213_v38  ;;  %7283 = vrcp.f32 %v4233_v49  ;;  %v11224_v37 = vmul.f32 %v7262_v34, %v10723_v17  ;;  %v11229_v28 = vpop.eup %7263  ;;  %v4171_v1 = vand.u32 2147483647, %v5687_v13 }
 0x5d9   :  { %7285 = vrcp.f32 %v3791_v26  ;;  %v3781_v48 = vpop.xlane.xlu1 %3780  ;;  %v7266_v30 = vpop.eup %7265  ;;  %v4103_v17 = vmul.f32 %v4039_v44, %v11156_v12  ;;  %v4041_v61 = vmax.f32 %v11190_v57, 0.0  ;;  %v11243_v26 = vmul.f32 %v7260_v36, %v11139_v54 }
 0x5da   :  { %7287 = vrcp.f32 %v3781_v48  ;;  %v11238_v7 = vadd.f32 -0.0025, %v11224_v37  ;;  %4508 = vadd.xlane.f32.xlu1 %v4417_v51  ;;  %v11240_v21 = vmul.f32 %v7266_v30, %v4099_v22  ;;  %v4235_v62 = vadd.f32 1e-12, %v4171_v1 }
 0x5db   :  { %4506 = vadd.xlane.f32.xlu0 %v12224_v35  ;;  %v7268_v46 = vpop.eup %7267  ;;  %12225 = vst [vmem:[#allocation29_spill] sm:$0xff] %v11243_v26  ;;  %v4176_v20 = vand.u32 2147483647, %v11227_v4  ;;  %7289 = vrcp.f32 %v4238_v55  ;;  %v11251_v12 = vadd.f32 -0.0025, %v11220_v59  ;;  %v4043_v51 = vmax.f32 %v5687_v13, 0.0 }
 0x5dc   :  { %v4173_v49 = vand.u32 2147483647, %v11238_v7  ;;  %v11248_v34 = vmul.f32 %v7268_v46, %v10731_v63  ;;  %v4419_v22 = vand.u32 2147483647, %v11240_v21  ;;  %7291 = vrcp.f32 %v4235_v62 }
 0x5dd   :  { %v7270_v57 = vpop.eup %7269  ;;  %v3785_v44 = vpop.xlane.xlu1 %3784  ;;  %v11255_v54 = vmul.f32 %v4046_v45, %v11160_v10  ;;  %v12226_v48 = vand.u32 2147483647, %v11114_v31  ;;  %v11265_v1 = vmul.f32 %v11165_v42, %v10700_v60  ;;  %v4105_v13 = vmul.f32 %v4041_v61, %v11180_v19 }
 0x5de   :  { %v11257_v36 = vpop.eup %7271  ;;  %7293 = vrcp.f32 %v3785_v44  ;;  %v11261_v63 = vmul.f32 %v7270_v57, %v4101_v27  ;;  %v4237_v55 = vadd.f32 1e-12, %v4173_v49  ;;  %4512 = vadd.xlane.f32.xlu1 %v4419_v22  ;;  %v4424_v10 = vand.u32 2147483647, %v11243_v26  ;;  %v3795_v49 = vpop.xlane.xlu0 %3794 }
 0x5df   :  { %4510 = vadd.xlane.f32.xlu0 %v12226_v48  ;;  %v7274_v30 = vpop.eup %7273  ;;  %v11270_v45 = vadd.f32 -0.0025, %v11248_v34  ;;  %v4240_v35 = vadd.f32 1e-12, %v4176_v20  ;;  %v4178_v60 = vand.u32 2147483647, %v11251_v12  ;;  %v4107_v19 = vmul.f32 %v4043_v51, %v11202_v50 }
 0x5e0   :  { %12227 = vst [vmem:[#allocation30_spill] sm:$0xff] %v11261_v63  ;;  %v7276_v46 = vpop.eup %7275  ;;  %v4421_v62 = vand.u32 2147483647, %v11261_v63  ;;  %7295 = vrcp.f32 %v4237_v55  ;;  %v11274_v27 = vmul.f32 %v7274_v30, %v10735_v24  ;;  %v4048_v44 = vmax.f32 %v11227_v4, 0.0 }
 0x5e1   :  { %v7278_v42 = vpop.eup %7277  ;;  %v3789_v57 = vpop.xlane.xlu1 %3788  ;;  %v4175_v61 = vand.u32 2147483647, %v11270_v45  ;;  %7297 = vrcp.f32 %v4240_v35  ;;  %v12228_v22 = vand.u32 2147483647, %v11144_v16  ;;  %v4045_v24 = vmax.f32 %v11238_v7, 0.0 }
 0x5e2   :  { %v7280_v20 = vpop.eup %7279  ;;  %7299 = vrcp.f32 %v3789_v57  ;;  %v11284_v48 = vadd.f32 -0.0025, %v11274_v27  ;;  %v11287_v55 = vadd.f32 -0.0025, %v11265_v1  ;;  %4516 = vadd.xlane.f32.xlu1 %v4421_v62  ;;  %v11292_v4 = vmul.f32 %v7276_v46, %v11176_v5 }
 0x5e3   :  { %4514 = vadd.xlane.f32.xlu0 %v12228_v22  ;;  %v7282_v30 = vpop.eup %7281  ;;  %v11289_v50 = vmul.f32 %v7280_v20, %v4103_v17  ;;  %v4239_v51 = vadd.f32 1e-12, %v4175_v61  ;;  %v4242_v35 = vadd.f32 1e-12, %v4178_v60  ;;  %7301 = vrcp.f32 %v3795_v49  ;;  %v12230_v22 = vld [vmem:[#allocation21_spill] sm:$0xff]  ;;  %v3799_v62 = vpop.xlane.xlu0 %3798 }
 0x5e4   :  { %12229 = vst [vmem:[#allocation31_spill] sm:$0xff] %v11292_v4  ;;  %v4177_v57 = vand.u32 2147483647, %v11284_v48  ;;  %v11296_v7 = vmul.f32 %v7282_v30, %v12230_v22  ;;  %v4050_v15 = vmax.f32 %v11251_v12, 0.0  ;;  %v11301_v17 = vmul.f32 %v4048_v44, %v11194_v41 }
 0x5e5   :  { %v7284_v26 = vpop.eup %7283  ;;  %v3793_v63 = vpop.xlane.xlu1 %3792  ;;  %v4423_v16 = vand.u32 2147483647, %v11289_v50  ;;  %7303 = vrcp.f32 %v4239_v51  ;;  %v4180_v5 = vand.u32 2147483647, %v11287_v55  ;;  %v12231_v60 = vand.u32 2147483647, %v11206_v53 }
 0x5e6   :  { %v11304_v46 = vpop.eup %7285  ;;  %7305 = vrcp.f32 %v3793_v63  ;;  %v11308_v49 = vmul.f32 %v7284_v26, %v4105_v13  ;;  %v11311_v12 = vmul.f32 %v7278_v42, %v11209_v56  ;;  %v4241_v61 = vadd.f32 1e-12, %v4177_v57  ;;  %v12233_v51 = vld [vmem:[#allocation5_spill] sm:$0xff] }
 0x5e7   :  { %4518 = vadd.xlane.f32.xlu0 %v12231_v60  ;;  %v7288_v20 = vpop.eup %7287  ;;  %4520 = vadd.xlane.f32.xlu1 %v4423_v16  ;;  %v4426_v41 = vand.u32 2147483647, %v11292_v4  ;;  %v4109_v44 = vmul.f32 %v4045_v24, %v11224_v37  ;;  %v11316_v30 = vadd.f32 -0.0025, %v11296_v7  ;;  %7307 = vrcp.f32 %v4242_v35  ;;  %v12234_v37 = vld [vmem:[#allocation37_spill] sm:$0xff] }
 0x5e8   :  { %12232 = vst [vmem:[#allocation33_spill] sm:$0xff] %v11311_v12  ;;  %v4425_v63 = vand.u32 2147483647, %v11308_v49  ;;  %7309 = vrcp.f32 %v4241_v61  ;;  %v11320_v26 = vmul.f32 %v7288_v20, %v12233_v51  ;;  %v4244_v13 = vadd.f32 1e-12, %v4180_v5  ;;  %v7290_v56 = vpop.eup %7289  ;;  %v12236_v20 = vld [vmem:[#allocation40_spill] sm:$0xff] }
 0x5e9   :  { %7311 = vrcp.f32 %v3799_v62  ;;  %v3797_v42 = vpop.xlane.xlu1 %3796  ;;  %v4179_v16 = vand.u32 2147483647, %v11316_v30  ;;  %v11324_v57 = vmul.f32 %v4050_v15, %v11220_v59  ;;  %v11328_v24 = vmul.f32 %v11229_v28, %v12234_v37  ;;  %v7292_v35 = vpop.eup %7291 }
 0x5ea   :  { %7313 = vrcp.f32 %v3797_v42  ;;  %v4428_v22 = vand.u32 2147483647, %v11311_v12  ;;  %v4047_v60 = vmax.f32 %v11270_v45, 0.0  ;;  %v11333_v5 = vadd.f32 -0.0025, %v11320_v26  ;;  %v12237_v45 = vld [vmem:[#allocation13_spill] sm:$0xff] }
 0x5eb   :  { %4522 = vadd.xlane.f32.xlu0 %v4424_v10  ;;  %v7294_v62 = vpop.eup %7293  ;;  %4524 = vadd.xlane.f32.xlu1 %v4425_v63  ;;  %v11335_v61 = vmul.f32 %v7292_v35, %v4107_v19  ;;  %v4049_v59 = vmax.f32 %v11284_v48, 0.0  ;;  %v4243_v15 = vadd.f32 1e-12, %v4179_v16  ;;  %v11340_v28 = vmul.f32 %v11257_v36, %v12236_v20  ;;  %v3803_v16 = vpop.xlane.xlu0 %3802 }
 0x5ec   :  { %v4181_v10 = vand.u32 2147483647, %v11333_v5  ;;  %v4052_v51 = vmax.f32 %v11287_v55, 0.0  ;;  %7315 = vrcp.f32 %v4244_v13  ;;  %v11345_v42 = vmul.f32 %v7294_v62, %v12237_v45 }
 0x5ed   :  { %12235 = vst [vmem:[#allocation32_spill] sm:$0xff] %v11335_v61  ;;  %v7296_v37 = vpop.eup %7295  ;;  %v3801_v12 = vpop.xlane.xlu1 %3800  ;;  %v4427_v19 = vand.u32 2147483647, %v11335_v61  ;;  %v11349_v63 = vmul.f32 %v7290_v56, %v11255_v54  ;;  %7317 = vrcp.f32 %v4243_v15  ;;  %v11352_v48 = vadd.f32 -0.0025, %v11328_v24 }
 0x5ee   :  { %v7298_v36 = vpop.eup %7297  ;;  %7319 = vrcp.f32 %v3801_v12  ;;  %v11354_v55 = vmul.f32 %v7296_v37, %v4109_v44  ;;  %v4111_v13 = vmul.f32 %v4047_v60, %v11248_v34  ;;  %v4245_v35 = vadd.f32 1e-12, %v4181_v10  ;;  %v12240_v44 = vld [vmem:[#allocation20_spill] sm:$0xff] }
 0x5ef   :  { %12238 = vst [vmem:[#allocation34_spill] sm:$0xff] %v11349_v63  ;;  %4526 = vadd.xlane.f32.xlu0 %v4426_v41  ;;  %v7300_v62 = vpop.eup %7299  ;;  %4528 = vadd.xlane.f32.xlu1 %v4427_v19  ;;  %v4113_v20 = vmul.f32 %v4049_v59, %v11274_v27  ;;  %v11359_v54 = vadd.f32 -0.0025, %v11345_v42  ;;  %v4182_v56 = vand.u32 2147483647, %v11352_v48  ;;  %v4051_v41 = vmax.f32 %v11316_v30, 0.0 }
 0x5f0   :  { %12239 = vst [vmem:[#allocation35_spill] sm:$0xff] %v11354_v55  ;;  %v11363_v15 = vadd.f32 -0.0025, %v11340_v28  ;;  %v4429_v12 = vand.u32 2147483647, %v11354_v55  ;;  %7321 = vrcp.f32 %v4245_v35  ;;  %v11368_v34 = vmul.f32 %v7300_v62, %v12240_v44  ;;  %v7302_v60 = vpop.eup %7301  ;;  %v12242_v35 = vld [vmem:[#allocation38_spill] sm:$0xff] }
 0x5f1   :  { %7323 = vrcp.f32 %v3803_v16  ;;  %v3805_v10 = vpop.xlane.xlu1 %3804  ;;  %v4430_v27 = vand.u32 2147483647, %v11349_v63  ;;  %v11372_v59 = vmul.f32 %v4052_v51, %v11265_v1  ;;  %v4183_v45 = vand.u32 2147483647, %v11359_v54  ;;  %v12244_v55 = vld [vmem:[#allocation9_spill] sm:$0xff] }
 0x5f2   :  { %v7304_v37 = vpop.eup %7303  ;;  %7325 = vrcp.f32 %v3805_v10  ;;  %v11376_v19 = vmul.f32 %v7298_v36, %v11301_v17  ;;  %v11379_v30 = vadd.f32 -0.0025, %v11368_v34  ;;  %v11383_v16 = vmul.f32 %v11304_v46, %v12242_v35 }
 0x5f3   :  { %4530 = vadd.xlane.f32.xlu0 %v4428_v22  ;;  %v7306_v62 = vpop.eup %7305  ;;  %4532 = vadd.xlane.f32.xlu1 %v4429_v12  ;;  %v3807_v44 = vpop.xlane.xlu0 %3806  ;;  %v11385_v1 = vmul.f32 %v7304_v37, %v4111_v13  ;;  %v4247_v51 = vadd.f32 1e-12, %v4183_v45  ;;  %v4246_v63 = vadd.f32 1e-12, %v4182_v56  ;;  %v4184_v10 = vand.u32 2147483647, %v11363_v15 }
 0x5f4   :  { %12241 = vst [vmem:[#allocation39_spill] sm:$0xff] %v11376_v19  ;;  %v7308_v22 = vpop.eup %7307  ;;  %7327 = vrcp.f32 %v3807_v44  ;;  %v4115_v17 = vmul.f32 %v4051_v41, %v11296_v7  ;;  %v4185_v36 = vand.u32 2147483647, %v11379_v30  ;;  %v11391_v61 = vmul.f32 %v7306_v62, %v12244_v55 }
 0x5f5   :  { %12243 = vst [vmem:[#allocation36_spill] sm:$0xff] %v11385_v1  ;;  %v7310_v46 = vpop.eup %7309  ;;  %v3809_v35 = vpop.xlane.xlu1 %3808  ;;  %v4431_v12 = vand.u32 2147483647, %v11385_v1  ;;  %v4053_v13 = vmax.f32 %v11333_v5, 0.0  ;;  %7329 = vrcp.f32 %v4247_v51  ;;  %v4248_v45 = vadd.f32 1e-12, %v4184_v10 }
 0x5f6   :  { %v7312_v56 = vpop.eup %7311  ;;  %7331 = vrcp.f32 %v3809_v35  ;;  %v11395_v37 = vmul.f32 %v7310_v46, %v4113_v20  ;;  %v4054_v7 = vmax.f32 %v11352_v48, 0.0  ;;  %v4249_v41 = vadd.f32 1e-12, %v4185_v36  ;;  %v12247_v20 = vld [vmem:[#allocation24_spill] sm:$0xff]  ;;  %v12248_v35 = vld [vmem:[#allocation19_spill] sm:$0xff] }
 0x5f7   :  { %4534 = vadd.xlane.f32.xlu0 %v4430_v27  ;;  %v7314_v44 = vpop.eup %7313  ;;  %4536 = vadd.xlane.f32.xlu1 %v4431_v12  ;;  %v4432_v55 = vand.u32 2147483647, %v11376_v19  ;;  %7333 = vrcp.f32 %v4246_v63  ;;  %v11400_v62 = vadd.f32 -0.0025, %v11391_v61  ;;  %v11403_v5 = vadd.f32 -0.0025, %v11383_v16 }
 0x5f8   :  { %12245 = vst [vmem:[#allocation7_spill] sm:$0xff] %v11395_v37  ;;  %v4433_v51 = vand.u32 2147483647, %v11395_v37  ;;  %v11407_v27 = vmul.f32 %v7308_v22, %v11324_v57  ;;  %7335 = vrcp.f32 %v4249_v41  ;;  %v11410_v48 = vmul.f32 %v7314_v44, %v12247_v20 }
 0x5f9   :  { %v7316_v10 = vpop.eup %7315  ;;  %v3813_v36 = vpop.xlane.xlu1 %3812  ;;  %v4117_v46 = vmul.f32 %v4053_v13, %v11320_v26  ;;  %7337 = vrcp.f32 %v4248_v45  ;;  %v4187_v63 = vand.u32 2147483647, %v11400_v62  ;;  %v11415_v12 = vmul.f32 %v7302_v60, %v12248_v35 }
 0x5fa   :  { %12246 = vst [vmem:[#allocation21_spill] sm:$0xff] %v11407_v27  ;;  %v7318_v19 = vpop.eup %7317  ;;  %7339 = vrcp.f32 %v3813_v36  ;;  %v4056_v57 = vmax.f32 %v11363_v15, 0.0  ;;  %v4186_v22 = vand.u32 2147483647, %v11403_v5  ;;  %v11420_v41 = vadd.f32 -0.0025, %v11410_v48 }
 0x5fb   :  { %4538 = vadd.xlane.f32.xlu0 %v4432_v55  ;;  %v7320_v44 = vpop.eup %7319  ;;  %4540 = vadd.xlane.f32.xlu1 %v4433_v51  ;;  %v3811_v20 = vpop.xlane.xlu0 %3810  ;;  %v11422_v26 = vmul.f32 %v7318_v19, %v4115_v17  ;;  %v4055_v13 = vmax.f32 %v11359_v54, 0.0  ;;  %v4118_v60 = vmul.f32 %v4054_v7, %v11328_v24  ;;  %v4251_v45 = vadd.f32 1e-12, %v4187_v63  ;;  %v12252_v7 = vld [vmem:[#allocation6_spill] sm:$0xff] }
 0x5fc   :  { %7341 = vrcp.f32 %v3811_v20  ;;  %v4434_v55 = vand.u32 2147483647, %v11407_v27  ;;  %v11428_v15 = vmul.f32 %v7316_v10, %v11372_v59  ;;  %v4250_v36 = vadd.f32 1e-12, %v4186_v22 }
 0x5fd   :  { %12249 = vst [vmem:[#allocation5_spill] sm:$0xff] %v11422_v26  ;;  %v7322_v35 = vpop.eup %7321  ;;  %v4435_v37 = vand.u32 2147483647, %v11422_v26  ;;  %7343 = vrcp.f32 %v4251_v45  ;;  %v4189_v51 = vand.u32 2147483647, %v11420_v41  ;;  %v4057_v17 = vmax.f32 %v11379_v30, 0.0 }
 0x5fe   :  { %12250 = vst [vmem:[#allocation37_spill] sm:$0xff] %v11428_v15  ;;  %v11433_v19 = vadd.f32 -0.0025, %v11415_v12  ;;  %v7324_v54 = vpop.eup %7323  ;;  %v11435_v24 = vmul.f32 %v7322_v35, %v4117_v46  ;;  %7345 = vrcp.f32 %v4250_v36  ;;  %v11439_v59 = vmul.f32 %v7320_v44, %v12252_v7  ;;  %v12253_v45 = vld [vmem:[#allocation23_spill] sm:$0xff]  ;;  %v12254_v36 = vld [vmem:[#allocation22_spill] sm:$0xff] }
 0x5ff   :  { %4542 = vadd.xlane.f32.xlu0 %v4434_v55  ;;  %v7326_v10 = vpop.eup %7325  ;;  %4544 = vadd.xlane.f32.xlu1 %v4435_v37  ;;  %v4059_v63 = vmax.f32 %v11400_v62, 0.0  ;;  %v4253_v22 = vadd.f32 1e-12, %v4189_v51  ;;  %v11444_v26 = vmul.f32 %v7312_v56, %v12253_v45  ;;  %v4436_v46 = vand.u32 2147483647, %v11428_v15 }
 0x600   :  { %12251 = vst [vmem:[#allocation40_spill] sm:$0xff] %v11435_v24  ;;  %v4188_v20 = vand.u32 2147483647, %v11433_v19  ;;  %v4437_v55 = vand.u32 2147483647, %v11435_v24  ;;  %v11452_v44 = vmul.f32 %v7326_v10, %v12254_v36  ;;  %v4119_v37 = vmul.f32 %v4055_v13, %v11345_v42  ;;  %v12255_v13 = vld [vmem:[#allocation11_spill] sm:$0xff] }
 0x601   :  { %v11449_v30 = vadd.f32 -0.0025, %v11439_v59  ;;  %v7328_v35 = vpop.eup %7327  ;;  %7347 = vrcp.f32 %v4253_v22  ;;  %v11456_v51 = vadd.f32 -0.0025, %v11444_v26  ;;  %v4121_v7 = vmul.f32 %v4057_v17, %v11368_v34 }
 0x602   :  { %v4252_v62 = vadd.f32 1e-12, %v4188_v20  ;;  %v7330_v56 = vpop.eup %7329  ;;  %v4120_v45 = vmul.f32 %v4056_v57, %v11340_v28  ;;  %v11462_v15 = vadd.f32 -0.0025, %v11452_v44  ;;  %v11468_v22 = vmul.f32 %v7324_v54, %v12255_v13  ;;  %v12256_v13 = vld [vmem:[#allocation8_spill] sm:$0xff] }
 0x603   :  { %4546 = vadd.xlane.f32.xlu0 %v4436_v46  ;;  %v4191_v24 = vand.u32 2147483647, %v11449_v30  ;;  %v7332_v10 = vpop.eup %7331  ;;  %4548 = vadd.xlane.f32.xlu1 %v4437_v55  ;;  %v11464_v36 = vmul.f32 %v7330_v56, %v4119_v37  ;;  %v4190_v42 = vand.u32 2147483647, %v11456_v51  ;;  %v4123_v34 = vmul.f32 %v4059_v63, %v11391_v61 }
 0x604   :  { %7349 = vrcp.f32 %v4252_v62  ;;  %v7334_v20 = vpop.eup %7333  ;;  %v4058_v28 = vmax.f32 %v11403_v5, 0.0  ;;  %v4193_v17 = vand.u32 2147483647, %v11462_v15  ;;  %v4061_v37 = vmax.f32 %v11420_v41, 0.0 }
 0x605   :  { %v4255_v57 = vadd.f32 1e-12, %v4191_v24  ;;  %v7336_v46 = vpop.eup %7335  ;;  %v4439_v27 = vand.u32 2147483647, %v11464_v36  ;;  %v11474_v55 = vmul.f32 %v7334_v20, %v4118_v60  ;;  %v4254_v62 = vadd.f32 1e-12, %v4190_v42 }
 0x606   :  { %v7338_v56 = vpop.eup %7337  ;;  %v11477_v1 = vmul.f32 %v7336_v46, %v4121_v7  ;;  %v4257_v54 = vadd.f32 1e-12, %v4193_v17  ;;  %v11480_v61 = vmul.f32 %v7328_v35, %v12256_v13  ;;  %v11486_v60 = vadd.f32 -0.0025, %v11468_v22  ;;  %v12257_v42 = vld [vmem:[#allocation18_spill] sm:$0xff] }
 0x607   :  { %7351 = vrcp.f32 %v4255_v57  ;;  %v7340_v5 = vpop.eup %7339  ;;  %4552 = vadd.xlane.f32.xlu1 %v4439_v27  ;;  %v4438_v24 = vand.u32 2147483647, %v11474_v55  ;;  %v4457_v63 = vpop.xlane.xlu1 %4456  ;;  %v11483_v4 = vmul.f32 %v7338_v56, %v4120_v45  ;;  %v11490_v20 = vmul.f32 %v7332_v10, %v12257_v42  ;;  %v12258_v17 = vld [vmem:[#allocation10_spill] sm:$0xff] }
 0x608   :  { %7353 = vrcp.f32 %v4254_v62  ;;  %v4583_v41 = vmax.f32 %v4457_v63, 1e-12  ;;  %v4441_v7 = vand.u32 2147483647, %v11477_v1  ;;  %v4122_v27 = vmul.f32 %v4058_v28, %v11383_v16 }
 0x609   :  { %7355 = vrcp.f32 %v4257_v54  ;;  %v7342_v35 = vpop.eup %7341  ;;  %4550 = vadd.xlane.f32.xlu0 %v4438_v24  ;;  %v4060_v57 = vmax.f32 %v11433_v19, 0.0  ;;  %v4192_v45 = vand.u32 2147483647, %v11486_v60  ;;  %v11496_v46 = vmul.f32 %v7340_v5, %v12258_v17  ;;  %v12260_v5 = vld [vmem:[#allocation12_spill] sm:$0xff] }
 0x60a   :  { %v7344_v62 = vpop.eup %7343  ;;  %7357 = vrcp.f32 %v4583_v41  ;;  %v4125_v56 = vmul.f32 %v4061_v37, %v11410_v48  ;;  %v11500_v54 = vadd.f32 -0.0025, %v11490_v20  ;;  %v11503_v10 = vadd.f32 -0.0025, %v11480_v61 }
 0x60b   :  { %v7346_v13 = vpop.eup %7345  ;;  %4556 = vadd.xlane.f32.xlu1 %v4441_v7  ;;  %v4440_v16 = vand.u32 2147483647, %v11483_v4  ;;  %v4455_v19 = vpop.xlane.xlu0 %4454  ;;  %v11506_v28 = vmul.f32 %v7344_v62, %v4123_v34  ;;  %v4256_v24 = vadd.f32 1e-12, %v4192_v45  ;;  %v11509_v63 = vmul.f32 %v7342_v35, %v12260_v5 }
 0x60c   :  { %v4582_v41 = vmax.f32 %v4455_v19, 1e-12  ;;  %v11511_v42 = vmul.f32 %v7346_v13, %v4122_v27  ;;  %v4195_v48 = vand.u32 2147483647, %v11500_v54  ;;  %v11515_v37 = vadd.f32 -0.0025, %v11496_v46 }
 0x60d   :  { %12259 = vst [vmem:[#allocation13_spill] sm:$0xff] %v11506_v28  ;;  %4554 = vadd.xlane.f32.xlu0 %v4440_v16  ;;  %v4443_v7 = vand.u32 2147483647, %v11506_v28  ;;  %v4124_v17 = vmul.f32 %v4060_v57, %v11415_v12  ;;  %7359 = vrcp.f32 %v4256_v24  ;;  %v4194_v34 = vand.u32 2147483647, %v11503_v10 }
 0x60e   :  { %12261 = vst [vmem:[#allocation20_spill] sm:$0xff] %v11511_v42  ;;  %v7348_v45 = vpop.eup %7347  ;;  %7361 = vrcp.f32 %v4582_v41  ;;  %v4063_v35 = vmax.f32 %v11449_v30, 0.0  ;;  %v4062_v27 = vmax.f32 %v11456_v51, 0.0  ;;  %v4259_v62 = vadd.f32 1e-12, %v4195_v48 }
 0x60f   :  { %4560 = vadd.xlane.f32.xlu1 %v4443_v7  ;;  %v4442_v13 = vand.u32 2147483647, %v11511_v42  ;;  %v4461_v19 = vpop.xlane.xlu1 %4460  ;;  %v11523_v5 = vmul.f32 %v7348_v45, %v4125_v56  ;;  %v4065_v16 = vmax.f32 %v11462_v15, 0.0  ;;  %v4258_v28 = vadd.f32 1e-12, %v4194_v34 }
 0x610   :  { %v4585_v57 = vmax.f32 %v4461_v19, 1e-12  ;;  %7363 = vrcp.f32 %v4259_v62  ;;  %v4197_v24 = vand.u32 2147483647, %v11515_v37  ;;  %v11528_v41 = vadd.f32 -0.0025, %v11509_v63 }
 0x611   :  { %v7350_v12 = vpop.eup %7349  ;;  %4558 = vadd.xlane.f32.xlu0 %v4442_v13  ;;  %v4445_v30 = vand.u32 2147483647, %v11523_v5  ;;  %7365 = vrcp.f32 %v4258_v28  ;;  %v4127_v56 = vmul.f32 %v4063_v35, %v11439_v59  ;;  %v4126_v62 = vmul.f32 %v4062_v27, %v11444_v26 }
 0x612   :  { %v11531_v51 = vmul.f32 %v7350_v12, %v4124_v17  ;;  %7367 = vrcp.f32 %v4585_v57  ;;  %v4261_v48 = vadd.f32 1e-12, %v4197_v24  ;;  %v4196_v15 = vand.u32 2147483647, %v11528_v41 }
 0x613   :  { %4564 = vadd.xlane.f32.xlu1 %v4445_v30  ;;  %v4459_v45 = vpop.xlane.xlu0 %4458  ;;  %v4129_v17 = vmul.f32 %v4065_v16, %v11452_v44  ;;  %v4064_v35 = vmax.f32 %v11486_v60, 0.0 }
 0x614   :  { %v7352_v7 = vpop.eup %7351  ;;  %v4444_v34 = vand.u32 2147483647, %v11531_v51  ;;  %v4584_v13 = vmax.f32 %v4459_v45, 1e-12  ;;  %7369 = vrcp.f32 %v4261_v48  ;;  %v4260_v12 = vadd.f32 1e-12, %v4196_v15 }
 0x615   :  { %v7354_v19 = vpop.eup %7353  ;;  %v11537_v42 = vmul.f32 %v7352_v7, %v4127_v56  ;;  %v4067_v56 = vmax.f32 %v11500_v54, 0.0  ;;  %v12262_v48 = vld [vmem:[#allocation16_spill] sm:$0xff]  ;;  %v4128_v60 = vmul.f32 %v4064_v35, %v11468_v22  ;;  %v4066_v15 = vmax.f32 %v11503_v10, 0.0 }
 0x616   :  { %v7356_v28 = vpop.eup %7355  ;;  %4562 = vadd.xlane.f32.xlu0 %v4444_v34  ;;  %v11540_v59 = vmul.f32 %v7354_v19, %v4126_v62  ;;  %7371 = vrcp.f32 %v4584_v13  ;;  %v4069_v54 = vmax.f32 %v11515_v37, 0.0 }
 0x617   :  { %v4447_v57 = vand.u32 2147483647, %v11537_v42  ;;  %v11544_v24 = vmul.f32 %v7356_v28, %v4129_v17  ;;  %v7358_v26 = vpop.eup %7357  ;;  %v4465_v30 = vpop.xlane.xlu1 %4464  ;;  %7373 = vrcp.f32 %v4260_v12  ;;  %v4131_v13 = vmul.f32 %v4067_v56, %v11490_v20 }
 0x618   :  { %v4446_v27 = vand.u32 2147483647, %v11540_v59  ;;  %v4587_v44 = vmax.f32 %v4465_v30, 1e-12  ;;  %v4711_v7 = vmul.f32 %v7358_v26, %v12262_v48  ;;  %v4130_v10 = vmul.f32 %v4066_v15, %v11480_v61 }
 0x619   :  { %4568 = vadd.xlane.f32.xlu1 %v4447_v57  ;;  %v4449_v16 = vand.u32 2147483647, %v11544_v24  ;;  %v4133_v30 = vmul.f32 %v4069_v54, %v11496_v46  ;;  %v12263_v46 = vld [vmem:[#allocation14_spill] sm:$0xff] }
 0x61a   :  { %4566 = vadd.xlane.f32.xlu0 %v4446_v27  ;;  %v7360_v34 = vpop.eup %7359  ;;  %7375 = vrcp.f32 %v4587_v44  ;;  %5288 = vst [vmem:[#allocation2 + $0x8] sm:$0xff] %v4711_v7 }
 0x61b   :  { %v7362_v45 = vpop.eup %7361  ;;  %v11552_v62 = vmul.f32 %v7360_v34, %v4128_v60 }
 0x61c   :  { %v4463_v19 = vpop.xlane.xlu0 %4462  ;;  %v4710_v17 = vmul.f32 %v7362_v45, %v10819_v2  ;;  %v4068_v2 = vmax.f32 %v11528_v41, 0.0 }
 0x61d   :  { %4572 = vadd.xlane.f32.xlu1 %v4449_v16  ;;  %v7364_v28 = vpop.eup %7363  ;;  %v4448_v12 = vand.u32 2147483647, %v11552_v62  ;;  %v4586_v22 = vmax.f32 %v4463_v19, 1e-12 }
 0x61e   :  { %v7366_v35 = vpop.eup %7365  ;;  %v11559_v57 = vmul.f32 %v7364_v28, %v4131_v13  ;;  %6372 = vmatprep.mubr.f32.mxu0 %v4710_v17  ;;  %5287 = vst [vmem:[#allocation2] sm:$0xff] %v4710_v17  ;;  %v4132_v41 = vmul.f32 %v4068_v2, %v11509_v63  ;;  %v12264_v28 = vld [vmem:[#allocation15_spill] sm:$0xff] }
 0x61f   :  { %v7368_v26 = vpop.eup %7367  ;;  %4570 = vadd.xlane.f32.xlu0 %v4448_v12  ;;  %7377 = vrcp.f32 %v4586_v22  ;;  %v11561_v27 = vmul.f32 %v7366_v35, %v4130_v10  ;;  %6373 = vmatmul.mubr.f32.vlgmr.msra.gmra.mxu0 %v4711_v7 }
 0x620   :  { %v4451_v20 = vand.u32 2147483647, %v11559_v57  ;;  %v4469_v37 = vpop.xlane.xlu1 %4468  ;;  %v4713_v61 = vmul.f32 %v7368_v26, %v10829_v58  ;;  %v12265_v26 = vld [vmem:[#allocation17_spill] sm:$0xff] }
 0x621   :  { %v7370_v44 = vpop.eup %7369  ;;  %v4450_v16 = vand.u32 2147483647, %v11561_v27  ;;  %v4589_v56 = vmax.f32 %v4469_v37, 1e-12 }
 0x622   :  { %4576 = vadd.xlane.f32.xlu1 %v4451_v20  ;;  %v11568_v48 = vmul.f32 %v7370_v44, %v4133_v30  ;;  %5290 = vst [vmem:[#allocation2 + $0x18] sm:$0xff] %v4713_v61 }
 0x623   :  { %v7372_v60 = vpop.eup %7371  ;;  %4574 = vadd.xlane.f32.xlu0 %v4450_v16  ;;  %7379 = vrcp.f32 %v4589_v56 }
 0x624   :  { %v7374_v7 = vpop.eup %7373  ;;  %v4453_v15 = vand.u32 2147483647, %v11568_v48  ;;  %v4467_v34 = vpop.xlane.xlu0 %4466  ;;  %v4712_v45 = vmul.f32 %v7372_v60, %v12263_v46 }
 0x625   :  { %v4588_v58 = vmax.f32 %v4467_v34, 1e-12  ;;  %v11573_v19 = vmul.f32 %v7374_v7, %v4132_v41  ;;  %v12267_v41 = vld [vmem:[#allocation26_spill] sm:$0xff] }
 0x626   :  { %4580 = vadd.xlane.f32.xlu1 %v4453_v15  ;;  %6375 = vmatprep.mubr.f32.mxu0 %v4712_v45  ;;  %5289 = vst [vmem:[#allocation2 + $0x10] sm:$0xff] %v4712_v45  ;;  %v12268_v45 = vld [vmem:[#allocation25_spill] sm:$0xff] }
 0x627   :  { %v7376_v13 = vpop.eup %7375  ;;  %7381 = vrcp.f32 %v4588_v58  ;;  %v4452_v17 = vand.u32 2147483647, %v11573_v19  ;;  %6376 = vmatmul.mubr.f32.gmra.mxu0 %v4713_v61  ;;  %v4473_v54 = vpop.xlane.xlu1 %4472  ;;  %v12266_v61 = vld [vmem:[#allocation28_spill] sm:$0xff] }
 0x628   :  { %v4715_v63 = vmul.f32 %v7376_v13, %v12264_v28  ;;  %v4591_v12 = vmax.f32 %v4473_v54, 1e-12 }
 0x629   :  { %4578 = vadd.xlane.f32.xlu0 %v4452_v17 }
 0x62a   :  { %5292 = vst [vmem:[#allocation2 + $0x28] sm:$0xff] %v4715_v63  ;;  %7383 = vrcp.f32 %v4591_v12 }
 0x62b   :  { %v4471_v10 = vpop.xlane.xlu0 %4470 }
 0x62c   :  { %v7378_v22 = vpop.eup %7377  ;;  %v4590_v35 = vmax.f32 %v4471_v10, 1e-12 }
 0x62d   :  { %v4714_v2 = vmul.f32 %v7378_v22, %v12265_v26 }
 0x62e   :  { %7385 = vrcp.f32 %v4590_v35 }
 0x62f   :  { %6378 = vmatprep.mubr.f32.mxu0 %v4714_v2  ;;  %5291 = vst [vmem:[#allocation2 + $0x20] sm:$0xff] %v4714_v2  ;;  %v4477_v37 = vpop.xlane.xlu1 %4476 }
 0x630   :  { %v7380_v20 = vpop.eup %7379  ;;  %6379 = vmatmul.mubr.f32.gmra.mxu0 %v4715_v63  ;;  %v4593_v30 = vmax.f32 %v4477_v37, 1e-12 }
 0x631   :  { %v4717_v44 = vmul.f32 %v7380_v20, %v12266_v61 }
 0x632   :  { %7387 = vrcp.f32 %v4593_v30 }
 0x633   :  { %5294 = vst [vmem:[#allocation2 + $0x38] sm:$0xff] %v4717_v44  ;;  %v4475_v56 = vpop.xlane.xlu0 %4474 }
 0x634   :  { %v7382_v16 = vpop.eup %7381  ;;  %v4592_v60 = vmax.f32 %v4475_v56, 1e-12 }
 0x635   :  { %v4716_v7 = vmul.f32 %v7382_v16, %v12267_v41 }
 0x636   :  { %7389 = vrcp.f32 %v4592_v60 }
 0x637   :  { %6381 = vmatprep.mubr.f32.mxu0 %v4716_v7  ;;  %5293 = vst [vmem:[#allocation2 + $0x30] sm:$0xff] %v4716_v7  ;;  %v7384_v15 = vpop.eup %7383 }
 0x638   :  { %v4481_v34 = vpop.xlane.xlu1 %4480  ;;  %6382 = vmatmul.mubr.f32.gmra.mxu0 %v4717_v44  ;;  %v4719_v58 = vmul.f32 %v7384_v15, %v12268_v45 }
 0x639   :  { %v4595_v46 = vmax.f32 %v4481_v34, 1e-12 }
 0x63a   :  { %5296 = vst [vmem:[#allocation2 + $0x48] sm:$0xff] %v4719_v58 }
 0x63b   :  { %7391 = vrcp.f32 %v4595_v46  ;;  %v7386_v13 = vpop.eup %7385  ;;  %v4479_v17 = vpop.xlane.xlu0 %4478 }
 0x63c   :  { %v4594_v54 = vmax.f32 %v4479_v17, 1e-12  ;;  %v4718_v28 = vmul.f32 %v7386_v13, %v10942_v0 }
 0x63e   :  { %7393 = vrcp.f32 %v4594_v54  ;;  %6384 = vmatprep.mubr.f32.mxu0 %v4718_v28  ;;  %5295 = vst [vmem:[#allocation2 + $0x40] sm:$0xff] %v4718_v28 }
 0x63f   :  { %v7388_v63 = vpop.eup %7387  ;;  %6385 = vmatmul.mubr.f32.gmra.mxu0 %v4719_v58 }
 0x640   :  { %v4485_v12 = vpop.xlane.xlu1 %4484  ;;  %v4721_v10 = vmul.f32 %v7388_v63, %v10957_v23 }
 0x641   :  { %v4597_v22 = vmax.f32 %v4485_v12, 1e-12 }
 0x642   :  { %5298 = vst [vmem:[#allocation2 + $0x58] sm:$0xff] %v4721_v10 }
 0x643   :  { %7395 = vrcp.f32 %v4597_v22  ;;  %v7390_v35 = vpop.eup %7389  ;;  %v4483_v26 = vpop.xlane.xlu0 %4482 }
 0x644   :  { %v4596_v2 = vmax.f32 %v4483_v26, 1e-12  ;;  %v4720_v20 = vmul.f32 %v7390_v35, %v10976_v6 }
 0x646   :  { %7397 = vrcp.f32 %v4596_v2  ;;  %6387 = vmatprep.mubr.f32.mxu0 %v4720_v20  ;;  %5297 = vst [vmem:[#allocation2 + $0x50] sm:$0xff] %v4720_v20 }
 0x647   :  { %6388 = vmatmul.mubr.f32.gmra.mxu0 %v4721_v10 }
 0x648   :  { %v7392_v0 = vpop.eup %7391  ;;  %v4489_v37 = vpop.xlane.xlu1 %4488 }
 0x649   :  { %v4599_v30 = vmax.f32 %v4489_v37, 1e-12  ;;  %v4723_v61 = vmul.f32 %v7392_v0, %v10998_v8 }
 0x64b   :  { %7399 = vrcp.f32 %v4599_v30  ;;  %v4487_v44 = vpop.xlane.xlu0 %4486  ;;  %5300 = vst [vmem:[#allocation2 + $0x68] sm:$0xff] %v4723_v61  ;;  %v7394_v23 = vpop.eup %7393 }
 0x64c   :  { %v4598_v16 = vmax.f32 %v4487_v44, 1e-12  ;;  %v4722_v56 = vmul.f32 %v7394_v23, %v11013_v11 }
 0x64e   :  { %7401 = vrcp.f32 %v4598_v16  ;;  %6390 = vmatprep.mubr.f32.mxu0 %v4722_v56  ;;  %5299 = vst [vmem:[#allocation2 + $0x60] sm:$0xff] %v4722_v56 }
 0x64f   :  { %v4493_v60 = vpop.xlane.xlu1 %4492  ;;  %6391 = vmatmul.mubr.f32.gmra.mxu0 %v4723_v61 }
 0x650   :  { %v7396_v6 = vpop.eup %7395  ;;  %v4601_v41 = vmax.f32 %v4493_v60, 1e-12 }
 0x651   :  { %v4725_v7 = vmul.f32 %v7396_v6, %v11034_v18 }
 0x652   :  { %7403 = vrcp.f32 %v4601_v41 }
 0x653   :  { %v4491_v15 = vpop.xlane.xlu0 %4490  ;;  %5302 = vst [vmem:[#allocation2 + $0x78] sm:$0xff] %v4725_v7  ;;  %v7398_v8 = vpop.eup %7397 }
 0x654   :  { %v4600_v34 = vmax.f32 %v4491_v15, 1e-12  ;;  %v4724_v46 = vmul.f32 %v7398_v8, %v11055_v25 }
 0x656   :  { %7405 = vrcp.f32 %v4600_v34  ;;  %6393 = vmatprep.mubr.f32.mxu0 %v4724_v46  ;;  %5301 = vst [vmem:[#allocation2 + $0x70] sm:$0xff] %v4724_v46 }
 0x657   :  { %v4497_v58 = vpop.xlane.xlu1 %4496  ;;  %6394 = vmatmul.mubr.f32.gmra.mxu0 %v4725_v7 }
 0x658   :  { %v4495_v11 = vpop.xlane.xlu0 %4494  ;;  %v7400_v45 = vpop.eup %7399  ;;  %v4603_v17 = vmax.f32 %v4497_v58, 1e-12 }
 0x659   :  { %v4602_v13 = vmax.f32 %v4495_v11, 1e-12  ;;  %v4727_v54 = vmul.f32 %v7400_v45, %v11075_v9 }
 0x65b   :  { %7407 = vrcp.f32 %v4602_v13  ;;  %v7402_v18 = vpop.eup %7401  ;;  %5304 = vst [vmem:[#allocation2 + $0x88] sm:$0xff] %v4727_v54  ;;  %v4501_v63 = vpop.xlane.xlu1 %4500 }
 0x65c   :  { %7409 = vrcp.f32 %v4603_v17  ;;  %v4499_v28 = vpop.xlane.xlu0 %4498  ;;  %v4726_v25 = vmul.f32 %v7402_v18, %v11090_v47  ;;  %v4605_v22 = vmax.f32 %v4501_v63, 1e-12 }
 0x65d   :  { %v4604_v12 = vmax.f32 %v4499_v28, 1e-12 }
 0x65e   :  { %6396 = vmatprep.mubr.f32.mxu0 %v4726_v25  ;;  %5303 = vst [vmem:[#allocation2 + $0x80] sm:$0xff] %v4726_v25 }
 0x65f   :  { %7411 = vrcp.f32 %v4604_v12  ;;  %6397 = vmatmul.mubr.f32.gmra.mxu0 %v4727_v54  ;;  %v7404_v35 = vpop.eup %7403  ;;  %v4505_v26 = vpop.xlane.xlu1 %4504 }
 0x660   :  { %7413 = vrcp.f32 %v4605_v22  ;;  %v4503_v10 = vpop.xlane.xlu0 %4502  ;;  %v4607_v9 = vmax.f32 %v4505_v26, 1e-12  ;;  %v4729_v20 = vmul.f32 %v7404_v35, %v11110_v14 }
 0x661   :  { %v4606_v2 = vmax.f32 %v4503_v10, 1e-12 }
 0x662   :  { %5306 = vst [vmem:[#allocation2 + $0x98] sm:$0xff] %v4729_v20 }
 0x663   :  { %7415 = vrcp.f32 %v4606_v2  ;;  %v7406_v0 = vpop.eup %7405  ;;  %v4509_v30 = vpop.xlane.xlu1 %4508 }
 0x664   :  { %7417 = vrcp.f32 %v4607_v9  ;;  %v4507_v37 = vpop.xlane.xlu0 %4506  ;;  %v4728_v61 = vmul.f32 %v7406_v0, %v11122_v33  ;;  %v4609_v44 = vmax.f32 %v4509_v30, 1e-12 }
 0x665   :  { %v4608_v47 = vmax.f32 %v4507_v37, 1e-12 }
 0x666   :  { %6399 = vmatprep.mubr.f32.mxu0 %v4728_v61  ;;  %5305 = vst [vmem:[#allocation2 + $0x90] sm:$0xff] %v4728_v61 }
 0x667   :  { %7419 = vrcp.f32 %v4608_v47  ;;  %6400 = vmatmul.mubr.f32.gmra.mxu0 %v4729_v20  ;;  %v4513_v6 = vpop.xlane.xlu1 %4512 }
 0x668   :  { %v7408_v23 = vpop.eup %7407  ;;  %7421 = vrcp.f32 %v4609_v44  ;;  %v4511_v16 = vpop.xlane.xlu0 %4510  ;;  %v4611_v41 = vmax.f32 %v4513_v6, 1e-12  ;;  %v12270_v6 = vld [vmem:[#allocation30_spill] sm:$0xff] }
 0x669   :  { %v7410_v56 = vpop.eup %7409  ;;  %v4610_v14 = vmax.f32 %v4511_v16, 1e-12  ;;  %v4730_v60 = vmul.f32 %v7408_v23, %v10996_v39  ;;  %v12269_v23 = vld [vmem:[#allocation27_spill] sm:$0xff] }
 0x66a   :  { %v4731_v7 = vmul.f32 %v7410_v56, %v11151_v29 }
 0x66b   :  { %7423 = vrcp.f32 %v4610_v14  ;;  %6402 = vmatprep.mubr.f32.mxu0 %v4730_v60  ;;  %5307 = vst [vmem:[#allocation2 + $0xa0] sm:$0xff] %v4730_v60  ;;  %v4517_v34 = vpop.xlane.xlu1 %4516 }
 0x66c   :  { %v7412_v33 = vpop.eup %7411  ;;  %7425 = vrcp.f32 %v4611_v41  ;;  %6403 = vmatmul.mubr.f32.gmra.mxu0 %v4731_v7  ;;  %5308 = vst [vmem:[#allocation2 + $0xa8] sm:$0xff] %v4731_v7  ;;  %v4515_v15 = vpop.xlane.xlu0 %4514  ;;  %v4613_v45 = vmax.f32 %v4517_v34, 1e-12 }
 0x66d   :  { %v7414_v8 = vpop.eup %7413  ;;  %v4612_v46 = vmax.f32 %v4515_v15, 1e-12  ;;  %v4732_v11 = vmul.f32 %v7412_v33, %v11037_v43 }
 0x66e   :  { %v4733_v58 = vmul.f32 %v7414_v8, %v11169_v3 }
 0x66f   :  { %7427 = vrcp.f32 %v4612_v46  ;;  %6405 = vmatprep.mubr.f32.mxu0 %v4732_v11  ;;  %5309 = vst [vmem:[#allocation2 + $0xb0] sm:$0xff] %v4732_v11 }
 0x670   :  { %v7416_v39 = vpop.eup %7415  ;;  %7429 = vrcp.f32 %v4613_v45  ;;  %6406 = vmatmul.mubr.f32.gmra.mxu0 %v4733_v58  ;;  %5310 = vst [vmem:[#allocation2 + $0xb8] sm:$0xff] %v4733_v58  ;;  %v4519_v29 = vpop.xlane.xlu0 %4518 }
 0x671   :  { %v7418_v13 = vpop.eup %7417  ;;  %v4521_v17 = vpop.xlane.xlu1 %4520  ;;  %v4614_v54 = vmax.f32 %v4519_v29, 1e-12  ;;  %v4734_v18 = vmul.f32 %v7416_v39, %v11053_v40  ;;  %v12271_v39 = vld [vmem:[#allocation29_spill] sm:$0xff] }
 0x672   :  { %v4615_v28 = vmax.f32 %v4521_v17, 1e-12  ;;  %v4735_v63 = vmul.f32 %v7418_v13, %v11196_v32 }
 0x673   :  { %7431 = vrcp.f32 %v4614_v54  ;;  %6408 = vmatprep.mubr.f32.mxu0 %v4734_v18  ;;  %5311 = vst [vmem:[#allocation2 + $0xc0] sm:$0xff] %v4734_v18 }
 0x674   :  { %v7420_v43 = vpop.eup %7419  ;;  %7433 = vrcp.f32 %v4615_v28  ;;  %6409 = vmatmul.mubr.f32.gmra.mxu0 %v4735_v63  ;;  %5312 = vst [vmem:[#allocation2 + $0xc8] sm:$0xff] %v4735_v63  ;;  %v4523_v3 = vpop.xlane.xlu0 %4522  ;;  %v12272_v63 = vld [vmem:[#allocation31_spill] sm:$0xff] }
 0x675   :  { %v7422_v12 = vpop.eup %7421  ;;  %v4525_v25 = vpop.xlane.xlu1 %4524  ;;  %v4616_v22 = vmax.f32 %v4523_v3, 1e-12  ;;  %v4736_v10 = vmul.f32 %v7420_v43, %v11085_v52 }
 0x676   :  { %v4617_v35 = vmax.f32 %v4525_v25, 1e-12  ;;  %v4737_v26 = vmul.f32 %v7422_v12, %v11213_v38  ;;  %v12273_v12 = vld [vmem:[#allocation32_spill] sm:$0xff] }
 0x677   :  { %7435 = vrcp.f32 %v4616_v22  ;;  %6411 = vmatprep.mubr.f32.mxu0 %v4736_v10  ;;  %5313 = vst [vmem:[#allocation2 + $0xd0] sm:$0xff] %v4736_v10 }
 0x678   :  { %v7424_v40 = vpop.eup %7423  ;;  %7437 = vrcp.f32 %v4617_v35  ;;  %6412 = vmatmul.mubr.f32.gmra.mxu0 %v4737_v26  ;;  %5314 = vst [vmem:[#allocation2 + $0xd8] sm:$0xff] %v4737_v26  ;;  %v4527_v32 = vpop.xlane.xlu0 %4526 }
 0x679   :  { %v7426_v2 = vpop.eup %7425  ;;  %v4529_v9 = vpop.xlane.xlu1 %4528  ;;  %v4618_v20 = vmax.f32 %v4527_v32, 1e-12  ;;  %v4738_v0 = vmul.f32 %v7424_v40, %v11114_v31  ;;  %v12274_v40 = vld [vmem:[#allocation33_spill] sm:$0xff] }
 0x67a   :  { %v4619_v37 = vmax.f32 %v4529_v9, 1e-12  ;;  %v4739_v30 = vmul.f32 %v7426_v2, %v11240_v21  ;;  %v12275_v9 = vld [vmem:[#allocation35_spill] sm:$0xff] }
 0x67b   :  { %7439 = vrcp.f32 %v4618_v20  ;;  %6414 = vmatprep.mubr.f32.mxu0 %v4738_v0  ;;  %5315 = vst [vmem:[#allocation2 + $0xe0] sm:$0xff] %v4738_v0 }
 0x67c   :  { %v7428_v52 = vpop.eup %7427  ;;  %7441 = vrcp.f32 %v4619_v37  ;;  %6415 = vmatmul.mubr.f32.gmra.mxu0 %v4739_v30  ;;  %5316 = vst [vmem:[#allocation2 + $0xe8] sm:$0xff] %v4739_v30  ;;  %v4531_v38 = vpop.xlane.xlu0 %4530 }
 0x67d   :  { %v7430_v47 = vpop.eup %7429  ;;  %v4533_v61 = vpop.xlane.xlu1 %4532  ;;  %v4620_v44 = vmax.f32 %v4531_v38, 1e-12  ;;  %v4740_v16 = vmul.f32 %v7428_v52, %v12269_v23  ;;  %v12276_v52 = vld [vmem:[#allocation34_spill] sm:$0xff] }
 0x67e   :  { %v4621_v56 = vmax.f32 %v4533_v61, 1e-12  ;;  %v4741_v14 = vmul.f32 %v7430_v47, %v12270_v6  ;;  %v12277_v61 = vld [vmem:[#allocation36_spill] sm:$0xff] }
 0x67f   :  { %7443 = vrcp.f32 %v4620_v44  ;;  %6417 = vmatprep.mubr.f32.mxu0 %v4740_v16  ;;  %5317 = vst [vmem:[#allocation2 + $0xf0] sm:$0xff] %v4740_v16 }
 0x680   :  { %v7432_v31 = vpop.eup %7431  ;;  %7445 = vrcp.f32 %v4621_v56  ;;  %6418 = vmatmul.mubr.f32.gmra.mxu0 %v4741_v14  ;;  %5318 = vst [vmem:[#allocation2 + $0xf8] sm:$0xff] %v4741_v14  ;;  %v4535_v21 = vpop.xlane.xlu0 %4534 }
 0x681   :  { %v7434_v60 = vpop.eup %7433  ;;  %v4537_v41 = vpop.xlane.xlu1 %4536  ;;  %v4622_v7 = vmax.f32 %v4535_v21, 1e-12  ;;  %v4742_v33 = vmul.f32 %v7432_v31, %v11206_v53  ;;  %v12278_v31 = vld [vmem:[#allocation39_spill] sm:$0xff] }
 0x682   :  { %v4623_v15 = vmax.f32 %v4537_v41, 1e-12  ;;  %v4743_v8 = vmul.f32 %v7434_v60, %v11289_v50  ;;  %v12279_v41 = vld [vmem:[#allocation7_spill] sm:$0xff] }
 0x683   :  { %7447 = vrcp.f32 %v4622_v7  ;;  %6420 = vmatprep.mubr.f32.mxu0 %v4742_v33  ;;  %5319 = vst [vmem:[#allocation2 + $0x100] sm:$0xff] %v4742_v33 }
 0x684   :  { %v7436_v34 = vpop.eup %7435  ;;  %7449 = vrcp.f32 %v4623_v15  ;;  %6421 = vmatmul.mubr.f32.gmra.mxu0 %v4743_v8  ;;  %5320 = vst [vmem:[#allocation2 + $0x108] sm:$0xff] %v4743_v8  ;;  %v4539_v46 = vpop.xlane.xlu0 %4538 }
 0x685   :  { %v7438_v11 = vpop.eup %7437  ;;  %v4541_v45 = vpop.xlane.xlu1 %4540  ;;  %v4624_v58 = vmax.f32 %v4539_v46, 1e-12  ;;  %v4744_v29 = vmul.f32 %v7436_v34, %v12271_v39  ;;  %v12281_v39 = vld [vmem:[#allocation5_spill] sm:$0xff] }
 0x686   :  { %v4625_v13 = vmax.f32 %v4541_v45, 1e-12  ;;  %v4745_v17 = vmul.f32 %v7438_v11, %v11308_v49  ;;  %v12280_v11 = vld [vmem:[#allocation21_spill] sm:$0xff] }
 0x687   :  { %7451 = vrcp.f32 %v4624_v58  ;;  %6423 = vmatprep.mubr.f32.mxu0 %v4744_v29  ;;  %5321 = vst [vmem:[#allocation2 + $0x110] sm:$0xff] %v4744_v29 }
 0x688   :  { %v7440_v53 = vpop.eup %7439  ;;  %7453 = vrcp.f32 %v4625_v13  ;;  %6424 = vmatmul.mubr.f32.gmra.mxu0 %v4745_v17  ;;  %5322 = vst [vmem:[#allocation2 + $0x118] sm:$0xff] %v4745_v17  ;;  %v4543_v50 = vpop.xlane.xlu0 %4542 }
 0x689   :  { %v7442_v54 = vpop.eup %7441  ;;  %v4545_v18 = vpop.xlane.xlu1 %4544  ;;  %v4626_v28 = vmax.f32 %v4543_v50, 1e-12  ;;  %v4746_v43 = vmul.f32 %v7440_v53, %v12272_v63 }
 0x68a   :  { %v4627_v3 = vmax.f32 %v4545_v18, 1e-12  ;;  %v4747_v25 = vmul.f32 %v7442_v54, %v12273_v12  ;;  %v12282_v18 = vld [vmem:[#allocation37_spill] sm:$0xff] }
 0x68b   :  { %7455 = vrcp.f32 %v4626_v28  ;;  %6426 = vmatprep.mubr.f32.mxu0 %v4746_v43  ;;  %5323 = vst [vmem:[#allocation2 + $0x120] sm:$0xff] %v4746_v43  ;;  %v12283_v43 = vld [vmem:[#allocation40_spill] sm:$0xff] }
 0x68c   :  { %v7444_v49 = vpop.eup %7443  ;;  %7457 = vrcp.f32 %v4627_v3  ;;  %6427 = vmatmul.mubr.f32.gmra.mxu0 %v4747_v25  ;;  %5324 = vst [vmem:[#allocation2 + $0x128] sm:$0xff] %v4747_v25  ;;  %v4547_v22 = vpop.xlane.xlu0 %4546 }
 0x68d   :  { %v7446_v10 = vpop.eup %7445  ;;  %v4549_v35 = vpop.xlane.xlu1 %4548  ;;  %v4628_v26 = vmax.f32 %v4547_v22, 1e-12  ;;  %v4748_v32 = vmul.f32 %v7444_v49, %v12274_v40 }
 0x68e   :  { %v4629_v2 = vmax.f32 %v4549_v35, 1e-12  ;;  %v4749_v20 = vmul.f32 %v7446_v10, %v12275_v9 }
 0x68f   :  { %7459 = vrcp.f32 %v4628_v26  ;;  %6429 = vmatprep.mubr.f32.mxu0 %v4748_v32  ;;  %5325 = vst [vmem:[#allocation2 + $0x130] sm:$0xff] %v4748_v32 }
 0x690   :  { %v7448_v0 = vpop.eup %7447  ;;  %7461 = vrcp.f32 %v4629_v2  ;;  %6430 = vmatmul.mubr.f32.gmra.mxu0 %v4749_v20  ;;  %5326 = vst [vmem:[#allocation2 + $0x138] sm:$0xff] %v4749_v20 }
 0x691   :  { %v7450_v37 = vpop.eup %7449  ;;  %v4553_v30 = vpop.xlane.xlu1 %4552  ;;  %v4750_v38 = vmul.f32 %v7448_v0, %v12276_v52 }
 0x692   :  { %v4631_v47 = vmax.f32 %v4553_v30, 1e-12  ;;  %v4751_v44 = vmul.f32 %v7450_v37, %v12277_v61  ;;  %v4551_v23 = vpop.xlane.xlu0 %4550 }
 0x693   :  { %6432 = vmatprep.mubr.f32.mxu0 %v4750_v38  ;;  %5327 = vst [vmem:[#allocation2 + $0x140] sm:$0xff] %v4750_v38  ;;  %v4630_v56 = vmax.f32 %v4551_v23, 1e-12 }
 0x694   :  { %v7452_v16 = vpop.eup %7451  ;;  %7463 = vrcp.f32 %v4631_v47  ;;  %6433 = vmatmul.mubr.f32.gmra.mxu0 %v4751_v44  ;;  %5328 = vst [vmem:[#allocation2 + $0x148] sm:$0xff] %v4751_v44 }
 0x695   :  { %v7454_v6 = vpop.eup %7453  ;;  %v4557_v14 = vpop.xlane.xlu1 %4556  ;;  %v4752_v21 = vmul.f32 %v7452_v16, %v12278_v31  ;;  %7465 = vrcp.f32 %v4630_v56  ;;  %v12285_v16 = vld [vmem:[#allocation20_spill] sm:$0xff] }
 0x696   :  { %v4633_v60 = vmax.f32 %v4557_v14, 1e-12  ;;  %v4753_v7 = vmul.f32 %v7454_v6, %v12279_v41  ;;  %v4555_v33 = vpop.xlane.xlu0 %4554 }
 0x697   :  { %6435 = vmatprep.mubr.f32.mxu0 %v4752_v21  ;;  %5329 = vst [vmem:[#allocation2 + $0x150] sm:$0xff] %v4752_v21  ;;  %v4632_v8 = vmax.f32 %v4555_v33, 1e-12 }
 0x698   :  { %v7456_v15 = vpop.eup %7455  ;;  %7467 = vrcp.f32 %v4633_v60  ;;  %6436 = vmatmul.mubr.f32.gmra.mxu0 %v4753_v7  ;;  %5330 = vst [vmem:[#allocation2 + $0x158] sm:$0xff] %v4753_v7 }
 0x699   :  { %v7458_v34 = vpop.eup %7457  ;;  %v4561_v46 = vpop.xlane.xlu1 %4560  ;;  %v4754_v45 = vmul.f32 %v7456_v15, %v12280_v11  ;;  %7469 = vrcp.f32 %v4632_v8 }
 0x69a   :  { %v4635_v58 = vmax.f32 %v4561_v46, 1e-12  ;;  %v4755_v29 = vmul.f32 %v7458_v34, %v12281_v39  ;;  %v4559_v13 = vpop.xlane.xlu0 %4558 }
 0x69b   :  { %6438 = vmatprep.mubr.f32.mxu0 %v4754_v45  ;;  %5331 = vst [vmem:[#allocation2 + $0x160] sm:$0xff] %v4754_v45  ;;  %v4634_v53 = vmax.f32 %v4559_v13, 1e-12 }
 0x69c   :  { %v7460_v17 = vpop.eup %7459  ;;  %7471 = vrcp.f32 %v4635_v58  ;;  %6439 = vmatmul.mubr.f32.gmra.mxu0 %v4755_v29  ;;  %5332 = vst [vmem:[#allocation2 + $0x168] sm:$0xff] %v4755_v29 }
 0x69d   :  { %v7462_v50 = vpop.eup %7461  ;;  %v4565_v54 = vpop.xlane.xlu1 %4564  ;;  %v4756_v28 = vmul.f32 %v7460_v17, %v12282_v18  ;;  %7473 = vrcp.f32 %v4634_v53 }
 0x69e   :  { %v4637_v63 = vmax.f32 %v4565_v54, 1e-12  ;;  %v4757_v3 = vmul.f32 %v7462_v50, %v12283_v43 }
 0x69f   :  { %v4563_v12 = vpop.xlane.xlu0 %4562  ;;  %6441 = vmatprep.mubr.f32.mxu0 %v4756_v28  ;;  %5333 = vst [vmem:[#allocation2 + $0x170] sm:$0xff] %v4756_v28 }
 0x6a0   :  { %7475 = vrcp.f32 %v4637_v63  ;;  %v4636_v25 = vmax.f32 %v4563_v12, 1e-12  ;;  %6442 = vmatmul.mubr.f32.gmra.mxu0 %v4757_v3  ;;  %5334 = vst [vmem:[#allocation2 + $0x178] sm:$0xff] %v4757_v3 }
 0x6a1   :  { %v7464_v49 = vpop.eup %7463 }
 0x6a2   :  { %7477 = vrcp.f32 %v4636_v25  ;;  %v4569_v22 = vpop.xlane.xlu1 %4568  ;;  %v4759_v10 = vmul.f32 %v7464_v49, %v11464_v36  ;;  %v7466_v35 = vpop.eup %7465 }
 0x6a3   :  { %v4639_v26 = vmax.f32 %v4569_v22, 1e-12  ;;  %v4567_v40 = vpop.xlane.xlu0 %4566  ;;  %v4758_v2 = vmul.f32 %v7466_v35, %v11474_v55  ;;  %v12284_v55 = vld [vmem:[#allocation13_spill] sm:$0xff] }
 0x6a4   :  { %v4638_v32 = vmax.f32 %v4567_v40, 1e-12  ;;  %5336 = vst [vmem:[#allocation2 + $0x188] sm:$0xff] %v4759_v10 }
 0x6a5   :  { %v7468_v9 = vpop.eup %7467  ;;  %7479 = vrcp.f32 %v4639_v26  ;;  %6444 = vmatprep.mubr.f32.mxu0 %v4758_v2  ;;  %5335 = vst [vmem:[#allocation2 + $0x180] sm:$0xff] %v4758_v2 }
 0x6a6   :  { %7481 = vrcp.f32 %v4638_v32  ;;  %v4573_v20 = vpop.xlane.xlu1 %4572  ;;  %v4761_v0 = vmul.f32 %v7468_v9, %v11477_v1  ;;  %v7470_v37 = vpop.eup %7469  ;;  %6445 = vmatmul.mubr.f32.gmra.mxu0 %v4759_v10 }
 0x6a7   :  { %v4641_v30 = vmax.f32 %v4573_v20, 1e-12  ;;  %v4760_v36 = vmul.f32 %v7470_v37, %v11483_v4 }
 0x6a8   :  { %5338 = vst [vmem:[#allocation2 + $0x198] sm:$0xff] %v4761_v0  ;;  %v4571_v38 = vpop.xlane.xlu0 %4570 }
 0x6a9   :  { %v7472_v52 = vpop.eup %7471  ;;  %7483 = vrcp.f32 %v4641_v30  ;;  %v4640_v47 = vmax.f32 %v4571_v38, 1e-12  ;;  %6447 = vmatprep.mubr.f32.mxu0 %v4760_v36  ;;  %5337 = vst [vmem:[#allocation2 + $0x190] sm:$0xff] %v4760_v36 }
 0x6aa   :  { %v4763_v61 = vmul.f32 %v7472_v52, %v12284_v55  ;;  %v7474_v44 = vpop.eup %7473  ;;  %6448 = vmatmul.mubr.f32.gmra.mxu0 %v4761_v0 }
 0x6ab   :  { %7485 = vrcp.f32 %v4640_v47  ;;  %v4577_v23 = vpop.xlane.xlu1 %4576  ;;  %v4762_v1 = vmul.f32 %v7474_v44, %v12285_v16 }
 0x6ac   :  { %5340 = vst [vmem:[#allocation2 + $0x1a8] sm:$0xff] %v4763_v61  ;;  %v4643_v6 = vmax.f32 %v4577_v23, 1e-12  ;;  %v4575_v14 = vpop.xlane.xlu0 %4574 }
 0x6ad   :  { %v7476_v56 = vpop.eup %7475  ;;  %v4642_v4 = vmax.f32 %v4575_v14, 1e-12  ;;  %6450 = vmatprep.mubr.f32.mxu0 %v4762_v1  ;;  %5339 = vst [vmem:[#allocation2 + $0x1a0] sm:$0xff] %v4762_v1 }
 0x6ae   :  { %v4765_v31 = vmul.f32 %v7476_v56, %v11523_v5  ;;  %7487 = vrcp.f32 %v4643_v6  ;;  %6451 = vmatmul.mubr.f32.gmra.mxu0 %v4763_v61 }
 0x6af   :  { %v7478_v21 = vpop.eup %7477  ;;  %7489 = vrcp.f32 %v4642_v4  ;;  %v4581_v60 = vpop.xlane.xlu1 %4580 }
 0x6b0   :  { %v4764_v41 = vmul.f32 %v7478_v21, %v11531_v51  ;;  %5342 = vst [vmem:[#allocation2 + $0x1b8] sm:$0xff] %v4765_v31  ;;  %v4645_v7 = vmax.f32 %v4581_v60, 1e-12 }
 0x6b2   :  { %v7480_v33 = vpop.eup %7479  ;;  %6453 = vmatprep.mubr.f32.mxu0 %v4764_v41  ;;  %5341 = vst [vmem:[#allocation2 + $0x1b0] sm:$0xff] %v4764_v41  ;;  %7491 = vrcp.f32 %v4645_v7  ;;  %v4579_v8 = vpop.xlane.xlu0 %4578 }
 0x6b3   :  { %v7482_v15 = vpop.eup %7481  ;;  %6454 = vmatmul.mubr.f32.gmra.mxu0 %v4765_v31  ;;  %v4767_v34 = vmul.f32 %v7480_v33, %v11537_v42  ;;  %v4644_v46 = vmax.f32 %v4579_v8, 1e-12 }
 0x6b4   :  { %v4766_v5 = vmul.f32 %v7482_v15, %v11540_v59 }
 0x6b5   :  { %5344 = vst [vmem:[#allocation2 + $0x1c8] sm:$0xff] %v4767_v34  ;;  %7493 = vrcp.f32 %v4644_v46 }
 0x6b6   :  { %v7484_v11 = vpop.eup %7483  ;;  %6456 = vmatprep.mubr.f32.mxu0 %v4766_v5  ;;  %5343 = vst [vmem:[#allocation2 + $0x1c0] sm:$0xff] %v4766_v5 }
 0x6b7   :  { %6457 = vmatmul.mubr.f32.gmra.mxu0 %v4767_v34  ;;  %v4769_v51 = vmul.f32 %v7484_v11, %v11544_v24 }
 0x6b8   :  { %v7486_v45 = vpop.eup %7485 }
 0x6b9   :  { %5346 = vst [vmem:[#allocation2 + $0x1d8] sm:$0xff] %v4769_v51  ;;  %v4768_v58 = vmul.f32 %v7486_v45, %v11552_v62 }
 0x6bb   :  { %v7488_v39 = vpop.eup %7487  ;;  %6459 = vmatprep.mubr.f32.mxu0 %v4768_v58  ;;  %5345 = vst [vmem:[#allocation2 + $0x1d0] sm:$0xff] %v4768_v58 }
 0x6bc   :  { %v7490_v29 = vpop.eup %7489  ;;  %6460 = vmatmul.mubr.f32.gmra.mxu0 %v4769_v51  ;;  %v4771_v42 = vmul.f32 %v7488_v39, %v11559_v57 }
 0x6bd   :  { %v4770_v59 = vmul.f32 %v7490_v29, %v11561_v27 }
 0x6be   :  { %5348 = vst [vmem:[#allocation2 + $0x1e8] sm:$0xff] %v4771_v42 }
 0x6bf   :  { %v7492_v13 = vpop.eup %7491  ;;  %6462 = vmatprep.mubr.f32.mxu0 %v4770_v59  ;;  %5347 = vst [vmem:[#allocation2 + $0x1e0] sm:$0xff] %v4770_v59 }
 0x6c0   :  { %6463 = vmatmul.mubr.f32.gmra.mxu0 %v4771_v42  ;;  %v4773_v24 = vmul.f32 %v7492_v13, %v11568_v48 }
 0x6c2   :  { %v7494_v17 = vpop.eup %7493  ;;  %5350 = vst [vmem:[#allocation2 + $0x1f8] sm:$0xff] %v4773_v24 }
 0x6c3   :  { %v4772_v62 = vmul.f32 %v7494_v17, %v11573_v19 }
 0x6c5   :  { %6465 = vmatprep.mubr.f32.mxu0 %v4772_v62  ;;  %5349 = vst [vmem:[#allocation2 + $0x1f0] sm:$0xff] %v4772_v62 }
 0x6c6   :  { %6466 = vmatmul.mubr.f32.gmra.mxu0 %v4773_v24 }
 0x6df   :  { %v6374_v53 = vpop.f32.mrf.mxu0 }
 0x6e0   :  { %5224 = vst.msk [vmem:[%s11899_s4 + $0x8] sm:$0xff] %vm101_vm0, %v6374_v53 }
 0x6e1   :  { %v4840_v57 = vpop.f32.mrf.mxu0 }
 0x6e2   :  { %5223 = vst.msk [vmem:[%s11899_s4] sm:$0xff] %vm101_vm0, %v4840_v57 }
 0x6e7   :  { %v6377_v27 = vpop.f32.mrf.mxu0 }
 0x6e8   :  { %5226 = vst.msk [vmem:[%s11899_s4 + $0x18] sm:$0xff] %vm101_vm0, %v6377_v27 }
 0x6e9   :  { %v4850_v48 = vpop.f32.mrf.mxu0 }
 0x6ea   :  { %5225 = vst.msk [vmem:[%s11899_s4 + $0x10] sm:$0xff] %vm101_vm0, %v4850_v48 }
 0x6f0   :  { %v6380_v19 = vpop.f32.mrf.mxu0 }
 0x6f1   :  { %5228 = vst.msk [vmem:[%s11899_s4 + $0x28] sm:$0xff] %vm101_vm0, %v6380_v19 }
 0x6f2   :  { %v4860_v50 = vpop.f32.mrf.mxu0 }
 0x6f3   :  { %5227 = vst.msk [vmem:[%s11899_s4 + $0x20] sm:$0xff] %vm101_vm0, %v4860_v50 }
 0x6f8   :  { %v6383_v54 = vpop.f32.mrf.mxu0 }
 0x6f9   :  { %5230 = vst.msk [vmem:[%s11899_s4 + $0x38] sm:$0xff] %vm101_vm0, %v6383_v54 }
 0x6fa   :  { %v4870_v18 = vpop.f32.mrf.mxu0 }
 0x6fb   :  { %5229 = vst.msk [vmem:[%s11899_s4 + $0x30] sm:$0xff] %vm101_vm0, %v4870_v18 }
 0x6ff   :  { %v6386_v28 = vpop.f32.mrf.mxu0 }
 0x700   :  { %5232 = vst.msk [vmem:[%s11899_s4 + $0x48] sm:$0xff] %vm101_vm0, %v6386_v28 }
 0x701   :  { %v4880_v63 = vpop.f32.mrf.mxu0 }
 0x702   :  { %5231 = vst.msk [vmem:[%s11899_s4 + $0x40] sm:$0xff] %vm101_vm0, %v4880_v63 }
 0x707   :  { %v6389_v43 = vpop.f32.mrf.mxu0 }
 0x708   :  { %5234 = vst.msk [vmem:[%s11899_s4 + $0x58] sm:$0xff] %vm101_vm0, %v6389_v43 }
 0x709   :  { %v4890_v3 = vpop.f32.mrf.mxu0 }
 0x70a   :  { %5233 = vst.msk [vmem:[%s11899_s4 + $0x50] sm:$0xff] %vm101_vm0, %v4890_v3 }
 0x70b   :  { %7572 = shalt.err (!%p7569_p4)
}
 0x70c   :  { %s7584_s14 = smov 128   ;;  %s7585_s15 = smov 8  }
 0x70d   :  { %5366 = dma.vmem_to_hbm [thread:$0]  %s5361_s10, 8192, %s11900_s5, [#allocation3], %s7584_s14, %s7584_s14, %s7585_s15  }
 0x70f   :  { %v6392_v12 = vpop.f32.mrf.mxu0 }
 0x710   :  { %5236 = vst.msk [vmem:[%s11899_s4 + $0x68] sm:$0xff] %vm101_vm0, %v6392_v12 }
 0x711   :  { %v4900_v25 = vpop.f32.mrf.mxu0 }
 0x712   :  { %5235 = vst.msk [vmem:[%s11899_s4 + $0x60] sm:$0xff] %vm101_vm0, %v4900_v25 }
 0x717   :  { %v6395_v49 = vpop.f32.mrf.mxu0 }
 0x718   :  { %5238 = vst.msk [vmem:[%s11899_s4 + $0x78] sm:$0xff] %vm101_vm0, %v6395_v49 }
 0x719   :  { %v4910_v22 = vpop.f32.mrf.mxu0 }
 0x71a   :  { %5237 = vst.msk [vmem:[%s11899_s4 + $0x70] sm:$0xff] %vm101_vm0, %v4910_v22 }
 0x71f   :  { %v6398_v10 = vpop.f32.mrf.mxu0 }
 0x720   :  { %5240 = vst.msk [vmem:[%s11899_s4 + $0x88] sm:$0xff] %vm101_vm0, %v6398_v10 }
 0x721   :  { %v4920_v35 = vpop.f32.mrf.mxu0 }
 0x722   :  { %5239 = vst.msk [vmem:[%s11899_s4 + $0x80] sm:$0xff] %vm101_vm0, %v4920_v35 }
 0x727   :  { %v6401_v26 = vpop.f32.mrf.mxu0 }
 0x728   :  { %5242 = vst.msk [vmem:[%s11899_s4 + $0x98] sm:$0xff] %vm101_vm0, %v6401_v26 }
 0x729   :  { %v4930_v40 = vpop.f32.mrf.mxu0 }
 0x72a   :  { %5241 = vst.msk [vmem:[%s11899_s4 + $0x90] sm:$0xff] %vm101_vm0, %v4930_v40 }
 0x72c   :  { %v6404_v32 = vpop.f32.mrf.mxu0 }
 0x72d   :  { %5244 = vst.msk [vmem:[%s11899_s4 + $0xa8] sm:$0xff] %vm101_vm0, %v6404_v32 }
 0x72e   :  { %v4940_v2 = vpop.f32.mrf.mxu0 }
 0x72f   :  { %5243 = vst.msk [vmem:[%s11899_s4 + $0xa0] sm:$0xff] %vm101_vm0, %v4940_v2 }
 0x730   :  { %v6407_v9 = vpop.f32.mrf.mxu0 }
 0x731   :  { %5246 = vst.msk [vmem:[%s11899_s4 + $0xb8] sm:$0xff] %vm101_vm0, %v6407_v9 }
 0x732   :  { %v4950_v20 = vpop.f32.mrf.mxu0 }
 0x733   :  { %5245 = vst.msk [vmem:[%s11899_s4 + $0xb0] sm:$0xff] %vm101_vm0, %v4950_v20 }
 0x734   :  { %v6410_v0 = vpop.f32.mrf.mxu0 }
 0x735   :  { %5248 = vst.msk [vmem:[%s11899_s4 + $0xc8] sm:$0xff] %vm101_vm0, %v6410_v0 }
 0x736   :  { %v4960_v37 = vpop.f32.mrf.mxu0 }
 0x737   :  { %5247 = vst.msk [vmem:[%s11899_s4 + $0xc0] sm:$0xff] %vm101_vm0, %v4960_v37 }
 0x738   :  { %v6413_v30 = vpop.f32.mrf.mxu0 }
 0x739   :  { %5250 = vst.msk [vmem:[%s11899_s4 + $0xd8] sm:$0xff] %vm101_vm0, %v6413_v30 }
 0x73a   :  { %v4970_v36 = vpop.f32.mrf.mxu0 }
 0x73b   :  { %5249 = vst.msk [vmem:[%s11899_s4 + $0xd0] sm:$0xff] %vm101_vm0, %v4970_v36 }
 0x73c   :  { %v6416_v52 = vpop.f32.mrf.mxu0 }
 0x73d   :  { %5252 = vst.msk [vmem:[%s11899_s4 + $0xe8] sm:$0xff] %vm101_vm0, %v6416_v52 }
 0x73e   :  { %v4980_v38 = vpop.f32.mrf.mxu0 }
 0x73f   :  { %5251 = vst.msk [vmem:[%s11899_s4 + $0xe0] sm:$0xff] %vm101_vm0, %v4980_v38 }
 0x740   :  { %v6419_v47 = vpop.f32.mrf.mxu0 }
 0x741   :  { %5254 = vst.msk [vmem:[%s11899_s4 + $0xf8] sm:$0xff] %vm101_vm0, %v6419_v47 }
 0x742   :  { %v4990_v55 = vpop.f32.mrf.mxu0 }
 0x743   :  { %5253 = vst.msk [vmem:[%s11899_s4 + $0xf0] sm:$0xff] %vm101_vm0, %v4990_v55 }
 0x744   :  { %v6422_v61 = vpop.f32.mrf.mxu0 }
 0x745   :  { %5256 = vst.msk [vmem:[%s11899_s4 + $0x108] sm:$0xff] %vm101_vm0, %v6422_v61 }
 0x746   :  { %v5000_v44 = vpop.f32.mrf.mxu0 }
 0x747   :  { %5255 = vst.msk [vmem:[%s11899_s4 + $0x100] sm:$0xff] %vm101_vm0, %v5000_v44 }
 0x748   :  { %v6425_v23 = vpop.f32.mrf.mxu0 }
 0x749   :  { %5258 = vst.msk [vmem:[%s11899_s4 + $0x118] sm:$0xff] %vm101_vm0, %v6425_v23 }
 0x74a   :  { %v5010_v16 = vpop.f32.mrf.mxu0 }
 0x74b   :  { %5257 = vst.msk [vmem:[%s11899_s4 + $0x110] sm:$0xff] %vm101_vm0, %v5010_v16 }
 0x74c   :  { %v6428_v1 = vpop.f32.mrf.mxu0 }
 0x74d   :  { %5260 = vst.msk [vmem:[%s11899_s4 + $0x128] sm:$0xff] %vm101_vm0, %v6428_v1 }
 0x74e   :  { %v5020_v56 = vpop.f32.mrf.mxu0 }
 0x74f   :  { %5259 = vst.msk [vmem:[%s11899_s4 + $0x120] sm:$0xff] %vm101_vm0, %v5020_v56 }
 0x750   :  { %v6431_v6 = vpop.f32.mrf.mxu0 }
 0x751   :  { %5262 = vst.msk [vmem:[%s11899_s4 + $0x138] sm:$0xff] %vm101_vm0, %v6431_v6 }
 0x752   :  { %v5030_v14 = vpop.f32.mrf.mxu0 }
 0x753   :  { %5261 = vst.msk [vmem:[%s11899_s4 + $0x130] sm:$0xff] %vm101_vm0, %v5030_v14 }
 0x754   :  { %v6434_v4 = vpop.f32.mrf.mxu0 }
 0x755   :  { %5264 = vst.msk [vmem:[%s11899_s4 + $0x148] sm:$0xff] %vm101_vm0, %v6434_v4 }
 0x756   :  { %v5040_v31 = vpop.f32.mrf.mxu0 }
 0x757   :  { %5263 = vst.msk [vmem:[%s11899_s4 + $0x140] sm:$0xff] %vm101_vm0, %v5040_v31 }
 0x758   :  { %v6437_v21 = vpop.f32.mrf.mxu0 }
 0x759   :  { %5266 = vst.msk [vmem:[%s11899_s4 + $0x158] sm:$0xff] %vm101_vm0, %v6437_v21 }
 0x75a   :  { %v5050_v60 = vpop.f32.mrf.mxu0 }
 0x75b   :  { %5265 = vst.msk [vmem:[%s11899_s4 + $0x150] sm:$0xff] %vm101_vm0, %v5050_v60 }
 0x75c   :  { %v6440_v41 = vpop.f32.mrf.mxu0 }
 0x75d   :  { %5268 = vst.msk [vmem:[%s11899_s4 + $0x168] sm:$0xff] %vm101_vm0, %v6440_v41 }
 0x75e   :  { %v5060_v7 = vpop.f32.mrf.mxu0 }
 0x75f   :  { %5267 = vst.msk [vmem:[%s11899_s4 + $0x160] sm:$0xff] %vm101_vm0, %v5060_v7 }
 0x760   :  { %v6443_v33 = vpop.f32.mrf.mxu0 }
 0x761   :  { %5270 = vst.msk [vmem:[%s11899_s4 + $0x178] sm:$0xff] %vm101_vm0, %v6443_v33 }
 0x762   :  { %v5070_v15 = vpop.f32.mrf.mxu0 }
 0x763   :  { %5269 = vst.msk [vmem:[%s11899_s4 + $0x170] sm:$0xff] %vm101_vm0, %v5070_v15 }
 0x766   :  { %v6446_v8 = vpop.f32.mrf.mxu0 }
 0x767   :  { %5272 = vst.msk [vmem:[%s11899_s4 + $0x188] sm:$0xff] %vm101_vm0, %v6446_v8 }
 0x768   :  { %v5080_v34 = vpop.f32.mrf.mxu0 }
 0x769   :  { %5271 = vst.msk [vmem:[%s11899_s4 + $0x180] sm:$0xff] %vm101_vm0, %v5080_v34 }
 0x76a   :  { %v6449_v46 = vpop.f32.mrf.mxu0 }
 0x76b   :  { %5274 = vst.msk [vmem:[%s11899_s4 + $0x198] sm:$0xff] %vm101_vm0, %v6449_v46 }
 0x76c   :  { %v5090_v5 = vpop.f32.mrf.mxu0 }
 0x76d   :  { %5273 = vst.msk [vmem:[%s11899_s4 + $0x190] sm:$0xff] %vm101_vm0, %v5090_v5 }
 0x76e   :  { %v6452_v11 = vpop.f32.mrf.mxu0 }
 0x76f   :  { %5276 = vst.msk [vmem:[%s11899_s4 + $0x1a8] sm:$0xff] %vm101_vm0, %v6452_v11 }
 0x770   :  { %v5100_v51 = vpop.f32.mrf.mxu0 }
 0x771   :  { %5275 = vst.msk [vmem:[%s11899_s4 + $0x1a0] sm:$0xff] %vm101_vm0, %v5100_v51 }
 0x773   :  { %v6455_v45 = vpop.f32.mrf.mxu0 }
 0x774   :  { %5278 = vst.msk [vmem:[%s11899_s4 + $0x1b8] sm:$0xff] %vm101_vm0, %v6455_v45 }
 0x775   :  { %v5110_v58 = vpop.f32.mrf.mxu0 }
 0x776   :  { %5277 = vst.msk [vmem:[%s11899_s4 + $0x1b0] sm:$0xff] %vm101_vm0, %v5110_v58 }
 0x777   :  { %v6458_v39 = vpop.f32.mrf.mxu0 }
 0x778   :  { %5280 = vst.msk [vmem:[%s11899_s4 + $0x1c8] sm:$0xff] %vm101_vm0, %v6458_v39 }
 0x779   :  { %v5120_v29 = vpop.f32.mrf.mxu0 }
 0x77a   :  { %5279 = vst.msk [vmem:[%s11899_s4 + $0x1c0] sm:$0xff] %vm101_vm0, %v5120_v29 }
 0x77c   :  { %v6461_v42 = vpop.f32.mrf.mxu0 }
 0x77d   :  { %5282 = vst.msk [vmem:[%s11899_s4 + $0x1d8] sm:$0xff] %vm101_vm0, %v6461_v42 }
 0x77e   :  { %v5130_v59 = vpop.f32.mrf.mxu0 }
 0x77f   :  { %5281 = vst.msk [vmem:[%s11899_s4 + $0x1d0] sm:$0xff] %vm101_vm0, %v5130_v59 }
 0x780   :  { %v6464_v13 = vpop.f32.mrf.mxu0 }
 0x781   :  { %5284 = vst.msk [vmem:[%s11899_s4 + $0x1e8] sm:$0xff] %vm101_vm0, %v6464_v13 }
 0x782   :  { %v5140_v24 = vpop.f32.mrf.mxu0 }
 0x783   :  { %5283 = vst.msk [vmem:[%s11899_s4 + $0x1e0] sm:$0xff] %vm101_vm0, %v5140_v24 }
 0x786   :  { %v6467_v17 = vpop.f32.mrf.mxu0 }
 0x787   :  { %5286 = vst.msk [vmem:[%s11899_s4 + $0x1f8] sm:$0xff] %vm101_vm0, %v6467_v17 }
 0x788   :  { %v5150_v62 = vpop.f32.mrf.mxu0 }
 0x789   :  { %5285 = vst.msk [vmem:[%s11899_s4 + $0x1f0] sm:$0xff] %vm101_vm0, %v5150_v62 }
 0x78a   :  { %7581 = dma.done.wait [#allocation3], 8192  }
 0x78b   :  { %7582 = vsyncadd [#allocation3], 4294959104 }
 0x78c   :  { %5374 = vsyncpa [#allocation3], 1 }

</bundles_post_ra>
